<compile_context>
chip_gen: v5e
topology: v5e:2x2
jax: 0.10.0
libtpu: 0.0.40
codegen_flags: <defaults>
</compile_context>

<pallas_src>
import functools

import jax
import jax.numpy as jnp
from jax.experimental import pallas as pl
from jax.experimental.pallas import tpu as pltpu


# -----------------------------------------------------------------------------
# Fused kernel: InstanceNorm2d + LSTM (recurrence over the sample axis, exactly
# like nn.LSTM with batch_first=False fed (n_samples, L, N)) + shrunk sample
# covariance + batched CG min-variance solve.
# -----------------------------------------------------------------------------
def _lstm_minvar_kernel(x_ref, gb_ref, wih_t_ref, whh_t_ref, b_ref,   # inputs
                        w_ref,                                        # output
                        z_ref, h_ref, c_ref, a_ref):                  # scratch
    n_samples, L, N = x_ref.shape

    # ---- InstanceNorm2d(1, affine=True): per-sample mean/var over (L, N),
    # biased variance, eps = 1e-5, scalar affine (gamma, beta). ----
    x = x_ref[...]                                              # (S, L, N)
    mean = jnp.mean(jnp.mean(x, axis=2, keepdims=True), axis=1, keepdims=True)
    d = x - mean
    var = jnp.mean(jnp.mean(d * d, axis=2, keepdims=True), axis=1, keepdims=True)
    xn = d * jax.lax.rsqrt(var + 1e-5)
    xn = xn * gb_ref[0] + gb_ref[1]

    # ---- Hoisted input projection: one dense MXU matmul over ALL samples,
    # with the merged bias folded in.  z = xn @ W_ih^T + (b_ih + b_hh). ----
    xn2 = xn.reshape(n_samples * L, N)                          # (S*L, N)
    z_ref[...] = (jnp.dot(xn2, wih_t_ref[...],
                          preferred_element_type=jnp.float32)
                  + b_ref[...])                                 # (S*L, 4N)

    # ---- LSTM recurrence over the sample axis (= nn.LSTM sequence dim). ----
    h_ref[...] = jnp.zeros_like(h_ref)                          # h_0 = 0
    c_ref[...] = jnp.zeros_like(c_ref)                          # c_0 = 0
    whh_t = whh_t_ref[...]                                      # (N, 4N)

    row = jax.lax.broadcasted_iota(jnp.int32, (N, N), 0)
    col = jax.lax.broadcasted_iota(jnp.int32, (N, N), 1)
    diag = row == col

    @pl.loop(0, n_samples, unroll=True)
    def _(s):
        start = pl.multiple_of(s * L, L)
        zs = z_ref[pl.ds(start, L), :]                          # (L, 4N)
        gates = zs + jnp.dot(h_ref[...], whh_t,
                             preferred_element_type=jnp.float32)
        # PyTorch gate order along the 4N axis: i, f, g, o.
        i_g = jax.nn.sigmoid(gates[:, 0 * N:1 * N])
        f_g = jax.nn.sigmoid(gates[:, 1 * N:2 * N])
        g_g = jnp.tanh(gates[:, 2 * N:3 * N])
        o_g = jax.nn.sigmoid(gates[:, 3 * N:4 * N])
        c_new = f_g * c_ref[...] + i_g * g_g
        h_new = o_g * jnp.tanh(c_new)
        c_ref[...] = c_new
        h_ref[...] = h_new

        # CovarianceMatrix(sqrt=False, 'diagonal', coef=0.5) for this sample,
        # then A = covmat^T covmat (the cvxpy quadratic form).  This work is
        # independent of the h/c carry, so it sits off the serial chain.
        hc = h_new - jnp.mean(h_new, axis=0, keepdims=True)     # center over L
        cov = jax.lax.dot_general(hc, hc, (((0,), (0,)), ((), ())),
                                  preferred_element_type=jnp.float32)
        cov = cov / float(L - 1)
        cov = jnp.where(diag, cov, 0.5 * cov)                   # diagonal shrink
        a_ref[s] = jnp.dot(cov, cov, preferred_element_type=jnp.float32)

    # ---- Batched min-variance solve: w* = A^{-1} 1 / (1^T A^{-1} 1), all
    # samples at once via fully-unrolled conjugate gradient (A is SPD). ----
    a = a_ref[...]                                              # (S, N, N)
    ones = jnp.ones((n_samples, N), jnp.float32)
    x_cg = jnp.zeros((n_samples, N), jnp.float32)
    r = ones
    p = ones
    for _ in range(2 * N):                                      # static, unrolled
        # batched matvec on VPU/XLU: Ap[b, j] = sum_i p[b, i] * A[b, i, j]
        ap = jnp.sum(p[:, :, None] * a, axis=1)                 # (S, N)
        rr = jnp.sum(r * r, axis=-1, keepdims=True)
        alpha = rr / (jnp.sum(p * ap, axis=-1, keepdims=True) + 1e-30)
        x_cg = x_cg + alpha * p
        r_new = r - alpha * ap
        beta = jnp.sum(r_new * r_new, axis=-1, keepdims=True) / (rr + 1e-30)
        p = r_new + beta * p
        r = r_new

    w_ref[...] = x_cg * pl.reciprocal(
        jnp.sum(x_cg, axis=-1, keepdims=True), approx=False)


def lstm_minvar_fused(x3, gamma_beta, w_ih_t, w_hh_t, bias):
    n_samples, L, N = x3.shape
    return pl.pallas_call(
        _lstm_minvar_kernel,
        out_shape=jax.ShapeDtypeStruct((n_samples, N), jnp.float32),
        in_specs=[
            pl.BlockSpec(memory_space=pltpu.MemorySpace.VMEM),   # x (S, L, N)
            pl.BlockSpec(memory_space=pltpu.MemorySpace.SMEM),   # gamma/beta (2,)
            pl.BlockSpec(memory_space=pltpu.MemorySpace.VMEM),   # W_ih^T (N, 4N)
            pl.BlockSpec(memory_space=pltpu.MemorySpace.VMEM),   # W_hh^T (N, 4N)
            pl.BlockSpec(memory_space=pltpu.MemorySpace.VMEM),   # bias (1, 4N)
        ],
        out_specs=pl.BlockSpec(memory_space=pltpu.MemorySpace.VMEM),
        scratch_shapes=[
            pltpu.VMEM((n_samples * L, 4 * N), jnp.float32),     # hoisted z
            pltpu.VMEM((L, N), jnp.float32),                     # h carry
            pltpu.VMEM((L, N), jnp.float32),                     # c carry
            pltpu.VMEM((n_samples, N, N), jnp.float32),          # per-sample A
        ],
    )(x3, gamma_beta, w_ih_t, w_hh_t, bias)


# -----------------------------------------------------------------------------
# Full forward pass (glue: squeeze NCHW channel, pre-transpose LSTM weights,
# merge biases -- all free metadata / tiny XLA ops).
# -----------------------------------------------------------------------------
@functools.partial(jax.jit, static_argnames=())
def lstm_net_minvar_forward(x, gamma_beta, w_ih, w_hh, b_ih, b_hh):
    # x: (n_samples, 1, lookback, n_assets)  (NCHW, channel = 1)
    n_samples, _, L, N = x.shape
    x3 = x[:, 0, :, :]                                           # (S, L, N)
    bias = (b_ih + b_hh).reshape(1, 4 * N)                       # merged bias
    return lstm_minvar_fused(x3, gamma_beta, w_ih.T, w_hh.T, bias)


if __name__ == "__main__":
    n_samples, lookback, n_assets = 4, 32, 16

    key = jax.random.PRNGKey(0)
    kx, k1, k2, k3, k4 = jax.random.split(key, 5)

    x = jax.random.normal(kx, (n_samples, 1, lookback, n_assets), jnp.float32)

    # InstanceNorm2d(1, affine=True) default params: weight=1, bias=0.
    gamma_beta = jnp.array([1.0, 0.0], jnp.float32)

    # nn.LSTM default init: U(-k, k) with k = 1/sqrt(hidden_size); gate order i,f,g,o.
    k = 1.0 / jnp.sqrt(float(n_assets))
    w_ih = jax.random.uniform(k1, (4 * n_assets, n_assets), jnp.float32, -k, k)
    w_hh = jax.random.uniform(k2, (4 * n_assets, n_assets), jnp.float32, -k, k)
    b_ih = jax.random.uniform(k3, (4 * n_assets,), jnp.float32, -k, k)
    b_hh = jax.random.uniform(k4, (4 * n_assets,), jnp.float32, -k, k)

    weights = lstm_net_minvar_forward(x, gamma_beta, w_ih, w_hh, b_ih, b_hh)
    weights = jax.block_until_ready(weights)

    assert weights.shape == (n_samples, n_assets)
    assert bool(jnp.all(jnp.isfinite(weights)))
    assert bool(jnp.allclose(jnp.sum(weights, axis=-1), 1.0, atol=1e-3))
    print("KERNEL_OK")
</pallas_src>

<mosaic_0001>
module attributes {stable_mosaic.version = 11 : i64} {
  func.func @_lstm_minvar_kernel(%arg0: memref<4x32x16xf32, #tpu.memory_space<vmem>>, %arg1: memref<2xf32, #tpu.memory_space<smem>>, %arg2: memref<16x64xf32, #tpu.memory_space<vmem>>, %arg3: memref<16x64xf32, #tpu.memory_space<vmem>>, %arg4: memref<1x64xf32, #tpu.memory_space<vmem>>, %arg5: memref<4x16xf32, #tpu.memory_space<vmem>>, %arg6: memref<128x64xf32, #tpu.memory_space<vmem>>, %arg7: memref<32x16xf32, #tpu.memory_space<vmem>>, %arg8: memref<32x16xf32, #tpu.memory_space<vmem>>, %arg9: memref<4x16x16xf32, #tpu.memory_space<vmem>>) attributes {dimension_semantics = [], scalar_prefetch = 0 : i64, scratch_operands = 4 : i64, tpu.core_type = #tpu.core_type<tc>} {
    %c0 = arith.constant 0 : index
    %c0_0 = arith.constant 0 : index
    %c0_1 = arith.constant 0 : index
    %0 = vector.load %arg0[%c0, %c0_0, %c0_1] : memref<4x32x16xf32, #tpu.memory_space<vmem>>, vector<4x32x16xf32>
    %cst = arith.constant dense<0.000000e+00> : vector<4x32xf32>
    %1 = vector.multi_reduction <add>, %0, %cst [2] : vector<4x32x16xf32> to vector<4x32xf32>
    %2 = vector.shape_cast %1 : vector<4x32xf32> to vector<4x32x1xf32>
    %cst_2 = arith.constant 1.600000e+01 : f32
    %3 = vector.broadcast %cst_2 : f32 to vector<4x32x1xf32>
    %4 = arith.divf %2, %3 : vector<4x32x1xf32>
    %cst_3 = arith.constant dense<0.000000e+00> : vector<4x1xf32>
    %5 = vector.multi_reduction <add>, %4, %cst_3 [1] : vector<4x32x1xf32> to vector<4x1xf32>
    %6 = vector.shape_cast %5 : vector<4x1xf32> to vector<4x1x1xf32>
    %cst_4 = arith.constant 3.200000e+01 : f32
    %7 = vector.broadcast %cst_4 : f32 to vector<4x1x1xf32>
    %8 = arith.divf %6, %7 : vector<4x1x1xf32>
    %9 = vector.broadcast %8 : vector<4x1x1xf32> to vector<4x32x16xf32>
    %10 = arith.subf %0, %9 : vector<4x32x16xf32>
    %11 = arith.mulf %10, %10 : vector<4x32x16xf32>
    %cst_5 = arith.constant dense<0.000000e+00> : vector<4x32xf32>
    %12 = vector.multi_reduction <add>, %11, %cst_5 [2] : vector<4x32x16xf32> to vector<4x32xf32>
    %13 = vector.shape_cast %12 : vector<4x32xf32> to vector<4x32x1xf32>
    %cst_6 = arith.constant 1.600000e+01 : f32
    %14 = vector.broadcast %cst_6 : f32 to vector<4x32x1xf32>
    %15 = arith.divf %13, %14 : vector<4x32x1xf32>
    %cst_7 = arith.constant dense<0.000000e+00> : vector<4x1xf32>
    %16 = vector.multi_reduction <add>, %15, %cst_7 [1] : vector<4x32x1xf32> to vector<4x1xf32>
    %17 = vector.shape_cast %16 : vector<4x1xf32> to vector<4x1x1xf32>
    %cst_8 = arith.constant 3.200000e+01 : f32
    %18 = vector.broadcast %cst_8 : f32 to vector<4x1x1xf32>
    %19 = arith.divf %17, %18 : vector<4x1x1xf32>
    %cst_9 = arith.constant 9.99999974E-6 : f32
    %20 = vector.broadcast %cst_9 : f32 to vector<4x1x1xf32>
    %21 = arith.addf %19, %20 : vector<4x1x1xf32>
    %22 = math.rsqrt %21 : vector<4x1x1xf32>
    %23 = vector.broadcast %22 : vector<4x1x1xf32> to vector<4x32x16xf32>
    %24 = arith.mulf %10, %23 : vector<4x32x16xf32>
    %c0_10 = arith.constant 0 : index
    %25 = memref.load %arg1[%c0_10] : memref<2xf32, #tpu.memory_space<smem>>
    %26 = vector.broadcast %25 : f32 to vector<4x32x16xf32>
    %27 = arith.mulf %24, %26 : vector<4x32x16xf32>
    %c1 = arith.constant 1 : index
    %28 = memref.load %arg1[%c1] : memref<2xf32, #tpu.memory_space<smem>>
    %29 = vector.broadcast %28 : f32 to vector<4x32x16xf32>
    %30 = arith.addf %27, %29 : vector<4x32x16xf32>
    %31 = vector.shape_cast %30 : vector<4x32x16xf32> to vector<128x16xf32>
    %c0_11 = arith.constant 0 : index
    %c0_12 = arith.constant 0 : index
    %32 = vector.load %arg2[%c0_11, %c0_12] : memref<16x64xf32, #tpu.memory_space<vmem>>, vector<16x64xf32>
    %cst_13 = arith.constant dense<0.000000e+00> : vector<128x64xf32>
    %33 = tpu.matmul %31, %32, %cst_13 {dimension_numbers = #tpu.dot_dimension_numbers<[1], [0], [0], [1], [0, 0, 1, 1], [], []>} : vector<128x16xf32>, vector<16x64xf32>, vector<128x64xf32> -> vector<128x64xf32>
    %c0_14 = arith.constant 0 : index
    %c0_15 = arith.constant 0 : index
    %34 = vector.load %arg4[%c0_14, %c0_15] : memref<1x64xf32, #tpu.memory_space<vmem>>, vector<1x64xf32>
    %35 = vector.broadcast %34 : vector<1x64xf32> to vector<128x64xf32>
    %36 = arith.addf %33, %35 : vector<128x64xf32>
    %c0_16 = arith.constant 0 : index
    %c0_17 = arith.constant 0 : index
    %37 = vector.load %arg6[%c0_16, %c0_17] : memref<128x64xf32, #tpu.memory_space<vmem>>, vector<128x64xf32>
    tpu.vector_store %arg6[%c0_16, %c0_17], %36 {strides = array<i32>} : memref<128x64xf32, #tpu.memory_space<vmem>>, vector<128x64xf32>,
    %cst_18 = arith.constant 0.000000e+00 : f32
    %38 = vector.broadcast %cst_18 : f32 to vector<32x16xf32>
    %c0_19 = arith.constant 0 : index
    %c0_20 = arith.constant 0 : index
    %39 = vector.load %arg7[%c0_19, %c0_20] : memref<32x16xf32, #tpu.memory_space<vmem>>, vector<32x16xf32>
    tpu.vector_store %arg7[%c0_19, %c0_20], %38 {strides = array<i32>} : memref<32x16xf32, #tpu.memory_space<vmem>>, vector<32x16xf32>,
    %cst_21 = arith.constant 0.000000e+00 : f32
    %40 = vector.broadcast %cst_21 : f32 to vector<32x16xf32>
    %c0_22 = arith.constant 0 : index
    %c0_23 = arith.constant 0 : index
    %41 = vector.load %arg8[%c0_22, %c0_23] : memref<32x16xf32, #tpu.memory_space<vmem>>, vector<32x16xf32>
    tpu.vector_store %arg8[%c0_22, %c0_23], %40 {strides = array<i32>} : memref<32x16xf32, #tpu.memory_space<vmem>>, vector<32x16xf32>,
    %c0_24 = arith.constant 0 : index
    %c0_25 = arith.constant 0 : index
    %42 = vector.load %arg3[%c0_24, %c0_25] : memref<16x64xf32, #tpu.memory_space<vmem>>, vector<16x64xf32>
    %43 = tpu.iota {dimensions = array<i32: 0>} : vector<16x16xi32>
    %44 = tpu.iota {dimensions = array<i32: 1>} : vector<16x16xi32>
    %45 = arith.cmpi eq, %43, %44 : vector<16x16xi32>
    %c0_i32 = arith.constant 0 : i32
    %c1_i32 = arith.constant 1 : i32
    %46 = arith.muli %c0_i32, %c1_i32 : i32
    %c0_i32_26 = arith.constant 0 : i32
    %47 = arith.addi %c0_i32_26, %46 : i32
    %c32_i32 = arith.constant 32 : i32
    %48 = arith.muli %47, %c32_i32 : i32
    %49 = tpu.assume_multiple %48, 32 : i32
    %50 = arith.index_cast %49 : i32 to index
    %c0_27 = arith.constant 0 : index
    %51 = vector.load %arg6[%50, %c0_27] : memref<128x64xf32, #tpu.memory_space<vmem>>, vector<32x64xf32>
    %c0_28 = arith.constant 0 : index
    %c0_29 = arith.constant 0 : index
    %52 = vector.load %arg7[%c0_28, %c0_29] : memref<32x16xf32, #tpu.memory_space<vmem>>, vector<32x16xf32>
    %cst_30 = arith.constant dense<0.000000e+00> : vector<32x64xf32>
    %53 = tpu.matmul %52, %42, %cst_30 {dimension_numbers = #tpu.dot_dimension_numbers<[1], [0], [0], [1], [0, 0, 1, 1], [], []>} : vector<32x16xf32>, vector<16x64xf32>, vector<32x64xf32> -> vector<32x64xf32>
    %54 = arith.addf %51, %53 : vector<32x64xf32>
    %55 = vector.extract_strided_slice %54 {offsets = [0, 0], sizes = [32, 16], strides = [1, 1]} : vector<32x64xf32> to vector<32x16xf32>
    %56 = arith.negf %55 : vector<32x16xf32>
    %57 = math.exp %56 : vector<32x16xf32>
    %cst_31 = arith.constant 1.000000e+00 : f32
    %58 = vector.broadcast %cst_31 : f32 to vector<32x16xf32>
    %59 = arith.addf %58, %57 : vector<32x16xf32>
    %60 = arith.divf %58, %59 : vector<32x16xf32>
    %61 = vector.extract_strided_slice %54 {offsets = [0, 16], sizes = [32, 16], strides = [1, 1]} : vector<32x64xf32> to vector<32x16xf32>
    %62 = arith.negf %61 : vector<32x16xf32>
    %63 = math.exp %62 : vector<32x16xf32>
    %cst_32 = arith.constant 1.000000e+00 : f32
    %64 = vector.broadcast %cst_32 : f32 to vector<32x16xf32>
    %65 = arith.addf %64, %63 : vector<32x16xf32>
    %66 = arith.divf %64, %65 : vector<32x16xf32>
    %67 = vector.extract_strided_slice %54 {offsets = [0, 32], sizes = [32, 16], strides = [1, 1]} : vector<32x64xf32> to vector<32x16xf32>
    %68 = math.tanh %67 : vector<32x16xf32>
    %69 = vector.extract_strided_slice %54 {offsets = [0, 48], sizes = [32, 16], strides = [1, 1]} : vector<32x64xf32> to vector<32x16xf32>
    %70 = arith.negf %69 : vector<32x16xf32>
    %71 = math.exp %70 : vector<32x16xf32>
    %cst_33 = arith.constant 1.000000e+00 : f32
    %72 = vector.broadcast %cst_33 : f32 to vector<32x16xf32>
    %73 = arith.addf %72, %71 : vector<32x16xf32>
    %74 = arith.divf %72, %73 : vector<32x16xf32>
    %c0_34 = arith.constant 0 : index
    %c0_35 = arith.constant 0 : index
    %75 = vector.load %arg8[%c0_34, %c0_35] : memref<32x16xf32, #tpu.memory_space<vmem>>, vector<32x16xf32>
    %76 = arith.mulf %66, %75 : vector<32x16xf32>
    %77 = arith.mulf %60, %68 : vector<32x16xf32>
    %78 = arith.addf %76, %77 : vector<32x16xf32>
    %79 = math.tanh %78 : vector<32x16xf32>
    %80 = arith.mulf %74, %79 : vector<32x16xf32>
    %c0_36 = arith.constant 0 : index
    %c0_37 = arith.constant 0 : index
    %81 = vector.load %arg8[%c0_36, %c0_37] : memref<32x16xf32, #tpu.memory_space<vmem>>, vector<32x16xf32>
    tpu.vector_store %arg8[%c0_36, %c0_37], %78 {strides = array<i32>} : memref<32x16xf32, #tpu.memory_space<vmem>>, vector<32x16xf32>,
    %c0_38 = arith.constant 0 : index
    %c0_39 = arith.constant 0 : index
    %82 = vector.load %arg7[%c0_38, %c0_39] : memref<32x16xf32, #tpu.memory_space<vmem>>, vector<32x16xf32>
    tpu.vector_store %arg7[%c0_38, %c0_39], %80 {strides = array<i32>} : memref<32x16xf32, #tpu.memory_space<vmem>>, vector<32x16xf32>,
    %cst_40 = arith.constant dense<0.000000e+00> : vector<16xf32>
    %83 = vector.multi_reduction <add>, %80, %cst_40 [0] : vector<32x16xf32> to vector<16xf32>
    %84 = vector.shape_cast %83 : vector<16xf32> to vector<1x16xf32>
    %cst_41 = arith.constant 3.200000e+01 : f32
    %85 = vector.broadcast %cst_41 : f32 to vector<1x16xf32>
    %86 = arith.divf %84, %85 : vector<1x16xf32>
    %87 = vector.broadcast %86 : vector<1x16xf32> to vector<32x16xf32>
    %88 = arith.subf %80, %87 : vector<32x16xf32>
    %cst_42 = arith.constant dense<0.000000e+00> : vector<16x16xf32>
    %89 = tpu.matmul %88, %88, %cst_42 {dimension_numbers = #tpu.dot_dimension_numbers<[0], [0], [1], [1], [0, 1, 1, 1], [], []>} : vector<32x16xf32>, vector<32x16xf32>, vector<16x16xf32> -> vector<16x16xf32>
    %cst_43 = arith.constant 3.100000e+01 : f32
    %90 = vector.broadcast %cst_43 : f32 to vector<16x16xf32>
    %91 = arith.divf %89, %90 : vector<16x16xf32>
    %cst_44 = arith.constant 5.000000e-01 : f32
    %92 = vector.broadcast %cst_44 : f32 to vector<16x16xf32>
    %93 = arith.mulf %92, %91 : vector<16x16xf32>
    %94 = arith.select %45, %91, %93 : vector<16x16xi1>, vector<16x16xf32>
    %cst_45 = arith.constant dense<0.000000e+00> : vector<16x16xf32>
    %95 = tpu.matmul %94, %94, %cst_45 {dimension_numbers = #tpu.dot_dimension_numbers<[1], [0], [0], [1], [0, 0, 1, 1], [], []>} : vector<16x16xf32>, vector<16x16xf32>, vector<16x16xf32> -> vector<16x16xf32>
    %96 = arith.index_cast %47 : i32 to index
    %c0_46 = arith.constant 0 : index
    %c0_47 = arith.constant 0 : index
    %97 = vector.load %arg9[%96, %c0_46, %c0_47] : memref<4x16x16xf32, #tpu.memory_space<vmem>>, vector<1x16x16xf32>
    %98 = vector.shape_cast %97 : vector<1x16x16xf32> to vector<16x16xf32>
    %99 = vector.shape_cast %95 : vector<16x16xf32> to vector<1x16x16xf32>
    tpu.vector_store %arg9[%96, %c0_46, %c0_47], %99 {strides = array<i32>} : memref<4x16x16xf32, #tpu.memory_space<vmem>>, vector<1x16x16xf32>,
    %c1_i32_48 = arith.constant 1 : i32
    %c1_i32_49 = arith.constant 1 : i32
    %100 = arith.muli %c1_i32_48, %c1_i32_49 : i32
    %c0_i32_50 = arith.constant 0 : i32
    %101 = arith.addi %c0_i32_50, %100 : i32
    %c32_i32_51 = arith.constant 32 : i32
    %102 = arith.muli %101, %c32_i32_51 : i32
    %103 = tpu.assume_multiple %102, 32 : i32
    %104 = arith.index_cast %103 : i32 to index
    %c0_52 = arith.constant 0 : index
    %105 = vector.load %arg6[%104, %c0_52] : memref<128x64xf32, #tpu.memory_space<vmem>>, vector<32x64xf32>
    %c0_53 = arith.constant 0 : index
    %c0_54 = arith.constant 0 : index
    %106 = vector.load %arg7[%c0_53, %c0_54] : memref<32x16xf32, #tpu.memory_space<vmem>>, vector<32x16xf32>
    %cst_55 = arith.constant dense<0.000000e+00> : vector<32x64xf32>
    %107 = tpu.matmul %106, %42, %cst_55 {dimension_numbers = #tpu.dot_dimension_numbers<[1], [0], [0], [1], [0, 0, 1, 1], [], []>} : vector<32x16xf32>, vector<16x64xf32>, vector<32x64xf32> -> vector<32x64xf32>
    %108 = arith.addf %105, %107 : vector<32x64xf32>
    %109 = vector.extract_strided_slice %108 {offsets = [0, 0], sizes = [32, 16], strides = [1, 1]} : vector<32x64xf32> to vector<32x16xf32>
    %110 = arith.negf %109 : vector<32x16xf32>
    %111 = math.exp %110 : vector<32x16xf32>
    %cst_56 = arith.constant 1.000000e+00 : f32
    %112 = vector.broadcast %cst_56 : f32 to vector<32x16xf32>
    %113 = arith.addf %112, %111 : vector<32x16xf32>
    %114 = arith.divf %112, %113 : vector<32x16xf32>
    %115 = vector.extract_strided_slice %108 {offsets = [0, 16], sizes = [32, 16], strides = [1, 1]} : vector<32x64xf32> to vector<32x16xf32>
    %116 = arith.negf %115 : vector<32x16xf32>
    %117 = math.exp %116 : vector<32x16xf32>
    %cst_57 = arith.constant 1.000000e+00 : f32
    %118 = vector.broadcast %cst_57 : f32 to vector<32x16xf32>
    %119 = arith.addf %118, %117 : vector<32x16xf32>
    %120 = arith.divf %118, %119 : vector<32x16xf32>
    %121 = vector.extract_strided_slice %108 {offsets = [0, 32], sizes = [32, 16], strides = [1, 1]} : vector<32x64xf32> to vector<32x16xf32>
    %122 = math.tanh %121 : vector<32x16xf32>
    %123 = vector.extract_strided_slice %108 {offsets = [0, 48], sizes = [32, 16], strides = [1, 1]} : vector<32x64xf32> to vector<32x16xf32>
    %124 = arith.negf %123 : vector<32x16xf32>
    %125 = math.exp %124 : vector<32x16xf32>
    %cst_58 = arith.constant 1.000000e+00 : f32
    %126 = vector.broadcast %cst_58 : f32 to vector<32x16xf32>
    %127 = arith.addf %126, %125 : vector<32x16xf32>
    %128 = arith.divf %126, %127 : vector<32x16xf32>
    %c0_59 = arith.constant 0 : index
    %c0_60 = arith.constant 0 : index
    %129 = vector.load %arg8[%c0_59, %c0_60] : memref<32x16xf32, #tpu.memory_space<vmem>>, vector<32x16xf32>
    %130 = arith.mulf %120, %129 : vector<32x16xf32>
    %131 = arith.mulf %114, %122 : vector<32x16xf32>
    %132 = arith.addf %130, %131 : vector<32x16xf32>
    %133 = math.tanh %132 : vector<32x16xf32>
    %134 = arith.mulf %128, %133 : vector<32x16xf32>
    %c0_61 = arith.constant 0 : index
    %c0_62 = arith.constant 0 : index
    %135 = vector.load %arg8[%c0_61, %c0_62] : memref<32x16xf32, #tpu.memory_space<vmem>>, vector<32x16xf32>
    tpu.vector_store %arg8[%c0_61, %c0_62], %132 {strides = array<i32>} : memref<32x16xf32, #tpu.memory_space<vmem>>, vector<32x16xf32>,
    %c0_63 = arith.constant 0 : index
    %c0_64 = arith.constant 0 : index
    %136 = vector.load %arg7[%c0_63, %c0_64] : memref<32x16xf32, #tpu.memory_space<vmem>>, vector<32x16xf32>
    tpu.vector_store %arg7[%c0_63, %c0_64], %134 {strides = array<i32>} : memref<32x16xf32, #tpu.memory_space<vmem>>, vector<32x16xf32>,
    %cst_65 = arith.constant dense<0.000000e+00> : vector<16xf32>
    %137 = vector.multi_reduction <add>, %134, %cst_65 [0] : vector<32x16xf32> to vector<16xf32>
    %138 = vector.shape_cast %137 : vector<16xf32> to vector<1x16xf32>
    %cst_66 = arith.constant 3.200000e+01 : f32
    %139 = vector.broadcast %cst_66 : f32 to vector<1x16xf32>
    %140 = arith.divf %138, %139 : vector<1x16xf32>
    %141 = vector.broadcast %140 : vector<1x16xf32> to vector<32x16xf32>
    %142 = arith.subf %134, %141 : vector<32x16xf32>
    %cst_67 = arith.constant dense<0.000000e+00> : vector<16x16xf32>
    %143 = tpu.matmul %142, %142, %cst_67 {dimension_numbers = #tpu.dot_dimension_numbers<[0], [0], [1], [1], [0, 1, 1, 1], [], []>} : vector<32x16xf32>, vector<32x16xf32>, vector<16x16xf32> -> vector<16x16xf32>
    %cst_68 = arith.constant 3.100000e+01 : f32
    %144 = vector.broadcast %cst_68 : f32 to vector<16x16xf32>
    %145 = arith.divf %143, %144 : vector<16x16xf32>
    %cst_69 = arith.constant 5.000000e-01 : f32
    %146 = vector.broadcast %cst_69 : f32 to vector<16x16xf32>
    %147 = arith.mulf %146, %145 : vector<16x16xf32>
    %148 = arith.select %45, %145, %147 : vector<16x16xi1>, vector<16x16xf32>
    %cst_70 = arith.constant dense<0.000000e+00> : vector<16x16xf32>
    %149 = tpu.matmul %148, %148, %cst_70 {dimension_numbers = #tpu.dot_dimension_numbers<[1], [0], [0], [1], [0, 0, 1, 1], [], []>} : vector<16x16xf32>, vector<16x16xf32>, vector<16x16xf32> -> vector<16x16xf32>
    %150 = arith.index_cast %101 : i32 to index
    %c0_71 = arith.constant 0 : index
    %c0_72 = arith.constant 0 : index
    %151 = vector.load %arg9[%150, %c0_71, %c0_72] : memref<4x16x16xf32, #tpu.memory_space<vmem>>, vector<1x16x16xf32>
    %152 = vector.shape_cast %151 : vector<1x16x16xf32> to vector<16x16xf32>
    %153 = vector.shape_cast %149 : vector<16x16xf32> to vector<1x16x16xf32>
    tpu.vector_store %arg9[%150, %c0_71, %c0_72], %153 {strides = array<i32>} : memref<4x16x16xf32, #tpu.memory_space<vmem>>, vector<1x16x16xf32>,
    %c2_i32 = arith.constant 2 : i32
    %c1_i32_73 = arith.constant 1 : i32
    %154 = arith.muli %c2_i32, %c1_i32_73 : i32
    %c0_i32_74 = arith.constant 0 : i32
    %155 = arith.addi %c0_i32_74, %154 : i32
    %c32_i32_75 = arith.constant 32 : i32
    %156 = arith.muli %155, %c32_i32_75 : i32
    %157 = tpu.assume_multiple %156, 32 : i32
    %158 = arith.index_cast %157 : i32 to index
    %c0_76 = arith.constant 0 : index
    %159 = vector.load %arg6[%158, %c0_76] : memref<128x64xf32, #tpu.memory_space<vmem>>, vector<32x64xf32>
    %c0_77 = arith.constant 0 : index
    %c0_78 = arith.constant 0 : index
    %160 = vector.load %arg7[%c0_77, %c0_78] : memref<32x16xf32, #tpu.memory_space<vmem>>, vector<32x16xf32>
    %cst_79 = arith.constant dense<0.000000e+00> : vector<32x64xf32>
    %161 = tpu.matmul %160, %42, %cst_79 {dimension_numbers = #tpu.dot_dimension_numbers<[1], [0], [0], [1], [0, 0, 1, 1], [], []>} : vector<32x16xf32>, vector<16x64xf32>, vector<32x64xf32> -> vector<32x64xf32>
    %162 = arith.addf %159, %161 : vector<32x64xf32>
    %163 = vector.extract_strided_slice %162 {offsets = [0, 0], sizes = [32, 16], strides = [1, 1]} : vector<32x64xf32> to vector<32x16xf32>
    %164 = arith.negf %163 : vector<32x16xf32>
    %165 = math.exp %164 : vector<32x16xf32>
    %cst_80 = arith.constant 1.000000e+00 : f32
    %166 = vector.broadcast %cst_80 : f32 to vector<32x16xf32>
    %167 = arith.addf %166, %165 : vector<32x16xf32>
    %168 = arith.divf %166, %167 : vector<32x16xf32>
    %169 = vector.extract_strided_slice %162 {offsets = [0, 16], sizes = [32, 16], strides = [1, 1]} : vector<32x64xf32> to vector<32x16xf32>
    %170 = arith.negf %169 : vector<32x16xf32>
    %171 = math.exp %170 : vector<32x16xf32>
    %cst_81 = arith.constant 1.000000e+00 : f32
    %172 = vector.broadcast %cst_81 : f32 to vector<32x16xf32>
    %173 = arith.addf %172, %171 : vector<32x16xf32>
    %174 = arith.divf %172, %173 : vector<32x16xf32>
    %175 = vector.extract_strided_slice %162 {offsets = [0, 32], sizes = [32, 16], strides = [1, 1]} : vector<32x64xf32> to vector<32x16xf32>
    %176 = math.tanh %175 : vector<32x16xf32>
    %177 = vector.extract_strided_slice %162 {offsets = [0, 48], sizes = [32, 16], strides = [1, 1]} : vector<32x64xf32> to vector<32x16xf32>
    %178 = arith.negf %177 : vector<32x16xf32>
    %179 = math.exp %178 : vector<32x16xf32>
    %cst_82 = arith.constant 1.000000e+00 : f32
    %180 = vector.broadcast %cst_82 : f32 to vector<32x16xf32>
    %181 = arith.addf %180, %179 : vector<32x16xf32>
    %182 = arith.divf %180, %181 : vector<32x16xf32>
    %c0_83 = arith.constant 0 : index
    %c0_84 = arith.constant 0 : index
    %183 = vector.load %arg8[%c0_83, %c0_84] : memref<32x16xf32, #tpu.memory_space<vmem>>, vector<32x16xf32>
    %184 = arith.mulf %174, %183 : vector<32x16xf32>
    %185 = arith.mulf %168, %176 : vector<32x16xf32>
    %186 = arith.addf %184, %185 : vector<32x16xf32>
    %187 = math.tanh %186 : vector<32x16xf32>
    %188 = arith.mulf %182, %187 : vector<32x16xf32>
    %c0_85 = arith.constant 0 : index
    %c0_86 = arith.constant 0 : index
    %189 = vector.load %arg8[%c0_85, %c0_86] : memref<32x16xf32, #tpu.memory_space<vmem>>, vector<32x16xf32>
    tpu.vector_store %arg8[%c0_85, %c0_86], %186 {strides = array<i32>} : memref<32x16xf32, #tpu.memory_space<vmem>>, vector<32x16xf32>,
    %c0_87 = arith.constant 0 : index
    %c0_88 = arith.constant 0 : index
    %190 = vector.load %arg7[%c0_87, %c0_88] : memref<32x16xf32, #tpu.memory_space<vmem>>, vector<32x16xf32>
    tpu.vector_store %arg7[%c0_87, %c0_88], %188 {strides = array<i32>} : memref<32x16xf32, #tpu.memory_space<vmem>>, vector<32x16xf32>,
    %cst_89 = arith.constant dense<0.000000e+00> : vector<16xf32>
    %191 = vector.multi_reduction <add>, %188, %cst_89 [0] : vector<32x16xf32> to vector<16xf32>
    %192 = vector.shape_cast %191 : vector<16xf32> to vector<1x16xf32>
    %cst_90 = arith.constant 3.200000e+01 : f32
    %193 = vector.broadcast %cst_90 : f32 to vector<1x16xf32>
    %194 = arith.divf %192, %193 : vector<1x16xf32>
    %195 = vector.broadcast %194 : vector<1x16xf32> to vector<32x16xf32>
    %196 = arith.subf %188, %195 : vector<32x16xf32>
    %cst_91 = arith.constant dense<0.000000e+00> : vector<16x16xf32>
    %197 = tpu.matmul %196, %196, %cst_91 {dimension_numbers = #tpu.dot_dimension_numbers<[0], [0], [1], [1], [0, 1, 1, 1], [], []>} : vector<32x16xf32>, vector<32x16xf32>, vector<16x16xf32> -> vector<16x16xf32>
    %cst_92 = arith.constant 3.100000e+01 : f32
    %198 = vector.broadcast %cst_92 : f32 to vector<16x16xf32>
    %199 = arith.divf %197, %198 : vector<16x16xf32>
    %cst_93 = arith.constant 5.000000e-01 : f32
    %200 = vector.broadcast %cst_93 : f32 to vector<16x16xf32>
    %201 = arith.mulf %200, %199 : vector<16x16xf32>
    %202 = arith.select %45, %199, %201 : vector<16x16xi1>, vector<16x16xf32>
    %cst_94 = arith.constant dense<0.000000e+00> : vector<16x16xf32>
    %203 = tpu.matmul %202, %202, %cst_94 {dimension_numbers = #tpu.dot_dimension_numbers<[1], [0], [0], [1], [0, 0, 1, 1], [], []>} : vector<16x16xf32>, vector<16x16xf32>, vector<16x16xf32> -> vector<16x16xf32>
    %204 = arith.index_cast %155 : i32 to index
    %c0_95 = arith.constant 0 : index
    %c0_96 = arith.constant 0 : index
    %205 = vector.load %arg9[%204, %c0_95, %c0_96] : memref<4x16x16xf32, #tpu.memory_space<vmem>>, vector<1x16x16xf32>
    %206 = vector.shape_cast %205 : vector<1x16x16xf32> to vector<16x16xf32>
    %207 = vector.shape_cast %203 : vector<16x16xf32> to vector<1x16x16xf32>
    tpu.vector_store %arg9[%204, %c0_95, %c0_96], %207 {strides = array<i32>} : memref<4x16x16xf32, #tpu.memory_space<vmem>>, vector<1x16x16xf32>,
    %c3_i32 = arith.constant 3 : i32
    %c1_i32_97 = arith.constant 1 : i32
    %208 = arith.muli %c3_i32, %c1_i32_97 : i32
    %c0_i32_98 = arith.constant 0 : i32
    %209 = arith.addi %c0_i32_98, %208 : i32
    %c32_i32_99 = arith.constant 32 : i32
    %210 = arith.muli %209, %c32_i32_99 : i32
    %211 = tpu.assume_multiple %210, 32 : i32
    %212 = arith.index_cast %211 : i32 to index
    %c0_100 = arith.constant 0 : index
    %213 = vector.load %arg6[%212, %c0_100] : memref<128x64xf32, #tpu.memory_space<vmem>>, vector<32x64xf32>
    %c0_101 = arith.constant 0 : index
    %c0_102 = arith.constant 0 : index
    %214 = vector.load %arg7[%c0_101, %c0_102] : memref<32x16xf32, #tpu.memory_space<vmem>>, vector<32x16xf32>
    %cst_103 = arith.constant dense<0.000000e+00> : vector<32x64xf32>
    %215 = tpu.matmul %214, %42, %cst_103 {dimension_numbers = #tpu.dot_dimension_numbers<[1], [0], [0], [1], [0, 0, 1, 1], [], []>} : vector<32x16xf32>, vector<16x64xf32>, vector<32x64xf32> -> vector<32x64xf32>
    %216 = arith.addf %213, %215 : vector<32x64xf32>
    %217 = vector.extract_strided_slice %216 {offsets = [0, 0], sizes = [32, 16], strides = [1, 1]} : vector<32x64xf32> to vector<32x16xf32>
    %218 = arith.negf %217 : vector<32x16xf32>
    %219 = math.exp %218 : vector<32x16xf32>
    %cst_104 = arith.constant 1.000000e+00 : f32
    %220 = vector.broadcast %cst_104 : f32 to vector<32x16xf32>
    %221 = arith.addf %220, %219 : vector<32x16xf32>
    %222 = arith.divf %220, %221 : vector<32x16xf32>
    %223 = vector.extract_strided_slice %216 {offsets = [0, 16], sizes = [32, 16], strides = [1, 1]} : vector<32x64xf32> to vector<32x16xf32>
    %224 = arith.negf %223 : vector<32x16xf32>
    %225 = math.exp %224 : vector<32x16xf32>
    %cst_105 = arith.constant 1.000000e+00 : f32
    %226 = vector.broadcast %cst_105 : f32 to vector<32x16xf32>
    %227 = arith.addf %226, %225 : vector<32x16xf32>
    %228 = arith.divf %226, %227 : vector<32x16xf32>
    %229 = vector.extract_strided_slice %216 {offsets = [0, 32], sizes = [32, 16], strides = [1, 1]} : vector<32x64xf32> to vector<32x16xf32>
    %230 = math.tanh %229 : vector<32x16xf32>
    %231 = vector.extract_strided_slice %216 {offsets = [0, 48], sizes = [32, 16], strides = [1, 1]} : vector<32x64xf32> to vector<32x16xf32>
    %232 = arith.negf %231 : vector<32x16xf32>
    %233 = math.exp %232 : vector<32x16xf32>
    %cst_106 = arith.constant 1.000000e+00 : f32
    %234 = vector.broadcast %cst_106 : f32 to vector<32x16xf32>
    %235 = arith.addf %234, %233 : vector<32x16xf32>
    %236 = arith.divf %234, %235 : vector<32x16xf32>
    %c0_107 = arith.constant 0 : index
    %c0_108 = arith.constant 0 : index
    %237 = vector.load %arg8[%c0_107, %c0_108] : memref<32x16xf32, #tpu.memory_space<vmem>>, vector<32x16xf32>
    %238 = arith.mulf %228, %237 : vector<32x16xf32>
    %239 = arith.mulf %222, %230 : vector<32x16xf32>
    %240 = arith.addf %238, %239 : vector<32x16xf32>
    %241 = math.tanh %240 : vector<32x16xf32>
    %242 = arith.mulf %236, %241 : vector<32x16xf32>
    %c0_109 = arith.constant 0 : index
    %c0_110 = arith.constant 0 : index
    %243 = vector.load %arg8[%c0_109, %c0_110] : memref<32x16xf32, #tpu.memory_space<vmem>>, vector<32x16xf32>
    tpu.vector_store %arg8[%c0_109, %c0_110], %240 {strides = array<i32>} : memref<32x16xf32, #tpu.memory_space<vmem>>, vector<32x16xf32>,
    %c0_111 = arith.constant 0 : index
    %c0_112 = arith.constant 0 : index
    %244 = vector.load %arg7[%c0_111, %c0_112] : memref<32x16xf32, #tpu.memory_space<vmem>>, vector<32x16xf32>
    tpu.vector_store %arg7[%c0_111, %c0_112], %242 {strides = array<i32>} : memref<32x16xf32, #tpu.memory_space<vmem>>, vector<32x16xf32>,
    %cst_113 = arith.constant dense<0.000000e+00> : vector<16xf32>
    %245 = vector.multi_reduction <add>, %242, %cst_113 [0] : vector<32x16xf32> to vector<16xf32>
    %246 = vector.shape_cast %245 : vector<16xf32> to vector<1x16xf32>
    %cst_114 = arith.constant 3.200000e+01 : f32
    %247 = vector.broadcast %cst_114 : f32 to vector<1x16xf32>
    %248 = arith.divf %246, %247 : vector<1x16xf32>
    %249 = vector.broadcast %248 : vector<1x16xf32> to vector<32x16xf32>
    %250 = arith.subf %242, %249 : vector<32x16xf32>
    %cst_115 = arith.constant dense<0.000000e+00> : vector<16x16xf32>
    %251 = tpu.matmul %250, %250, %cst_115 {dimension_numbers = #tpu.dot_dimension_numbers<[0], [0], [1], [1], [0, 1, 1, 1], [], []>} : vector<32x16xf32>, vector<32x16xf32>, vector<16x16xf32> -> vector<16x16xf32>
    %cst_116 = arith.constant 3.100000e+01 : f32
    %252 = vector.broadcast %cst_116 : f32 to vector<16x16xf32>
    %253 = arith.divf %251, %252 : vector<16x16xf32>
    %cst_117 = arith.constant 5.000000e-01 : f32
    %254 = vector.broadcast %cst_117 : f32 to vector<16x16xf32>
    %255 = arith.mulf %254, %253 : vector<16x16xf32>
    %256 = arith.select %45, %253, %255 : vector<16x16xi1>, vector<16x16xf32>
    %cst_118 = arith.constant dense<0.000000e+00> : vector<16x16xf32>
    %257 = tpu.matmul %256, %256, %cst_118 {dimension_numbers = #tpu.dot_dimension_numbers<[1], [0], [0], [1], [0, 0, 1, 1], [], []>} : vector<16x16xf32>, vector<16x16xf32>, vector<16x16xf32> -> vector<16x16xf32>
    %258 = arith.index_cast %209 : i32 to index
    %c0_119 = arith.constant 0 : index
    %c0_120 = arith.constant 0 : index
    %259 = vector.load %arg9[%258, %c0_119, %c0_120] : memref<4x16x16xf32, #tpu.memory_space<vmem>>, vector<1x16x16xf32>
    %260 = vector.shape_cast %259 : vector<1x16x16xf32> to vector<16x16xf32>
    %261 = vector.shape_cast %257 : vector<16x16xf32> to vector<1x16x16xf32>
    tpu.vector_store %arg9[%258, %c0_119, %c0_120], %261 {strides = array<i32>} : memref<4x16x16xf32, #tpu.memory_space<vmem>>, vector<1x16x16xf32>,
    %c4_i32 = arith.constant 4 : i32
    %c0_121 = arith.constant 0 : index
    %c0_122 = arith.constant 0 : index
    %c0_123 = arith.constant 0 : index
    %262 = vector.load %arg9[%c0_121, %c0_122, %c0_123] : memref<4x16x16xf32, #tpu.memory_space<vmem>>, vector<4x16x16xf32>
    %cst_124 = arith.constant 1.000000e+00 : f32
    %263 = vector.broadcast %cst_124 : f32 to vector<4x16xf32>
    %cst_125 = arith.constant 0.000000e+00 : f32
    %264 = vector.broadcast %cst_125 : f32 to vector<4x16xf32>
    %265 = vector.shape_cast %263 : vector<4x16xf32> to vector<4x16x1xf32>
    %266 = vector.broadcast %265 : vector<4x16x1xf32> to vector<4x16x16xf32>
    %267 = arith.mulf %266, %262 : vector<4x16x16xf32>
    %cst_126 = arith.constant dense<0.000000e+00> : vector<4x16xf32>
    %268 = vector.multi_reduction <add>, %267, %cst_126 [1] : vector<4x16x16xf32> to vector<4x16xf32>
    %269 = arith.mulf %263, %263 : vector<4x16xf32>
    %cst_127 = arith.constant dense<0.000000e+00> : vector<4xf32>
    %270 = vector.multi_reduction <add>, %269, %cst_127 [1] : vector<4x16xf32> to vector<4xf32>
    %271 = vector.shape_cast %270 : vector<4xf32> to vector<4x1xf32>
    %272 = arith.mulf %263, %268 : vector<4x16xf32>
    %cst_128 = arith.constant dense<0.000000e+00> : vector<4xf32>
    %273 = vector.multi_reduction <add>, %272, %cst_128 [1] : vector<4x16xf32> to vector<4xf32>
    %274 = vector.shape_cast %273 : vector<4xf32> to vector<4x1xf32>
    %cst_129 = arith.constant 1.000000e-30 : f32
    %275 = vector.broadcast %cst_129 : f32 to vector<4x1xf32>
    %276 = arith.addf %274, %275 : vector<4x1xf32>
    %277 = arith.divf %271, %276 : vector<4x1xf32>
    %278 = vector.broadcast %277 : vector<4x1xf32> to vector<4x16xf32>
    %279 = arith.mulf %278, %263 : vector<4x16xf32>
    %280 = arith.addf %264, %279 : vector<4x16xf32>
    %281 = vector.broadcast %277 : vector<4x1xf32> to vector<4x16xf32>
    %282 = arith.mulf %281, %268 : vector<4x16xf32>
    %283 = arith.subf %263, %282 : vector<4x16xf32>
    %284 = arith.mulf %283, %283 : vector<4x16xf32>
    %cst_130 = arith.constant dense<0.000000e+00> : vector<4xf32>
    %285 = vector.multi_reduction <add>, %284, %cst_130 [1] : vector<4x16xf32> to vector<4xf32>
    %286 = vector.shape_cast %285 : vector<4xf32> to vector<4x1xf32>
    %cst_131 = arith.constant 1.000000e-30 : f32
    %287 = vector.broadcast %cst_131 : f32 to vector<4x1xf32>
    %288 = arith.addf %271, %287 : vector<4x1xf32>
    %289 = arith.divf %286, %288 : vector<4x1xf32>
    %290 = vector.broadcast %289 : vector<4x1xf32> to vector<4x16xf32>
    %291 = arith.mulf %290, %263 : vector<4x16xf32>
    %292 = arith.addf %283, %291 : vector<4x16xf32>
    %293 = vector.shape_cast %292 : vector<4x16xf32> to vector<4x16x1xf32>
    %294 = vector.broadcast %293 : vector<4x16x1xf32> to vector<4x16x16xf32>
    %295 = arith.mulf %294, %262 : vector<4x16x16xf32>
    %cst_132 = arith.constant dense<0.000000e+00> : vector<4x16xf32>
    %296 = vector.multi_reduction <add>, %295, %cst_132 [1] : vector<4x16x16xf32> to vector<4x16xf32>
    %297 = arith.mulf %283, %283 : vector<4x16xf32>
    %cst_133 = arith.constant dense<0.000000e+00> : vector<4xf32>
    %298 = vector.multi_reduction <add>, %297, %cst_133 [1] : vector<4x16xf32> to vector<4xf32>
    %299 = vector.shape_cast %298 : vector<4xf32> to vector<4x1xf32>
    %300 = arith.mulf %292, %296 : vector<4x16xf32>
    %cst_134 = arith.constant dense<0.000000e+00> : vector<4xf32>
    %301 = vector.multi_reduction <add>, %300, %cst_134 [1] : vector<4x16xf32> to vector<4xf32>
    %302 = vector.shape_cast %301 : vector<4xf32> to vector<4x1xf32>
    %cst_135 = arith.constant 1.000000e-30 : f32
    %303 = vector.broadcast %cst_135 : f32 to vector<4x1xf32>
    %304 = arith.addf %302, %303 : vector<4x1xf32>
    %305 = arith.divf %299, %304 : vector<4x1xf32>
    %306 = vector.broadcast %305 : vector<4x1xf32> to vector<4x16xf32>
    %307 = arith.mulf %306, %292 : vector<4x16xf32>
    %308 = arith.addf %280, %307 : vector<4x16xf32>
    %309 = vector.broadcast %305 : vector<4x1xf32> to vector<4x16xf32>
    %310 = arith.mulf %309, %296 : vector<4x16xf32>
    %311 = arith.subf %283, %310 : vector<4x16xf32>
    %312 = arith.mulf %311, %311 : vector<4x16xf32>
    %cst_136 = arith.constant dense<0.000000e+00> : vector<4xf32>
    %313 = vector.multi_reduction <add>, %312, %cst_136 [1] : vector<4x16xf32> to vector<4xf32>
    %314 = vector.shape_cast %313 : vector<4xf32> to vector<4x1xf32>
    %cst_137 = arith.constant 1.000000e-30 : f32
    %315 = vector.broadcast %cst_137 : f32 to vector<4x1xf32>
    %316 = arith.addf %299, %315 : vector<4x1xf32>
    %317 = arith.divf %314, %316 : vector<4x1xf32>
    %318 = vector.broadcast %317 : vector<4x1xf32> to vector<4x16xf32>
    %319 = arith.mulf %318, %292 : vector<4x16xf32>
    %320 = arith.addf %311, %319 : vector<4x16xf32>
    %321 = vector.shape_cast %320 : vector<4x16xf32> to vector<4x16x1xf32>
    %322 = vector.broadcast %321 : vector<4x16x1xf32> to vector<4x16x16xf32>
    %323 = arith.mulf %322, %262 : vector<4x16x16xf32>
    %cst_138 = arith.constant dense<0.000000e+00> : vector<4x16xf32>
    %324 = vector.multi_reduction <add>, %323, %cst_138 [1] : vector<4x16x16xf32> to vector<4x16xf32>
    %325 = arith.mulf %311, %311 : vector<4x16xf32>
    %cst_139 = arith.constant dense<0.000000e+00> : vector<4xf32>
    %326 = vector.multi_reduction <add>, %325, %cst_139 [1] : vector<4x16xf32> to vector<4xf32>
    %327 = vector.shape_cast %326 : vector<4xf32> to vector<4x1xf32>
    %328 = arith.mulf %320, %324 : vector<4x16xf32>
    %cst_140 = arith.constant dense<0.000000e+00> : vector<4xf32>
    %329 = vector.multi_reduction <add>, %328, %cst_140 [1] : vector<4x16xf32> to vector<4xf32>
    %330 = vector.shape_cast %329 : vector<4xf32> to vector<4x1xf32>
    %cst_141 = arith.constant 1.000000e-30 : f32
    %331 = vector.broadcast %cst_141 : f32 to vector<4x1xf32>
    %332 = arith.addf %330, %331 : vector<4x1xf32>
    %333 = arith.divf %327, %332 : vector<4x1xf32>
    %334 = vector.broadcast %333 : vector<4x1xf32> to vector<4x16xf32>
    %335 = arith.mulf %334, %320 : vector<4x16xf32>
    %336 = arith.addf %308, %335 : vector<4x16xf32>
    %337 = vector.broadcast %333 : vector<4x1xf32> to vector<4x16xf32>
    %338 = arith.mulf %337, %324 : vector<4x16xf32>
    %339 = arith.subf %311, %338 : vector<4x16xf32>
    %340 = arith.mulf %339, %339 : vector<4x16xf32>
    %cst_142 = arith.constant dense<0.000000e+00> : vector<4xf32>
    %341 = vector.multi_reduction <add>, %340, %cst_142 [1] : vector<4x16xf32> to vector<4xf32>
    %342 = vector.shape_cast %341 : vector<4xf32> to vector<4x1xf32>
    %cst_143 = arith.constant 1.000000e-30 : f32
    %343 = vector.broadcast %cst_143 : f32 to vector<4x1xf32>
    %344 = arith.addf %327, %343 : vector<4x1xf32>
    %345 = arith.divf %342, %344 : vector<4x1xf32>
    %346 = vector.broadcast %345 : vector<4x1xf32> to vector<4x16xf32>
    %347 = arith.mulf %346, %320 : vector<4x16xf32>
    %348 = arith.addf %339, %347 : vector<4x16xf32>
    %349 = vector.shape_cast %348 : vector<4x16xf32> to vector<4x16x1xf32>
    %350 = vector.broadcast %349 : vector<4x16x1xf32> to vector<4x16x16xf32>
    %351 = arith.mulf %350, %262 : vector<4x16x16xf32>
    %cst_144 = arith.constant dense<0.000000e+00> : vector<4x16xf32>
    %352 = vector.multi_reduction <add>, %351, %cst_144 [1] : vector<4x16x16xf32> to vector<4x16xf32>
    %353 = arith.mulf %339, %339 : vector<4x16xf32>
    %cst_145 = arith.constant dense<0.000000e+00> : vector<4xf32>
    %354 = vector.multi_reduction <add>, %353, %cst_145 [1] : vector<4x16xf32> to vector<4xf32>
    %355 = vector.shape_cast %354 : vector<4xf32> to vector<4x1xf32>
    %356 = arith.mulf %348, %352 : vector<4x16xf32>
    %cst_146 = arith.constant dense<0.000000e+00> : vector<4xf32>
    %357 = vector.multi_reduction <add>, %356, %cst_146 [1] : vector<4x16xf32> to vector<4xf32>
    %358 = vector.shape_cast %357 : vector<4xf32> to vector<4x1xf32>
    %cst_147 = arith.constant 1.000000e-30 : f32
    %359 = vector.broadcast %cst_147 : f32 to vector<4x1xf32>
    %360 = arith.addf %358, %359 : vector<4x1xf32>
    %361 = arith.divf %355, %360 : vector<4x1xf32>
    %362 = vector.broadcast %361 : vector<4x1xf32> to vector<4x16xf32>
    %363 = arith.mulf %362, %348 : vector<4x16xf32>
    %364 = arith.addf %336, %363 : vector<4x16xf32>
    %365 = vector.broadcast %361 : vector<4x1xf32> to vector<4x16xf32>
    %366 = arith.mulf %365, %352 : vector<4x16xf32>
    %367 = arith.subf %339, %366 : vector<4x16xf32>
    %368 = arith.mulf %367, %367 : vector<4x16xf32>
    %cst_148 = arith.constant dense<0.000000e+00> : vector<4xf32>
    %369 = vector.multi_reduction <add>, %368, %cst_148 [1] : vector<4x16xf32> to vector<4xf32>
    %370 = vector.shape_cast %369 : vector<4xf32> to vector<4x1xf32>
    %cst_149 = arith.constant 1.000000e-30 : f32
    %371 = vector.broadcast %cst_149 : f32 to vector<4x1xf32>
    %372 = arith.addf %355, %371 : vector<4x1xf32>
    %373 = arith.divf %370, %372 : vector<4x1xf32>
    %374 = vector.broadcast %373 : vector<4x1xf32> to vector<4x16xf32>
    %375 = arith.mulf %374, %348 : vector<4x16xf32>
    %376 = arith.addf %367, %375 : vector<4x16xf32>
    %377 = vector.shape_cast %376 : vector<4x16xf32> to vector<4x16x1xf32>
    %378 = vector.broadcast %377 : vector<4x16x1xf32> to vector<4x16x16xf32>
    %379 = arith.mulf %378, %262 : vector<4x16x16xf32>
    %cst_150 = arith.constant dense<0.000000e+00> : vector<4x16xf32>
    %380 = vector.multi_reduction <add>, %379, %cst_150 [1] : vector<4x16x16xf32> to vector<4x16xf32>
    %381 = arith.mulf %367, %367 : vector<4x16xf32>
    %cst_151 = arith.constant dense<0.000000e+00> : vector<4xf32>
    %382 = vector.multi_reduction <add>, %381, %cst_151 [1] : vector<4x16xf32> to vector<4xf32>
    %383 = vector.shape_cast %382 : vector<4xf32> to vector<4x1xf32>
    %384 = arith.mulf %376, %380 : vector<4x16xf32>
    %cst_152 = arith.constant dense<0.000000e+00> : vector<4xf32>
    %385 = vector.multi_reduction <add>, %384, %cst_152 [1] : vector<4x16xf32> to vector<4xf32>
    %386 = vector.shape_cast %385 : vector<4xf32> to vector<4x1xf32>
    %cst_153 = arith.constant 1.000000e-30 : f32
    %387 = vector.broadcast %cst_153 : f32 to vector<4x1xf32>
    %388 = arith.addf %386, %387 : vector<4x1xf32>
    %389 = arith.divf %383, %388 : vector<4x1xf32>
    %390 = vector.broadcast %389 : vector<4x1xf32> to vector<4x16xf32>
    %391 = arith.mulf %390, %376 : vector<4x16xf32>
    %392 = arith.addf %364, %391 : vector<4x16xf32>
    %393 = vector.broadcast %389 : vector<4x1xf32> to vector<4x16xf32>
    %394 = arith.mulf %393, %380 : vector<4x16xf32>
    %395 = arith.subf %367, %394 : vector<4x16xf32>
    %396 = arith.mulf %395, %395 : vector<4x16xf32>
    %cst_154 = arith.constant dense<0.000000e+00> : vector<4xf32>
    %397 = vector.multi_reduction <add>, %396, %cst_154 [1] : vector<4x16xf32> to vector<4xf32>
    %398 = vector.shape_cast %397 : vector<4xf32> to vector<4x1xf32>
    %cst_155 = arith.constant 1.000000e-30 : f32
    %399 = vector.broadcast %cst_155 : f32 to vector<4x1xf32>
    %400 = arith.addf %383, %399 : vector<4x1xf32>
    %401 = arith.divf %398, %400 : vector<4x1xf32>
    %402 = vector.broadcast %401 : vector<4x1xf32> to vector<4x16xf32>
    %403 = arith.mulf %402, %376 : vector<4x16xf32>
    %404 = arith.addf %395, %403 : vector<4x16xf32>
    %405 = vector.shape_cast %404 : vector<4x16xf32> to vector<4x16x1xf32>
    %406 = vector.broadcast %405 : vector<4x16x1xf32> to vector<4x16x16xf32>
    %407 = arith.mulf %406, %262 : vector<4x16x16xf32>
    %cst_156 = arith.constant dense<0.000000e+00> : vector<4x16xf32>
    %408 = vector.multi_reduction <add>, %407, %cst_156 [1] : vector<4x16x16xf32> to vector<4x16xf32>
    %409 = arith.mulf %395, %395 : vector<4x16xf32>
    %cst_157 = arith.constant dense<0.000000e+00> : vector<4xf32>
    %410 = vector.multi_reduction <add>, %409, %cst_157 [1] : vector<4x16xf32> to vector<4xf32>
    %411 = vector.shape_cast %410 : vector<4xf32> to vector<4x1xf32>
    %412 = arith.mulf %404, %408 : vector<4x16xf32>
    %cst_158 = arith.constant dense<0.000000e+00> : vector<4xf32>
    %413 = vector.multi_reduction <add>, %412, %cst_158 [1] : vector<4x16xf32> to vector<4xf32>
    %414 = vector.shape_cast %413 : vector<4xf32> to vector<4x1xf32>
    %cst_159 = arith.constant 1.000000e-30 : f32
    %415 = vector.broadcast %cst_159 : f32 to vector<4x1xf32>
    %416 = arith.addf %414, %415 : vector<4x1xf32>
    %417 = arith.divf %411, %416 : vector<4x1xf32>
    %418 = vector.broadcast %417 : vector<4x1xf32> to vector<4x16xf32>
    %419 = arith.mulf %418, %404 : vector<4x16xf32>
    %420 = arith.addf %392, %419 : vector<4x16xf32>
    %421 = vector.broadcast %417 : vector<4x1xf32> to vector<4x16xf32>
    %422 = arith.mulf %421, %408 : vector<4x16xf32>
    %423 = arith.subf %395, %422 : vector<4x16xf32>
    %424 = arith.mulf %423, %423 : vector<4x16xf32>
    %cst_160 = arith.constant dense<0.000000e+00> : vector<4xf32>
    %425 = vector.multi_reduction <add>, %424, %cst_160 [1] : vector<4x16xf32> to vector<4xf32>
    %426 = vector.shape_cast %425 : vector<4xf32> to vector<4x1xf32>
    %cst_161 = arith.constant 1.000000e-30 : f32
    %427 = vector.broadcast %cst_161 : f32 to vector<4x1xf32>
    %428 = arith.addf %411, %427 : vector<4x1xf32>
    %429 = arith.divf %426, %428 : vector<4x1xf32>
    %430 = vector.broadcast %429 : vector<4x1xf32> to vector<4x16xf32>
    %431 = arith.mulf %430, %404 : vector<4x16xf32>
    %432 = arith.addf %423, %431 : vector<4x16xf32>
    %433 = vector.shape_cast %432 : vector<4x16xf32> to vector<4x16x1xf32>
    %434 = vector.broadcast %433 : vector<4x16x1xf32> to vector<4x16x16xf32>
    %435 = arith.mulf %434, %262 : vector<4x16x16xf32>
    %cst_162 = arith.constant dense<0.000000e+00> : vector<4x16xf32>
    %436 = vector.multi_reduction <add>, %435, %cst_162 [1] : vector<4x16x16xf32> to vector<4x16xf32>
    %437 = arith.mulf %423, %423 : vector<4x16xf32>
    %cst_163 = arith.constant dense<0.000000e+00> : vector<4xf32>
    %438 = vector.multi_reduction <add>, %437, %cst_163 [1] : vector<4x16xf32> to vector<4xf32>
    %439 = vector.shape_cast %438 : vector<4xf32> to vector<4x1xf32>
    %440 = arith.mulf %432, %436 : vector<4x16xf32>
    %cst_164 = arith.constant dense<0.000000e+00> : vector<4xf32>
    %441 = vector.multi_reduction <add>, %440, %cst_164 [1] : vector<4x16xf32> to vector<4xf32>
    %442 = vector.shape_cast %441 : vector<4xf32> to vector<4x1xf32>
    %cst_165 = arith.constant 1.000000e-30 : f32
    %443 = vector.broadcast %cst_165 : f32 to vector<4x1xf32>
    %444 = arith.addf %442, %443 : vector<4x1xf32>
    %445 = arith.divf %439, %444 : vector<4x1xf32>
    %446 = vector.broadcast %445 : vector<4x1xf32> to vector<4x16xf32>
    %447 = arith.mulf %446, %432 : vector<4x16xf32>
    %448 = arith.addf %420, %447 : vector<4x16xf32>
    %449 = vector.broadcast %445 : vector<4x1xf32> to vector<4x16xf32>
    %450 = arith.mulf %449, %436 : vector<4x16xf32>
    %451 = arith.subf %423, %450 : vector<4x16xf32>
    %452 = arith.mulf %451, %451 : vector<4x16xf32>
    %cst_166 = arith.constant dense<0.000000e+00> : vector<4xf32>
    %453 = vector.multi_reduction <add>, %452, %cst_166 [1] : vector<4x16xf32> to vector<4xf32>
    %454 = vector.shape_cast %453 : vector<4xf32> to vector<4x1xf32>
    %cst_167 = arith.constant 1.000000e-30 : f32
    %455 = vector.broadcast %cst_167 : f32 to vector<4x1xf32>
    %456 = arith.addf %439, %455 : vector<4x1xf32>
    %457 = arith.divf %454, %456 : vector<4x1xf32>
    %458 = vector.broadcast %457 : vector<4x1xf32> to vector<4x16xf32>
    %459 = arith.mulf %458, %432 : vector<4x16xf32>
    %460 = arith.addf %451, %459 : vector<4x16xf32>
    %461 = vector.shape_cast %460 : vector<4x16xf32> to vector<4x16x1xf32>
    %462 = vector.broadcast %461 : vector<4x16x1xf32> to vector<4x16x16xf32>
    %463 = arith.mulf %462, %262 : vector<4x16x16xf32>
    %cst_168 = arith.constant dense<0.000000e+00> : vector<4x16xf32>
    %464 = vector.multi_reduction <add>, %463, %cst_168 [1] : vector<4x16x16xf32> to vector<4x16xf32>
    %465 = arith.mulf %451, %451 : vector<4x16xf32>
    %cst_169 = arith.constant dense<0.000000e+00> : vector<4xf32>
    %466 = vector.multi_reduction <add>, %465, %cst_169 [1] : vector<4x16xf32> to vector<4xf32>
    %467 = vector.shape_cast %466 : vector<4xf32> to vector<4x1xf32>
    %468 = arith.mulf %460, %464 : vector<4x16xf32>
    %cst_170 = arith.constant dense<0.000000e+00> : vector<4xf32>
    %469 = vector.multi_reduction <add>, %468, %cst_170 [1] : vector<4x16xf32> to vector<4xf32>
    %470 = vector.shape_cast %469 : vector<4xf32> to vector<4x1xf32>
    %cst_171 = arith.constant 1.000000e-30 : f32
    %471 = vector.broadcast %cst_171 : f32 to vector<4x1xf32>
    %472 = arith.addf %470, %471 : vector<4x1xf32>
    %473 = arith.divf %467, %472 : vector<4x1xf32>
    %474 = vector.broadcast %473 : vector<4x1xf32> to vector<4x16xf32>
    %475 = arith.mulf %474, %460 : vector<4x16xf32>
    %476 = arith.addf %448, %475 : vector<4x16xf32>
    %477 = vector.broadcast %473 : vector<4x1xf32> to vector<4x16xf32>
    %478 = arith.mulf %477, %464 : vector<4x16xf32>
    %479 = arith.subf %451, %478 : vector<4x16xf32>
    %480 = arith.mulf %479, %479 : vector<4x16xf32>
    %cst_172 = arith.constant dense<0.000000e+00> : vector<4xf32>
    %481 = vector.multi_reduction <add>, %480, %cst_172 [1] : vector<4x16xf32> to vector<4xf32>
    %482 = vector.shape_cast %481 : vector<4xf32> to vector<4x1xf32>
    %cst_173 = arith.constant 1.000000e-30 : f32
    %483 = vector.broadcast %cst_173 : f32 to vector<4x1xf32>
    %484 = arith.addf %467, %483 : vector<4x1xf32>
    %485 = arith.divf %482, %484 : vector<4x1xf32>
    %486 = vector.broadcast %485 : vector<4x1xf32> to vector<4x16xf32>
    %487 = arith.mulf %486, %460 : vector<4x16xf32>
    %488 = arith.addf %479, %487 : vector<4x16xf32>
    %489 = vector.shape_cast %488 : vector<4x16xf32> to vector<4x16x1xf32>
    %490 = vector.broadcast %489 : vector<4x16x1xf32> to vector<4x16x16xf32>
    %491 = arith.mulf %490, %262 : vector<4x16x16xf32>
    %cst_174 = arith.constant dense<0.000000e+00> : vector<4x16xf32>
    %492 = vector.multi_reduction <add>, %491, %cst_174 [1] : vector<4x16x16xf32> to vector<4x16xf32>
    %493 = arith.mulf %479, %479 : vector<4x16xf32>
    %cst_175 = arith.constant dense<0.000000e+00> : vector<4xf32>
    %494 = vector.multi_reduction <add>, %493, %cst_175 [1] : vector<4x16xf32> to vector<4xf32>
    %495 = vector.shape_cast %494 : vector<4xf32> to vector<4x1xf32>
    %496 = arith.mulf %488, %492 : vector<4x16xf32>
    %cst_176 = arith.constant dense<0.000000e+00> : vector<4xf32>
    %497 = vector.multi_reduction <add>, %496, %cst_176 [1] : vector<4x16xf32> to vector<4xf32>
    %498 = vector.shape_cast %497 : vector<4xf32> to vector<4x1xf32>
    %cst_177 = arith.constant 1.000000e-30 : f32
    %499 = vector.broadcast %cst_177 : f32 to vector<4x1xf32>
    %500 = arith.addf %498, %499 : vector<4x1xf32>
    %501 = arith.divf %495, %500 : vector<4x1xf32>
    %502 = vector.broadcast %501 : vector<4x1xf32> to vector<4x16xf32>
    %503 = arith.mulf %502, %488 : vector<4x16xf32>
    %504 = arith.addf %476, %503 : vector<4x16xf32>
    %505 = vector.broadcast %501 : vector<4x1xf32> to vector<4x16xf32>
    %506 = arith.mulf %505, %492 : vector<4x16xf32>
    %507 = arith.subf %479, %506 : vector<4x16xf32>
    %508 = arith.mulf %507, %507 : vector<4x16xf32>
    %cst_178 = arith.constant dense<0.000000e+00> : vector<4xf32>
    %509 = vector.multi_reduction <add>, %508, %cst_178 [1] : vector<4x16xf32> to vector<4xf32>
    %510 = vector.shape_cast %509 : vector<4xf32> to vector<4x1xf32>
    %cst_179 = arith.constant 1.000000e-30 : f32
    %511 = vector.broadcast %cst_179 : f32 to vector<4x1xf32>
    %512 = arith.addf %495, %511 : vector<4x1xf32>
    %513 = arith.divf %510, %512 : vector<4x1xf32>
    %514 = vector.broadcast %513 : vector<4x1xf32> to vector<4x16xf32>
    %515 = arith.mulf %514, %488 : vector<4x16xf32>
    %516 = arith.addf %507, %515 : vector<4x16xf32>
    %517 = vector.shape_cast %516 : vector<4x16xf32> to vector<4x16x1xf32>
    %518 = vector.broadcast %517 : vector<4x16x1xf32> to vector<4x16x16xf32>
    %519 = arith.mulf %518, %262 : vector<4x16x16xf32>
    %cst_180 = arith.constant dense<0.000000e+00> : vector<4x16xf32>
    %520 = vector.multi_reduction <add>, %519, %cst_180 [1] : vector<4x16x16xf32> to vector<4x16xf32>
    %521 = arith.mulf %507, %507 : vector<4x16xf32>
    %cst_181 = arith.constant dense<0.000000e+00> : vector<4xf32>
    %522 = vector.multi_reduction <add>, %521, %cst_181 [1] : vector<4x16xf32> to vector<4xf32>
    %523 = vector.shape_cast %522 : vector<4xf32> to vector<4x1xf32>
    %524 = arith.mulf %516, %520 : vector<4x16xf32>
    %cst_182 = arith.constant dense<0.000000e+00> : vector<4xf32>
    %525 = vector.multi_reduction <add>, %524, %cst_182 [1] : vector<4x16xf32> to vector<4xf32>
    %526 = vector.shape_cast %525 : vector<4xf32> to vector<4x1xf32>
    %cst_183 = arith.constant 1.000000e-30 : f32
    %527 = vector.broadcast %cst_183 : f32 to vector<4x1xf32>
    %528 = arith.addf %526, %527 : vector<4x1xf32>
    %529 = arith.divf %523, %528 : vector<4x1xf32>
    %530 = vector.broadcast %529 : vector<4x1xf32> to vector<4x16xf32>
    %531 = arith.mulf %530, %516 : vector<4x16xf32>
    %532 = arith.addf %504, %531 : vector<4x16xf32>
    %533 = vector.broadcast %529 : vector<4x1xf32> to vector<4x16xf32>
    %534 = arith.mulf %533, %520 : vector<4x16xf32>
    %535 = arith.subf %507, %534 : vector<4x16xf32>
    %536 = arith.mulf %535, %535 : vector<4x16xf32>
    %cst_184 = arith.constant dense<0.000000e+00> : vector<4xf32>
    %537 = vector.multi_reduction <add>, %536, %cst_184 [1] : vector<4x16xf32> to vector<4xf32>
    %538 = vector.shape_cast %537 : vector<4xf32> to vector<4x1xf32>
    %cst_185 = arith.constant 1.000000e-30 : f32
    %539 = vector.broadcast %cst_185 : f32 to vector<4x1xf32>
    %540 = arith.addf %523, %539 : vector<4x1xf32>
    %541 = arith.divf %538, %540 : vector<4x1xf32>
    %542 = vector.broadcast %541 : vector<4x1xf32> to vector<4x16xf32>
    %543 = arith.mulf %542, %516 : vector<4x16xf32>
    %544 = arith.addf %535, %543 : vector<4x16xf32>
    %545 = vector.shape_cast %544 : vector<4x16xf32> to vector<4x16x1xf32>
    %546 = vector.broadcast %545 : vector<4x16x1xf32> to vector<4x16x16xf32>
    %547 = arith.mulf %546, %262 : vector<4x16x16xf32>
    %cst_186 = arith.constant dense<0.000000e+00> : vector<4x16xf32>
    %548 = vector.multi_reduction <add>, %547, %cst_186 [1] : vector<4x16x16xf32> to vector<4x16xf32>
    %549 = arith.mulf %535, %535 : vector<4x16xf32>
    %cst_187 = arith.constant dense<0.000000e+00> : vector<4xf32>
    %550 = vector.multi_reduction <add>, %549, %cst_187 [1] : vector<4x16xf32> to vector<4xf32>
    %551 = vector.shape_cast %550 : vector<4xf32> to vector<4x1xf32>
    %552 = arith.mulf %544, %548 : vector<4x16xf32>
    %cst_188 = arith.constant dense<0.000000e+00> : vector<4xf32>
    %553 = vector.multi_reduction <add>, %552, %cst_188 [1] : vector<4x16xf32> to vector<4xf32>
    %554 = vector.shape_cast %553 : vector<4xf32> to vector<4x1xf32>
    %cst_189 = arith.constant 1.000000e-30 : f32
    %555 = vector.broadcast %cst_189 : f32 to vector<4x1xf32>
    %556 = arith.addf %554, %555 : vector<4x1xf32>
    %557 = arith.divf %551, %556 : vector<4x1xf32>
    %558 = vector.broadcast %557 : vector<4x1xf32> to vector<4x16xf32>
    %559 = arith.mulf %558, %544 : vector<4x16xf32>
    %560 = arith.addf %532, %559 : vector<4x16xf32>
    %561 = vector.broadcast %557 : vector<4x1xf32> to vector<4x16xf32>
    %562 = arith.mulf %561, %548 : vector<4x16xf32>
    %563 = arith.subf %535, %562 : vector<4x16xf32>
    %564 = arith.mulf %563, %563 : vector<4x16xf32>
    %cst_190 = arith.constant dense<0.000000e+00> : vector<4xf32>
    %565 = vector.multi_reduction <add>, %564, %cst_190 [1] : vector<4x16xf32> to vector<4xf32>
    %566 = vector.shape_cast %565 : vector<4xf32> to vector<4x1xf32>
    %cst_191 = arith.constant 1.000000e-30 : f32
    %567 = vector.broadcast %cst_191 : f32 to vector<4x1xf32>
    %568 = arith.addf %551, %567 : vector<4x1xf32>
    %569 = arith.divf %566, %568 : vector<4x1xf32>
    %570 = vector.broadcast %569 : vector<4x1xf32> to vector<4x16xf32>
    %571 = arith.mulf %570, %544 : vector<4x16xf32>
    %572 = arith.addf %563, %571 : vector<4x16xf32>
    %573 = vector.shape_cast %572 : vector<4x16xf32> to vector<4x16x1xf32>
    %574 = vector.broadcast %573 : vector<4x16x1xf32> to vector<4x16x16xf32>
    %575 = arith.mulf %574, %262 : vector<4x16x16xf32>
    %cst_192 = arith.constant dense<0.000000e+00> : vector<4x16xf32>
    %576 = vector.multi_reduction <add>, %575, %cst_192 [1] : vector<4x16x16xf32> to vector<4x16xf32>
    %577 = arith.mulf %563, %563 : vector<4x16xf32>
    %cst_193 = arith.constant dense<0.000000e+00> : vector<4xf32>
    %578 = vector.multi_reduction <add>, %577, %cst_193 [1] : vector<4x16xf32> to vector<4xf32>
    %579 = vector.shape_cast %578 : vector<4xf32> to vector<4x1xf32>
    %580 = arith.mulf %572, %576 : vector<4x16xf32>
    %cst_194 = arith.constant dense<0.000000e+00> : vector<4xf32>
    %581 = vector.multi_reduction <add>, %580, %cst_194 [1] : vector<4x16xf32> to vector<4xf32>
    %582 = vector.shape_cast %581 : vector<4xf32> to vector<4x1xf32>
    %cst_195 = arith.constant 1.000000e-30 : f32
    %583 = vector.broadcast %cst_195 : f32 to vector<4x1xf32>
    %584 = arith.addf %582, %583 : vector<4x1xf32>
    %585 = arith.divf %579, %584 : vector<4x1xf32>
    %586 = vector.broadcast %585 : vector<4x1xf32> to vector<4x16xf32>
    %587 = arith.mulf %586, %572 : vector<4x16xf32>
    %588 = arith.addf %560, %587 : vector<4x16xf32>
    %589 = vector.broadcast %585 : vector<4x1xf32> to vector<4x16xf32>
    %590 = arith.mulf %589, %576 : vector<4x16xf32>
    %591 = arith.subf %563, %590 : vector<4x16xf32>
    %592 = arith.mulf %591, %591 : vector<4x16xf32>
    %cst_196 = arith.constant dense<0.000000e+00> : vector<4xf32>
    %593 = vector.multi_reduction <add>, %592, %cst_196 [1] : vector<4x16xf32> to vector<4xf32>
    %594 = vector.shape_cast %593 : vector<4xf32> to vector<4x1xf32>
    %cst_197 = arith.constant 1.000000e-30 : f32
    %595 = vector.broadcast %cst_197 : f32 to vector<4x1xf32>
    %596 = arith.addf %579, %595 : vector<4x1xf32>
    %597 = arith.divf %594, %596 : vector<4x1xf32>
    %598 = vector.broadcast %597 : vector<4x1xf32> to vector<4x16xf32>
    %599 = arith.mulf %598, %572 : vector<4x16xf32>
    %600 = arith.addf %591, %599 : vector<4x16xf32>
    %601 = vector.shape_cast %600 : vector<4x16xf32> to vector<4x16x1xf32>
    %602 = vector.broadcast %601 : vector<4x16x1xf32> to vector<4x16x16xf32>
    %603 = arith.mulf %602, %262 : vector<4x16x16xf32>
    %cst_198 = arith.constant dense<0.000000e+00> : vector<4x16xf32>
    %604 = vector.multi_reduction <add>, %603, %cst_198 [1] : vector<4x16x16xf32> to vector<4x16xf32>
    %605 = arith.mulf %591, %591 : vector<4x16xf32>
    %cst_199 = arith.constant dense<0.000000e+00> : vector<4xf32>
    %606 = vector.multi_reduction <add>, %605, %cst_199 [1] : vector<4x16xf32> to vector<4xf32>
    %607 = vector.shape_cast %606 : vector<4xf32> to vector<4x1xf32>
    %608 = arith.mulf %600, %604 : vector<4x16xf32>
    %cst_200 = arith.constant dense<0.000000e+00> : vector<4xf32>
    %609 = vector.multi_reduction <add>, %608, %cst_200 [1] : vector<4x16xf32> to vector<4xf32>
    %610 = vector.shape_cast %609 : vector<4xf32> to vector<4x1xf32>
    %cst_201 = arith.constant 1.000000e-30 : f32
    %611 = vector.broadcast %cst_201 : f32 to vector<4x1xf32>
    %612 = arith.addf %610, %611 : vector<4x1xf32>
    %613 = arith.divf %607, %612 : vector<4x1xf32>
    %614 = vector.broadcast %613 : vector<4x1xf32> to vector<4x16xf32>
    %615 = arith.mulf %614, %600 : vector<4x16xf32>
    %616 = arith.addf %588, %615 : vector<4x16xf32>
    %617 = vector.broadcast %613 : vector<4x1xf32> to vector<4x16xf32>
    %618 = arith.mulf %617, %604 : vector<4x16xf32>
    %619 = arith.subf %591, %618 : vector<4x16xf32>
    %620 = arith.mulf %619, %619 : vector<4x16xf32>
    %cst_202 = arith.constant dense<0.000000e+00> : vector<4xf32>
    %621 = vector.multi_reduction <add>, %620, %cst_202 [1] : vector<4x16xf32> to vector<4xf32>
    %622 = vector.shape_cast %621 : vector<4xf32> to vector<4x1xf32>
    %cst_203 = arith.constant 1.000000e-30 : f32
    %623 = vector.broadcast %cst_203 : f32 to vector<4x1xf32>
    %624 = arith.addf %607, %623 : vector<4x1xf32>
    %625 = arith.divf %622, %624 : vector<4x1xf32>
    %626 = vector.broadcast %625 : vector<4x1xf32> to vector<4x16xf32>
    %627 = arith.mulf %626, %600 : vector<4x16xf32>
    %628 = arith.addf %619, %627 : vector<4x16xf32>
    %629 = vector.shape_cast %628 : vector<4x16xf32> to vector<4x16x1xf32>
    %630 = vector.broadcast %629 : vector<4x16x1xf32> to vector<4x16x16xf32>
    %631 = arith.mulf %630, %262 : vector<4x16x16xf32>
    %cst_204 = arith.constant dense<0.000000e+00> : vector<4x16xf32>
    %632 = vector.multi_reduction <add>, %631, %cst_204 [1] : vector<4x16x16xf32> to vector<4x16xf32>
    %633 = arith.mulf %619, %619 : vector<4x16xf32>
    %cst_205 = arith.constant dense<0.000000e+00> : vector<4xf32>
    %634 = vector.multi_reduction <add>, %633, %cst_205 [1] : vector<4x16xf32> to vector<4xf32>
    %635 = vector.shape_cast %634 : vector<4xf32> to vector<4x1xf32>
    %636 = arith.mulf %628, %632 : vector<4x16xf32>
    %cst_206 = arith.constant dense<0.000000e+00> : vector<4xf32>
    %637 = vector.multi_reduction <add>, %636, %cst_206 [1] : vector<4x16xf32> to vector<4xf32>
    %638 = vector.shape_cast %637 : vector<4xf32> to vector<4x1xf32>
    %cst_207 = arith.constant 1.000000e-30 : f32
    %639 = vector.broadcast %cst_207 : f32 to vector<4x1xf32>
    %640 = arith.addf %638, %639 : vector<4x1xf32>
    %641 = arith.divf %635, %640 : vector<4x1xf32>
    %642 = vector.broadcast %641 : vector<4x1xf32> to vector<4x16xf32>
    %643 = arith.mulf %642, %628 : vector<4x16xf32>
    %644 = arith.addf %616, %643 : vector<4x16xf32>
    %645 = vector.broadcast %641 : vector<4x1xf32> to vector<4x16xf32>
    %646 = arith.mulf %645, %632 : vector<4x16xf32>
    %647 = arith.subf %619, %646 : vector<4x16xf32>
    %648 = arith.mulf %647, %647 : vector<4x16xf32>
    %cst_208 = arith.constant dense<0.000000e+00> : vector<4xf32>
    %649 = vector.multi_reduction <add>, %648, %cst_208 [1] : vector<4x16xf32> to vector<4xf32>
    %650 = vector.shape_cast %649 : vector<4xf32> to vector<4x1xf32>
    %cst_209 = arith.constant 1.000000e-30 : f32
    %651 = vector.broadcast %cst_209 : f32 to vector<4x1xf32>
    %652 = arith.addf %635, %651 : vector<4x1xf32>
    %653 = arith.divf %650, %652 : vector<4x1xf32>
    %654 = vector.broadcast %653 : vector<4x1xf32> to vector<4x16xf32>
    %655 = arith.mulf %654, %628 : vector<4x16xf32>
    %656 = arith.addf %647, %655 : vector<4x16xf32>
    %657 = vector.shape_cast %656 : vector<4x16xf32> to vector<4x16x1xf32>
    %658 = vector.broadcast %657 : vector<4x16x1xf32> to vector<4x16x16xf32>
    %659 = arith.mulf %658, %262 : vector<4x16x16xf32>
    %cst_210 = arith.constant dense<0.000000e+00> : vector<4x16xf32>
    %660 = vector.multi_reduction <add>, %659, %cst_210 [1] : vector<4x16x16xf32> to vector<4x16xf32>
    %661 = arith.mulf %647, %647 : vector<4x16xf32>
    %cst_211 = arith.constant dense<0.000000e+00> : vector<4xf32>
    %662 = vector.multi_reduction <add>, %661, %cst_211 [1] : vector<4x16xf32> to vector<4xf32>
    %663 = vector.shape_cast %662 : vector<4xf32> to vector<4x1xf32>
    %664 = arith.mulf %656, %660 : vector<4x16xf32>
    %cst_212 = arith.constant dense<0.000000e+00> : vector<4xf32>
    %665 = vector.multi_reduction <add>, %664, %cst_212 [1] : vector<4x16xf32> to vector<4xf32>
    %666 = vector.shape_cast %665 : vector<4xf32> to vector<4x1xf32>
    %cst_213 = arith.constant 1.000000e-30 : f32
    %667 = vector.broadcast %cst_213 : f32 to vector<4x1xf32>
    %668 = arith.addf %666, %667 : vector<4x1xf32>
    %669 = arith.divf %663, %668 : vector<4x1xf32>
    %670 = vector.broadcast %669 : vector<4x1xf32> to vector<4x16xf32>
    %671 = arith.mulf %670, %656 : vector<4x16xf32>
    %672 = arith.addf %644, %671 : vector<4x16xf32>
    %673 = vector.broadcast %669 : vector<4x1xf32> to vector<4x16xf32>
    %674 = arith.mulf %673, %660 : vector<4x16xf32>
    %675 = arith.subf %647, %674 : vector<4x16xf32>
    %676 = arith.mulf %675, %675 : vector<4x16xf32>
    %cst_214 = arith.constant dense<0.000000e+00> : vector<4xf32>
    %677 = vector.multi_reduction <add>, %676, %cst_214 [1] : vector<4x16xf32> to vector<4xf32>
    %678 = vector.shape_cast %677 : vector<4xf32> to vector<4x1xf32>
    %cst_215 = arith.constant 1.000000e-30 : f32
    %679 = vector.broadcast %cst_215 : f32 to vector<4x1xf32>
    %680 = arith.addf %663, %679 : vector<4x1xf32>
    %681 = arith.divf %678, %680 : vector<4x1xf32>
    %682 = vector.broadcast %681 : vector<4x1xf32> to vector<4x16xf32>
    %683 = arith.mulf %682, %656 : vector<4x16xf32>
    %684 = arith.addf %675, %683 : vector<4x16xf32>
    %685 = vector.shape_cast %684 : vector<4x16xf32> to vector<4x16x1xf32>
    %686 = vector.broadcast %685 : vector<4x16x1xf32> to vector<4x16x16xf32>
    %687 = arith.mulf %686, %262 : vector<4x16x16xf32>
    %cst_216 = arith.constant dense<0.000000e+00> : vector<4x16xf32>
    %688 = vector.multi_reduction <add>, %687, %cst_216 [1] : vector<4x16x16xf32> to vector<4x16xf32>
    %689 = arith.mulf %675, %675 : vector<4x16xf32>
    %cst_217 = arith.constant dense<0.000000e+00> : vector<4xf32>
    %690 = vector.multi_reduction <add>, %689, %cst_217 [1] : vector<4x16xf32> to vector<4xf32>
    %691 = vector.shape_cast %690 : vector<4xf32> to vector<4x1xf32>
    %692 = arith.mulf %684, %688 : vector<4x16xf32>
    %cst_218 = arith.constant dense<0.000000e+00> : vector<4xf32>
    %693 = vector.multi_reduction <add>, %692, %cst_218 [1] : vector<4x16xf32> to vector<4xf32>
    %694 = vector.shape_cast %693 : vector<4xf32> to vector<4x1xf32>
    %cst_219 = arith.constant 1.000000e-30 : f32
    %695 = vector.broadcast %cst_219 : f32 to vector<4x1xf32>
    %696 = arith.addf %694, %695 : vector<4x1xf32>
    %697 = arith.divf %691, %696 : vector<4x1xf32>
    %698 = vector.broadcast %697 : vector<4x1xf32> to vector<4x16xf32>
    %699 = arith.mulf %698, %684 : vector<4x16xf32>
    %700 = arith.addf %672, %699 : vector<4x16xf32>
    %701 = vector.broadcast %697 : vector<4x1xf32> to vector<4x16xf32>
    %702 = arith.mulf %701, %688 : vector<4x16xf32>
    %703 = arith.subf %675, %702 : vector<4x16xf32>
    %704 = arith.mulf %703, %703 : vector<4x16xf32>
    %cst_220 = arith.constant dense<0.000000e+00> : vector<4xf32>
    %705 = vector.multi_reduction <add>, %704, %cst_220 [1] : vector<4x16xf32> to vector<4xf32>
    %706 = vector.shape_cast %705 : vector<4xf32> to vector<4x1xf32>
    %cst_221 = arith.constant 1.000000e-30 : f32
    %707 = vector.broadcast %cst_221 : f32 to vector<4x1xf32>
    %708 = arith.addf %691, %707 : vector<4x1xf32>
    %709 = arith.divf %706, %708 : vector<4x1xf32>
    %710 = vector.broadcast %709 : vector<4x1xf32> to vector<4x16xf32>
    %711 = arith.mulf %710, %684 : vector<4x16xf32>
    %712 = arith.addf %703, %711 : vector<4x16xf32>
    %713 = vector.shape_cast %712 : vector<4x16xf32> to vector<4x16x1xf32>
    %714 = vector.broadcast %713 : vector<4x16x1xf32> to vector<4x16x16xf32>
    %715 = arith.mulf %714, %262 : vector<4x16x16xf32>
    %cst_222 = arith.constant dense<0.000000e+00> : vector<4x16xf32>
    %716 = vector.multi_reduction <add>, %715, %cst_222 [1] : vector<4x16x16xf32> to vector<4x16xf32>
    %717 = arith.mulf %703, %703 : vector<4x16xf32>
    %cst_223 = arith.constant dense<0.000000e+00> : vector<4xf32>
    %718 = vector.multi_reduction <add>, %717, %cst_223 [1] : vector<4x16xf32> to vector<4xf32>
    %719 = vector.shape_cast %718 : vector<4xf32> to vector<4x1xf32>
    %720 = arith.mulf %712, %716 : vector<4x16xf32>
    %cst_224 = arith.constant dense<0.000000e+00> : vector<4xf32>
    %721 = vector.multi_reduction <add>, %720, %cst_224 [1] : vector<4x16xf32> to vector<4xf32>
    %722 = vector.shape_cast %721 : vector<4xf32> to vector<4x1xf32>
    %cst_225 = arith.constant 1.000000e-30 : f32
    %723 = vector.broadcast %cst_225 : f32 to vector<4x1xf32>
    %724 = arith.addf %722, %723 : vector<4x1xf32>
    %725 = arith.divf %719, %724 : vector<4x1xf32>
    %726 = vector.broadcast %725 : vector<4x1xf32> to vector<4x16xf32>
    %727 = arith.mulf %726, %712 : vector<4x16xf32>
    %728 = arith.addf %700, %727 : vector<4x16xf32>
    %729 = vector.broadcast %725 : vector<4x1xf32> to vector<4x16xf32>
    %730 = arith.mulf %729, %716 : vector<4x16xf32>
    %731 = arith.subf %703, %730 : vector<4x16xf32>
    %732 = arith.mulf %731, %731 : vector<4x16xf32>
    %cst_226 = arith.constant dense<0.000000e+00> : vector<4xf32>
    %733 = vector.multi_reduction <add>, %732, %cst_226 [1] : vector<4x16xf32> to vector<4xf32>
    %734 = vector.shape_cast %733 : vector<4xf32> to vector<4x1xf32>
    %cst_227 = arith.constant 1.000000e-30 : f32
    %735 = vector.broadcast %cst_227 : f32 to vector<4x1xf32>
    %736 = arith.addf %719, %735 : vector<4x1xf32>
    %737 = arith.divf %734, %736 : vector<4x1xf32>
    %738 = vector.broadcast %737 : vector<4x1xf32> to vector<4x16xf32>
    %739 = arith.mulf %738, %712 : vector<4x16xf32>
    %740 = arith.addf %731, %739 : vector<4x16xf32>
    %741 = vector.shape_cast %740 : vector<4x16xf32> to vector<4x16x1xf32>
    %742 = vector.broadcast %741 : vector<4x16x1xf32> to vector<4x16x16xf32>
    %743 = arith.mulf %742, %262 : vector<4x16x16xf32>
    %cst_228 = arith.constant dense<0.000000e+00> : vector<4x16xf32>
    %744 = vector.multi_reduction <add>, %743, %cst_228 [1] : vector<4x16x16xf32> to vector<4x16xf32>
    %745 = arith.mulf %731, %731 : vector<4x16xf32>
    %cst_229 = arith.constant dense<0.000000e+00> : vector<4xf32>
    %746 = vector.multi_reduction <add>, %745, %cst_229 [1] : vector<4x16xf32> to vector<4xf32>
    %747 = vector.shape_cast %746 : vector<4xf32> to vector<4x1xf32>
    %748 = arith.mulf %740, %744 : vector<4x16xf32>
    %cst_230 = arith.constant dense<0.000000e+00> : vector<4xf32>
    %749 = vector.multi_reduction <add>, %748, %cst_230 [1] : vector<4x16xf32> to vector<4xf32>
    %750 = vector.shape_cast %749 : vector<4xf32> to vector<4x1xf32>
    %cst_231 = arith.constant 1.000000e-30 : f32
    %751 = vector.broadcast %cst_231 : f32 to vector<4x1xf32>
    %752 = arith.addf %750, %751 : vector<4x1xf32>
    %753 = arith.divf %747, %752 : vector<4x1xf32>
    %754 = vector.broadcast %753 : vector<4x1xf32> to vector<4x16xf32>
    %755 = arith.mulf %754, %740 : vector<4x16xf32>
    %756 = arith.addf %728, %755 : vector<4x16xf32>
    %757 = vector.broadcast %753 : vector<4x1xf32> to vector<4x16xf32>
    %758 = arith.mulf %757, %744 : vector<4x16xf32>
    %759 = arith.subf %731, %758 : vector<4x16xf32>
    %760 = arith.mulf %759, %759 : vector<4x16xf32>
    %cst_232 = arith.constant dense<0.000000e+00> : vector<4xf32>
    %761 = vector.multi_reduction <add>, %760, %cst_232 [1] : vector<4x16xf32> to vector<4xf32>
    %762 = vector.shape_cast %761 : vector<4xf32> to vector<4x1xf32>
    %cst_233 = arith.constant 1.000000e-30 : f32
    %763 = vector.broadcast %cst_233 : f32 to vector<4x1xf32>
    %764 = arith.addf %747, %763 : vector<4x1xf32>
    %765 = arith.divf %762, %764 : vector<4x1xf32>
    %766 = vector.broadcast %765 : vector<4x1xf32> to vector<4x16xf32>
    %767 = arith.mulf %766, %740 : vector<4x16xf32>
    %768 = arith.addf %759, %767 : vector<4x16xf32>
    %769 = vector.shape_cast %768 : vector<4x16xf32> to vector<4x16x1xf32>
    %770 = vector.broadcast %769 : vector<4x16x1xf32> to vector<4x16x16xf32>
    %771 = arith.mulf %770, %262 : vector<4x16x16xf32>
    %cst_234 = arith.constant dense<0.000000e+00> : vector<4x16xf32>
    %772 = vector.multi_reduction <add>, %771, %cst_234 [1] : vector<4x16x16xf32> to vector<4x16xf32>
    %773 = arith.mulf %759, %759 : vector<4x16xf32>
    %cst_235 = arith.constant dense<0.000000e+00> : vector<4xf32>
    %774 = vector.multi_reduction <add>, %773, %cst_235 [1] : vector<4x16xf32> to vector<4xf32>
    %775 = vector.shape_cast %774 : vector<4xf32> to vector<4x1xf32>
    %776 = arith.mulf %768, %772 : vector<4x16xf32>
    %cst_236 = arith.constant dense<0.000000e+00> : vector<4xf32>
    %777 = vector.multi_reduction <add>, %776, %cst_236 [1] : vector<4x16xf32> to vector<4xf32>
    %778 = vector.shape_cast %777 : vector<4xf32> to vector<4x1xf32>
    %cst_237 = arith.constant 1.000000e-30 : f32
    %779 = vector.broadcast %cst_237 : f32 to vector<4x1xf32>
    %780 = arith.addf %778, %779 : vector<4x1xf32>
    %781 = arith.divf %775, %780 : vector<4x1xf32>
    %782 = vector.broadcast %781 : vector<4x1xf32> to vector<4x16xf32>
    %783 = arith.mulf %782, %768 : vector<4x16xf32>
    %784 = arith.addf %756, %783 : vector<4x16xf32>
    %785 = vector.broadcast %781 : vector<4x1xf32> to vector<4x16xf32>
    %786 = arith.mulf %785, %772 : vector<4x16xf32>
    %787 = arith.subf %759, %786 : vector<4x16xf32>
    %788 = arith.mulf %787, %787 : vector<4x16xf32>
    %cst_238 = arith.constant dense<0.000000e+00> : vector<4xf32>
    %789 = vector.multi_reduction <add>, %788, %cst_238 [1] : vector<4x16xf32> to vector<4xf32>
    %790 = vector.shape_cast %789 : vector<4xf32> to vector<4x1xf32>
    %cst_239 = arith.constant 1.000000e-30 : f32
    %791 = vector.broadcast %cst_239 : f32 to vector<4x1xf32>
    %792 = arith.addf %775, %791 : vector<4x1xf32>
    %793 = arith.divf %790, %792 : vector<4x1xf32>
    %794 = vector.broadcast %793 : vector<4x1xf32> to vector<4x16xf32>
    %795 = arith.mulf %794, %768 : vector<4x16xf32>
    %796 = arith.addf %787, %795 : vector<4x16xf32>
    %797 = vector.shape_cast %796 : vector<4x16xf32> to vector<4x16x1xf32>
    %798 = vector.broadcast %797 : vector<4x16x1xf32> to vector<4x16x16xf32>
    %799 = arith.mulf %798, %262 : vector<4x16x16xf32>
    %cst_240 = arith.constant dense<0.000000e+00> : vector<4x16xf32>
    %800 = vector.multi_reduction <add>, %799, %cst_240 [1] : vector<4x16x16xf32> to vector<4x16xf32>
    %801 = arith.mulf %787, %787 : vector<4x16xf32>
    %cst_241 = arith.constant dense<0.000000e+00> : vector<4xf32>
    %802 = vector.multi_reduction <add>, %801, %cst_241 [1] : vector<4x16xf32> to vector<4xf32>
    %803 = vector.shape_cast %802 : vector<4xf32> to vector<4x1xf32>
    %804 = arith.mulf %796, %800 : vector<4x16xf32>
    %cst_242 = arith.constant dense<0.000000e+00> : vector<4xf32>
    %805 = vector.multi_reduction <add>, %804, %cst_242 [1] : vector<4x16xf32> to vector<4xf32>
    %806 = vector.shape_cast %805 : vector<4xf32> to vector<4x1xf32>
    %cst_243 = arith.constant 1.000000e-30 : f32
    %807 = vector.broadcast %cst_243 : f32 to vector<4x1xf32>
    %808 = arith.addf %806, %807 : vector<4x1xf32>
    %809 = arith.divf %803, %808 : vector<4x1xf32>
    %810 = vector.broadcast %809 : vector<4x1xf32> to vector<4x16xf32>
    %811 = arith.mulf %810, %796 : vector<4x16xf32>
    %812 = arith.addf %784, %811 : vector<4x16xf32>
    %813 = vector.broadcast %809 : vector<4x1xf32> to vector<4x16xf32>
    %814 = arith.mulf %813, %800 : vector<4x16xf32>
    %815 = arith.subf %787, %814 : vector<4x16xf32>
    %816 = arith.mulf %815, %815 : vector<4x16xf32>
    %cst_244 = arith.constant dense<0.000000e+00> : vector<4xf32>
    %817 = vector.multi_reduction <add>, %816, %cst_244 [1] : vector<4x16xf32> to vector<4xf32>
    %818 = vector.shape_cast %817 : vector<4xf32> to vector<4x1xf32>
    %cst_245 = arith.constant 1.000000e-30 : f32
    %819 = vector.broadcast %cst_245 : f32 to vector<4x1xf32>
    %820 = arith.addf %803, %819 : vector<4x1xf32>
    %821 = arith.divf %818, %820 : vector<4x1xf32>
    %822 = vector.broadcast %821 : vector<4x1xf32> to vector<4x16xf32>
    %823 = arith.mulf %822, %796 : vector<4x16xf32>
    %824 = arith.addf %815, %823 : vector<4x16xf32>
    %825 = vector.shape_cast %824 : vector<4x16xf32> to vector<4x16x1xf32>
    %826 = vector.broadcast %825 : vector<4x16x1xf32> to vector<4x16x16xf32>
    %827 = arith.mulf %826, %262 : vector<4x16x16xf32>
    %cst_246 = arith.constant dense<0.000000e+00> : vector<4x16xf32>
    %828 = vector.multi_reduction <add>, %827, %cst_246 [1] : vector<4x16x16xf32> to vector<4x16xf32>
    %829 = arith.mulf %815, %815 : vector<4x16xf32>
    %cst_247 = arith.constant dense<0.000000e+00> : vector<4xf32>
    %830 = vector.multi_reduction <add>, %829, %cst_247 [1] : vector<4x16xf32> to vector<4xf32>
    %831 = vector.shape_cast %830 : vector<4xf32> to vector<4x1xf32>
    %832 = arith.mulf %824, %828 : vector<4x16xf32>
    %cst_248 = arith.constant dense<0.000000e+00> : vector<4xf32>
    %833 = vector.multi_reduction <add>, %832, %cst_248 [1] : vector<4x16xf32> to vector<4xf32>
    %834 = vector.shape_cast %833 : vector<4xf32> to vector<4x1xf32>
    %cst_249 = arith.constant 1.000000e-30 : f32
    %835 = vector.broadcast %cst_249 : f32 to vector<4x1xf32>
    %836 = arith.addf %834, %835 : vector<4x1xf32>
    %837 = arith.divf %831, %836 : vector<4x1xf32>
    %838 = vector.broadcast %837 : vector<4x1xf32> to vector<4x16xf32>
    %839 = arith.mulf %838, %824 : vector<4x16xf32>
    %840 = arith.addf %812, %839 : vector<4x16xf32>
    %841 = vector.broadcast %837 : vector<4x1xf32> to vector<4x16xf32>
    %842 = arith.mulf %841, %828 : vector<4x16xf32>
    %843 = arith.subf %815, %842 : vector<4x16xf32>
    %844 = arith.mulf %843, %843 : vector<4x16xf32>
    %cst_250 = arith.constant dense<0.000000e+00> : vector<4xf32>
    %845 = vector.multi_reduction <add>, %844, %cst_250 [1] : vector<4x16xf32> to vector<4xf32>
    %846 = vector.shape_cast %845 : vector<4xf32> to vector<4x1xf32>
    %cst_251 = arith.constant 1.000000e-30 : f32
    %847 = vector.broadcast %cst_251 : f32 to vector<4x1xf32>
    %848 = arith.addf %831, %847 : vector<4x1xf32>
    %849 = arith.divf %846, %848 : vector<4x1xf32>
    %850 = vector.broadcast %849 : vector<4x1xf32> to vector<4x16xf32>
    %851 = arith.mulf %850, %824 : vector<4x16xf32>
    %852 = arith.addf %843, %851 : vector<4x16xf32>
    %853 = vector.shape_cast %852 : vector<4x16xf32> to vector<4x16x1xf32>
    %854 = vector.broadcast %853 : vector<4x16x1xf32> to vector<4x16x16xf32>
    %855 = arith.mulf %854, %262 : vector<4x16x16xf32>
    %cst_252 = arith.constant dense<0.000000e+00> : vector<4x16xf32>
    %856 = vector.multi_reduction <add>, %855, %cst_252 [1] : vector<4x16x16xf32> to vector<4x16xf32>
    %857 = arith.mulf %843, %843 : vector<4x16xf32>
    %cst_253 = arith.constant dense<0.000000e+00> : vector<4xf32>
    %858 = vector.multi_reduction <add>, %857, %cst_253 [1] : vector<4x16xf32> to vector<4xf32>
    %859 = vector.shape_cast %858 : vector<4xf32> to vector<4x1xf32>
    %860 = arith.mulf %852, %856 : vector<4x16xf32>
    %cst_254 = arith.constant dense<0.000000e+00> : vector<4xf32>
    %861 = vector.multi_reduction <add>, %860, %cst_254 [1] : vector<4x16xf32> to vector<4xf32>
    %862 = vector.shape_cast %861 : vector<4xf32> to vector<4x1xf32>
    %cst_255 = arith.constant 1.000000e-30 : f32
    %863 = vector.broadcast %cst_255 : f32 to vector<4x1xf32>
    %864 = arith.addf %862, %863 : vector<4x1xf32>
    %865 = arith.divf %859, %864 : vector<4x1xf32>
    %866 = vector.broadcast %865 : vector<4x1xf32> to vector<4x16xf32>
    %867 = arith.mulf %866, %852 : vector<4x16xf32>
    %868 = arith.addf %840, %867 : vector<4x16xf32>
    %869 = vector.broadcast %865 : vector<4x1xf32> to vector<4x16xf32>
    %870 = arith.mulf %869, %856 : vector<4x16xf32>
    %871 = arith.subf %843, %870 : vector<4x16xf32>
    %872 = arith.mulf %871, %871 : vector<4x16xf32>
    %cst_256 = arith.constant dense<0.000000e+00> : vector<4xf32>
    %873 = vector.multi_reduction <add>, %872, %cst_256 [1] : vector<4x16xf32> to vector<4xf32>
    %874 = vector.shape_cast %873 : vector<4xf32> to vector<4x1xf32>
    %cst_257 = arith.constant 1.000000e-30 : f32
    %875 = vector.broadcast %cst_257 : f32 to vector<4x1xf32>
    %876 = arith.addf %859, %875 : vector<4x1xf32>
    %877 = arith.divf %874, %876 : vector<4x1xf32>
    %878 = vector.broadcast %877 : vector<4x1xf32> to vector<4x16xf32>
    %879 = arith.mulf %878, %852 : vector<4x16xf32>
    %880 = arith.addf %871, %879 : vector<4x16xf32>
    %881 = vector.shape_cast %880 : vector<4x16xf32> to vector<4x16x1xf32>
    %882 = vector.broadcast %881 : vector<4x16x1xf32> to vector<4x16x16xf32>
    %883 = arith.mulf %882, %262 : vector<4x16x16xf32>
    %cst_258 = arith.constant dense<0.000000e+00> : vector<4x16xf32>
    %884 = vector.multi_reduction <add>, %883, %cst_258 [1] : vector<4x16x16xf32> to vector<4x16xf32>
    %885 = arith.mulf %871, %871 : vector<4x16xf32>
    %cst_259 = arith.constant dense<0.000000e+00> : vector<4xf32>
    %886 = vector.multi_reduction <add>, %885, %cst_259 [1] : vector<4x16xf32> to vector<4xf32>
    %887 = vector.shape_cast %886 : vector<4xf32> to vector<4x1xf32>
    %888 = arith.mulf %880, %884 : vector<4x16xf32>
    %cst_260 = arith.constant dense<0.000000e+00> : vector<4xf32>
    %889 = vector.multi_reduction <add>, %888, %cst_260 [1] : vector<4x16xf32> to vector<4xf32>
    %890 = vector.shape_cast %889 : vector<4xf32> to vector<4x1xf32>
    %cst_261 = arith.constant 1.000000e-30 : f32
    %891 = vector.broadcast %cst_261 : f32 to vector<4x1xf32>
    %892 = arith.addf %890, %891 : vector<4x1xf32>
    %893 = arith.divf %887, %892 : vector<4x1xf32>
    %894 = vector.broadcast %893 : vector<4x1xf32> to vector<4x16xf32>
    %895 = arith.mulf %894, %880 : vector<4x16xf32>
    %896 = arith.addf %868, %895 : vector<4x16xf32>
    %897 = vector.broadcast %893 : vector<4x1xf32> to vector<4x16xf32>
    %898 = arith.mulf %897, %884 : vector<4x16xf32>
    %899 = arith.subf %871, %898 : vector<4x16xf32>
    %900 = arith.mulf %899, %899 : vector<4x16xf32>
    %cst_262 = arith.constant dense<0.000000e+00> : vector<4xf32>
    %901 = vector.multi_reduction <add>, %900, %cst_262 [1] : vector<4x16xf32> to vector<4xf32>
    %902 = vector.shape_cast %901 : vector<4xf32> to vector<4x1xf32>
    %cst_263 = arith.constant 1.000000e-30 : f32
    %903 = vector.broadcast %cst_263 : f32 to vector<4x1xf32>
    %904 = arith.addf %887, %903 : vector<4x1xf32>
    %905 = arith.divf %902, %904 : vector<4x1xf32>
    %906 = vector.broadcast %905 : vector<4x1xf32> to vector<4x16xf32>
    %907 = arith.mulf %906, %880 : vector<4x16xf32>
    %908 = arith.addf %899, %907 : vector<4x16xf32>
    %909 = vector.shape_cast %908 : vector<4x16xf32> to vector<4x16x1xf32>
    %910 = vector.broadcast %909 : vector<4x16x1xf32> to vector<4x16x16xf32>
    %911 = arith.mulf %910, %262 : vector<4x16x16xf32>
    %cst_264 = arith.constant dense<0.000000e+00> : vector<4x16xf32>
    %912 = vector.multi_reduction <add>, %911, %cst_264 [1] : vector<4x16x16xf32> to vector<4x16xf32>
    %913 = arith.mulf %899, %899 : vector<4x16xf32>
    %cst_265 = arith.constant dense<0.000000e+00> : vector<4xf32>
    %914 = vector.multi_reduction <add>, %913, %cst_265 [1] : vector<4x16xf32> to vector<4xf32>
    %915 = vector.shape_cast %914 : vector<4xf32> to vector<4x1xf32>
    %916 = arith.mulf %908, %912 : vector<4x16xf32>
    %cst_266 = arith.constant dense<0.000000e+00> : vector<4xf32>
    %917 = vector.multi_reduction <add>, %916, %cst_266 [1] : vector<4x16xf32> to vector<4xf32>
    %918 = vector.shape_cast %917 : vector<4xf32> to vector<4x1xf32>
    %cst_267 = arith.constant 1.000000e-30 : f32
    %919 = vector.broadcast %cst_267 : f32 to vector<4x1xf32>
    %920 = arith.addf %918, %919 : vector<4x1xf32>
    %921 = arith.divf %915, %920 : vector<4x1xf32>
    %922 = vector.broadcast %921 : vector<4x1xf32> to vector<4x16xf32>
    %923 = arith.mulf %922, %908 : vector<4x16xf32>
    %924 = arith.addf %896, %923 : vector<4x16xf32>
    %925 = vector.broadcast %921 : vector<4x1xf32> to vector<4x16xf32>
    %926 = arith.mulf %925, %912 : vector<4x16xf32>
    %927 = arith.subf %899, %926 : vector<4x16xf32>
    %928 = arith.mulf %927, %927 : vector<4x16xf32>
    %cst_268 = arith.constant dense<0.000000e+00> : vector<4xf32>
    %929 = vector.multi_reduction <add>, %928, %cst_268 [1] : vector<4x16xf32> to vector<4xf32>
    %930 = vector.shape_cast %929 : vector<4xf32> to vector<4x1xf32>
    %cst_269 = arith.constant 1.000000e-30 : f32
    %931 = vector.broadcast %cst_269 : f32 to vector<4x1xf32>
    %932 = arith.addf %915, %931 : vector<4x1xf32>
    %933 = arith.divf %930, %932 : vector<4x1xf32>
    %934 = vector.broadcast %933 : vector<4x1xf32> to vector<4x16xf32>
    %935 = arith.mulf %934, %908 : vector<4x16xf32>
    %936 = arith.addf %927, %935 : vector<4x16xf32>
    %937 = vector.shape_cast %936 : vector<4x16xf32> to vector<4x16x1xf32>
    %938 = vector.broadcast %937 : vector<4x16x1xf32> to vector<4x16x16xf32>
    %939 = arith.mulf %938, %262 : vector<4x16x16xf32>
    %cst_270 = arith.constant dense<0.000000e+00> : vector<4x16xf32>
    %940 = vector.multi_reduction <add>, %939, %cst_270 [1] : vector<4x16x16xf32> to vector<4x16xf32>
    %941 = arith.mulf %927, %927 : vector<4x16xf32>
    %cst_271 = arith.constant dense<0.000000e+00> : vector<4xf32>
    %942 = vector.multi_reduction <add>, %941, %cst_271 [1] : vector<4x16xf32> to vector<4xf32>
    %943 = vector.shape_cast %942 : vector<4xf32> to vector<4x1xf32>
    %944 = arith.mulf %936, %940 : vector<4x16xf32>
    %cst_272 = arith.constant dense<0.000000e+00> : vector<4xf32>
    %945 = vector.multi_reduction <add>, %944, %cst_272 [1] : vector<4x16xf32> to vector<4xf32>
    %946 = vector.shape_cast %945 : vector<4xf32> to vector<4x1xf32>
    %cst_273 = arith.constant 1.000000e-30 : f32
    %947 = vector.broadcast %cst_273 : f32 to vector<4x1xf32>
    %948 = arith.addf %946, %947 : vector<4x1xf32>
    %949 = arith.divf %943, %948 : vector<4x1xf32>
    %950 = vector.broadcast %949 : vector<4x1xf32> to vector<4x16xf32>
    %951 = arith.mulf %950, %936 : vector<4x16xf32>
    %952 = arith.addf %924, %951 : vector<4x16xf32>
    %953 = vector.broadcast %949 : vector<4x1xf32> to vector<4x16xf32>
    %954 = arith.mulf %953, %940 : vector<4x16xf32>
    %955 = arith.subf %927, %954 : vector<4x16xf32>
    %956 = arith.mulf %955, %955 : vector<4x16xf32>
    %cst_274 = arith.constant dense<0.000000e+00> : vector<4xf32>
    %957 = vector.multi_reduction <add>, %956, %cst_274 [1] : vector<4x16xf32> to vector<4xf32>
    %958 = vector.shape_cast %957 : vector<4xf32> to vector<4x1xf32>
    %cst_275 = arith.constant 1.000000e-30 : f32
    %959 = vector.broadcast %cst_275 : f32 to vector<4x1xf32>
    %960 = arith.addf %943, %959 : vector<4x1xf32>
    %961 = arith.divf %958, %960 : vector<4x1xf32>
    %962 = vector.broadcast %961 : vector<4x1xf32> to vector<4x16xf32>
    %963 = arith.mulf %962, %936 : vector<4x16xf32>
    %964 = arith.addf %955, %963 : vector<4x16xf32>
    %965 = vector.shape_cast %964 : vector<4x16xf32> to vector<4x16x1xf32>
    %966 = vector.broadcast %965 : vector<4x16x1xf32> to vector<4x16x16xf32>
    %967 = arith.mulf %966, %262 : vector<4x16x16xf32>
    %cst_276 = arith.constant dense<0.000000e+00> : vector<4x16xf32>
    %968 = vector.multi_reduction <add>, %967, %cst_276 [1] : vector<4x16x16xf32> to vector<4x16xf32>
    %969 = arith.mulf %955, %955 : vector<4x16xf32>
    %cst_277 = arith.constant dense<0.000000e+00> : vector<4xf32>
    %970 = vector.multi_reduction <add>, %969, %cst_277 [1] : vector<4x16xf32> to vector<4xf32>
    %971 = vector.shape_cast %970 : vector<4xf32> to vector<4x1xf32>
    %972 = arith.mulf %964, %968 : vector<4x16xf32>
    %cst_278 = arith.constant dense<0.000000e+00> : vector<4xf32>
    %973 = vector.multi_reduction <add>, %972, %cst_278 [1] : vector<4x16xf32> to vector<4xf32>
    %974 = vector.shape_cast %973 : vector<4xf32> to vector<4x1xf32>
    %cst_279 = arith.constant 1.000000e-30 : f32
    %975 = vector.broadcast %cst_279 : f32 to vector<4x1xf32>
    %976 = arith.addf %974, %975 : vector<4x1xf32>
    %977 = arith.divf %971, %976 : vector<4x1xf32>
    %978 = vector.broadcast %977 : vector<4x1xf32> to vector<4x16xf32>
    %979 = arith.mulf %978, %964 : vector<4x16xf32>
    %980 = arith.addf %952, %979 : vector<4x16xf32>
    %981 = vector.broadcast %977 : vector<4x1xf32> to vector<4x16xf32>
    %982 = arith.mulf %981, %968 : vector<4x16xf32>
    %983 = arith.subf %955, %982 : vector<4x16xf32>
    %984 = arith.mulf %983, %983 : vector<4x16xf32>
    %cst_280 = arith.constant dense<0.000000e+00> : vector<4xf32>
    %985 = vector.multi_reduction <add>, %984, %cst_280 [1] : vector<4x16xf32> to vector<4xf32>
    %986 = vector.shape_cast %985 : vector<4xf32> to vector<4x1xf32>
    %cst_281 = arith.constant 1.000000e-30 : f32
    %987 = vector.broadcast %cst_281 : f32 to vector<4x1xf32>
    %988 = arith.addf %971, %987 : vector<4x1xf32>
    %989 = arith.divf %986, %988 : vector<4x1xf32>
    %990 = vector.broadcast %989 : vector<4x1xf32> to vector<4x16xf32>
    %991 = arith.mulf %990, %964 : vector<4x16xf32>
    %992 = arith.addf %983, %991 : vector<4x16xf32>
    %993 = vector.shape_cast %992 : vector<4x16xf32> to vector<4x16x1xf32>
    %994 = vector.broadcast %993 : vector<4x16x1xf32> to vector<4x16x16xf32>
    %995 = arith.mulf %994, %262 : vector<4x16x16xf32>
    %cst_282 = arith.constant dense<0.000000e+00> : vector<4x16xf32>
    %996 = vector.multi_reduction <add>, %995, %cst_282 [1] : vector<4x16x16xf32> to vector<4x16xf32>
    %997 = arith.mulf %983, %983 : vector<4x16xf32>
    %cst_283 = arith.constant dense<0.000000e+00> : vector<4xf32>
    %998 = vector.multi_reduction <add>, %997, %cst_283 [1] : vector<4x16xf32> to vector<4xf32>
    %999 = vector.shape_cast %998 : vector<4xf32> to vector<4x1xf32>
    %1000 = arith.mulf %992, %996 : vector<4x16xf32>
    %cst_284 = arith.constant dense<0.000000e+00> : vector<4xf32>
    %1001 = vector.multi_reduction <add>, %1000, %cst_284 [1] : vector<4x16xf32> to vector<4xf32>
    %1002 = vector.shape_cast %1001 : vector<4xf32> to vector<4x1xf32>
    %cst_285 = arith.constant 1.000000e-30 : f32
    %1003 = vector.broadcast %cst_285 : f32 to vector<4x1xf32>
    %1004 = arith.addf %1002, %1003 : vector<4x1xf32>
    %1005 = arith.divf %999, %1004 : vector<4x1xf32>
    %1006 = vector.broadcast %1005 : vector<4x1xf32> to vector<4x16xf32>
    %1007 = arith.mulf %1006, %992 : vector<4x16xf32>
    %1008 = arith.addf %980, %1007 : vector<4x16xf32>
    %1009 = vector.broadcast %1005 : vector<4x1xf32> to vector<4x16xf32>
    %1010 = arith.mulf %1009, %996 : vector<4x16xf32>
    %1011 = arith.subf %983, %1010 : vector<4x16xf32>
    %1012 = arith.mulf %1011, %1011 : vector<4x16xf32>
    %cst_286 = arith.constant dense<0.000000e+00> : vector<4xf32>
    %1013 = vector.multi_reduction <add>, %1012, %cst_286 [1] : vector<4x16xf32> to vector<4xf32>
    %1014 = vector.shape_cast %1013 : vector<4xf32> to vector<4x1xf32>
    %cst_287 = arith.constant 1.000000e-30 : f32
    %1015 = vector.broadcast %cst_287 : f32 to vector<4x1xf32>
    %1016 = arith.addf %999, %1015 : vector<4x1xf32>
    %1017 = arith.divf %1014, %1016 : vector<4x1xf32>
    %1018 = vector.broadcast %1017 : vector<4x1xf32> to vector<4x16xf32>
    %1019 = arith.mulf %1018, %992 : vector<4x16xf32>
    %1020 = arith.addf %1011, %1019 : vector<4x16xf32>
    %1021 = vector.shape_cast %1020 : vector<4x16xf32> to vector<4x16x1xf32>
    %1022 = vector.broadcast %1021 : vector<4x16x1xf32> to vector<4x16x16xf32>
    %1023 = arith.mulf %1022, %262 : vector<4x16x16xf32>
    %cst_288 = arith.constant dense<0.000000e+00> : vector<4x16xf32>
    %1024 = vector.multi_reduction <add>, %1023, %cst_288 [1] : vector<4x16x16xf32> to vector<4x16xf32>
    %1025 = arith.mulf %1011, %1011 : vector<4x16xf32>
    %cst_289 = arith.constant dense<0.000000e+00> : vector<4xf32>
    %1026 = vector.multi_reduction <add>, %1025, %cst_289 [1] : vector<4x16xf32> to vector<4xf32>
    %1027 = vector.shape_cast %1026 : vector<4xf32> to vector<4x1xf32>
    %1028 = arith.mulf %1020, %1024 : vector<4x16xf32>
    %cst_290 = arith.constant dense<0.000000e+00> : vector<4xf32>
    %1029 = vector.multi_reduction <add>, %1028, %cst_290 [1] : vector<4x16xf32> to vector<4xf32>
    %1030 = vector.shape_cast %1029 : vector<4xf32> to vector<4x1xf32>
    %cst_291 = arith.constant 1.000000e-30 : f32
    %1031 = vector.broadcast %cst_291 : f32 to vector<4x1xf32>
    %1032 = arith.addf %1030, %1031 : vector<4x1xf32>
    %1033 = arith.divf %1027, %1032 : vector<4x1xf32>
    %1034 = vector.broadcast %1033 : vector<4x1xf32> to vector<4x16xf32>
    %1035 = arith.mulf %1034, %1020 : vector<4x16xf32>
    %1036 = arith.addf %1008, %1035 : vector<4x16xf32>
    %1037 = vector.broadcast %1033 : vector<4x1xf32> to vector<4x16xf32>
    %1038 = arith.mulf %1037, %1024 : vector<4x16xf32>
    %1039 = arith.subf %1011, %1038 : vector<4x16xf32>
    %1040 = arith.mulf %1039, %1039 : vector<4x16xf32>
    %cst_292 = arith.constant dense<0.000000e+00> : vector<4xf32>
    %1041 = vector.multi_reduction <add>, %1040, %cst_292 [1] : vector<4x16xf32> to vector<4xf32>
    %1042 = vector.shape_cast %1041 : vector<4xf32> to vector<4x1xf32>
    %cst_293 = arith.constant 1.000000e-30 : f32
    %1043 = vector.broadcast %cst_293 : f32 to vector<4x1xf32>
    %1044 = arith.addf %1027, %1043 : vector<4x1xf32>
    %1045 = arith.divf %1042, %1044 : vector<4x1xf32>
    %1046 = vector.broadcast %1045 : vector<4x1xf32> to vector<4x16xf32>
    %1047 = arith.mulf %1046, %1020 : vector<4x16xf32>
    %1048 = arith.addf %1039, %1047 : vector<4x16xf32>
    %1049 = vector.shape_cast %1048 : vector<4x16xf32> to vector<4x16x1xf32>
    %1050 = vector.broadcast %1049 : vector<4x16x1xf32> to vector<4x16x16xf32>
    %1051 = arith.mulf %1050, %262 : vector<4x16x16xf32>
    %cst_294 = arith.constant dense<0.000000e+00> : vector<4x16xf32>
    %1052 = vector.multi_reduction <add>, %1051, %cst_294 [1] : vector<4x16x16xf32> to vector<4x16xf32>
    %1053 = arith.mulf %1039, %1039 : vector<4x16xf32>
    %cst_295 = arith.constant dense<0.000000e+00> : vector<4xf32>
    %1054 = vector.multi_reduction <add>, %1053, %cst_295 [1] : vector<4x16xf32> to vector<4xf32>
    %1055 = vector.shape_cast %1054 : vector<4xf32> to vector<4x1xf32>
    %1056 = arith.mulf %1048, %1052 : vector<4x16xf32>
    %cst_296 = arith.constant dense<0.000000e+00> : vector<4xf32>
    %1057 = vector.multi_reduction <add>, %1056, %cst_296 [1] : vector<4x16xf32> to vector<4xf32>
    %1058 = vector.shape_cast %1057 : vector<4xf32> to vector<4x1xf32>
    %cst_297 = arith.constant 1.000000e-30 : f32
    %1059 = vector.broadcast %cst_297 : f32 to vector<4x1xf32>
    %1060 = arith.addf %1058, %1059 : vector<4x1xf32>
    %1061 = arith.divf %1055, %1060 : vector<4x1xf32>
    %1062 = vector.broadcast %1061 : vector<4x1xf32> to vector<4x16xf32>
    %1063 = arith.mulf %1062, %1048 : vector<4x16xf32>
    %1064 = arith.addf %1036, %1063 : vector<4x16xf32>
    %1065 = vector.broadcast %1061 : vector<4x1xf32> to vector<4x16xf32>
    %1066 = arith.mulf %1065, %1052 : vector<4x16xf32>
    %1067 = arith.subf %1039, %1066 : vector<4x16xf32>
    %1068 = arith.mulf %1067, %1067 : vector<4x16xf32>
    %cst_298 = arith.constant dense<0.000000e+00> : vector<4xf32>
    %1069 = vector.multi_reduction <add>, %1068, %cst_298 [1] : vector<4x16xf32> to vector<4xf32>
    %1070 = vector.shape_cast %1069 : vector<4xf32> to vector<4x1xf32>
    %cst_299 = arith.constant 1.000000e-30 : f32
    %1071 = vector.broadcast %cst_299 : f32 to vector<4x1xf32>
    %1072 = arith.addf %1055, %1071 : vector<4x1xf32>
    %1073 = arith.divf %1070, %1072 : vector<4x1xf32>
    %1074 = vector.broadcast %1073 : vector<4x1xf32> to vector<4x16xf32>
    %1075 = arith.mulf %1074, %1048 : vector<4x16xf32>
    %1076 = arith.addf %1067, %1075 : vector<4x16xf32>
    %1077 = vector.shape_cast %1076 : vector<4x16xf32> to vector<4x16x1xf32>
    %1078 = vector.broadcast %1077 : vector<4x16x1xf32> to vector<4x16x16xf32>
    %1079 = arith.mulf %1078, %262 : vector<4x16x16xf32>
    %cst_300 = arith.constant dense<0.000000e+00> : vector<4x16xf32>
    %1080 = vector.multi_reduction <add>, %1079, %cst_300 [1] : vector<4x16x16xf32> to vector<4x16xf32>
    %1081 = arith.mulf %1067, %1067 : vector<4x16xf32>
    %cst_301 = arith.constant dense<0.000000e+00> : vector<4xf32>
    %1082 = vector.multi_reduction <add>, %1081, %cst_301 [1] : vector<4x16xf32> to vector<4xf32>
    %1083 = vector.shape_cast %1082 : vector<4xf32> to vector<4x1xf32>
    %1084 = arith.mulf %1076, %1080 : vector<4x16xf32>
    %cst_302 = arith.constant dense<0.000000e+00> : vector<4xf32>
    %1085 = vector.multi_reduction <add>, %1084, %cst_302 [1] : vector<4x16xf32> to vector<4xf32>
    %1086 = vector.shape_cast %1085 : vector<4xf32> to vector<4x1xf32>
    %cst_303 = arith.constant 1.000000e-30 : f32
    %1087 = vector.broadcast %cst_303 : f32 to vector<4x1xf32>
    %1088 = arith.addf %1086, %1087 : vector<4x1xf32>
    %1089 = arith.divf %1083, %1088 : vector<4x1xf32>
    %1090 = vector.broadcast %1089 : vector<4x1xf32> to vector<4x16xf32>
    %1091 = arith.mulf %1090, %1076 : vector<4x16xf32>
    %1092 = arith.addf %1064, %1091 : vector<4x16xf32>
    %1093 = vector.broadcast %1089 : vector<4x1xf32> to vector<4x16xf32>
    %1094 = arith.mulf %1093, %1080 : vector<4x16xf32>
    %1095 = arith.subf %1067, %1094 : vector<4x16xf32>
    %1096 = arith.mulf %1095, %1095 : vector<4x16xf32>
    %cst_304 = arith.constant dense<0.000000e+00> : vector<4xf32>
    %1097 = vector.multi_reduction <add>, %1096, %cst_304 [1] : vector<4x16xf32> to vector<4xf32>
    %1098 = vector.shape_cast %1097 : vector<4xf32> to vector<4x1xf32>
    %cst_305 = arith.constant 1.000000e-30 : f32
    %1099 = vector.broadcast %cst_305 : f32 to vector<4x1xf32>
    %1100 = arith.addf %1083, %1099 : vector<4x1xf32>
    %1101 = arith.divf %1098, %1100 : vector<4x1xf32>
    %1102 = vector.broadcast %1101 : vector<4x1xf32> to vector<4x16xf32>
    %1103 = arith.mulf %1102, %1076 : vector<4x16xf32>
    %1104 = arith.addf %1095, %1103 : vector<4x16xf32>
    %1105 = vector.shape_cast %1104 : vector<4x16xf32> to vector<4x16x1xf32>
    %1106 = vector.broadcast %1105 : vector<4x16x1xf32> to vector<4x16x16xf32>
    %1107 = arith.mulf %1106, %262 : vector<4x16x16xf32>
    %cst_306 = arith.constant dense<0.000000e+00> : vector<4x16xf32>
    %1108 = vector.multi_reduction <add>, %1107, %cst_306 [1] : vector<4x16x16xf32> to vector<4x16xf32>
    %1109 = arith.mulf %1095, %1095 : vector<4x16xf32>
    %cst_307 = arith.constant dense<0.000000e+00> : vector<4xf32>
    %1110 = vector.multi_reduction <add>, %1109, %cst_307 [1] : vector<4x16xf32> to vector<4xf32>
    %1111 = vector.shape_cast %1110 : vector<4xf32> to vector<4x1xf32>
    %1112 = arith.mulf %1104, %1108 : vector<4x16xf32>
    %cst_308 = arith.constant dense<0.000000e+00> : vector<4xf32>
    %1113 = vector.multi_reduction <add>, %1112, %cst_308 [1] : vector<4x16xf32> to vector<4xf32>
    %1114 = vector.shape_cast %1113 : vector<4xf32> to vector<4x1xf32>
    %cst_309 = arith.constant 1.000000e-30 : f32
    %1115 = vector.broadcast %cst_309 : f32 to vector<4x1xf32>
    %1116 = arith.addf %1114, %1115 : vector<4x1xf32>
    %1117 = arith.divf %1111, %1116 : vector<4x1xf32>
    %1118 = vector.broadcast %1117 : vector<4x1xf32> to vector<4x16xf32>
    %1119 = arith.mulf %1118, %1104 : vector<4x16xf32>
    %1120 = arith.addf %1092, %1119 : vector<4x16xf32>
    %1121 = vector.broadcast %1117 : vector<4x1xf32> to vector<4x16xf32>
    %1122 = arith.mulf %1121, %1108 : vector<4x16xf32>
    %1123 = arith.subf %1095, %1122 : vector<4x16xf32>
    %1124 = arith.mulf %1123, %1123 : vector<4x16xf32>
    %cst_310 = arith.constant dense<0.000000e+00> : vector<4xf32>
    %1125 = vector.multi_reduction <add>, %1124, %cst_310 [1] : vector<4x16xf32> to vector<4xf32>
    %1126 = vector.shape_cast %1125 : vector<4xf32> to vector<4x1xf32>
    %cst_311 = arith.constant 1.000000e-30 : f32
    %1127 = vector.broadcast %cst_311 : f32 to vector<4x1xf32>
    %1128 = arith.addf %1111, %1127 : vector<4x1xf32>
    %1129 = arith.divf %1126, %1128 : vector<4x1xf32>
    %1130 = vector.broadcast %1129 : vector<4x1xf32> to vector<4x16xf32>
    %1131 = arith.mulf %1130, %1104 : vector<4x16xf32>
    %1132 = arith.addf %1123, %1131 : vector<4x16xf32>
    %1133 = vector.shape_cast %1132 : vector<4x16xf32> to vector<4x16x1xf32>
    %1134 = vector.broadcast %1133 : vector<4x16x1xf32> to vector<4x16x16xf32>
    %1135 = arith.mulf %1134, %262 : vector<4x16x16xf32>
    %cst_312 = arith.constant dense<0.000000e+00> : vector<4x16xf32>
    %1136 = vector.multi_reduction <add>, %1135, %cst_312 [1] : vector<4x16x16xf32> to vector<4x16xf32>
    %1137 = arith.mulf %1123, %1123 : vector<4x16xf32>
    %cst_313 = arith.constant dense<0.000000e+00> : vector<4xf32>
    %1138 = vector.multi_reduction <add>, %1137, %cst_313 [1] : vector<4x16xf32> to vector<4xf32>
    %1139 = vector.shape_cast %1138 : vector<4xf32> to vector<4x1xf32>
    %1140 = arith.mulf %1132, %1136 : vector<4x16xf32>
    %cst_314 = arith.constant dense<0.000000e+00> : vector<4xf32>
    %1141 = vector.multi_reduction <add>, %1140, %cst_314 [1] : vector<4x16xf32> to vector<4xf32>
    %1142 = vector.shape_cast %1141 : vector<4xf32> to vector<4x1xf32>
    %cst_315 = arith.constant 1.000000e-30 : f32
    %1143 = vector.broadcast %cst_315 : f32 to vector<4x1xf32>
    %1144 = arith.addf %1142, %1143 : vector<4x1xf32>
    %1145 = arith.divf %1139, %1144 : vector<4x1xf32>
    %1146 = vector.broadcast %1145 : vector<4x1xf32> to vector<4x16xf32>
    %1147 = arith.mulf %1146, %1132 : vector<4x16xf32>
    %1148 = arith.addf %1120, %1147 : vector<4x16xf32>
    %cst_316 = arith.constant dense<0.000000e+00> : vector<4xf32>
    %1149 = vector.multi_reduction <add>, %1148, %cst_316 [1] : vector<4x16xf32> to vector<4xf32>
    %1150 = vector.shape_cast %1149 : vector<4xf32> to vector<4x1xf32>
    %1151 = tpu.reciprocal %1150 : vector<4x1xf32> -> vector<4x1xf32>
    %1152 = vector.broadcast %1151 : vector<4x1xf32> to vector<4x16xf32>
    %1153 = arith.mulf %1148, %1152 : vector<4x16xf32>
    %c0_317 = arith.constant 0 : index
    %c0_318 = arith.constant 0 : index
    %1154 = vector.load %arg5[%c0_317, %c0_318] : memref<4x16xf32, #tpu.memory_space<vmem>>, vector<4x16xf32>
    tpu.vector_store %arg5[%c0_317, %c0_318], %1153 {strides = array<i32>} : memref<4x16xf32, #tpu.memory_space<vmem>>, vector<4x16xf32>,
    return
  }
}

</mosaic_0001>

<bundles_post_ra>
// kernel: lstm_net_minvar_forward.1
= control target key start
LH: loop header
LB: loop body
LE: loop exit
PB: predicated region body
PF: predicated region fallthrough
CT: control target
= control target key end

     0   :  { %10 = vsyncpa [#allocation8], 0  ;;  %s10005_s0 = inlined_call_operand.vmem [shape: f32[4,32,16], index: 0, kind: input, shape index: {}]   ;;  %s10006_s1 = inlined_call_operand.vmem [shape: f32[2], index: 1, kind: input, shape index: {}]   ;;  %s10007_s2 = inlined_call_operand.vmem [shape: f32[16,64], index: 2, kind: input, shape index: {}]   ;;  %s10008_s3 = inlined_call_operand.vmem [shape: f32[16,64], index: 3, kind: input, shape index: {}]   ;;  %s10009_s4 = inlined_call_operand.vmem [shape: f32[1,64], index: 4, kind: input, shape index: {}]   ;;  %s10010_s5 = inlined_call_operand.hbm [shape: f32[4,16], index: 5, kind: output, shape index: {}]  }
   0x1   :  { %11 = vsyncpa [#allocation7], 0  ;;  %s19_s20 = sshll.u32 %s10006_s1, 4  ;;  %s7514_s21 = smov [#allocation6]   ;;  %s20_s20 = int_to_ptr.vmem [resolvable:$true] %s19_s20 }
   0x2   :  { %22 = dma.vmem_to_smem %s20_s20, 16, %s7514_s21, [#allocation8]  }
   0x3   :  { %7510 = dma.done.wait [#allocation8], 16  }
   0x4   :  { %7511 = vsyncadd [#allocation8], 4294967280 }
   0x5   :  { %33 = sfence }
   0x6   :  { %v34_v0 = vld [vmem:[%s10005_s0] sm:$0xff]  ;;  %vm50_vm0 = vcmask 130048   ;;  %v36_v1 = vld [vmem:[%s10005_s0 + $0x10] sm:$0xff]  ;;  %v35_v4 = vld [vmem:[%s10005_s0 + $0x8] sm:$0xff]  ;;  %v7515_v8 = vmov 16.0   ;;  %v7516_v15 = vmov 32.0  }
   0x7   :  { %v51_v2 = vsel %vm50_vm0, %v34_v0, 0.0  ;;  %v57_v3 = vsel %vm50_vm0, %v36_v1, 0.0  ;;  %v37_v5 = vld [vmem:[%s10005_s0 + $0x18] sm:$0xff]  ;;  %v54_v6 = vsel %vm50_vm0, %v35_v4, 0.0  ;;  %7152 = vrcp.f32 %v7515_v8  ;;  %v402_v55 = vld [vmem:[%s10007_s2 + $0x8] sm:$0xff]  ;;  %v401_v56 = vld [vmem:[%s10007_s2] sm:$0xff] }
   0x8   :  { %52 = vadd.xlane.f32.xlu0 %v51_v2  ;;  %58 = vadd.xlane.f32.xlu1 %v57_v3  ;;  %v60_v7 = vsel %vm50_vm0, %v37_v5, 0.0  ;;  %7154 = vrcp.f32 %v7516_v15  ;;  %v7517_v8 = vmov 0.0   ;;  %s365_s11 = sld [smem:[#allocation6]]  ;;  %s7518_s13 = smov 16   ;;  %vm520_vm6 = vcmask 523264  }
   0x9   :  { %469 = vmatpush.msra.mxu0 %v402_v55  ;;  %6970 = vmatpush.msra.mxu2 %v402_v55  ;;  %537 = vst.msk [vmem:[#allocation3] sm:$0xff] %vm50_vm0, %v7517_v8  ;;  %s6905_s12 = sld [smem:[#allocation6 + $0x1]]  ;;  %s7519_s18 = smov 96  }
   0xa   :  { %6971 = vmatpush.msra.mxu3 %v402_v55  ;;  %538 = vst.msk [vmem:[#allocation3 + $0x8] sm:$0xff] %vm50_vm0, %v7517_v8  ;;  %s7520_s25 = smov 32   ;;  %s7521_s1 = smov 80  }
   0xb   :  { %470 = vmatpush.msra.mxu0 %v401_v56  ;;  %6972 = vmatpush.msra.mxu2 %v401_v56  ;;  %539 = vst.msk [vmem:[#allocation3 + $0x10] sm:$0xff] %vm50_vm0, %v7517_v8  ;;  %s7522_s8 = smov 112  }
   0xc   :  { %6973 = vmatpush.msra.mxu3 %v401_v56  ;;  %540 = vst.msk [vmem:[#allocation3 + $0x18] sm:$0xff] %vm50_vm0, %v7517_v8 }
   0xd   :  { %v7153_v9 = vpop.eup %7152  ;;  %541 = vst.msk [vmem:[#allocation4] sm:$0xff] %vm50_vm0, %v7517_v8 }
   0xe   :  { %v100_v10 = vmul.f32 16.0, %v7153_v9  ;;  %vm104_vm1 = vweird.f32 %v7153_v9  ;;  %v7155_v18 = vpop.eup %7154  ;;  %542 = vst.msk [vmem:[#allocation4 + $0x8] sm:$0xff] %vm50_vm0, %v7517_v8 }
   0xf   :  { %v159_v23 = vmul.f32 32.0, %v7155_v18  ;;  %vm163_vm2 = vweird.f32 %v7155_v18  ;;  %543 = vst.msk [vmem:[#allocation4 + $0x10] sm:$0xff] %vm50_vm0, %v7517_v8 }
  0x10   :  { %55 = vadd.xlane.f32.xlu0 %v54_v6  ;;  %61 = vadd.xlane.f32.xlu1 %v60_v7  ;;  %v101_v11 = vsub.f32 1.0, %v100_v10  ;;  %v546_v6 = vld [vmem:[%s10008_s3 + $0x8] sm:$0xff]  ;;  %544 = vst.msk [vmem:[#allocation4 + $0x18] sm:$0xff] %vm50_vm0, %v7517_v8 }
  0x11   :  { %v160_v28 = vsub.f32 1.0, %v159_v23  ;;  %588 = vmatpush.msra.mxu1 %v546_v6  ;;  %v559_v15 = vld [vmem:[#allocation3 + $0x8] sm:$0xff] }
  0x12   :  { %v102_v12 = vmul.f32 %v7153_v9, %v101_v11  ;;  %v7632_v11 = vld [vmem:[%s10008_s3] sm:$0xff] }
  0x13   :  { %v161_v31 = vmul.f32 %v7155_v18, %v160_v28  ;;  %589 = vmatpush.msra.mxu1 %v7632_v11 }
  0x14   :  { %v103_v16 = vadd.f32 %v7153_v9, %v102_v12  ;;  %v558_v12 = vld [vmem:[#allocation3] sm:$0xff] }
  0x15   :  { %v162_v34 = vadd.f32 %v7155_v18, %v161_v31  ;;  %6922 = vmatmul.msk.f32.vlgmr.msra.gmra.mxu1 %vm50_vm0, %v558_v12  ;;  %v561_v31 = vld [vmem:[#allocation3 + $0x18] sm:$0xff] }
  0x16   :  { %v7574_v17 = vsel %vm104_vm1, %v7153_v9, %v103_v16 }
  0x17   :  { %v7580_v37 = vsel %vm163_vm2, %v7155_v18, %v162_v34 }
  0x1d   :  { %6923 = vmatmul.msk.f32.gmra.mxu1 %vm50_vm0, %v559_v15 }
  0x7b   :  { %v53_v13 = vpop.xlane.xlu0 %52  ;;  %v59_v14 = vpop.xlane.xlu1 %58 }
  0x7c   :  { %v106_v21 = vmul.f32 %v7574_v17, %v53_v13  ;;  %v108_v24 = vmul.f32 %v7574_v17, %v59_v14 }
  0x83   :  { %v56_v19 = vpop.xlane.xlu0 %55  ;;  %v62_v20 = vpop.xlane.xlu1 %61 }
  0x84   :  { %v107_v22 = vmul.f32 %v7574_v17, %v56_v19  ;;  %v109_v26 = vmul.f32 %v7574_v17, %v62_v20 }
  0x86   :  { %v122_v25 = vadd.f32 %v107_v22, %v106_v21  ;;  %v560_v21 = vld [vmem:[#allocation3 + $0x10] sm:$0xff] }
  0x87   :  { %v689_v22 = vld [vmem:[#allocation4 + $0x10] sm:$0xff]  ;;  %6924 = vmatmul.msk.f32.gmra.mxu1 %vm50_vm0, %v560_v21 }
  0x88   :  { %v123_v27 = vadd.f32 %v122_v25, %v108_v24  ;;  %v7641_v24 = vstv %s365_s11 }
  0x8a   :  { %v124_v29 = vadd.f32 %v123_v27, %v109_v26  ;;  %v7646_v26 = vstv %s6905_s12 }
  0x8c   :  { %v125_v30 = vrot.slane %v124_v29, 4 }
  0x8e   :  { %v126_v32 = vadd.f32 %v125_v30, %v124_v29  ;;  %v690_v30 = vld [vmem:[#allocation4 + $0x18] sm:$0xff] }
  0x8f   :  { %6925 = vmatmul.msk.f32.gmra.mxu1 %vm50_vm0, %v561_v31 }
  0x90   :  { %v127_v33 = vrot.slane %v126_v32, 2 }
  0x92   :  { %v128_v35 = vadd.f32 %v127_v33, %v126_v32 }
  0x94   :  { %v129_v36 = vrot.slane %v128_v35, 1 }
  0x96   :  { %v130_v38 = vadd.f32 %v129_v36, %v128_v35 }
  0x98   :  { %v165_v39 = vmul.f32 %v7580_v37, %v130_v38 }
  0x9a   :  { %v7583_v40 = vsub.f32 %v37_v5, %v165_v39  ;;  %v7585_v41 = vsub.f32 %v36_v1, %v165_v39  ;;  %v7587_v42 = vsub.f32 %v34_v0, %v165_v39  ;;  %v7598_v49 = vsub.f32 %v35_v4, %v165_v39 }
  0x9c   :  { %v188_v43 = vmul.f32 %v7583_v40, %v7583_v40  ;;  %v187_v44 = vmul.f32 %v7585_v41, %v7585_v41  ;;  %v185_v45 = vmul.f32 %v7587_v42, %v7587_v42  ;;  %v186_v50 = vmul.f32 %v7598_v49, %v7598_v49 }
  0x9e   :  { %v210_v46 = vsel %vm50_vm0, %v188_v43, 0.0  ;;  %v207_v47 = vsel %vm50_vm0, %v187_v44, 0.0  ;;  %v201_v48 = vsel %vm50_vm0, %v185_v45, 0.0  ;;  %v204_v51 = vsel %vm50_vm0, %v186_v50, 0.0 }
  0x9f   :  { %211 = vadd.xlane.f32.xlu1 %v210_v46  ;;  %208 = vadd.xlane.f32.xlu0 %v207_v47  ;;  %v591_v46 = vpop.f32.mrf.mxu1 }
  0xa0   :  { %202 = vadd.xlane.f32.xlu2 %v201_v48 }
  0xa8   :  { %205 = vadd.xlane.f32.xlu2 %v204_v51  ;;  %v594_v51 = vpop.f32.mrf.mxu1 }
  0xb8   :  { %699 = vrot.lane.b32.xlu1 %v689_v22, %s7518_s13 }
  0xc0   :  { %701 = vrot.lane.b32.xlu1 %v690_v30, %s7518_s13 }
 0x112   :  { %v209_v53 = vpop.xlane.xlu0 %208  ;;  %v212_v59 = vpop.xlane.xlu1 %211 }
 0x113   :  { %v203_v52 = vpop.xlane.xlu2 %202  ;;  %v251_v60 = vmul.f32 %v209_v53, %v7574_v17  ;;  %v252_v62 = vmul.f32 %v212_v59, %v7574_v17 }
 0x114   :  { %v249_v57 = vmul.f32 %v203_v52, %v7574_v17 }
 0x11b   :  { %v206_v54 = vpop.xlane.xlu2 %205 }
 0x11c   :  { %v250_v58 = vmul.f32 %v206_v54, %v7574_v17 }
 0x11e   :  { %v265_v61 = vadd.f32 %v250_v58, %v249_v57  ;;  %v597_v57 = vpop.f32.mrf.mxu1 }
 0x120   :  { %v266_v63 = vadd.f32 %v265_v61, %v251_v60  ;;  %v688_v60 = vld [vmem:[#allocation4 + $0x8] sm:$0xff] }
 0x122   :  { %v267_v0 = vadd.f32 %v266_v63, %v252_v62 }
 0x124   :  { %v268_v1 = vrot.slane %v267_v0, 4 }
 0x126   :  { %v269_v2 = vadd.f32 %v268_v1, %v267_v0  ;;  %v600_v0 = vpop.f32.mrf.mxu1  ;;  %v687_v1 = vld [vmem:[#allocation4] sm:$0xff] }
 0x128   :  { %v270_v3 = vrot.slane %v269_v2, 2 }
 0x12a   :  { %v271_v4 = vadd.f32 %v270_v3, %v269_v2 }
 0x12c   :  { %v272_v5 = vrot.slane %v271_v4, 1 }
 0x12e   :  { %v273_v7 = vadd.f32 %v272_v5, %v271_v4 }
 0x130   :  { %v301_v9 = vmul.f32 %v273_v7, %v7580_v37 }
 0x132   :  { %v305_v10 = vadd.f32 1e-05, %v301_v9 }
 0x134   :  { %7156 = vrsqrt.f32 %v305_v10  ;;  %vm315_vm4 = vweird.f32 %v305_v10 }
 0x13a   :  { %v7157_v13 = vpop.eup %7156 }
 0x13b   :  { %v310_v14 = vmul.f32 %v7157_v13, %v305_v10  ;;  %vm316_vm3 = vweird.f32 %v7157_v13 }
 0x13c   :  { %vm317_vm5 = vmor %vm315_vm4, %vm316_vm3 }
 0x13d   :  { %v311_v16 = vmul.f32 %v7157_v13, %v310_v14 }
 0x13f   :  { %v312_v18 = vmul.f32 0.5, %v311_v16 }
 0x141   :  { %v313_v19 = vsub.f32 1.5, %v312_v18 }
 0x143   :  { %v314_v20 = vmul.f32 %v7157_v13, %v313_v19 }
 0x145   :  { %v318_v23 = vsel %vm317_vm5, %v7157_v13, %v314_v20 }
 0x146   :  { %v349_v25 = vmul.f32 %v318_v23, %v7587_v42  ;;  %v350_v29 = vmul.f32 %v318_v23, %v7598_v49  ;;  %v351_v34 = vmul.f32 %v318_v23, %v7585_v41  ;;  %v352_v38 = vmul.f32 %v318_v23, %v7583_v40  ;;  %v7668_v41 = vld [vmem:[%s10005_s0 + $0x60] sm:$0xff] }
 0x147   :  { %v87_v43 = vsel %vm50_vm0, %v7668_v41, 0.0  ;;  %v7675_v40 = vld [vmem:[%s10009_s4] ss:$0 sm:$0xff] }
 0x148   :  { %v367_v27 = vmul.f32 %v7641_v24, %v349_v25  ;;  %v368_v32 = vmul.f32 %v7641_v24, %v350_v29  ;;  %v369_v35 = vmul.f32 %v7641_v24, %v351_v34  ;;  %v370_v39 = vmul.f32 %v7641_v24, %v352_v38  ;;  %88 = vadd.xlane.f32.xlu1 %v87_v43  ;;  %v7695_v38 = vpop.permute.xlu1 %699 }
 0x14a   :  { %v385_v28 = vadd.f32 %v7646_v26, %v367_v27  ;;  %v386_v33 = vadd.f32 %v7646_v26, %v368_v32  ;;  %v387_v36 = vadd.f32 %v7646_v26, %v369_v35  ;;  %v388_v42 = vadd.f32 %v7646_v26, %v370_v39 }
 0x14c   :  { %6906 = vmatmul.msk.f32.vlgmr.msra.gmra.mxu0 %vm50_vm0, %v385_v28 }
 0x154   :  { %6907 = vmatmul.msk.f32.gmra.mxu0 %vm50_vm0, %v386_v33 }
 0x15c   :  { %6908 = vmatmul.msk.f32.gmra.mxu0 %vm50_vm0, %v387_v36 }
 0x164   :  { %6909 = vmatmul.msk.f32.gmra.mxu0 %vm50_vm0, %v388_v42 }
 0x1c9   :  { %v472_v44 = vpop.f32.mrf.mxu0 }
 0x1ca   :  { %v473_v45 = vadd.f32 %v7675_v40, %v472_v44 }
 0x1cc   :  { %521 = vst.msk [vmem:[#allocation2] sm:$0xff] %vm520_vm6, %v473_v45 }
 0x1d1   :  { %v475_v47 = vpop.f32.mrf.mxu0 }
 0x1d2   :  { %v476_v48 = vadd.f32 %v7675_v40, %v475_v47  ;;  %v7697_v47 = vpop.permute.xlu1 %701 }
 0x1d3   :  { %v554_v49 = vld [vmem:[#allocation2] sm:$0xff] }
 0x1d4   :  { %522 = vst.msk [vmem:[#allocation2 + $0x8] sm:$0xff] %vm520_vm6, %v476_v48  ;;  %v603_v50 = vadd.f32 %v591_v46, %v554_v49 }
 0x1d6   :  { %7158 = vtanh.f32 %v603_v50  ;;  %v6926_v6 = vmul.f32 -1.442695, %v603_v50 }
 0x1d9   :  { %v478_v52 = vpop.f32.mrf.mxu0 }
 0x1da   :  { %v479_v53 = vadd.f32 %v7675_v40, %v478_v52 }
 0x1db   :  { %v555_v54 = vld [vmem:[#allocation2 + $0x8] sm:$0xff] }
 0x1dc   :  { %v7159_v55 = vpop.eup %7158  ;;  %523 = vst.msk [vmem:[#allocation2 + $0x10] sm:$0xff] %vm520_vm6, %v479_v53  ;;  %v604_v56 = vadd.f32 %v594_v51, %v555_v54 }
 0x1dd   :  { %715 = vrot.lane.b32.xlu2 %v7159_v55, %s7519_s18 }
 0x1de   :  { %7160 = vtanh.f32 %v604_v56  ;;  %v6927_v14 = vmul.f32 -1.442695, %v604_v56 }
 0x1e1   :  { %v481_v58 = vpop.f32.mrf.mxu0 }
 0x1e2   :  { %v482_v59 = vadd.f32 %v7675_v40, %v481_v58 }
 0x1e3   :  { %v556_v61 = vld [vmem:[#allocation2 + $0x10] sm:$0xff] }
 0x1e4   :  { %v7161_v62 = vpop.eup %7160  ;;  %524 = vst.msk [vmem:[#allocation2 + $0x18] sm:$0xff] %vm520_vm6, %v482_v59  ;;  %v605_v63 = vadd.f32 %v597_v57, %v556_v61  ;;  %v7701_v59 = vpop.xlane.xlu1 %88 }
 0x1e5   :  { %717 = vrot.lane.b32.xlu0 %v7161_v62, %s7519_s18  ;;  %697 = vrot.lane.b32.xlu2 %v688_v60, %s7518_s13 }
 0x1e6   :  { %7162 = vtanh.f32 %v605_v63  ;;  %v6928_v18 = vmul.f32 -1.442695, %v605_v63 }
 0x1eb   :  { %v557_v2 = vld [vmem:[#allocation2 + $0x18] sm:$0xff] }
 0x1ec   :  { %v7163_v3 = vpop.eup %7162  ;;  %v606_v4 = vadd.f32 %v600_v0, %v557_v2 }
 0x1ed   :  { %719 = vrot.lane.b32.xlu1 %v7163_v3, %s7519_s18  ;;  %695 = vrot.lane.b32.xlu0 %v687_v1, %s7518_s13 }
 0x1ee   :  { %7164 = vtanh.f32 %v606_v4  ;;  %v6929_v20 = vmul.f32 -1.442695, %v606_v4 }
 0x1ef   :  { %7166 = vpow2.f32 %v6926_v6 }
 0x1f4   :  { %v7165_v5 = vpop.eup %7164 }
 0x1f5   :  { %721 = vrot.lane.b32.xlu2 %v7165_v5, %s7519_s18  ;;  %v7167_v7 = vpop.eup %7166 }
 0x1f6   :  { %v619_v9 = vadd.f32 1.0, %v7167_v7 }
 0x1f8   :  { %7168 = vrcp.f32 %v619_v9  ;;  %v634_v19 = vand.u32 2147483648, %v619_v9  ;;  %vm628_vm8 = vweird.f32 %v619_v9  ;;  %v632_v21 = vand.u32 2147483647, %v619_v9 }
 0x1f9   :  { %7170 = vpow2.f32 %v6927_v14 }
 0x1fa   :  { %7172 = vpow2.f32 %v6928_v18  ;;  %v635_v25 = vor.u32 1.1754944e-38, %v634_v19  ;;  %vm633_vm10 = vcmp.eq.f32.partialorder %v632_v21, 8.507059e+37  ;;  %v48_v19 = vld [vmem:[%s10005_s0 + $0x70] sm:$0xff] }
 0x1fb   :  { %7174 = vpow2.f32 %v6929_v20  ;;  %v47_v20 = vld [vmem:[%s10005_s0 + $0x68] sm:$0xff]  ;;  %v93_v21 = vsel %vm50_vm0, %v48_v19, 0.0 }
 0x1fe   :  { %v7169_v10 = vpop.eup %7168 }
 0x1ff   :  { %v624_v12 = vmul.f32 %v7169_v10, %v619_v9  ;;  %vm629_vm7 = vweird.f32 %v7169_v10  ;;  %v7171_v22 = vpop.eup %7170 }
 0x200   :  { %vm630_vm9 = vmor %vm628_vm8, %vm629_vm7  ;;  %v620_v27 = vadd.f32 1.0, %v7171_v22  ;;  %v7173_v31 = vpop.eup %7172  ;;  %v90_v22 = vsel %vm50_vm0, %v47_v20, 0.0 }
 0x201   :  { %v625_v13 = vsub.f32 1.0, %v624_v12  ;;  %v7175_v32 = vpop.eup %7174  ;;  %v621_v33 = vadd.f32 1.0, %v7173_v31 }
 0x202   :  { %7176 = vrcp.f32 %v620_v27  ;;  %v622_v34 = vadd.f32 1.0, %v7175_v32  ;;  %v649_v51 = vand.u32 2147483648, %v620_v27  ;;  %vm643_vm12 = vweird.f32 %v620_v27 }
 0x203   :  { %v626_v15 = vmul.f32 %v7169_v10, %v625_v13  ;;  %7178 = vrcp.f32 %v621_v33  ;;  %v647_v52 = vand.u32 2147483647, %v620_v27  ;;  %vm658_vm2 = vweird.f32 %v621_v33 }
 0x204   :  { %7180 = vrcp.f32 %v622_v34  ;;  %v650_v56 = vor.u32 1.1754944e-38, %v649_v51  ;;  %v664_v0 = vand.u32 2147483648, %v621_v33  ;;  %v679_v1 = vand.u32 2147483648, %v622_v34 }
 0x205   :  { %v627_v16 = vadd.f32 %v7169_v10, %v626_v15  ;;  %vm648_vm14 = vcmp.eq.f32.partialorder %v647_v52, 8.507059e+37  ;;  %v662_v2 = vand.u32 2147483647, %v621_v33  ;;  %vm673_vm4 = vweird.f32 %v622_v34 }
 0x206   :  { %v677_v3 = vand.u32 2147483647, %v622_v34  ;;  %v665_v6 = vor.u32 1.1754944e-38, %v664_v0  ;;  %v680_v7 = vor.u32 1.1754944e-38, %v679_v1 }
 0x207   :  { %v631_v23 = vsel %vm630_vm9, %v7169_v10, %v627_v16  ;;  %vm663_vm7 = vcmp.eq.f32.partialorder %v662_v2, 8.507059e+37  ;;  %v49_v16 = vld [vmem:[%s10005_s0 + $0x78] sm:$0xff]  ;;  %vm815_vm9 = vcmask 523648  }
 0x208   :  { %v7691_v29 = vsel %vm633_vm10, %v635_v25, %v631_v23  ;;  %v7177_v35 = vpop.eup %7176  ;;  %vm678_vm8 = vcmp.eq.f32.partialorder %v677_v3, 8.507059e+37  ;;  %v96_v18 = vsel %vm50_vm0, %v49_v16, 0.0 }
 0x209   :  { %v639_v36 = vmul.f32 %v7177_v35, %v620_v27  ;;  %v7179_v39 = vpop.eup %7178  ;;  %vm644_vm11 = vweird.f32 %v7177_v35 }
 0x20a   :  { %v7181_v43 = vpop.eup %7180  ;;  %v654_v44 = vmul.f32 %v7179_v39, %v621_v33  ;;  %vm645_vm13 = vmor %vm643_vm12, %vm644_vm11  ;;  %vm659_vm15 = vweird.f32 %v7179_v39 }
 0x20b   :  { %v640_v42 = vsub.f32 1.0, %v639_v36  ;;  %v669_v45 = vmul.f32 %v7181_v43, %v622_v34  ;;  %vm674_vm1 = vweird.f32 %v7181_v43  ;;  %vm660_vm3 = vmor %vm658_vm2, %vm659_vm15 }
 0x20c   :  { %v655_v48 = vsub.f32 1.0, %v654_v44  ;;  %vm675_vm5 = vmor %vm673_vm4, %vm674_vm1 }
 0x20d   :  { %v641_v46 = vmul.f32 %v7177_v35, %v640_v42  ;;  %v670_v49 = vsub.f32 1.0, %v669_v45 }
 0x20e   :  { %v656_v53 = vmul.f32 %v7179_v39, %v655_v48 }
 0x20f   :  { %v642_v50 = vadd.f32 %v7177_v35, %v641_v46  ;;  %v671_v54 = vmul.f32 %v7181_v43, %v670_v49 }
 0x210   :  { %v657_v61 = vadd.f32 %v7179_v39, %v656_v53 }
 0x211   :  { %v646_v55 = vsel %vm645_vm13, %v7177_v35, %v642_v50  ;;  %v672_v62 = vadd.f32 %v7181_v43, %v671_v54  ;;  %v118_v50 = vmul.f32 %v7574_v17, %v7701_v59  ;;  %vm882_vm13 = vcmask 261120  }
 0x212   :  { %v7699_v58 = vsel %vm648_vm14, %v650_v56, %v646_v55  ;;  %v661_v4 = vsel %vm660_vm3, %v7179_v39, %v657_v61 }
 0x213   :  { %v676_v5 = vsel %vm675_vm5, %v7181_v43, %v672_v62  ;;  %v7705_v10 = vsel %vm663_vm7, %v665_v6, %v661_v4 }
 0x214   :  { %v7707_v12 = vsel %vm678_vm8, %v680_v7, %v676_v5  ;;  %v709_v43 = vmul.f32 %v7695_v38, %v7705_v10 }
 0x215   :  { %v710_v34 = vmul.f32 %v7697_v47, %v7707_v12 }
 0x217   :  { %97 = vadd.xlane.f32.xlu1 %v96_v18 }
 0x237   :  { %v716_v28 = vpop.permute.xlu2 %715 }
 0x238   :  { %v727_v30 = vmul.f32 %v716_v28, %v7691_v29 }
 0x23a   :  { %735 = vrot.lane.b32.xlu0 %v727_v30, %s7518_s13 }
 0x23f   :  { %v698_v57 = vpop.permute.xlu2 %697 }
 0x240   :  { %v708_v30 = vmul.f32 %v698_v57, %v7699_v58 }
 0x24f   :  { %v722_v9 = vpop.permute.xlu2 %721 }
 0x250   :  { %v730_v14 = vmul.f32 %v722_v9, %v7707_v12 }
 0x257   :  { %v718_v60 = vpop.permute.xlu0 %717 }
 0x258   :  { %v728_v63 = vmul.f32 %v718_v60, %v7699_v58 }
 0x25a   :  { %737 = vrot.lane.b32.xlu2 %v728_v63, %s7518_s13 }
 0x25f   :  { %v720_v13 = vpop.permute.xlu1 %719  ;;  %v696_v23 = vpop.permute.xlu0 %695 }
 0x260   :  { %v729_v15 = vmul.f32 %v720_v13, %v7705_v10  ;;  %v707_v25 = vmul.f32 %v696_v23, %v7691_v29 }
 0x262   :  { %741 = vrot.lane.b32.xlu2 %v730_v14, %s7518_s13  ;;  %739 = vrot.lane.b32.xlu0 %v729_v15, %s7518_s13 }
 0x28a   :  { %v98_v49 = vpop.xlane.xlu1 %97 }
 0x28b   :  { %94 = vadd.xlane.f32.xlu2 %v93_v21  ;;  %v121_v38 = vmul.f32 %v7574_v17, %v98_v49  ;;  %v7806_v49 = vld [vmem:[%s10005_s0 + $0x28] sm:$0xff] }
 0x28c   :  { %91 = vadd.xlane.f32.xlu0 %v90_v22 }
 0x2ac   :  { %v736_v27 = vpop.permute.xlu0 %735 }
 0x2ad   :  { %v7726_v28 = vadd.f32 %v736_v27, %v707_v25 }
 0x2af   :  { %7182 = vtanh.f32 %v7726_v28 }
 0x2b4   :  { %v738_v31 = vpop.permute.xlu2 %737 }
 0x2b5   :  { %v7183_v32 = vpop.eup %7182  ;;  %v7730_v33 = vadd.f32 %v738_v31, %v708_v30 }
 0x2b6   :  { %759 = vrot.lane.b32.xlu0 %v7183_v32, %s7520_s25 }
 0x2b7   :  { %7184 = vtanh.f32 %v7730_v33 }
 0x2bc   :  { %v742_v35 = vpop.permute.xlu2 %741 }
 0x2bd   :  { %v7185_v36 = vpop.eup %7184  ;;  %v7736_v39 = vadd.f32 %v742_v35, %v710_v34 }
 0x2be   :  { %761 = vrot.lane.b32.xlu2 %v7185_v36, %s7520_s25 }
 0x2bf   :  { %7186 = vtanh.f32 %v7736_v39 }
 0x2c5   :  { %v7187_v42 = vpop.eup %7186 }
 0x2c6   :  { %765 = vrot.lane.b32.xlu0 %v7187_v42, %s7520_s25 }
 0x2d4   :  { %v740_v44 = vpop.permute.xlu0 %739 }
 0x2d5   :  { %v7743_v45 = vadd.f32 %v740_v44, %v709_v43 }
 0x2d7   :  { %7188 = vtanh.f32 %v7743_v45 }
 0x2dd   :  { %v7189_v46 = vpop.eup %7188 }
 0x2de   :  { %763 = vrot.lane.b32.xlu1 %v7189_v46, %s7520_s25 }
 0x2fe   :  { %v95_v47 = vpop.xlane.xlu2 %94 }
 0x2ff   :  { %v92_v48 = vpop.xlane.xlu0 %91  ;;  %v120_v52 = vmul.f32 %v7574_v17, %v95_v47 }
 0x300   :  { %v119_v51 = vmul.f32 %v7574_v17, %v92_v48 }
 0x302   :  { %v149_v53 = vadd.f32 %v119_v51, %v118_v50  ;;  %v66_v51 = vsel %vm50_vm0, %v7806_v49, 0.0 }
 0x304   :  { %v150_v54 = vadd.f32 %v149_v53, %v120_v52 }
 0x306   :  { %v151_v55 = vadd.f32 %v150_v54, %v121_v38 }
 0x308   :  { %v152_v56 = vrot.slane %v151_v55, 4 }
 0x30a   :  { %v153_v57 = vadd.f32 %v152_v56, %v151_v55  ;;  %v7815_v56 = vld [vmem:[%s10005_s0 + $0x38] sm:$0xff] }
 0x30c   :  { %v154_v60 = vrot.slane %v153_v57, 2 }
 0x30e   :  { %v155_v61 = vadd.f32 %v154_v60, %v153_v57  ;;  %v7821_v60 = vld [vmem:[%s10005_s0 + $0x20] sm:$0xff] }
 0x310   :  { %v156_v62 = vrot.slane %v155_v61, 1 }
 0x312   :  { %v157_v63 = vadd.f32 %v156_v62, %v155_v61  ;;  %v72_v62 = vsel %vm50_vm0, %v7815_v56, 0.0 }
 0x314   :  { %v168_v0 = vmul.f32 %v7580_v37, %v157_v63 }
 0x316   :  { %v7753_v1 = vsub.f32 %v48_v19, %v168_v0  ;;  %v7756_v59 = vsub.f32 %v7668_v41, %v168_v0  ;;  %v7758_v2 = vsub.f32 %v47_v20, %v168_v0  ;;  %v7769_v13 = vsub.f32 %v49_v16, %v168_v0 }
 0x318   :  { %v199_v3 = vmul.f32 %v7753_v1, %v7753_v1  ;;  %v197_v4 = vmul.f32 %v7756_v59, %v7756_v59  ;;  %v198_v5 = vmul.f32 %v7758_v2, %v7758_v2  ;;  %v200_v41 = vmul.f32 %v7769_v13, %v7769_v13  ;;  %v762_v18 = vpop.permute.xlu2 %761 }
 0x319   :  { %v7778_v20 = vmul.f32 %v762_v18, %v7699_v58 }
 0x31a   :  { %v243_v6 = vsel %vm50_vm0, %v199_v3, 0.0  ;;  %v237_v7 = vsel %vm50_vm0, %v197_v4, 0.0  ;;  %v240_v9 = vsel %vm50_vm0, %v198_v5, 0.0  ;;  %v246_v14 = vsel %vm50_vm0, %v200_v41, 0.0 }
 0x31b   :  { %244 = vadd.xlane.f32.xlu1 %v243_v6  ;;  %238 = vadd.xlane.f32.xlu2 %v237_v7  ;;  %v817_v23 = vsel %vm815_vm9, %v7778_v20, 0.0  ;;  %v63_v3 = vsel %vm50_vm0, %v7821_v60, 0.0  ;;  %v7831_v7 = vld [vmem:[%s10005_s0 + $0x30] sm:$0xff] }
 0x31c   :  { %241 = vadd.xlane.f32.xlu0 %v240_v9  ;;  %v69_v41 = vsel %vm50_vm0, %v7831_v7, 0.0 }
 0x323   :  { %247 = vadd.xlane.f32.xlu2 %v246_v14 }
 0x328   :  { %v760_v15 = vpop.permute.xlu0 %759 }
 0x329   :  { %v7775_v19 = vmul.f32 %v760_v15, %v7691_v29 }
 0x32b   :  { %v816_v21 = vsel %vm815_vm9, %v7775_v19, 0.0 }
 0x32c   :  { %v818_v29 = vadd.f32 %v817_v23, %v816_v21 }
 0x338   :  { %v766_v16 = vpop.permute.xlu0 %765 }
 0x339   :  { %v7785_v25 = vmul.f32 %v766_v16, %v7707_v12 }
 0x33b   :  { %v821_v31 = vsel %vm815_vm9, %v7785_v25, 0.0 }
 0x350   :  { %v764_v22 = vpop.permute.xlu1 %763 }
 0x351   :  { %v7788_v27 = vmul.f32 %v764_v22, %v7705_v10 }
 0x353   :  { %v819_v58 = vsel %vm815_vm9, %v7788_v27, 0.0 }
 0x354   :  { %v820_v30 = vadd.f32 %v819_v58, %v818_v29 }
 0x356   :  { %v822_v32 = vadd.f32 %v821_v31, %v820_v30 }
 0x358   :  { %v823_v34 = vrot.slane %v822_v32, 4 }
 0x35a   :  { %v824_v35 = vadd.f32 %v823_v34, %v822_v32 }
 0x35c   :  { %v825_v36 = vrot.slane %v824_v35, 2 }
 0x35e   :  { %v826_v42 = vadd.f32 %v825_v36, %v824_v35 }
 0x360   :  { %v827_v43 = vrot.slane %v826_v42, 1 }
 0x362   :  { %v828_v44 = vadd.f32 %v827_v43, %v826_v42 }
 0x364   :  { %v829_v12 = vmul.f32 %v828_v44, %v7580_v37 }
 0x366   :  { %v832_v10 = vsub.f32 %v7788_v27, %v829_v12  ;;  %v831_v46 = vsub.f32 %v7778_v20, %v829_v12  ;;  %v830_v47 = vsub.f32 %v7775_v19, %v829_v12  ;;  %v833_v48 = vsub.f32 %v7785_v25, %v829_v12 }
 0x368   :  { %842 = vrot.lane.b32.xlu2 %v832_v10, %s7521_s1  ;;  %840 = vrot.lane.b32.xlu1 %v831_v46, %s7521_s1 }
 0x369   :  { %838 = vrot.lane.b32.xlu0 %v830_v47, %s7521_s1 }
 0x371   :  { %844 = vrot.lane.b32.xlu0 %v833_v48, %s7521_s1 }
 0x38e   :  { %v239_v50 = vpop.xlane.xlu2 %238  ;;  %v245_v54 = vpop.xlane.xlu1 %244 }
 0x38f   :  { %v261_v52 = vmul.f32 %v239_v50, %v7574_v17  ;;  %v242_v53 = vpop.xlane.xlu0 %241  ;;  %v263_v57 = vmul.f32 %v245_v54, %v7574_v17 }
 0x390   :  { %v262_v38 = vmul.f32 %v242_v53, %v7574_v17 }
 0x391   :  { %67 = vadd.xlane.f32.xlu2 %v66_v51 }
 0x392   :  { %v292_v55 = vadd.f32 %v262_v38, %v261_v52 }
 0x394   :  { %v293_v0 = vadd.f32 %v292_v55, %v263_v57 }
 0x396   :  { %v248_v61 = vpop.xlane.xlu2 %247 }
 0x397   :  { %v264_v63 = vmul.f32 %v248_v61, %v7574_v17 }
 0x399   :  { %v294_v4 = vadd.f32 %v293_v0, %v264_v63  ;;  %73 = vadd.xlane.f32.xlu2 %v72_v62 }
 0x39b   :  { %v295_v5 = vrot.slane %v294_v4, 4  ;;  %64 = vadd.xlane.f32.xlu0 %v63_v3 }
 0x39d   :  { %v296_v6 = vadd.f32 %v295_v5, %v294_v4 }
 0x39f   :  { %v297_v9 = vrot.slane %v296_v6, 2 }
 0x3a1   :  { %v298_v14 = vadd.f32 %v297_v9, %v296_v6 }
 0x3a3   :  { %v299_v15 = vrot.slane %v298_v14, 1  ;;  %70 = vadd.xlane.f32.xlu0 %v69_v41 }
 0x3a5   :  { %v300_v18 = vadd.f32 %v299_v15, %v298_v14 }
 0x3a7   :  { %v304_v16 = vmul.f32 %v300_v18, %v7580_v37 }
 0x3a9   :  { %v308_v21 = vadd.f32 1e-05, %v304_v16 }
 0x3ab   :  { %7190 = vrsqrt.f32 %v308_v21  ;;  %vm345_vm11 = vweird.f32 %v308_v21 }
 0x3b1   :  { %v7191_v22 = vpop.eup %7190 }
 0x3b2   :  { %v340_v23 = vmul.f32 %v7191_v22, %v308_v21  ;;  %vm346_vm10 = vweird.f32 %v7191_v22 }
 0x3b3   :  { %vm347_vm12 = vmor %vm345_vm11, %vm346_vm10 }
 0x3b4   :  { %v341_v29 = vmul.f32 %v7191_v22, %v340_v23 }
 0x3b6   :  { %v342_v58 = vmul.f32 0.5, %v341_v29 }
 0x3b8   :  { %v343_v30 = vsub.f32 1.5, %v342_v58 }
 0x3ba   :  { %v344_v31 = vmul.f32 %v7191_v22, %v343_v30 }
 0x3bc   :  { %v348_v32 = vsel %vm347_vm12, %v7191_v22, %v344_v31 }
 0x3bd   :  { %v361_v34 = vmul.f32 %v348_v32, %v7756_v59  ;;  %v363_v35 = vmul.f32 %v348_v32, %v7753_v1  ;;  %v362_v12 = vmul.f32 %v348_v32, %v7758_v2  ;;  %v364_v10 = vmul.f32 %v348_v32, %v7769_v13 }
 0x3bf   :  { %v379_v36 = vmul.f32 %v7641_v24, %v361_v34  ;;  %v381_v42 = vmul.f32 %v7641_v24, %v363_v35  ;;  %v380_v59 = vmul.f32 %v7641_v24, %v362_v12  ;;  %v382_v1 = vmul.f32 %v7641_v24, %v364_v10 }
 0x3c1   :  { %v397_v43 = vadd.f32 %v7646_v26, %v379_v36  ;;  %v399_v44 = vadd.f32 %v7646_v26, %v381_v42  ;;  %v398_v46 = vadd.f32 %v7646_v26, %v380_v59  ;;  %v400_v47 = vadd.f32 %v7646_v26, %v382_v1 }
 0x3c2   :  { %v843_v50 = vpop.permute.xlu2 %842 }
 0x3c3   :  { %6918 = vmatmul.msk.f32.vlgmr.msra.gmra.mxu2 %vm50_vm0, %v397_v43  ;;  %6920 = vmatmul.msk.f32.vlgmr.msra.gmra.mxu3 %vm50_vm0, %v399_v44 }
 0x3cb   :  { %6919 = vmatmul.msk.f32.gmra.mxu2 %vm50_vm0, %v398_v46  ;;  %6921 = vmatmul.msk.f32.gmra.mxu3 %vm50_vm0, %v400_v47 }
 0x3da   :  { %v841_v2 = vpop.permute.xlu1 %840 }
 0x3db   :  { %v839_v48 = vpop.permute.xlu0 %838 }
 0x3dc   :  { %850 = vxpose.xlu1.b32.start [1/4] (short) (narrow) %v839_v48, 16 }
 0x3e3   :  { %v845_v13 = vpop.permute.xlu0 %844 }
 0x3e4   :  { %851 = vxpose.xlu1.b32.cont [2/4] (short) (narrow) %v841_v2, 16  ;;  %901 = vmatpush.msrb.mxu2 %v845_v13 }
 0x3e6   :  { %902 = vmatpush.msrb.mxu2 %v843_v50 }
 0x3e8   :  { %903 = vmatpush.msrb.mxu2 %v841_v2 }
 0x3ea   :  { %904 = vmatpush.msrb.mxu2 %v839_v48 }
 0x3ec   :  { %852 = vxpose.xlu1.b32.cont [3/4] (short) (narrow) %v843_v50, 16 }
 0x3f4   :  { %853 = vxpose.xlu1.b32.end [4/4] (short) (narrow) %v845_v13, 16 }
 0x404   :  { %v68_v51 = vpop.xlane.xlu2 %67 }
 0x405   :  { %v111_v38 = vmul.f32 %v7574_v17, %v68_v51 }
 0x40c   :  { %v74_v54 = vpop.xlane.xlu2 %73 }
 0x40d   :  { %v113_v62 = vmul.f32 %v7574_v17, %v74_v54 }
 0x40e   :  { %v65_v52 = vpop.xlane.xlu0 %64 }
 0x40f   :  { %v110_v53 = vmul.f32 %v7574_v17, %v65_v52 }
 0x411   :  { %v131_v55 = vadd.f32 %v111_v38, %v110_v53 }
 0x416   :  { %v71_v57 = vpop.xlane.xlu0 %70 }
 0x417   :  { %v112_v61 = vmul.f32 %v7574_v17, %v71_v57 }
 0x419   :  { %v132_v63 = vadd.f32 %v131_v55, %v112_v61 }
 0x41b   :  { %v133_v0 = vadd.f32 %v132_v63, %v113_v62 }
 0x41d   :  { %v134_v3 = vrot.slane %v133_v0, 4 }
 0x41f   :  { %v135_v4 = vadd.f32 %v134_v3, %v133_v0 }
 0x421   :  { %v136_v5 = vrot.slane %v135_v4, 2 }
 0x423   :  { %v137_v6 = vadd.f32 %v136_v5, %v135_v4 }
 0x425   :  { %v138_v9 = vrot.slane %v137_v6, 1 }
 0x427   :  { %v139_v41 = vadd.f32 %v138_v9, %v137_v6 }
 0x429   :  { %v166_v14 = vmul.f32 %v7580_v37, %v139_v41 }
 0x42b   :  { %v7858_v15 = vsub.f32 %v7806_v49, %v166_v14  ;;  %v7861_v18 = vsub.f32 %v7821_v60, %v166_v14  ;;  %v7868_v22 = vsub.f32 %v7815_v56, %v166_v14  ;;  %v7871_v23 = vsub.f32 %v7831_v7, %v166_v14 }
 0x42d   :  { %v190_v16 = vmul.f32 %v7858_v15, %v7858_v15  ;;  %v189_v21 = vmul.f32 %v7861_v18, %v7861_v18  ;;  %v192_v60 = vmul.f32 %v7868_v22, %v7868_v22  ;;  %v191_v58 = vmul.f32 %v7871_v23, %v7871_v23 }
 0x42f   :  { %v216_v29 = vsel %vm50_vm0, %v190_v16, 0.0  ;;  %v213_v49 = vsel %vm50_vm0, %v189_v21, 0.0  ;;  %v222_v30 = vsel %vm50_vm0, %v192_v60, 0.0  ;;  %v219_v56 = vsel %vm50_vm0, %v191_v58, 0.0 }
 0x430   :  { %217 = vadd.xlane.f32.xlu2 %v216_v29  ;;  %214 = vadd.xlane.f32.xlu0 %v213_v49 }
 0x438   :  { %223 = vadd.xlane.f32.xlu2 %v222_v30  ;;  %220 = vadd.xlane.f32.xlu0 %v219_v56 }
 0x446   :  { %v508_v7 = vpop.f32.mrf.mxu2  ;;  %v514_v31 = vpop.f32.mrf.mxu3 }
 0x447   :  { %v509_v32 = vadd.f32 %v7675_v40, %v508_v7  ;;  %v515_v34 = vadd.f32 %v7675_v40, %v514_v31  ;;  %v547_v31 = vlaneseq }
 0x449   :  { %533 = vst.msk [vmem:[#allocation2 + $0x60] sm:$0xff] %vm520_vm6, %v509_v32  ;;  %v7933_v32 = vshrl.u32 %v547_v31, 7 }
 0x44a   :  { %535 = vst.msk [vmem:[#allocation2 + $0x70] sm:$0xff] %vm520_vm6, %v515_v34 }
 0x44b   :  { %6985 = vset.pattern.permute.xlu0 %v7933_v32 }
 0x44c   :  { %799 = vrot.lane.b32.xlu0 %v7775_v19, %s7521_s1 }
 0x44e   :  { %803 = vrot.lane.b32.xlu1 %v7788_v27, %s7521_s1  ;;  %v511_v35 = vpop.f32.mrf.mxu2  ;;  %v517_v36 = vpop.f32.mrf.mxu3 }
 0x44f   :  { %v512_v42 = vadd.f32 %v7675_v40, %v511_v35  ;;  %v518_v43 = vadd.f32 %v7675_v40, %v517_v36  ;;  %v7523_v36 = vmov 31.0  }
 0x450   :  { %801 = vrot.lane.b32.xlu2 %v7778_v20, %s7521_s1 }
 0x451   :  { %534 = vst.msk [vmem:[#allocation2 + $0x68] sm:$0xff] %vm520_vm6, %v512_v42 }
 0x452   :  { %536 = vst.msk [vmem:[#allocation2 + $0x78] sm:$0xff] %vm520_vm6, %v518_v43 }
 0x454   :  { %805 = vrot.lane.b32.xlu0 %v7785_v25, %s7521_s1 }
 0x458   :  { %779 = vrot.lane.b32.xlu2 %v7726_v28, %s7522_s8 }
 0x45c   :  { %781 = vrot.lane.b32.xlu0 %v7730_v33, %s7522_s8 }
 0x460   :  { %783 = vrot.lane.b32.xlu2 %v7743_v45, %s7522_s8 }
 0x464   :  { %785 = vrot.lane.b32.xlu0 %v7736_v39, %s7522_s8 }
 0x480   :  { %v866_v19 = vpop.trf.xlu1 }
 0x481   :  { %6930 = vmatmul.msk.f32.vlgmr.msrb.gmra.mxu2 %vm882_vm13, %v866_v19 }
 0x488   :  { %v867_v20 = vpop.trf.xlu1 }
 0x489   :  { %6931 = vmatmul.msk.f32.gmra.mxu2 %vm882_vm13, %v867_v20 }
 0x4a3   :  { %v218_v25 = vpop.xlane.xlu2 %217  ;;  %v215_v27 = vpop.xlane.xlu0 %214 }
 0x4a4   :  { %v254_v28 = vmul.f32 %v218_v25, %v7574_v17  ;;  %v253_v44 = vmul.f32 %v215_v27, %v7574_v17 }
 0x4a6   :  { %v274_v33 = vadd.f32 %v254_v28, %v253_v44  ;;  %v7945_v28 = vadd.s32 8, %v7933_v32 }
 0x4ab   :  { %v224_v12 = vpop.xlane.xlu2 %223  ;;  %v221_v10 = vpop.xlane.xlu0 %220 }
 0x4ac   :  { %v256_v45 = vmul.f32 %v224_v12, %v7574_v17  ;;  %v255_v39 = vmul.f32 %v221_v10, %v7574_v17  ;;  %v7948_v12 = vand.u32 127, %v547_v31 }
 0x4ae   :  { %v275_v59 = vadd.f32 %v274_v33, %v255_v39  ;;  %vm553_vm3 = vcmp.eq.s32.totalorder %v7945_v28, %v7948_v12  ;;  %vm552_vm4 = vcmp.eq.s32.totalorder %v7933_v32, %v7948_v12 }
 0x4b0   :  { %v276_v1 = vadd.f32 %v275_v59, %v256_v45 }
 0x4b2   :  { %v277_v46 = vrot.slane %v276_v1, 4 }
 0x4b3   :  { %v802_v47 = vpop.permute.xlu2 %801 }
 0x4b4   :  { %v278_v48 = vadd.f32 %v277_v46, %v276_v1  ;;  %812 = vst.msk [vmem:[#allocation3 + $0x8] sm:$0xff] %vm50_vm0, %v802_v47  ;;  %v7965_v46 = vld [vmem:[%s10008_s3 + $0x8] sm:$0xff] }
 0x4b6   :  { %v279_v2 = vrot.slane %v278_v48, 2 }
 0x4b8   :  { %v280_v13 = vadd.f32 %v279_v2, %v278_v48 }
 0x4ba   :  { %v281_v50 = vrot.slane %v280_v13, 1 }
 0x4bb   :  { %v780_v51 = vpop.permute.xlu2 %779  ;;  %v962_v48 = vld [vmem:[#allocation3 + $0x8] sm:$0xff] }
 0x4bc   :  { %v282_v52 = vadd.f32 %v281_v50, %v280_v13  ;;  %791 = vst.msk [vmem:[#allocation4] sm:$0xff] %vm50_vm0, %v780_v51 }
 0x4be   :  { %v302_v53 = vmul.f32 %v282_v52, %v7580_v37  ;;  %v800_v38 = vpop.permute.xlu0 %799 }
 0x4bf   :  { %811 = vst.msk [vmem:[#allocation3] sm:$0xff] %vm50_vm0, %v800_v38 }
 0x4c0   :  { %v306_v54 = vadd.f32 1e-05, %v302_v53  ;;  %v804_v55 = vpop.permute.xlu1 %803 }
 0x4c1   :  { %813 = vst.msk [vmem:[#allocation3 + $0x10] sm:$0xff] %vm50_vm0, %v804_v55 }
 0x4c2   :  { %7192 = vrsqrt.f32 %v306_v54  ;;  %vm325_vm14 = vweird.f32 %v306_v54 }
 0x4c3   :  { %v784_v57 = vpop.permute.xlu2 %783  ;;  %v1090_v61 = vld [vmem:[#allocation4] sm:$0xff]  ;;  %7194 = vrcp.f32 %v7523_v36 }
 0x4c4   :  { %793 = vst.msk [vmem:[#allocation4 + $0x10] sm:$0xff] %vm50_vm0, %v784_v57  ;;  %1098 = vrot.lane.b32.xlu2 %v1090_v61, %s7518_s13 }
 0x4c6   :  { %v806_v62 = vpop.permute.xlu0 %805  ;;  %v961_v47 = vld [vmem:[#allocation3] sm:$0xff] }
 0x4c7   :  { %814 = vst.msk [vmem:[#allocation3 + $0x18] sm:$0xff] %vm50_vm0, %v806_v62 }
 0x4c8   :  { %v7193_v63 = vpop.eup %7192  ;;  %v963_v2 = vld [vmem:[#allocation3 + $0x10] sm:$0xff] }
 0x4c9   :  { %v320_v0 = vmul.f32 %v7193_v63, %v306_v54  ;;  %vm326_vm15 = vweird.f32 %v7193_v63  ;;  %v7195_v42 = vpop.eup %7194 }
 0x4ca   :  { %vm327_vm1 = vmor %vm325_vm14, %vm326_vm15  ;;  %v913_v43 = vmul.f32 31.0, %v7195_v42  ;;  %vm917_vm2 = vweird.f32 %v7195_v42 }
 0x4cb   :  { %v1092_v3 = vld [vmem:[#allocation4 + $0x10] sm:$0xff]  ;;  %v321_v4 = vmul.f32 %v7193_v63, %v320_v0 }
 0x4cc   :  { %1102 = vrot.lane.b32.xlu2 %v1092_v3, %s7518_s13  ;;  %v914_v19 = vsub.f32 1.0, %v913_v43 }
 0x4cd   :  { %v322_v5 = vmul.f32 0.5, %v321_v4 }
 0x4ce   :  { %v782_v6 = vpop.permute.xlu0 %781  ;;  %v915_v20 = vmul.f32 %v7195_v42, %v914_v19  ;;  %v964_v13 = vld [vmem:[#allocation3 + $0x18] sm:$0xff] }
 0x4cf   :  { %792 = vst.msk [vmem:[#allocation4 + $0x8] sm:$0xff] %vm50_vm0, %v782_v6  ;;  %v323_v9 = vsub.f32 1.5, %v322_v5 }
 0x4d0   :  { %v916_v27 = vadd.f32 %v7195_v42, %v915_v20 }
 0x4d1   :  { %v324_v41 = vmul.f32 %v7193_v63, %v323_v9 }
 0x4d3   :  { %v328_v14 = vsel %vm327_vm1, %v7193_v63, %v324_v41 }
 0x4d4   :  { %v353_v16 = vmul.f32 %v328_v14, %v7861_v18  ;;  %v354_v58 = vmul.f32 %v328_v14, %v7858_v15  ;;  %v355_v18 = vmul.f32 %v328_v14, %v7871_v23  ;;  %v356_v35 = vmul.f32 %v328_v14, %v7868_v22 }
 0x4d5   :  { %v7942_v22 = vsel %vm917_vm2, %v7195_v42, %v916_v27 }
 0x4d6   :  { %v786_v21 = vpop.permute.xlu0 %785  ;;  %v1091_v29 = vld [vmem:[#allocation4 + $0x8] sm:$0xff]  ;;  %v371_v49 = vmul.f32 %v7641_v24, %v353_v16  ;;  %v372_v30 = vmul.f32 %v7641_v24, %v354_v58  ;;  %v373_v7 = vmul.f32 %v7641_v24, %v355_v18  ;;  %v374_v15 = vmul.f32 %v7641_v24, %v356_v35 }
 0x4d7   :  { %794 = vst.msk [vmem:[#allocation4 + $0x18] sm:$0xff] %vm50_vm0, %v786_v21  ;;  %1100 = vrot.lane.b32.xlu0 %v1091_v29, %s7518_s13 }
 0x4d8   :  { %v389_v60 = vadd.f32 %v7646_v26, %v371_v49  ;;  %v390_v56 = vadd.f32 %v7646_v26, %v372_v30  ;;  %v391_v34 = vadd.f32 %v7646_v26, %v373_v7  ;;  %v392_v23 = vadd.f32 %v7646_v26, %v374_v15  ;;  %v7992_v7 = vld [vmem:[%s10005_s0 + $0x40] sm:$0xff] }
 0x4d9   :  { %v75_v31 = vsel %vm50_vm0, %v7992_v7, 0.0 }
 0x4da   :  { %6910 = vmatmul.msk.f32.gmra.mxu0 %vm50_vm0, %v389_v60 }
 0x4de   :  { %v1093_v58 = vld [vmem:[#allocation4 + $0x18] sm:$0xff] }
 0x4e2   :  { %6911 = vmatmul.msk.f32.gmra.mxu0 %vm50_vm0, %v390_v56 }
 0x4ea   :  { %6912 = vmatmul.msk.f32.gmra.mxu0 %vm50_vm0, %v391_v34 }
 0x4f2   :  { %6913 = vmatmul.msk.f32.gmra.mxu0 %vm50_vm0, %v392_v23 }
 0x504   :  { %v906_v25 = vpop.f32.mrf.mxu2 }
 0x505   :  { %v919_v44 = vmul.f32 %v7942_v22, %v906_v25 }
 0x507   :  { %v921_v45 = vmul.f32 0.5, %v919_v44 }
 0x509   :  { %v923_v1 = vsel %vm552_vm4, %v919_v44, %v921_v45 }
 0x50c   :  { %v909_v33 = vpop.f32.mrf.mxu2 }
 0x50d   :  { %v920_v10 = vmul.f32 %v7942_v22, %v909_v33 }
 0x50f   :  { %v922_v39 = vmul.f32 0.5, %v920_v10 }
 0x511   :  { %v924_v59 = vsel %vm553_vm3, %v920_v10, %v922_v39 }
 0x512   :  { %945 = vmatpush.msrb.mxu3 %v924_v59 }
 0x514   :  { %946 = vmatpush.msrb.mxu3 %v923_v1 }
 0x515   :  { %6932 = vmatmul.msk.f32.vlgmr.msrb.gmra.mxu3 %vm50_vm0, %v923_v1 }
 0x516   :  { %991 = vmatpush.msra.mxu3 %v7965_v46 }
 0x518   :  { %992 = vmatpush.msra.mxu3 %v7632_v11 }
 0x51d   :  { %6933 = vmatmul.msk.f32.gmra.mxu3 %vm50_vm0, %v924_v59 }
 0x51e   :  { %v7996_v15 = vpop.permute.xlu2 %1098 }
 0x525   :  { %6934 = vmatmul.msk.f32.vlgmr.msra.gmra.mxu3 %vm50_vm0, %v961_v47 }
 0x526   :  { %v7998_v43 = vpop.permute.xlu2 %1102 }
 0x52d   :  { %6935 = vmatmul.msk.f32.gmra.mxu3 %vm50_vm0, %v962_v48 }
 0x535   :  { %6936 = vmatmul.msk.f32.gmra.mxu3 %vm50_vm0, %v963_v2 }
 0x53d   :  { %6937 = vmatmul.msk.f32.gmra.mxu3 %vm50_vm0, %v964_v13 }
 0x557   :  { %v484_v50 = vpop.f32.mrf.mxu0 }
 0x558   :  { %v485_v51 = vadd.f32 %v7675_v40, %v484_v50 }
 0x55a   :  { %525 = vst.msk [vmem:[#allocation2 + $0x20] sm:$0xff] %vm520_vm6, %v485_v51 }
 0x55f   :  { %v487_v11 = vpop.f32.mrf.mxu0 }
 0x560   :  { %v488_v52 = vadd.f32 %v7675_v40, %v487_v11 }
 0x561   :  { %v957_v62 = vld [vmem:[#allocation2 + $0x20] sm:$0xff] }
 0x562   :  { %526 = vst.msk [vmem:[#allocation2 + $0x28] sm:$0xff] %vm520_vm6, %v488_v52 }
 0x567   :  { %v490_v53 = vpop.f32.mrf.mxu0 }
 0x568   :  { %v491_v38 = vadd.f32 %v7675_v40, %v490_v53 }
 0x569   :  { %v958_v3 = vld [vmem:[#allocation2 + $0x28] sm:$0xff] }
 0x56a   :  { %527 = vst.msk [vmem:[#allocation2 + $0x30] sm:$0xff] %vm520_vm6, %v491_v38 }
 0x56f   :  { %v493_v54 = vpop.f32.mrf.mxu0 }
 0x570   :  { %v494_v55 = vadd.f32 %v7675_v40, %v493_v54 }
 0x571   :  { %v959_v40 = vld [vmem:[#allocation2 + $0x30] sm:$0xff] }
 0x572   :  { %528 = vst.msk [vmem:[#allocation2 + $0x38] sm:$0xff] %vm520_vm6, %v494_v55  ;;  %v1101_v55 = vpop.permute.xlu0 %1100 }
 0x579   :  { %v960_v16 = vld [vmem:[#allocation2 + $0x38] sm:$0xff] }
 0x598   :  { %v948_v57 = vpop.f32.mrf.mxu3 }
 0x599   :  { %954 = vst.msk [vmem:[#allocation5] sm:$0xff] %vm50_vm0, %v948_v57 }
 0x5a0   :  { %v951_v61 = vpop.f32.mrf.mxu3  ;;  %v8331_v12 = vld [vmem:[#allocation5] sm:$0xff] }
 0x5a1   :  { %955 = vst.msk [vmem:[#allocation5 + $0x8] sm:$0xff] %vm50_vm0, %v951_v61 }
 0x5a8   :  { %v994_v63 = vpop.f32.mrf.mxu3 }
 0x5a9   :  { %v1006_v0 = vadd.f32 %v994_v63, %v957_v62 }
 0x5ab   :  { %7196 = vtanh.f32 %v1006_v0  ;;  %v6938_v30 = vmul.f32 -1.442695, %v1006_v0 }
 0x5b0   :  { %v997_v4 = vpop.f32.mrf.mxu3 }
 0x5b1   :  { %v7197_v5 = vpop.eup %7196  ;;  %v1007_v6 = vadd.f32 %v997_v4, %v958_v3 }
 0x5b2   :  { %1118 = vrot.lane.b32.xlu2 %v7197_v5, %s7519_s18 }
 0x5b3   :  { %7198 = vtanh.f32 %v1007_v6  ;;  %v6939_v23 = vmul.f32 -1.442695, %v1007_v6 }
 0x5b8   :  { %v1000_v9 = vpop.f32.mrf.mxu3 }
 0x5b9   :  { %v7199_v41 = vpop.eup %7198  ;;  %v1008_v14 = vadd.f32 %v1000_v9, %v959_v40 }
 0x5ba   :  { %1120 = vrot.lane.b32.xlu0 %v7199_v41, %s7519_s18 }
 0x5bb   :  { %7200 = vtanh.f32 %v1008_v14  ;;  %v6940_v25 = vmul.f32 -1.442695, %v1008_v14 }
 0x5c0   :  { %v1003_v21 = vpop.f32.mrf.mxu3 }
 0x5c1   :  { %v7201_v29 = vpop.eup %7200  ;;  %v1009_v49 = vadd.f32 %v1003_v21, %v960_v16 }
 0x5c2   :  { %1122 = vrot.lane.b32.xlu2 %v7201_v29, %s7519_s18 }
 0x5c3   :  { %7202 = vtanh.f32 %v1009_v49  ;;  %v6941_v47 = vmul.f32 -1.442695, %v1009_v49 }
 0x5c4   :  { %7204 = vpow2.f32 %v6938_v30 }
 0x5c9   :  { %v7203_v60 = vpop.eup %7202 }
 0x5ca   :  { %1124 = vrot.lane.b32.xlu0 %v7203_v60, %s7519_s18  ;;  %v7205_v56 = vpop.eup %7204 }
 0x5cb   :  { %v1022_v18 = vadd.f32 1.0, %v7205_v56 }
 0x5cd   :  { %7206 = vrcp.f32 %v1022_v18  ;;  %v1037_v20 = vand.u32 2147483648, %v1022_v18  ;;  %vm1031_vm7 = vweird.f32 %v1022_v18  ;;  %v1035_v27 = vand.u32 2147483647, %v1022_v18 }
 0x5ce   :  { %7208 = vpow2.f32 %v6939_v23 }
 0x5cf   :  { %v1038_v10 = vor.u32 1.1754944e-38, %v1037_v20  ;;  %7210 = vpow2.f32 %v6940_v25  ;;  %vm1036_vm10 = vcmp.eq.f32.partialorder %v1035_v27, 8.507059e+37  ;;  %v44_v25 = vld [vmem:[%s10005_s0 + $0x50] sm:$0xff] }
 0x5d0   :  { %v81_v27 = vsel %vm50_vm0, %v44_v25, 0.0 }
 0x5d1   :  { %82 = vadd.xlane.f32.xlu1 %v81_v27 }
 0x5d2   :  { %1104 = vrot.lane.b32.xlu0 %v1093_v58, %s7518_s13 }
 0x5d3   :  { %v7207_v34 = vpop.eup %7206 }
 0x5d4   :  { %v1027_v35 = vmul.f32 %v7207_v34, %v1022_v18  ;;  %vm1032_vm5 = vweird.f32 %v7207_v34  ;;  %v7209_v44 = vpop.eup %7208 }
 0x5d5   :  { %vm1033_vm8 = vmor %vm1031_vm7, %vm1032_vm5  ;;  %v1023_v45 = vadd.f32 1.0, %v7209_v44  ;;  %v7211_v48 = vpop.eup %7210  ;;  %v45_v44 = vld [vmem:[%s10005_s0 + $0x58] sm:$0xff] }
 0x5d6   :  { %v1028_v36 = vsub.f32 1.0, %v1027_v35  ;;  %v1024_v2 = vadd.f32 1.0, %v7211_v48 }
 0x5d7   :  { %7212 = vrcp.f32 %v1023_v45  ;;  %v1052_v63 = vand.u32 2147483648, %v1023_v45  ;;  %vm1046_vm12 = vweird.f32 %v1023_v45  ;;  %v1050_v0 = vand.u32 2147483647, %v1023_v45 }
 0x5d8   :  { %v1029_v42 = vmul.f32 %v7207_v34, %v1028_v36  ;;  %7214 = vpow2.f32 %v6941_v47  ;;  %v1067_v21 = vand.u32 2147483648, %v1024_v2  ;;  %vm1061_vm2 = vweird.f32 %v1024_v2 }
 0x5d9   :  { %7216 = vrcp.f32 %v1024_v2  ;;  %v1053_v6 = vor.u32 1.1754944e-38, %v1052_v63  ;;  %vm1051_vm15 = vcmp.eq.f32.partialorder %v1050_v0, 8.507059e+37  ;;  %v1065_v29 = vand.u32 2147483647, %v1024_v2 }
 0x5da   :  { %v1030_v19 = vadd.f32 %v7207_v34, %v1029_v42  ;;  %v1068_v30 = vor.u32 1.1754944e-38, %v1067_v21 }
 0x5db   :  { %vm1066_vm7 = vcmp.eq.f32.partialorder %v1065_v29, 8.507059e+37 }
 0x5dc   :  { %v1034_v33 = vsel %vm1033_vm8, %v7207_v34, %v1030_v19 }
 0x5dd   :  { %v8000_v59 = vsel %vm1036_vm10, %v1038_v10, %v1034_v33  ;;  %v7213_v13 = vpop.eup %7212  ;;  %v84_v33 = vsel %vm50_vm0, %v45_v44, 0.0  ;;  %v43_v10 = vld [vmem:[%s10005_s0 + $0x48] sm:$0xff] }
 0x5de   :  { %v7215_v50 = vpop.eup %7214  ;;  %v1042_v51 = vmul.f32 %v7213_v13, %v1023_v45  ;;  %vm1047_vm11 = vweird.f32 %v7213_v13  ;;  %v78_v45 = vsel %vm50_vm0, %v43_v10, 0.0  ;;  %v1110_v47 = vmul.f32 %v7996_v15, %v8000_v59 }
 0x5df   :  { %v1025_v11 = vadd.f32 1.0, %v7215_v50  ;;  %v7217_v53 = vpop.eup %7216  ;;  %vm1048_vm14 = vmor %vm1046_vm12, %vm1047_vm11 }
 0x5e0   :  { %v1043_v52 = vsub.f32 1.0, %v1042_v51  ;;  %v1057_v38 = vmul.f32 %v7217_v53, %v1024_v2  ;;  %vm1062_vm1 = vweird.f32 %v7217_v53 }
 0x5e1   :  { %7218 = vrcp.f32 %v1025_v11  ;;  %vm1063_vm5 = vmor %vm1061_vm2, %vm1062_vm1  ;;  %v1082_v34 = vand.u32 2147483648, %v1025_v11  ;;  %vm1076_vm10 = vweird.f32 %v1025_v11  ;;  %v1080_v35 = vand.u32 2147483647, %v1025_v11 }
 0x5e2   :  { %v1044_v54 = vmul.f32 %v7213_v13, %v1043_v52  ;;  %v1058_v57 = vsub.f32 1.0, %v1057_v38 }
 0x5e3   :  { %v1083_v23 = vor.u32 1.1754944e-38, %v1082_v34  ;;  %vm1081_vm12 = vcmp.eq.f32.partialorder %v1080_v35, 8.507059e+37 }
 0x5e4   :  { %v1045_v61 = vadd.f32 %v7213_v13, %v1044_v54  ;;  %v1059_v3 = vmul.f32 %v7217_v53, %v1058_v57 }
 0x5e6   :  { %v1049_v4 = vsel %vm1048_vm14, %v7213_v13, %v1045_v61  ;;  %v1060_v41 = vadd.f32 %v7217_v53, %v1059_v3 }
 0x5e7   :  { %v7219_v62 = vpop.eup %7218  ;;  %v8004_v9 = vsel %vm1051_vm15, %v1053_v6, %v1049_v4 }
 0x5e8   :  { %v1072_v5 = vmul.f32 %v7219_v62, %v1025_v11  ;;  %v1064_v49 = vsel %vm1063_vm5, %v7217_v53, %v1060_v41  ;;  %vm1077_vm8 = vweird.f32 %v7219_v62  ;;  %v1111_v13 = vmul.f32 %v1101_v55, %v8004_v9 }
 0x5e9   :  { %v8008_v56 = vsel %vm1066_vm7, %v1068_v30, %v1064_v49  ;;  %vm1078_vm11 = vmor %vm1076_vm10, %vm1077_vm8 }
 0x5ea   :  { %v1073_v16 = vsub.f32 1.0, %v1072_v5  ;;  %v1112_v52 = vmul.f32 %v7998_v43, %v8008_v56 }
 0x5eb   :  { %76 = vadd.xlane.f32.xlu2 %v75_v31 }
 0x5ec   :  { %v1074_v60 = vmul.f32 %v7219_v62, %v1073_v16 }
 0x5ee   :  { %v1075_v31 = vadd.f32 %v7219_v62, %v1074_v60 }
 0x5f0   :  { %v1079_v36 = vsel %vm1078_vm11, %v7219_v62, %v1075_v31 }
 0x5f1   :  { %v8012_v19 = vsel %vm1081_vm12, %v1083_v23, %v1079_v36 }
 0x60c   :  { %v1119_v39 = vpop.permute.xlu2 %1118 }
 0x60d   :  { %v1130_v1 = vmul.f32 %v1119_v39, %v8000_v59 }
 0x60f   :  { %1138 = vrot.lane.b32.xlu0 %v1130_v1, %s7518_s13 }
 0x61c   :  { %v1123_v58 = vpop.permute.xlu2 %1122 }
 0x61d   :  { %v1132_v18 = vmul.f32 %v1123_v58, %v8008_v56 }
 0x62c   :  { %v1121_v40 = vpop.permute.xlu0 %1120 }
 0x62d   :  { %v1131_v14 = vmul.f32 %v1121_v40, %v8004_v9 }
 0x62f   :  { %1140 = vrot.lane.b32.xlu2 %v1131_v14, %s7518_s13 }
 0x637   :  { %1142 = vrot.lane.b32.xlu2 %v1132_v18, %s7518_s13 }
 0x63c   :  { %v1125_v42 = vpop.permute.xlu0 %1124 }
 0x63d   :  { %v1133_v20 = vmul.f32 %v1125_v42, %v8012_v19 }
 0x63f   :  { %1144 = vrot.lane.b32.xlu0 %v1133_v20, %s7518_s13 }
 0x644   :  { %v1105_v39 = vpop.permute.xlu0 %1104  ;;  %v83_v43 = vpop.xlane.xlu1 %82 }
 0x645   :  { %v1113_v55 = vmul.f32 %v1105_v39, %v8012_v19  ;;  %v116_v5 = vmul.f32 %v7574_v17, %v83_v43 }
 0x65e   :  { %v77_v1 = vpop.xlane.xlu2 %76 }
 0x65f   :  { %v114_v3 = vmul.f32 %v7574_v17, %v77_v1 }
 0x660   :  { %85 = vadd.xlane.f32.xlu2 %v84_v33 }
 0x669   :  { %79 = vadd.xlane.f32.xlu0 %v78_v45 }
 0x681   :  { %v1139_v48 = vpop.permute.xlu0 %1138 }
 0x682   :  { %v8030_v2 = vadd.f32 %v1139_v48, %v1110_v47 }
 0x684   :  { %7220 = vtanh.f32 %v8030_v2 }
 0x689   :  { %v1141_v50 = vpop.permute.xlu2 %1140 }
 0x68a   :  { %v7221_v51 = vpop.eup %7220  ;;  %v8034_v11 = vadd.f32 %v1141_v50, %v1111_v13 }
 0x68b   :  { %1162 = vrot.lane.b32.xlu0 %v7221_v51, %s7520_s25 }
 0x68c   :  { %7222 = vtanh.f32 %v8034_v11 }
 0x691   :  { %v1143_v53 = vpop.permute.xlu2 %1142 }
 0x692   :  { %v7223_v15 = vpop.eup %7222  ;;  %v8040_v38 = vadd.f32 %v1143_v53, %v1112_v52 }
 0x693   :  { %1164 = vrot.lane.b32.xlu2 %v7223_v15, %s7520_s25 }
 0x694   :  { %7224 = vtanh.f32 %v8040_v38 }
 0x69a   :  { %v7225_v54 = vpop.eup %7224 }
 0x69b   :  { %1166 = vrot.lane.b32.xlu1 %v7225_v54, %s7520_s25 }
 0x6b1   :  { %v1145_v57 = vpop.permute.xlu0 %1144 }
 0x6b2   :  { %v8046_v61 = vadd.f32 %v1145_v57, %v1113_v55 }
 0x6b4   :  { %7226 = vtanh.f32 %v8046_v61 }
 0x6ba   :  { %v7227_v62 = vpop.eup %7226 }
 0x6bb   :  { %1168 = vrot.lane.b32.xlu0 %v7227_v62, %s7520_s25 }
 0x6d3   :  { %v86_v0 = vpop.xlane.xlu2 %85 }
 0x6d4   :  { %v117_v40 = vmul.f32 %v7574_v17, %v86_v0 }
 0x6dc   :  { %v80_v63 = vpop.xlane.xlu0 %79 }
 0x6dd   :  { %v115_v4 = vmul.f32 %v7574_v17, %v80_v63 }
 0x6df   :  { %v140_v6 = vadd.f32 %v115_v4, %v114_v3 }
 0x6e1   :  { %v141_v41 = vadd.f32 %v140_v6, %v116_v5 }
 0x6e3   :  { %v142_v14 = vadd.f32 %v141_v41, %v117_v40 }
 0x6e5   :  { %v143_v16 = vrot.slane %v142_v14, 4 }
 0x6e7   :  { %v144_v21 = vadd.f32 %v143_v16, %v142_v14 }
 0x6e9   :  { %v145_v29 = vrot.slane %v144_v21, 2 }
 0x6eb   :  { %v146_v49 = vadd.f32 %v145_v29, %v144_v21 }
 0x6ed   :  { %v147_v60 = vrot.slane %v146_v49, 1  ;;  %v1165_v45 = vpop.permute.xlu2 %1164 }
 0x6ee   :  { %v1175_v47 = vmul.f32 %v1165_v45, %v8004_v9 }
 0x6ef   :  { %v148_v58 = vadd.f32 %v147_v60, %v146_v49 }
 0x6f0   :  { %v1219_v13 = vsel %vm815_vm9, %v1175_v47, 0.0 }
 0x6f1   :  { %v167_v30 = vmul.f32 %v7580_v37, %v148_v58 }
 0x6f3   :  { %v8055_v18 = vsub.f32 %v44_v25, %v167_v30  ;;  %v8057_v31 = vsub.f32 %v43_v10, %v167_v30  ;;  %v8060_v34 = vsub.f32 %v7992_v7, %v167_v30  ;;  %v8071_v27 = vsub.f32 %v45_v44, %v167_v30 }
 0x6f5   :  { %v195_v35 = vmul.f32 %v8055_v18, %v8055_v18  ;;  %v194_v36 = vmul.f32 %v8057_v31, %v8057_v31  ;;  %v193_v23 = vmul.f32 %v8060_v34, %v8060_v34  ;;  %v196_v7 = vmul.f32 %v8071_v27, %v8071_v27 }
 0x6f7   :  { %v231_v42 = vsel %vm50_vm0, %v195_v35, 0.0  ;;  %v228_v20 = vsel %vm50_vm0, %v194_v36, 0.0  ;;  %v225_v25 = vsel %vm50_vm0, %v193_v23, 0.0  ;;  %v234_v33 = vsel %vm50_vm0, %v196_v7, 0.0 }
 0x6f8   :  { %232 = vadd.xlane.f32.xlu1 %v231_v42  ;;  %229 = vadd.xlane.f32.xlu2 %v228_v20 }
 0x6f9   :  { %226 = vadd.xlane.f32.xlu0 %v225_v25 }
 0x6fd   :  { %v1163_v10 = vpop.permute.xlu0 %1162 }
 0x6fe   :  { %v1174_v1 = vmul.f32 %v1163_v10, %v8000_v59 }
 0x700   :  { %235 = vadd.xlane.f32.xlu2 %v234_v33  ;;  %v1218_v44 = vsel %vm815_vm9, %v1174_v1, 0.0 }
 0x701   :  { %v1220_v51 = vadd.f32 %v1219_v13, %v1218_v44 }
 0x70d   :  { %v1167_v39 = vpop.permute.xlu1 %1166 }
 0x70e   :  { %v1176_v48 = vmul.f32 %v1167_v39, %v8008_v56 }
 0x710   :  { %v1221_v50 = vsel %vm815_vm9, %v1176_v48, 0.0 }
 0x711   :  { %v1222_v15 = vadd.f32 %v1221_v50, %v1220_v51 }
 0x72d   :  { %v1169_v52 = vpop.permute.xlu0 %1168 }
 0x72e   :  { %v1177_v53 = vmul.f32 %v1169_v52, %v8012_v19 }
 0x730   :  { %v1223_v54 = vsel %vm815_vm9, %v1177_v53, 0.0 }
 0x731   :  { %v1224_v55 = vadd.f32 %v1223_v54, %v1222_v15 }
 0x733   :  { %v1225_v57 = vrot.slane %v1224_v55, 4 }
 0x735   :  { %v1226_v59 = vadd.f32 %v1225_v57, %v1224_v55 }
 0x737   :  { %v1227_v62 = vrot.slane %v1226_v59, 2 }
 0x739   :  { %v1228_v9 = vadd.f32 %v1227_v62, %v1226_v59 }
 0x73b   :  { %v1229_v43 = vrot.slane %v1228_v9, 1 }
 0x73d   :  { %v1230_v56 = vadd.f32 %v1229_v43, %v1228_v9 }
 0x73f   :  { %v1231_v63 = vmul.f32 %v1230_v56, %v7580_v37  ;;  %v7424_v56 = vld [vmem:[%s10009_s4] ss:$0 sm:$0xff] }
 0x741   :  { %v1234_v0 = vsub.f32 %v1176_v48, %v1231_v63  ;;  %v1233_v3 = vsub.f32 %v1175_v47, %v1231_v63  ;;  %v1232_v4 = vsub.f32 %v1174_v1, %v1231_v63  ;;  %v1235_v19 = vsub.f32 %v1177_v53, %v1231_v63 }
 0x743   :  { %1244 = vrot.lane.b32.xlu2 %v1234_v0, %s7521_s1  ;;  %1242 = vrot.lane.b32.xlu1 %v1233_v3, %s7521_s1 }
 0x744   :  { %1240 = vrot.lane.b32.xlu0 %v1232_v4, %s7521_s1 }
 0x74b   :  { %1204 = vrot.lane.b32.xlu1 %v1175_v47, %s7521_s1 }
 0x74c   :  { %1246 = vrot.lane.b32.xlu0 %v1235_v19, %s7521_s1 }
 0x753   :  { %1208 = vrot.lane.b32.xlu1 %v1177_v53, %s7521_s1 }
 0x754   :  { %1202 = vrot.lane.b32.xlu0 %v1174_v1, %s7521_s1 }
 0x75b   :  { %1184 = vrot.lane.b32.xlu1 %v8034_v11, %s7522_s8 }
 0x75c   :  { %1206 = vrot.lane.b32.xlu0 %v1176_v48, %s7521_s1 }
 0x763   :  { %1188 = vrot.lane.b32.xlu1 %v8046_v61, %s7522_s8 }
 0x764   :  { %1182 = vrot.lane.b32.xlu0 %v8030_v2, %s7522_s8 }
 0x76b   :  { %v230_v5 = vpop.xlane.xlu2 %229  ;;  %v233_v14 = vpop.xlane.xlu1 %232 }
 0x76c   :  { %v258_v6 = vmul.f32 %v230_v5, %v7574_v17  ;;  %v227_v40 = vpop.xlane.xlu0 %226  ;;  %1186 = vrot.lane.b32.xlu0 %v8040_v38, %s7522_s8  ;;  %v259_v11 = vmul.f32 %v233_v14, %v7574_v17 }
 0x76d   :  { %v257_v41 = vmul.f32 %v227_v40, %v7574_v17 }
 0x76f   :  { %v283_v16 = vadd.f32 %v258_v6, %v257_v41 }
 0x771   :  { %v284_v29 = vadd.f32 %v283_v16, %v259_v11 }
 0x773   :  { %v236_v21 = vpop.xlane.xlu2 %235 }
 0x774   :  { %v260_v61 = vmul.f32 %v236_v21, %v7574_v17 }
 0x776   :  { %v285_v49 = vadd.f32 %v284_v29, %v260_v61 }
 0x778   :  { %v286_v60 = vrot.slane %v285_v49, 4 }
 0x77a   :  { %v287_v2 = vadd.f32 %v286_v60, %v285_v49 }
 0x77c   :  { %v288_v58 = vrot.slane %v287_v2, 2 }
 0x77e   :  { %v289_v30 = vadd.f32 %v288_v58, %v287_v2 }
 0x780   :  { %v290_v35 = vrot.slane %v289_v30, 1 }
 0x782   :  { %v291_v36 = vadd.f32 %v290_v35, %v289_v30 }
 0x784   :  { %v303_v23 = vmul.f32 %v291_v36, %v7580_v37 }
 0x786   :  { %v307_v38 = vadd.f32 1e-05, %v303_v23 }
 0x788   :  { %7228 = vrsqrt.f32 %v307_v38  ;;  %vm335_vm15 = vweird.f32 %v307_v38 }
 0x78e   :  { %v7229_v42 = vpop.eup %7228 }
 0x78f   :  { %v330_v20 = vmul.f32 %v7229_v42, %v307_v38  ;;  %vm336_vm14 = vweird.f32 %v7229_v42 }
 0x790   :  { %vm337_vm1 = vmor %vm335_vm15, %vm336_vm14 }
 0x791   :  { %v331_v25 = vmul.f32 %v7229_v42, %v330_v20 }
 0x793   :  { %v332_v7 = vmul.f32 0.5, %v331_v25 }
 0x795   :  { %v333_v33 = vsub.f32 1.5, %v332_v7 }
 0x797   :  { %v334_v10 = vmul.f32 %v7229_v42, %v333_v33 }
 0x799   :  { %v338_v17 = vsel %vm337_vm1, %v7229_v42, %v334_v10 }
 0x79a   :  { %v357_v45 = vmul.f32 %v338_v17, %v8060_v34  ;;  %v358_v47 = vmul.f32 %v338_v17, %v8057_v31  ;;  %v359_v13 = vmul.f32 %v338_v17, %v8055_v18  ;;  %v360_v51 = vmul.f32 %v338_v17, %v8071_v27 }
 0x79c   :  { %v375_v39 = vmul.f32 %v7641_v24, %v357_v45  ;;  %v376_v48 = vmul.f32 %v7641_v24, %v358_v47  ;;  %v377_v50 = vmul.f32 %v7641_v24, %v359_v13  ;;  %v378_v31 = vmul.f32 %v7641_v24, %v360_v51  ;;  %v8129_v24 = vld [vmem:[%s10008_s3] sm:$0xff] }
 0x79d   :  { %v1245_v55 = vpop.permute.xlu2 %1244 }
 0x79e   :  { %v393_v1 = vadd.f32 %v7646_v26, %v375_v39  ;;  %v394_v44 = vadd.f32 %v7646_v26, %v376_v48  ;;  %v395_v34 = vadd.f32 %v7646_v26, %v377_v50  ;;  %v396_v15 = vadd.f32 %v7646_v26, %v378_v31 }
 0x7a0   :  { %6914 = vmatmul.msk.f32.gmra.mxu0 %vm50_vm0, %v393_v1 }
 0x7a8   :  { %6915 = vmatmul.msk.f32.gmra.mxu0 %vm50_vm0, %v394_v44 }
 0x7b0   :  { %6916 = vmatmul.msk.f32.gmra.mxu0 %vm50_vm0, %v395_v34 }
 0x7b5   :  { %v1243_v52 = vpop.permute.xlu1 %1242 }
 0x7b6   :  { %v1241_v53 = vpop.permute.xlu0 %1240 }
 0x7b7   :  { %1252 = vxpose.xlu2.b32.start [1/4] (short) (narrow) %v1241_v53, 16 }
 0x7b8   :  { %6917 = vmatmul.msk.f32.gmra.mxu0 %vm50_vm0, %v396_v15 }
 0x7bd   :  { %v1205_v18 = vpop.permute.xlu1 %1204 }
 0x7be   :  { %v1247_v54 = vpop.permute.xlu0 %1246  ;;  %1215 = vst.msk [vmem:[#allocation3 + $0x8] sm:$0xff] %vm50_vm0, %v1205_v18 }
 0x7bf   :  { %1302 = vmatpush.msra.mxu2 %v1247_v54  ;;  %1253 = vxpose.xlu2.b32.cont [2/4] (short) (narrow) %v1243_v52, 16 }
 0x7c1   :  { %1303 = vmatpush.msra.mxu2 %v1245_v55 }
 0x7c3   :  { %1304 = vmatpush.msra.mxu2 %v1243_v52 }
 0x7c5   :  { %1305 = vmatpush.msra.mxu2 %v1241_v53  ;;  %v1209_v27 = vpop.permute.xlu1 %1208  ;;  %v1357_v11 = vld [vmem:[#allocation3 + $0x8] sm:$0xff] }
 0x7c6   :  { %v1203_v57 = vpop.permute.xlu0 %1202  ;;  %1217 = vst.msk [vmem:[#allocation3 + $0x18] sm:$0xff] %vm50_vm0, %v1209_v27 }
 0x7c7   :  { %1386 = vmatpush.msrb.mxu2 %v7965_v46  ;;  %1214 = vst.msk [vmem:[#allocation3] sm:$0xff] %vm50_vm0, %v1203_v57  ;;  %1254 = vxpose.xlu2.b32.cont [3/4] (short) (narrow) %v1245_v55, 16 }
 0x7c9   :  { %1387 = vmatpush.msrb.mxu2 %v8129_v24 }
 0x7cd   :  { %v1185_v26 = vpop.permute.xlu1 %1184  ;;  %v1359_v29 = vld [vmem:[#allocation3 + $0x18] sm:$0xff] }
 0x7ce   :  { %v1207_v59 = vpop.permute.xlu0 %1206  ;;  %1195 = vst.msk [vmem:[#allocation4 + $0x8] sm:$0xff] %vm50_vm0, %v1185_v26  ;;  %v1356_v16 = vld [vmem:[#allocation3] sm:$0xff] }
 0x7cf   :  { %1216 = vst.msk [vmem:[#allocation3 + $0x10] sm:$0xff] %vm50_vm0, %v1207_v59  ;;  %1255 = vxpose.xlu2.b32.end [4/4] (short) (narrow) %v1247_v54, 16 }
 0x7d5   :  { %v1189_v62 = vpop.permute.xlu1 %1188  ;;  %v1486_v51 = vld [vmem:[#allocation4 + $0x8] sm:$0xff] }
 0x7d6   :  { %v1183_v9 = vpop.permute.xlu0 %1182  ;;  %1197 = vst.msk [vmem:[#allocation4 + $0x18] sm:$0xff] %vm50_vm0, %v1189_v62  ;;  %v1358_v21 = vld [vmem:[#allocation3 + $0x10] sm:$0xff] }
 0x7d7   :  { %1194 = vst.msk [vmem:[#allocation4] sm:$0xff] %vm50_vm0, %v1183_v9 }
 0x7dd   :  { %v1488_v40 = vld [vmem:[#allocation4 + $0x18] sm:$0xff] }
 0x7de   :  { %v1187_v46 = vpop.permute.xlu0 %1186  ;;  %v1485_v50 = vld [vmem:[#allocation4] sm:$0xff] }
 0x7df   :  { %1196 = vst.msk [vmem:[#allocation4 + $0x10] sm:$0xff] %vm50_vm0, %v1187_v46 }
 0x7e6   :  { %v1487_v34 = vld [vmem:[#allocation4 + $0x10] sm:$0xff] }
 0x81d   :  { %v496_v43 = vpop.f32.mrf.mxu0 }
 0x81e   :  { %v497_v63 = vadd.f32 %v7424_v56, %v496_v43 }
 0x820   :  { %529 = vst.msk [vmem:[#allocation2 + $0x40] sm:$0xff] %vm520_vm6, %v497_v63 }
 0x825   :  { %v499_v0 = vpop.f32.mrf.mxu0 }
 0x826   :  { %v500_v3 = vadd.f32 %v7424_v56, %v499_v0 }
 0x827   :  { %v1352_v23 = vld [vmem:[#allocation2 + $0x40] sm:$0xff] }
 0x828   :  { %530 = vst.msk [vmem:[#allocation2 + $0x48] sm:$0xff] %vm520_vm6, %v500_v3 }
 0x82d   :  { %v502_v4 = vpop.f32.mrf.mxu0 }
 0x82e   :  { %v503_v19 = vadd.f32 %v7424_v56, %v502_v4 }
 0x82f   :  { %v1353_v20 = vld [vmem:[#allocation2 + $0x48] sm:$0xff] }
 0x830   :  { %531 = vst.msk [vmem:[#allocation2 + $0x50] sm:$0xff] %vm520_vm6, %v503_v19 }
 0x835   :  { %v505_v5 = vpop.f32.mrf.mxu0 }
 0x836   :  { %v506_v6 = vadd.f32 %v7424_v56, %v505_v5 }
 0x837   :  { %v1354_v10 = vld [vmem:[#allocation2 + $0x50] sm:$0xff] }
 0x838   :  { %532 = vst.msk [vmem:[#allocation2 + $0x58] sm:$0xff] %vm520_vm6, %v506_v6  ;;  %1499 = vrot.lane.b32.xlu2 %v1488_v40, %s7518_s13 }
 0x83f   :  { %v1355_v1 = vld [vmem:[#allocation2 + $0x58] sm:$0xff] }
 0x850   :  { %v1268_v41 = vpop.trf.xlu2 }
 0x851   :  { %6942 = vmatmul.msk.f32.vlgmr.msra.gmra.mxu2 %vm882_vm13, %v1268_v41 }
 0x858   :  { %v1269_v14 = vpop.trf.xlu2 }
 0x859   :  { %6943 = vmatmul.msk.f32.gmra.mxu2 %vm882_vm13, %v1269_v14 }
 0x861   :  { %6946 = vmatmul.msk.f32.vlgmr.msrb.gmra.mxu2 %vm50_vm0, %v1356_v16 }
 0x869   :  { %6947 = vmatmul.msk.f32.gmra.mxu2 %vm50_vm0, %v1357_v11 }
 0x871   :  { %6948 = vmatmul.msk.f32.gmra.mxu2 %vm50_vm0, %v1358_v21 }
 0x879   :  { %6949 = vmatmul.msk.f32.gmra.mxu2 %vm50_vm0, %v1359_v29 }
 0x8d4   :  { %v1307_v61 = vpop.f32.mrf.mxu2 }
 0x8d5   :  { %v1313_v49 = vmul.f32 %v1307_v61, %v7942_v22 }
 0x8d7   :  { %v1315_v58 = vmul.f32 0.5, %v1313_v49 }
 0x8d9   :  { %v1317_v36 = vsel %vm552_vm4, %v1313_v49, %v1315_v58 }
 0x8dc   :  { %v1310_v60 = vpop.f32.mrf.mxu2 }
 0x8dd   :  { %v1314_v2 = vmul.f32 %v1310_v60, %v7942_v22 }
 0x8df   :  { %v1316_v30 = vmul.f32 0.5, %v1314_v2 }
 0x8e1   :  { %v1318_v35 = vsel %vm553_vm3, %v1314_v2, %v1316_v30 }
 0x8e2   :  { %1339 = vmatpush.msrb.mxu1 %v1318_v35 }
 0x8e4   :  { %1340 = vmatpush.msrb.mxu1 %v1317_v36  ;;  %v1389_v38 = vpop.f32.mrf.mxu2 }
 0x8e5   :  { %v1401_v42 = vadd.f32 %v1389_v38, %v1352_v23  ;;  %6944 = vmatmul.msk.f32.vlgmr.msrb.gmra.mxu1 %vm50_vm0, %v1317_v36 }
 0x8e7   :  { %7230 = vtanh.f32 %v1401_v42  ;;  %v6950_v31 = vmul.f32 -1.442695, %v1401_v42 }
 0x8ec   :  { %v1392_v25 = vpop.f32.mrf.mxu2 }
 0x8ed   :  { %v7231_v7 = vpop.eup %7230  ;;  %v1402_v33 = vadd.f32 %v1392_v25, %v1353_v20  ;;  %6945 = vmatmul.msk.f32.gmra.mxu1 %vm50_vm0, %v1318_v35 }
 0x8ee   :  { %1513 = vrot.lane.b32.xlu0 %v7231_v7, %s7519_s18 }
 0x8ef   :  { %7232 = vtanh.f32 %v1402_v33  ;;  %v6951_v52 = vmul.f32 -1.442695, %v1402_v33 }
 0x8f4   :  { %v1395_v17 = vpop.f32.mrf.mxu2 }
 0x8f5   :  { %v7233_v45 = vpop.eup %7232  ;;  %v1403_v39 = vadd.f32 %v1395_v17, %v1354_v10 }
 0x8f6   :  { %1515 = vrot.lane.b32.xlu1 %v7233_v45, %s7519_s18 }
 0x8f7   :  { %7234 = vtanh.f32 %v1403_v39  ;;  %v6952_v18 = vmul.f32 -1.442695, %v1403_v39 }
 0x8fc   :  { %v1398_v47 = vpop.f32.mrf.mxu2 }
 0x8fd   :  { %v7235_v48 = vpop.eup %7234  ;;  %v1404_v44 = vadd.f32 %v1398_v47, %v1355_v1 }
 0x8fe   :  { %1517 = vrot.lane.b32.xlu0 %v7235_v48, %s7519_s18 }
 0x8ff   :  { %7236 = vtanh.f32 %v1404_v44  ;;  %v6953_v57 = vmul.f32 -1.442695, %v1404_v44 }
 0x900   :  { %7238 = vpow2.f32 %v6950_v31 }
 0x901   :  { %7240 = vpow2.f32 %v6951_v52 }
 0x905   :  { %v7237_v13 = vpop.eup %7236 }
 0x906   :  { %1493 = vrot.lane.b32.xlu0 %v1485_v50, %s7518_s13  ;;  %1519 = vrot.lane.b32.xlu1 %v7237_v13, %s7519_s18  ;;  %v7239_v53 = vpop.eup %7238 }
 0x907   :  { %v1417_v15 = vadd.f32 1.0, %v7239_v53  ;;  %v7241_v54 = vpop.eup %7240 }
 0x908   :  { %v1418_v55 = vadd.f32 1.0, %v7241_v54 }
 0x909   :  { %7242 = vrcp.f32 %v1417_v15  ;;  %v1432_v5 = vand.u32 2147483648, %v1417_v15  ;;  %vm1426_vm2 = vweird.f32 %v1417_v15  ;;  %v1430_v6 = vand.u32 2147483647, %v1417_v15 }
 0x90a   :  { %7244 = vpow2.f32 %v6952_v18  ;;  %v1447_v58 = vand.u32 2147483648, %v1418_v55  ;;  %vm1441_vm10 = vweird.f32 %v1418_v55  ;;  %v1445_v30 = vand.u32 2147483647, %v1418_v55 }
 0x90b   :  { %7246 = vrcp.f32 %v1418_v55  ;;  %v1433_v16 = vor.u32 1.1754944e-38, %v1432_v5  ;;  %vm1431_vm7 = vcmp.eq.f32.partialorder %v1430_v6, 8.507059e+37 }
 0x90c   :  { %7248 = vpow2.f32 %v6953_v57  ;;  %v1448_v38 = vor.u32 1.1754944e-38, %v1447_v58  ;;  %vm1446_vm12 = vcmp.eq.f32.partialorder %v1445_v30, 8.507059e+37 }
 0x90e   :  { %1497 = vrot.lane.b32.xlu0 %v1487_v34, %s7518_s13  ;;  %1495 = vrot.lane.b32.xlu1 %v1486_v51, %s7518_s13 }
 0x90f   :  { %v7243_v27 = vpop.eup %7242 }
 0x910   :  { %v7245_v26 = vpop.eup %7244  ;;  %v1422_v59 = vmul.f32 %v7243_v27, %v1417_v15  ;;  %vm1427_vm6 = vweird.f32 %v7243_v27 }
 0x911   :  { %v1419_v62 = vadd.f32 1.0, %v7245_v26  ;;  %v7247_v46 = vpop.eup %7246  ;;  %vm1428_vm5 = vmor %vm1426_vm2, %vm1427_vm6 }
 0x912   :  { %v1423_v9 = vsub.f32 1.0, %v1422_v59  ;;  %v7249_v43 = vpop.eup %7248  ;;  %v1437_v63 = vmul.f32 %v7247_v46, %v1418_v55  ;;  %vm1442_vm8 = vweird.f32 %v7247_v46 }
 0x913   :  { %7250 = vrcp.f32 %v1419_v62  ;;  %v8168_v0 = vadd.f32 1.0, %v7249_v43  ;;  %vm1443_vm11 = vmor %vm1441_vm10, %vm1442_vm8  ;;  %v1462_v17 = vand.u32 2147483648, %v1419_v62  ;;  %vm1456_vm15 = vweird.f32 %v1419_v62 }
 0x914   :  { %v1424_v56 = vmul.f32 %v7243_v27, %v1423_v9  ;;  %v1438_v4 = vsub.f32 1.0, %v1437_v63  ;;  %v1460_v45 = vand.u32 2147483647, %v1419_v62 }
 0x915   :  { %7252 = vrcp.f32 %v8168_v0  ;;  %v1463_v47 = vor.u32 1.1754944e-38, %v1462_v17  ;;  %v1477_v34 = vand.u32 2147483648, %v8168_v0  ;;  %v1475_v51 = vand.u32 2147483647, %v8168_v0 }
 0x916   :  { %v1425_v3 = vadd.f32 %v7243_v27, %v1424_v56  ;;  %v1439_v41 = vmul.f32 %v7247_v46, %v1438_v4  ;;  %vm1461_vm6 = vcmp.eq.f32.partialorder %v1460_v45, 8.507059e+37  ;;  %v1500_v4 = vpop.permute.xlu2 %1499 }
 0x917   :  { %v1478_v52 = vor.u32 1.1754944e-38, %v1477_v34  ;;  %vm1476_vm8 = vcmp.eq.f32.partialorder %v1475_v51, 8.507059e+37 }
 0x918   :  { %v1429_v40 = vsel %vm1428_vm5, %v7243_v27, %v1425_v3  ;;  %v1440_v61 = vadd.f32 %v7247_v46, %v1439_v41  ;;  %vm1471_vm5 = vweird.f32 %v8168_v0 }
 0x919   :  { %v7251_v19 = vpop.eup %7250  ;;  %v8171_v21 = vsel %vm1431_vm7, %v1433_v16, %v1429_v40 }
 0x91a   :  { %v1452_v14 = vmul.f32 %v7251_v19, %v1419_v62  ;;  %v1444_v35 = vsel %vm1443_vm11, %v7247_v46, %v1440_v61  ;;  %vm1457_vm14 = vweird.f32 %v7251_v19 }
 0x91b   :  { %v7253_v60 = vpop.eup %7252  ;;  %v8177_v42 = vsel %vm1446_vm12, %v1448_v38, %v1444_v35  ;;  %vm1458_vm1 = vmor %vm1456_vm15, %vm1457_vm14 }
 0x91c   :  { %v1453_v49 = vsub.f32 1.0, %v1452_v14  ;;  %v1467_v23 = vmul.f32 %v7253_v60, %v8168_v0  ;;  %vm1472_vm2 = vweird.f32 %v7253_v60 }
 0x91d   :  { %vm1473_vm7 = vmor %vm1471_vm5, %vm1472_vm2 }
 0x91e   :  { %v1454_v36 = vmul.f32 %v7251_v19, %v1453_v49  ;;  %v1468_v33 = vsub.f32 1.0, %v1467_v23 }
 0x920   :  { %v1455_v7 = vadd.f32 %v7251_v19, %v1454_v36  ;;  %v1469_v1 = vmul.f32 %v7253_v60, %v1468_v33 }
 0x922   :  { %v1459_v39 = vsel %vm1458_vm1, %v7251_v19, %v1455_v7  ;;  %v1470_v50 = vadd.f32 %v7253_v60, %v1469_v1 }
 0x923   :  { %v1464_v44 = vsel %vm1461_vm6, %v1463_v47, %v1459_v39 }
 0x924   :  { %v1474_v31 = vsel %vm1473_vm7, %v7253_v60, %v1470_v50 }
 0x925   :  { %v1479_v53 = vsel %vm1476_vm8, %v1478_v52, %v1474_v31  ;;  %v7425_v31 = vld [vmem:[%s10008_s3 + $0x8] sm:$0xff]  ;;  %s7524_s3 = smov [#allocation9]  }
 0x926   :  { %v1508_v19 = vmul.f32 %v1500_v4, %v1479_v53 }
 0x960   :  { %v1514_v11 = vpop.permute.xlu0 %1513 }
 0x961   :  { %v1525_v29 = vmul.f32 %v1514_v11, %v8171_v21 }
 0x962   :  { %v1342_v2 = vpop.f32.mrf.mxu1 }
 0x963   :  { %1349 = vst.msk [vmem:[#allocation5 + $0x10] sm:$0xff] %vm50_vm0, %v1342_v2  ;;  %1533 = vrot.lane.b32.xlu1 %v1525_v29, %s7518_s13 }
 0x968   :  { %v1516_v20 = vpop.permute.xlu1 %1515 }
 0x969   :  { %v1526_v25 = vmul.f32 %v1516_v20, %v8177_v42 }
 0x96a   :  { %v1345_v10 = vpop.f32.mrf.mxu1 }
 0x96b   :  { %1350 = vst.msk [vmem:[#allocation5 + $0x18] sm:$0xff] %vm50_vm0, %v1345_v10  ;;  %1535 = vrot.lane.b32.xlu0 %v1526_v25, %s7518_s13 }
 0x970   :  { %v1518_v48 = vpop.permute.xlu0 %1517 }
 0x971   :  { %v1527_v13 = vmul.f32 %v1518_v48, %v1464_v44 }
 0x973   :  { %1537 = vrot.lane.b32.xlu1 %v1527_v13, %s7518_s13 }
 0x978   :  { %v1520_v15 = vpop.permute.xlu1 %1519  ;;  %v1494_v54 = vpop.permute.xlu0 %1493 }
 0x979   :  { %v1528_v18 = vmul.f32 %v1520_v15, %v1479_v53  ;;  %v1505_v27 = vmul.f32 %v1494_v54, %v8171_v21 }
 0x97b   :  { %1539 = vrot.lane.b32.xlu0 %v1528_v18, %s7518_s13 }
 0x980   :  { %v1496_v55 = vpop.permute.xlu1 %1495  ;;  %v1498_v57 = vpop.permute.xlu0 %1497 }
 0x981   :  { %v1506_v62 = vmul.f32 %v1496_v55, %v8177_v42  ;;  %v1507_v56 = vmul.f32 %v1498_v57, %v1464_v44 }
 0x9d5   :  { %v1534_v26 = vpop.permute.xlu1 %1533 }
 0x9d6   :  { %v1545_v59 = vadd.f32 %v1534_v26, %v1505_v27 }
 0x9d8   :  { %7254 = vtanh.f32 %v1545_v59 }
 0x9dd   :  { %v1536_v9 = vpop.permute.xlu0 %1535 }
 0x9de   :  { %v7255_v46 = vpop.eup %7254  ;;  %v1546_v43 = vadd.f32 %v1536_v9, %v1506_v62 }
 0x9df   :  { %1557 = vrot.lane.b32.xlu1 %v7255_v46, %s7520_s25 }
 0x9e0   :  { %7256 = vtanh.f32 %v1546_v43 }
 0x9e5   :  { %v1538_v63 = vpop.permute.xlu1 %1537 }
 0x9e6   :  { %v7257_v0 = vpop.eup %7256  ;;  %v1547_v3 = vadd.f32 %v1538_v63, %v1507_v56 }
 0x9e7   :  { %1559 = vrot.lane.b32.xlu0 %v7257_v0, %s7520_s25 }
 0x9e8   :  { %7258 = vtanh.f32 %v1547_v3 }
 0x9ed   :  { %v1540_v5 = vpop.permute.xlu0 %1539 }
 0x9ee   :  { %v7259_v6 = vpop.eup %7258  ;;  %v1548_v40 = vadd.f32 %v1540_v5, %v1508_v19  ;;  %v1747_v5 = vld [vmem:[#allocation2 + $0x60] sm:$0xff] }
 0x9ef   :  { %1561 = vrot.lane.b32.xlu1 %v7259_v6, %s7520_s25 }
 0x9f0   :  { %7260 = vtanh.f32 %v1548_v40 }
 0x9f6   :  { %v7261_v41 = vpop.eup %7260 }
 0x9f7   :  { %1563 = vrot.lane.b32.xlu0 %v7261_v41, %s7520_s25  ;;  %v1748_v41 = vld [vmem:[#allocation2 + $0x68] sm:$0xff] }
 0xa51   :  { %v1558_v14 = vpop.permute.xlu1 %1557 }
 0xa52   :  { %v1569_v61 = vmul.f32 %v1558_v14, %v8171_v21 }
 0xa54   :  { %v1613_v2 = vsel %vm815_vm9, %v1569_v61, 0.0 }
 0xa59   :  { %v1560_v16 = vpop.permute.xlu0 %1559 }
 0xa5a   :  { %v1570_v29 = vmul.f32 %v1560_v16, %v8177_v42 }
 0xa5c   :  { %v1614_v60 = vsel %vm815_vm9, %v1570_v29, 0.0 }
 0xa5d   :  { %v1615_v30 = vadd.f32 %v1614_v60, %v1613_v2  ;;  %v1750_v2 = vld [vmem:[#allocation2 + $0x78] sm:$0xff] }
 0xa61   :  { %v1562_v11 = vpop.permute.xlu1 %1561 }
 0xa62   :  { %v1571_v49 = vmul.f32 %v1562_v11, %v1464_v44 }
 0xa64   :  { %v1616_v58 = vsel %vm815_vm9, %v1571_v49, 0.0 }
 0xa65   :  { %v1617_v23 = vadd.f32 %v1616_v58, %v1615_v30 }
 0xa69   :  { %v1564_v35 = vpop.permute.xlu0 %1563 }
 0xa6a   :  { %v1572_v36 = vmul.f32 %v1564_v35, %v1479_v53 }
 0xa6c   :  { %v1618_v38 = vsel %vm815_vm9, %v1572_v36, 0.0 }
 0xa6d   :  { %v1619_v20 = vadd.f32 %v1618_v38, %v1617_v23 }
 0xa6f   :  { %v1620_v25 = vrot.slane %v1619_v20, 4 }
 0xa71   :  { %v1621_v7 = vadd.f32 %v1620_v25, %v1619_v20 }
 0xa73   :  { %v1622_v33 = vrot.slane %v1621_v7, 2 }
 0xa75   :  { %v1623_v42 = vadd.f32 %v1622_v33, %v1621_v7 }
 0xa77   :  { %v1624_v10 = vrot.slane %v1623_v42, 1 }
 0xa79   :  { %v1625_v21 = vadd.f32 %v1624_v10, %v1623_v42 }
 0xa7b   :  { %v1626_v17 = vmul.f32 %v1625_v21, %v7580_v37 }
 0xa7d   :  { %v1628_v45 = vsub.f32 %v1570_v29, %v1626_v17  ;;  %v1627_v39 = vsub.f32 %v1569_v61, %v1626_v17  ;;  %v1630_v1 = vsub.f32 %v1572_v36, %v1626_v17  ;;  %v1629_v47 = vsub.f32 %v1571_v49, %v1626_v17 }
 0xa7f   :  { %1637 = vrot.lane.b32.xlu0 %v1628_v45, %s7521_s1  ;;  %1635 = vrot.lane.b32.xlu1 %v1627_v39, %s7521_s1 }
 0xa87   :  { %1641 = vrot.lane.b32.xlu0 %v1630_v1, %s7521_s1  ;;  %1639 = vrot.lane.b32.xlu1 %v1629_v47, %s7521_s1 }
 0xa8f   :  { %1599 = vrot.lane.b32.xlu0 %v1570_v29, %s7521_s1  ;;  %1597 = vrot.lane.b32.xlu1 %v1569_v61, %s7521_s1  ;;  %v1749_v29 = vld [vmem:[#allocation2 + $0x70] sm:$0xff] }
 0xa97   :  { %1601 = vrot.lane.b32.xlu0 %v1571_v49, %s7521_s1 }
 0xa9f   :  { %1603 = vrot.lane.b32.xlu0 %v1572_v36, %s7521_s1 }
 0xaa7   :  { %1577 = vrot.lane.b32.xlu0 %v1545_v59, %s7522_s8 }
 0xaaf   :  { %1579 = vrot.lane.b32.xlu0 %v1546_v43, %s7522_s8 }
 0xab7   :  { %1581 = vrot.lane.b32.xlu0 %v1547_v3, %s7522_s8 }
 0xabf   :  { %1583 = vrot.lane.b32.xlu0 %v1548_v40, %s7522_s8 }
 0xaf1   :  { %v1638_v48 = vpop.permute.xlu0 %1637  ;;  %v1636_v44 = vpop.permute.xlu1 %1635 }
 0xaf2   :  { %1647 = vxpose.xlu1.b32.start [1/4] (short) (narrow) %v1636_v44, 16 }
 0xaf9   :  { %v1642_v13 = vpop.permute.xlu0 %1641  ;;  %v1640_v50 = vpop.permute.xlu1 %1639 }
 0xafa   :  { %1697 = vmatpush.msra.mxu1 %v1642_v13  ;;  %1648 = vxpose.xlu1.b32.cont [2/4] (short) (narrow) %v1638_v48, 16 }
 0xafc   :  { %1698 = vmatpush.msra.mxu1 %v1640_v50 }
 0xafe   :  { %1699 = vmatpush.msra.mxu1 %v1638_v48 }
 0xb00   :  { %1700 = vmatpush.msra.mxu1 %v1636_v44 }
 0xb01   :  { %v1600_v34 = vpop.permute.xlu0 %1599  ;;  %v1598_v51 = vpop.permute.xlu1 %1597 }
 0xb02   :  { %1781 = vmatpush.msrb.mxu1 %v7425_v31  ;;  %1610 = vst.msk [vmem:[#allocation3 + $0x8] sm:$0xff] %vm50_vm0, %v1600_v34  ;;  %1649 = vxpose.xlu1.b32.cont [3/4] (short) (narrow) %v1640_v50, 16 }
 0xb03   :  { %1609 = vst.msk [vmem:[#allocation3] sm:$0xff] %vm50_vm0, %v1598_v51 }
 0xb04   :  { %1782 = vmatpush.msrb.mxu1 %v8129_v24 }
 0xb09   :  { %v1602_v52 = vpop.permute.xlu0 %1601  ;;  %v1752_v59 = vld [vmem:[#allocation3 + $0x8] sm:$0xff] }
 0xb0a   :  { %1611 = vst.msk [vmem:[#allocation3 + $0x10] sm:$0xff] %vm50_vm0, %v1602_v52  ;;  %1650 = vxpose.xlu1.b32.end [4/4] (short) (narrow) %v1642_v13, 16  ;;  %v1751_v26 = vld [vmem:[#allocation3] sm:$0xff] }
 0xb11   :  { %v1604_v53 = vpop.permute.xlu0 %1603  ;;  %v1753_v62 = vld [vmem:[#allocation3 + $0x10] sm:$0xff] }
 0xb12   :  { %1612 = vst.msk [vmem:[#allocation3 + $0x18] sm:$0xff] %vm50_vm0, %v1604_v53 }
 0xb19   :  { %v1578_v15 = vpop.permute.xlu0 %1577  ;;  %v1754_v9 = vld [vmem:[#allocation3 + $0x18] sm:$0xff] }
 0xb1a   :  { %1589 = vst.msk [vmem:[#allocation4] sm:$0xff] %vm50_vm0, %v1578_v15 }
 0xb21   :  { %v1580_v18 = vpop.permute.xlu0 %1579  ;;  %v1880_v23 = vld [vmem:[#allocation4] sm:$0xff] }
 0xb22   :  { %1590 = vst.msk [vmem:[#allocation4 + $0x8] sm:$0xff] %vm50_vm0, %v1580_v18 }
 0xb29   :  { %v1582_v54 = vpop.permute.xlu0 %1581  ;;  %v1881_v20 = vld [vmem:[#allocation4 + $0x8] sm:$0xff] }
 0xb2a   :  { %1591 = vst.msk [vmem:[#allocation4 + $0x10] sm:$0xff] %vm50_vm0, %v1582_v54 }
 0xb31   :  { %v1584_v55 = vpop.permute.xlu0 %1583  ;;  %v1882_v24 = vld [vmem:[#allocation4 + $0x10] sm:$0xff] }
 0xb32   :  { %1592 = vst.msk [vmem:[#allocation4 + $0x18] sm:$0xff] %vm50_vm0, %v1584_v55 }
 0xb39   :  { %v1883_v38 = vld [vmem:[#allocation4 + $0x18] sm:$0xff] }
 0xb5d   :  { %6987 = vset.pattern.permute.xlu1 %v7933_v32 }
 0xb64   :  { %1892 = vrot.lane.b32.xlu1 %v1882_v24, %s7518_s13 }
 0xb96   :  { %v1663_v27 = vpop.trf.xlu1 }
 0xb97   :  { %6954 = vmatmul.msk.f32.vlgmr.msra.gmra.mxu1 %vm882_vm13, %v1663_v27 }
 0xb9e   :  { %v1664_v57 = vpop.trf.xlu1 }
 0xb9f   :  { %6955 = vmatmul.msk.f32.gmra.mxu1 %vm882_vm13, %v1664_v57 }
 0xba7   :  { %6958 = vmatmul.msk.f32.vlgmr.msrb.gmra.mxu1 %vm50_vm0, %v1751_v26 }
 0xbaf   :  { %6959 = vmatmul.msk.f32.gmra.mxu1 %vm50_vm0, %v1752_v59 }
 0xbb7   :  { %6960 = vmatmul.msk.f32.gmra.mxu1 %vm50_vm0, %v1753_v62 }
 0xbbf   :  { %6961 = vmatmul.msk.f32.gmra.mxu1 %vm50_vm0, %v1754_v9 }
 0xc14   :  { %v1702_v46 = vpop.f32.mrf.mxu1 }
 0xc15   :  { %v1708_v43 = vmul.f32 %v1702_v46, %v7942_v22 }
 0xc17   :  { %v1710_v0 = vmul.f32 0.5, %v1708_v43 }
 0xc19   :  { %v1712_v19 = vsel %vm552_vm4, %v1708_v43, %v1710_v0 }
 0xc1c   :  { %v1705_v56 = vpop.f32.mrf.mxu1 }
 0xc1d   :  { %v1709_v63 = vmul.f32 %v1705_v56, %v7942_v22 }
 0xc1f   :  { %v1711_v3 = vmul.f32 0.5, %v1709_v63 }
 0xc21   :  { %v1713_v4 = vsel %vm553_vm3, %v1709_v63, %v1711_v3 }
 0xc22   :  { %1734 = vmatpush.msrb.mxu3 %v1713_v4 }
 0xc24   :  { %1735 = vmatpush.msrb.mxu3 %v1712_v19  ;;  %v1784_v6 = vpop.f32.mrf.mxu1 }
 0xc25   :  { %v1796_v40 = vadd.f32 %v1784_v6, %v1747_v5  ;;  %6956 = vmatmul.msk.f32.vlgmr.msrb.gmra.mxu3 %vm50_vm0, %v1712_v19 }
 0xc27   :  { %7262 = vtanh.f32 %v1796_v40  ;;  %v6962_v42 = vmul.f32 -1.442695, %v1796_v40 }
 0xc2c   :  { %v1787_v14 = vpop.f32.mrf.mxu1 }
 0xc2d   :  { %v7263_v16 = vpop.eup %7262  ;;  %v1797_v11 = vadd.f32 %v1787_v14, %v1748_v41  ;;  %6957 = vmatmul.msk.f32.gmra.mxu3 %vm50_vm0, %v1713_v4 }
 0xc2e   :  { %1908 = vrot.lane.b32.xlu0 %v7263_v16, %s7519_s18 }
 0xc2f   :  { %7264 = vtanh.f32 %v1797_v11  ;;  %v6963_v25 = vmul.f32 -1.442695, %v1797_v11 }
 0xc34   :  { %v1790_v61 = vpop.f32.mrf.mxu1 }
 0xc35   :  { %v7265_v49 = vpop.eup %7264  ;;  %v1798_v60 = vadd.f32 %v1790_v61, %v1749_v29 }
 0xc36   :  { %1910 = vrot.lane.b32.xlu2 %v7265_v49, %s7519_s18 }
 0xc37   :  { %7266 = vtanh.f32 %v1798_v60  ;;  %v6964_v47 = vmul.f32 -1.442695, %v1798_v60 }
 0xc3c   :  { %v1793_v58 = vpop.f32.mrf.mxu1 }
 0xc3d   :  { %v7267_v30 = vpop.eup %7266  ;;  %v1799_v35 = vadd.f32 %v1793_v58, %v1750_v2 }
 0xc3e   :  { %1912 = vrot.lane.b32.xlu0 %v7267_v30, %s7519_s18 }
 0xc3f   :  { %7268 = vtanh.f32 %v1799_v35  ;;  %v6965_v21 = vmul.f32 -1.442695, %v1799_v35 }
 0xc40   :  { %7270 = vpow2.f32 %v6963_v25 }
 0xc45   :  { %v7269_v36 = vpop.eup %7268 }
 0xc46   :  { %1888 = vrot.lane.b32.xlu0 %v1880_v23, %s7518_s13  ;;  %1914 = vrot.lane.b32.xlu2 %v7269_v36, %s7519_s18  ;;  %v7271_v7 = vpop.eup %7270 }
 0xc47   :  { %v1813_v33 = vadd.f32 1.0, %v7271_v7 }
 0xc49   :  { %7272 = vrcp.f32 %v1813_v33  ;;  %v1842_v51 = vand.u32 2147483648, %v1813_v33  ;;  %vm1836_vm11 = vweird.f32 %v1813_v33  ;;  %v1840_v31 = vand.u32 2147483647, %v1813_v33 }
 0xc4a   :  { %7274 = vpow2.f32 %v6962_v42 }
 0xc4b   :  { %7276 = vpow2.f32 %v6965_v21  ;;  %v1843_v18 = vor.u32 1.1754944e-38, %v1842_v51  ;;  %vm1841_vm14 = vcmp.eq.f32.partialorder %v1840_v31, 8.507059e+37 }
 0xc4e   :  { %1894 = vrot.lane.b32.xlu0 %v1883_v38, %s7518_s13  ;;  %1890 = vrot.lane.b32.xlu2 %v1881_v20, %s7518_s13 }
 0xc4f   :  { %v7273_v10 = vpop.eup %7272 }
 0xc50   :  { %v7275_v17 = vpop.eup %7274  ;;  %v1832_v45 = vmul.f32 %v7273_v10, %v1813_v33  ;;  %vm1837_vm10 = vweird.f32 %v7273_v10 }
 0xc51   :  { %v1812_v39 = vadd.f32 1.0, %v7275_v17  ;;  %v7277_v48 = vpop.eup %7276  ;;  %vm1838_vm12 = vmor %vm1836_vm11, %vm1837_vm10 }
 0xc52   :  { %v1833_v1 = vsub.f32 1.0, %v1832_v45  ;;  %v1815_v13 = vadd.f32 1.0, %v7277_v48 }
 0xc53   :  { %7278 = vrcp.f32 %v1812_v39  ;;  %v1827_v56 = vand.u32 2147483648, %v1812_v39  ;;  %vm1821_vm1 = vweird.f32 %v1812_v39  ;;  %v1825_v63 = vand.u32 2147483647, %v1812_v39 }
 0xc54   :  { %v1834_v44 = vmul.f32 %v7273_v10, %v1833_v1  ;;  %7280 = vpow2.f32 %v6964_v47  ;;  %v1872_v16 = vand.u32 2147483648, %v1815_v13  ;;  %vm1866_vm7 = vweird.f32 %v1815_v13 }
 0xc55   :  { %7282 = vrcp.f32 %v1815_v13  ;;  %v1828_v19 = vor.u32 1.1754944e-38, %v1827_v56  ;;  %vm1826_vm2 = vcmp.eq.f32.partialorder %v1825_v63, 8.507059e+37  ;;  %v1870_v11 = vand.u32 2147483647, %v1815_v13 }
 0xc56   :  { %v1835_v50 = vadd.f32 %v7273_v10, %v1834_v44  ;;  %v1873_v60 = vor.u32 1.1754944e-38, %v1872_v16 }
 0xc57   :  { %vm1871_vm10 = vcmp.eq.f32.partialorder %v1870_v11, 8.507059e+37 }
 0xc58   :  { %v1839_v53 = vsel %vm1838_vm12, %v7273_v10, %v1835_v50  ;;  %v1893_v50 = vpop.permute.xlu1 %1892 }
 0xc59   :  { %v7279_v34 = vpop.eup %7278  ;;  %v8249_v24 = vsel %vm1841_vm14, %v1843_v18, %v1839_v53 }
 0xc5a   :  { %v7281_v52 = vpop.eup %7280  ;;  %v1817_v15 = vmul.f32 %v7279_v34, %v1812_v39  ;;  %vm1822_vm15 = vweird.f32 %v7279_v34 }
 0xc5b   :  { %v1814_v54 = vadd.f32 1.0, %v7281_v52  ;;  %v7283_v26 = vpop.eup %7282  ;;  %vm1823_vm6 = vmor %vm1821_vm1, %vm1822_vm15 }
 0xc5c   :  { %v1818_v57 = vsub.f32 1.0, %v1817_v15  ;;  %v1862_v62 = vmul.f32 %v7283_v26, %v1815_v13  ;;  %vm1867_vm5 = vweird.f32 %v7283_v26 }
 0xc5d   :  { %7284 = vrcp.f32 %v1814_v54  ;;  %vm1868_vm8 = vmor %vm1866_vm7, %vm1867_vm5  ;;  %v1857_v36 = vand.u32 2147483648, %v1814_v54  ;;  %vm1851_vm12 = vweird.f32 %v1814_v54  ;;  %v1855_v23 = vand.u32 2147483647, %v1814_v54 }
 0xc5e   :  { %v1819_v59 = vmul.f32 %v7279_v34, %v1818_v57  ;;  %v1863_v46 = vsub.f32 1.0, %v1862_v62 }
 0xc5f   :  { %v1858_v20 = vor.u32 1.1754944e-38, %v1857_v36  ;;  %vm1856_vm15 = vcmp.eq.f32.partialorder %v1855_v23, 8.507059e+37 }
 0xc60   :  { %v1820_v9 = vadd.f32 %v7279_v34, %v1819_v59  ;;  %v1864_v3 = vmul.f32 %v7283_v26, %v1863_v46 }
 0xc62   :  { %v1824_v0 = vsel %vm1823_vm6, %v7279_v34, %v1820_v9  ;;  %v1865_v41 = vadd.f32 %v7283_v26, %v1864_v3 }
 0xc63   :  { %v7285_v43 = vpop.eup %7284  ;;  %v8253_v6 = vsel %vm1826_vm2, %v1828_v19, %v1824_v0 }
 0xc64   :  { %v1847_v4 = vmul.f32 %v7285_v43, %v1814_v54  ;;  %v1869_v29 = vsel %vm1868_vm8, %v7283_v26, %v1865_v41  ;;  %vm1852_vm11 = vweird.f32 %v7285_v43 }
 0xc65   :  { %v1874_v2 = vsel %vm1871_vm10, %v1873_v60, %v1869_v29  ;;  %vm1853_vm14 = vmor %vm1851_vm12, %vm1852_vm11 }
 0xc66   :  { %v1848_v14 = vsub.f32 1.0, %v1847_v4 }
 0xc68   :  { %v1849_v61 = vmul.f32 %v7285_v43, %v1848_v14 }
 0xc6a   :  { %v1850_v35 = vadd.f32 %v7285_v43, %v1849_v61 }
 0xc6c   :  { %v1854_v38 = vsel %vm1853_vm14, %v7285_v43, %v1850_v35 }
 0xc6d   :  { %v1859_v7 = vsel %vm1856_vm15, %v1858_v20, %v1854_v38 }
 0xc6e   :  { %v1902_v51 = vmul.f32 %v1893_v50, %v1859_v7 }
 0xc90   :  { %v1911_v55 = vpop.permute.xlu2 %1910 }
 0xc91   :  { %v1921_v27 = vmul.f32 %v1911_v55, %v8249_v24 }
 0xc93   :  { %1930 = vrot.lane.b32.xlu2 %v1921_v27, %s7518_s13 }
 0xca0   :  { %v1909_v5 = vpop.permute.xlu0 %1908  ;;  %v1915_v49 = vpop.permute.xlu2 %1914 }
 0xca1   :  { %v1920_v40 = vmul.f32 %v1909_v5, %v8253_v6  ;;  %v1923_v30 = vmul.f32 %v1915_v49, %v1874_v2 }
 0xca3   :  { %1928 = vrot.lane.b32.xlu0 %v1920_v40, %s7518_s13 }
 0xca8   :  { %v1737_v58 = vpop.f32.mrf.mxu3  ;;  %v1891_v10 = vpop.permute.xlu2 %1890 }
 0xca9   :  { %1744 = vst.msk [vmem:[#allocation5 + $0x20] sm:$0xff] %vm50_vm0, %v1737_v58  ;;  %v1901_v21 = vmul.f32 %v1891_v10, %v8249_v24 }
 0xcab   :  { %1934 = vrot.lane.b32.xlu0 %v1923_v30, %s7518_s13 }
 0xcb0   :  { %v1913_v25 = vpop.permute.xlu0 %1912  ;;  %v1740_v33 = vpop.f32.mrf.mxu3 }
 0xcb1   :  { %v1922_v42 = vmul.f32 %v1913_v25, %v1859_v7  ;;  %1745 = vst.msk [vmem:[#allocation5 + $0x28] sm:$0xff] %vm50_vm0, %v1740_v33 }
 0xcb3   :  { %1932 = vrot.lane.b32.xlu2 %v1922_v42, %s7518_s13  ;;  %s6893_s13 = sshll.u32 %s7524_s3, 4  ;;  %s6894_s13 = int_to_ptr.vmem [resolvable:$true] %s6893_s13 }
 0xcb8   :  { %v1889_v1 = vpop.permute.xlu0 %1888 }
 0xcb9   :  { %v1900_v48 = vmul.f32 %v1889_v1, %v8253_v6  ;;  %v8327_v1 = vld [vmem:[#allocation5 + $0x20] sm:$0xff] }
 0xcc0   :  { %v1895_v47 = vpop.permute.xlu0 %1894 }
 0xcc1   :  { %v1903_v52 = vmul.f32 %v1895_v47, %v1874_v2 }
 0xced   :  { %v1931_v17 = vpop.permute.xlu2 %1930 }
 0xcee   :  { %v8262_v45 = vadd.f32 %v1931_v17, %v1901_v21  ;;  %v8319_v21 = vld [vmem:[#allocation5 + $0x18] sm:$0xff]  ;;  %v8321_v17 = vld [vmem:[#allocation5 + $0x28] sm:$0xff] }
 0xcef   :  { %v2159_v47 = vsel %vm50_vm0, %v8319_v21, 0.0 }
 0xcf0   :  { %7286 = vtanh.f32 %v8262_v45 }
 0xcf6   :  { %v7287_v39 = vpop.eup %7286 }
 0xcf7   :  { %1954 = vrot.lane.b32.xlu0 %v7287_v39, %s7520_s25  ;;  %v8325_v39 = vld [vmem:[#allocation5 + $0x10] sm:$0xff] }
 0xd0d   :  { %v1933_v34 = vpop.permute.xlu2 %1932 }
 0xd0e   :  { %v8270_v31 = vadd.f32 %v1933_v34, %v1902_v51  ;;  %v2158_v34 = vsel %vm50_vm0, %v8325_v39, 0.0 }
 0xd0f   :  { %v2160_v51 = vadd.f32 %v2159_v47, %v2158_v34 }
 0xd15   :  { %v1929_v44 = vpop.permute.xlu0 %1928 }
 0xd16   :  { %v8267_v13 = vadd.f32 %v1929_v44, %v1900_v48  ;;  %v2168_v44 = vsel %vm50_vm0, %v8321_v17, 0.0 }
 0xd18   :  { %7288 = vtanh.f32 %v8267_v13 }
 0xd19   :  { %7290 = vtanh.f32 %v8270_v31 }
 0xd1d   :  { %v1935_v53 = vpop.permute.xlu0 %1934 }
 0xd1e   :  { %v7289_v15 = vpop.eup %7288  ;;  %v8272_v18 = vadd.f32 %v1935_v53, %v1903_v52  ;;  %v2167_v52 = vsel %vm50_vm0, %v8327_v1, 0.0  ;;  %v2185_v53 = vsel %vm50_vm0, 1.0, %v7517_v8 }
 0xd1f   :  { %1952 = vrot.lane.b32.xlu2 %v7289_v15, %s7520_s25  ;;  %v7291_v54 = vpop.eup %7290  ;;  %v2149_v15 = vsel %vm50_vm0, %v8331_v12, 0.0  ;;  %2186 = vadd.xlane.f32.xlu1 %v2185_v53 }
 0xd20   :  { %7292 = vtanh.f32 %v8272_v18 }
 0xd26   :  { %v7293_v55 = vpop.eup %7292 }
 0xd27   :  { %1958 = vrot.lane.b32.xlu0 %v7293_v55, %s7520_s25  ;;  %1956 = vrot.lane.b32.xlu2 %v7291_v54, %s7520_s25  ;;  %v2169_v54 = vadd.f32 %v2168_v44, %v2167_v52 }
 0xd69   :  { %v1955_v57 = vpop.permute.xlu0 %1954 }
 0xd6a   :  { %v8283_v62 = vmul.f32 %v1955_v57, %v8249_v24  ;;  %v2170_v57 = vrot.slane %v2169_v54, 4 }
 0xd6c   :  { %v2009_v43 = vsel %vm815_vm9, %v8283_v62, 0.0 }
 0xd79   :  { %v1953_v27 = vpop.permute.xlu2 %1952 }
 0xd7a   :  { %v8280_v59 = vmul.f32 %v1953_v27, %v8253_v6  ;;  %v2161_v27 = vrot.slane %v2160_v51, 4 }
 0xd7c   :  { %v2008_v46 = vsel %vm815_vm9, %v8280_v59, 0.0 }
 0xd7d   :  { %v2010_v63 = vadd.f32 %v2009_v43, %v2008_v46  ;;  %v2162_v43 = vadd.f32 %v2161_v27, %v2160_v51 }
 0xd81   :  { %v1957_v26 = vpop.permute.xlu2 %1956 }
 0xd82   :  { %v8285_v9 = vmul.f32 %v1957_v26, %v1859_v7 }
 0xd84   :  { %v2011_v56 = vsel %vm815_vm9, %v8285_v9, 0.0 }
 0xd85   :  { %v2012_v4 = vadd.f32 %v2011_v56, %v2010_v63  ;;  %v2171_v56 = vadd.f32 %v2170_v57, %v2169_v54 }
 0xd92   :  { %v2187_v54 = vpop.xlane.xlu1 %2186 }
 0xd99   :  { %v1959_v0 = vpop.permute.xlu0 %1958 }
 0xd9a   :  { %v8293_v3 = vmul.f32 %v1959_v0, %v1874_v2 }
 0xd9c   :  { %v2013_v24 = vsel %vm815_vm9, %v8293_v3, 0.0  ;;  %vm2192_vm9 = vcmask 1041409  }
 0xd9d   :  { %v2014_v19 = vadd.f32 %v2013_v24, %v2012_v4  ;;  %v2163_v4 = vrot.slane %v2162_v43, 2  ;;  %v2172_v24 = vrot.slane %v2171_v56, 2 }
 0xd9f   :  { %v2015_v5 = vrot.slane %v2014_v19, 4 }
 0xda1   :  { %v2016_v6 = vadd.f32 %v2015_v5, %v2014_v19 }
 0xda3   :  { %v2017_v40 = vrot.slane %v2016_v6, 2 }
 0xda5   :  { %v2018_v41 = vadd.f32 %v2017_v40, %v2016_v6  ;;  %v2164_v40 = vadd.f32 %v2163_v4, %v2162_v43  ;;  %v2226_v43 = vadd.f32 1e-30, %v2187_v54 }
 0xda7   :  { %v2019_v14 = vrot.slane %v2018_v41, 1  ;;  %vm2232_vm7 = vweird.f32 %v2226_v43 }
 0xda9   :  { %v2020_v16 = vadd.f32 %v2019_v14, %v2018_v41  ;;  %v2173_v14 = vadd.f32 %v2172_v24, %v2171_v56 }
 0xdab   :  { %v2021_v11 = vmul.f32 %v2020_v16, %v7580_v37 }
 0xdad   :  { %v2023_v29 = vsub.f32 %v8283_v62, %v2021_v11  ;;  %v2022_v61 = vsub.f32 %v8280_v59, %v2021_v11  ;;  %v2025_v49 = vsub.f32 %v8293_v3, %v2021_v11  ;;  %v2024_v60 = vsub.f32 %v8285_v9, %v2021_v11 }
 0xdaf   :  { %2032 = vrot.lane.b32.xlu0 %v2023_v29, %s7521_s1  ;;  %2030 = vrot.lane.b32.xlu2 %v2022_v61, %s7521_s1  ;;  %v2165_v29 = vrot.slane %v2164_v40, 1 }
 0xdb7   :  { %2036 = vrot.lane.b32.xlu0 %v2025_v49, %s7521_s1  ;;  %2034 = vrot.lane.b32.xlu2 %v2024_v60, %s7521_s1  ;;  %v2174_v49 = vrot.slane %v2173_v14, 1 }
 0xe09   :  { %v2031_v2 = vpop.permute.xlu2 %2030 }
 0xe0a   :  { %2042 = vxpose.xlu2.b32.start [1/4] (short) (narrow) %v2031_v2, 16 }
 0xe11   :  { %v2035_v37 = vpop.permute.xlu2 %2034 }
 0xe21   :  { %v2033_v58 = vpop.permute.xlu0 %2032 }
 0xe22   :  { %2043 = vxpose.xlu2.b32.cont [2/4] (short) (narrow) %v2033_v58, 16 }
 0xe29   :  { %v2037_v30 = vpop.permute.xlu0 %2036 }
 0xe2a   :  { %2092 = vmatpush.msra.mxu3 %v2037_v30  ;;  %2044 = vxpose.xlu2.b32.cont [3/4] (short) (narrow) %v2035_v37, 16 }
 0xe2c   :  { %2093 = vmatpush.msra.mxu3 %v2035_v37 }
 0xe2e   :  { %2094 = vmatpush.msra.mxu3 %v2033_v58  ;;  %v2166_v58 = vadd.f32 %v2165_v29, %v2164_v40 }
 0xe30   :  { %2095 = vmatpush.msra.mxu3 %v2031_v2 }
 0xe32   :  { %2045 = vxpose.xlu2.b32.end [4/4] (short) (narrow) %v2037_v30, 16  ;;  %v2175_v30 = vadd.f32 %v2174_v49, %v2173_v14 }
 0xe94   :  { %6986 = vset.pattern.permute.xlu2 %v7945_v28 }
 0xeb3   :  { %v2058_v35 = vpop.trf.xlu2 }
 0xeb4   :  { %6966 = vmatmul.msk.f32.vlgmr.msra.gmra.mxu3 %vm882_vm13, %v2058_v35 }
 0xebb   :  { %v2059_v36 = vpop.trf.xlu2 }
 0xebc   :  { %6967 = vmatmul.msk.f32.gmra.mxu3 %vm882_vm13, %v2059_v36  ;;  %vm2194_vm13 = vcmask 1042434  }
 0xf37   :  { %v2097_v23 = vpop.f32.mrf.mxu3 }
 0xf38   :  { %v2103_v38 = vmul.f32 %v2097_v23, %v7942_v22 }
 0xf3a   :  { %v2105_v7 = vmul.f32 0.5, %v2103_v38 }
 0xf3c   :  { %v2107_v10 = vsel %vm552_vm4, %v2103_v38, %v2105_v7  ;;  %vm2199_vm4 = vcmask 125952  }
 0xf3f   :  { %v2100_v20 = vpop.f32.mrf.mxu3 }
 0xf40   :  { %v2104_v25 = vmul.f32 %v2100_v20, %v7942_v22  ;;  %v8323_v22 = vld [vmem:[#allocation5 + $0x8] sm:$0xff] }
 0xf41   :  { %v2150_v50 = vsel %vm50_vm0, %v8323_v22, 0.0 }
 0xf42   :  { %v2106_v33 = vmul.f32 0.5, %v2104_v25  ;;  %v2151_v55 = vadd.f32 %v2150_v50, %v2149_v15 }
 0xf44   :  { %v2108_v42 = vsel %vm553_vm3, %v2104_v25, %v2106_v33  ;;  %v2152_v46 = vrot.slane %v2151_v55, 4  ;;  %vm2196_vm3 = vcmask 1043459  }
 0xf45   :  { %2129 = vmatpush.msra.mxu2 %v2108_v42 }
 0xf46   :  { %v2153_v63 = vadd.f32 %v2152_v46, %v2151_v55 }
 0xf47   :  { %2130 = vmatpush.msra.mxu2 %v2107_v10 }
 0xf48   :  { %6968 = vmatmul.msk.f32.vlgmr.msra.gmra.mxu2 %vm50_vm0, %v2107_v10  ;;  %v2154_v19 = vrot.slane %v2153_v63, 2 }
 0xf4a   :  { %v2155_v16 = vadd.f32 %v2154_v19, %v2153_v63  ;;  %v2238_v19 = vand.u32 2147483648, %v2226_v43 }
 0xf4c   :  { %v2156_v60 = vrot.slane %v2155_v16, 1  ;;  %v2239_v40 = vor.u32 1.1754944e-38, %v2238_v19 }
 0xf4e   :  { %v2157_v35 = vadd.f32 %v2156_v60, %v2155_v16 }
 0xf50   :  { %6969 = vmatmul.msk.f32.gmra.mxu2 %vm50_vm0, %v2108_v42  ;;  %v2193_v38 = vsel %vm2192_vm9, %v2166_v58, %v2157_v35 }
 0xf51   :  { %v2195_v20 = vsel %vm2194_vm13, %v2175_v30, %v2193_v38 }
 0xfcb   :  { %v2132_v48 = vpop.f32.mrf.mxu2 }
 0xfcc   :  { %2139 = vst.msk [vmem:[#allocation5 + $0x30] sm:$0xff] %vm50_vm0, %v2132_v48 }
 0xfd3   :  { %v2135_v26 = vpop.f32.mrf.mxu2  ;;  %v8347_v0 = vld [vmem:[#allocation5 + $0x30] sm:$0xff] }
 0xfd4   :  { %2140 = vst.msk [vmem:[#allocation5 + $0x38] sm:$0xff] %vm50_vm0, %v2135_v26  ;;  %v2176_v5 = vsel %vm50_vm0, %v8347_v0, 0.0 }
 0xfdb   :  { %v8349_v8 = vld [vmem:[#allocation5 + $0x38] sm:$0xff] }
 0xfdc   :  { %v2177_v6 = vsel %vm50_vm0, %v8349_v8, 0.0 }
 0xfdd   :  { %v2178_v41 = vadd.f32 %v2177_v6, %v2176_v5  ;;  %v2236_v6 = vand.u32 2147483647, %v2226_v43 }
 0xfdf   :  { %v2179_v11 = vrot.slane %v2178_v41, 4  ;;  %vm2237_vm11 = vcmp.eq.f32.partialorder %v2236_v6, 8.507059e+37 }
 0xfe1   :  { %v2180_v61 = vadd.f32 %v2179_v11, %v2178_v41 }
 0xfe3   :  { %v2181_v2 = vrot.slane %v2180_v61, 2 }
 0xfe5   :  { %v2182_v37 = vadd.f32 %v2181_v2, %v2180_v61 }
 0xfe7   :  { %v2183_v36 = vrot.slane %v2182_v37, 1 }
 0xfe9   :  { %v2184_v23 = vadd.f32 %v2183_v36, %v2182_v37 }
 0xfeb   :  { %v2197_v25 = vsel %vm2196_vm3, %v2184_v23, %v2195_v20 }
 0xfec   :  { %v2200_v7 = vsel %vm2199_vm4, %v2197_v25, 0.0 }
 0xfed   :  { %2201 = vadd.xlane.f32.xlu0 %v2200_v7 }
0x1060   :  { %v2202_v33 = vpop.xlane.xlu0 %2201 }
0x1061   :  { %v2203_v42 = vadd.f32 1e-30, %v2202_v33 }
0x1063   :  { %7294 = vrcp.f32 %v2203_v42  ;;  %v2215_v44 = vand.u32 2147483648, %v2203_v42  ;;  %v2213_v34 = vand.u32 2147483647, %v2203_v42  ;;  %vm2209_vm6 = vweird.f32 %v2203_v42 }
0x1064   :  { %7296 = vrcp.f32 %v2226_v43 }
0x1065   :  { %v2216_v52 = vor.u32 1.1754944e-38, %v2215_v44  ;;  %vm2214_vm5 = vcmp.eq.f32.partialorder %v2213_v34, 8.507059e+37 }
0x1069   :  { %v7295_v10 = vpop.eup %7294 }
0x106a   :  { %v2205_v47 = vmul.f32 %v7295_v10, %v2203_v42  ;;  %vm2210_vm1 = vweird.f32 %v7295_v10  ;;  %v7297_v56 = vpop.eup %7296 }
0x106b   :  { %vm2211_vm2 = vmor %vm2209_vm6, %vm2210_vm1  ;;  %v2228_v63 = vmul.f32 %v7297_v56, %v2226_v43  ;;  %vm2233_vm8 = vweird.f32 %v7297_v56 }
0x106c   :  { %v2206_v48 = vsub.f32 1.0, %v2205_v47  ;;  %vm2234_vm10 = vmor %vm2232_vm7, %vm2233_vm8 }
0x106d   :  { %v2229_v4 = vsub.f32 1.0, %v2228_v63 }
0x106e   :  { %v2207_v50 = vmul.f32 %v7295_v10, %v2206_v48 }
0x106f   :  { %v2230_v24 = vmul.f32 %v7297_v56, %v2229_v4 }
0x1070   :  { %v2208_v51 = vadd.f32 %v7295_v10, %v2207_v50 }
0x1071   :  { %v2231_v5 = vadd.f32 %v7297_v56, %v2230_v24 }
0x1072   :  { %v2212_v53 = vsel %vm2211_vm2, %v7295_v10, %v2208_v51 }
0x1073   :  { %v2217_v15 = vsel %vm2214_vm5, %v2216_v52, %v2212_v53  ;;  %v2235_v41 = vsel %vm2234_vm10, %v7297_v56, %v2231_v5 }
0x1074   :  { %v8359_v55 = vmul.f32 %v2217_v15, %v2187_v54  ;;  %v2240_v16 = vsel %vm2237_vm11, %v2239_v40, %v2235_v41 }
0x1076   :  { %v2220_v27 = vmul.f32 %v8359_v55, %v2197_v25 }
0x1078   :  { %v8362_v57 = vsub.f32 1.0, %v2220_v27 }
0x107a   :  { %v2222_v26 = vmul.f32 %v8362_v57, %v8362_v57 }
0x107c   :  { %v2223_v46 = vsel %vm2199_vm4, %v2222_v26, 0.0 }
0x107d   :  { %2224 = vadd.xlane.f32.xlu0 %v2223_v46 }
0x10f0   :  { %v8367_v14 = vpop.xlane.xlu0 %2224 }
0x10f1   :  { %v2241_v11 = vmul.f32 %v2240_v16, %v8367_v14 }
0x10f3   :  { %v8371_v29 = vadd.f32 %v2241_v11, %v8362_v57 }
0x10f5   :  { %v2256_v61 = vperm.slane %v8371_v29, 1  ;;  %v2243_v49 = vperm.slane %v8371_v29, 0  ;;  %v2269_v60 = vperm.slane %v8371_v29, 2  ;;  %v2282_v2 = vperm.slane %v8371_v29, 3 }
0x10f7   :  { %2261 = vperm.xlu1 %6987, %v2256_v61   ;;  %2254 = vperm.xlu2 %6986, %v2243_v49  }
0x10f8   :  { %2248 = vperm.xlu0 %6985, %v2243_v49  }
0x10ff   :  { %2274 = vperm.xlu1 %6987, %v2269_v60  }
0x1100   :  { %6988 = vset.pattern.permute.xlu0 %v7945_v28 }
0x1107   :  { %2287 = vperm.xlu1 %6987, %v2282_v2  }
0x1108   :  { %2267 = vperm.xlu0 %6988, %v2256_v61  }
0x1110   :  { %2280 = vperm.xlu0 %6988, %v2269_v60  }
0x1118   :  { %2293 = vperm.xlu0 %6988, %v2282_v2  }
0x1120   :  { %6989 = vset.pattern.permute.xlu0 %v7933_v32 }
0x1151   :  { %v2255_v30 = vpop.permute.xlu2 %2254 }
0x1152   :  { %v2296_v38 = vmul.f32 %v2255_v30, %v8323_v22 }
0x1154   :  { %v2304_v47 = vsel %vm50_vm0, %v2296_v38, 0.0 }
0x1169   :  { %v2262_v58 = vpop.permute.xlu1 %2261 }
0x116a   :  { %v2249_v37 = vpop.permute.xlu0 %2248  ;;  %v2297_v35 = vmul.f32 %v2262_v58, %v8325_v39 }
0x116b   :  { %v2295_v36 = vmul.f32 %v2249_v37, %v8331_v12 }
0x116c   :  { %v2312_v7 = vsel %vm50_vm0, %v2297_v35, 0.0 }
0x116d   :  { %v2303_v33 = vsel %vm50_vm0, %v2295_v36, 0.0 }
0x116e   :  { %v2305_v48 = vadd.f32 %v2304_v47, %v2303_v33 }
0x1170   :  { %v2306_v52 = vrot.slane %v2305_v48, 4 }
0x1171   :  { %v2275_v25 = vpop.permute.xlu1 %2274 }
0x1172   :  { %v2299_v44 = vmul.f32 %v2275_v25, %v8327_v1  ;;  %v2307_v46 = vadd.f32 %v2306_v52, %v2305_v48 }
0x1174   :  { %v2321_v53 = vsel %vm50_vm0, %v2299_v44, 0.0  ;;  %v2308_v5 = vrot.slane %v2307_v46, 2 }
0x1176   :  { %v2309_v49 = vadd.f32 %v2308_v5, %v2307_v46  ;;  %v2375_v5 = vadd.f32 1e-30, %v8367_v14 }
0x1178   :  { %v2310_v30 = vrot.slane %v2309_v49, 1  ;;  %vm2381_vm2 = vweird.f32 %v2375_v5 }
0x1179   :  { %v2288_v54 = vpop.permute.xlu1 %2287 }
0x117a   :  { %v2268_v23 = vpop.permute.xlu0 %2267  ;;  %v2301_v56 = vmul.f32 %v2288_v54, %v8347_v0 }
0x117b   :  { %v2298_v20 = vmul.f32 %v2268_v23, %v8319_v21 }
0x117c   :  { %v2330_v40 = vsel %vm50_vm0, %v2301_v56, 0.0 }
0x117d   :  { %v2313_v42 = vsel %vm50_vm0, %v2298_v20, 0.0  ;;  %v2311_v20 = vadd.f32 %v2310_v30, %v2309_v49  ;;  %v2385_v49 = vand.u32 2147483647, %v2375_v5 }
0x117e   :  { %v2314_v10 = vadd.f32 %v2313_v42, %v2312_v7 }
0x117f   :  { %vm2386_vm7 = vcmp.eq.f32.partialorder %v2385_v49, 8.507059e+37 }
0x1180   :  { %v2315_v50 = vrot.slane %v2314_v10, 4 }
0x1182   :  { %v2281_v34 = vpop.permute.xlu0 %2280  ;;  %v2316_v27 = vadd.f32 %v2315_v50, %v2314_v10 }
0x1183   :  { %v2300_v51 = vmul.f32 %v2281_v34, %v8321_v17 }
0x1184   :  { %v2317_v63 = vrot.slane %v2316_v27, 2 }
0x1185   :  { %v2322_v15 = vsel %vm50_vm0, %v2300_v51, 0.0 }
0x1186   :  { %v2323_v26 = vadd.f32 %v2322_v15, %v2321_v53  ;;  %v2318_v16 = vadd.f32 %v2317_v63, %v2316_v27 }
0x1188   :  { %v2324_v43 = vrot.slane %v2323_v26, 4  ;;  %v2319_v2 = vrot.slane %v2318_v16, 1 }
0x118a   :  { %v2325_v4 = vadd.f32 %v2324_v43, %v2323_v26  ;;  %v2294_v24 = vpop.permute.xlu0 %2293  ;;  %v2320_v36 = vadd.f32 %v2319_v2, %v2318_v16 }
0x118b   :  { %v2302_v19 = vmul.f32 %v2294_v24, %v8349_v8 }
0x118c   :  { %v2326_v6 = vrot.slane %v2325_v4, 2  ;;  %v2343_v33 = vsel %vm2192_vm9, %v2320_v36, %v2311_v20 }
0x118d   :  { %v2331_v41 = vsel %vm50_vm0, %v2302_v19, 0.0 }
0x118e   :  { %v2332_v11 = vadd.f32 %v2331_v41, %v2330_v40  ;;  %v2327_v61 = vadd.f32 %v2326_v6, %v2325_v4 }
0x1190   :  { %v2333_v60 = vrot.slane %v2332_v11, 4  ;;  %v2328_v37 = vrot.slane %v2327_v61, 1 }
0x1192   :  { %v2334_v58 = vadd.f32 %v2333_v60, %v2332_v11  ;;  %v2329_v38 = vadd.f32 %v2328_v37, %v2327_v61  ;;  %v2387_v61 = vand.u32 2147483648, %v2375_v5 }
0x1194   :  { %v2335_v35 = vrot.slane %v2334_v58, 2  ;;  %v2344_v42 = vsel %vm2194_vm13, %v2329_v38, %v2343_v33  ;;  %v2388_v60 = vor.u32 1.1754944e-38, %v2387_v61 }
0x1196   :  { %v2336_v23 = vadd.f32 %v2335_v35, %v2334_v58 }
0x1198   :  { %v2337_v25 = vrot.slane %v2336_v23, 1 }
0x119a   :  { %v2338_v7 = vadd.f32 %v2337_v25, %v2336_v23 }
0x119c   :  { %v2345_v10 = vsel %vm2196_vm3, %v2338_v7, %v2344_v42 }
0x119d   :  { %v2347_v47 = vmul.f32 %v2345_v10, %v8371_v29 }
0x119f   :  { %v2348_v48 = vsel %vm2199_vm4, %v2347_v47, 0.0 }
0x11a0   :  { %2349 = vadd.xlane.f32.xlu1 %v2348_v48 }
0x1213   :  { %v2350_v44 = vpop.xlane.xlu1 %2349 }
0x1214   :  { %v2351_v50 = vadd.f32 1e-30, %v2350_v44 }
0x1216   :  { %7298 = vrcp.f32 %v2351_v50  ;;  %v2363_v53 = vand.u32 2147483648, %v2351_v50  ;;  %v2361_v54 = vand.u32 2147483647, %v2351_v50  ;;  %vm2357_vm14 = vweird.f32 %v2351_v50 }
0x1217   :  { %7300 = vrcp.f32 %v2375_v5 }
0x1218   :  { %v2364_v26 = vor.u32 1.1754944e-38, %v2363_v53  ;;  %vm2362_vm1 = vcmp.eq.f32.partialorder %v2361_v54, 8.507059e+37 }
0x121c   :  { %v7299_v34 = vpop.eup %7298 }
0x121d   :  { %v2353_v51 = vmul.f32 %v7299_v34, %v2351_v50  ;;  %vm2358_vm12 = vweird.f32 %v7299_v34  ;;  %v7301_v6 = vpop.eup %7300 }
0x121e   :  { %vm2359_vm15 = vmor %vm2357_vm14, %vm2358_vm12  ;;  %v2377_v40 = vmul.f32 %v7301_v6, %v2375_v5  ;;  %vm2382_vm6 = vweird.f32 %v7301_v6 }
0x121f   :  { %v2354_v52 = vsub.f32 1.0, %v2353_v51  ;;  %vm2383_vm5 = vmor %vm2381_vm2, %vm2382_vm6 }
0x1220   :  { %v2378_v41 = vsub.f32 1.0, %v2377_v40 }
0x1221   :  { %v2355_v15 = vmul.f32 %v7299_v34, %v2354_v52 }
0x1222   :  { %v2379_v16 = vmul.f32 %v7301_v6, %v2378_v41 }
0x1223   :  { %v2356_v27 = vadd.f32 %v7299_v34, %v2355_v15 }
0x1224   :  { %v2380_v11 = vadd.f32 %v7301_v6, %v2379_v16 }
0x1225   :  { %v2360_v46 = vsel %vm2359_vm15, %v7299_v34, %v2356_v27 }
0x1226   :  { %v2365_v43 = vsel %vm2362_vm1, %v2364_v26, %v2360_v46 }
0x1227   :  { %v8401_v56 = vmul.f32 %v2365_v43, %v8367_v14 }
0x1229   :  { %v2369_v63 = vmul.f32 %v8401_v56, %v2345_v10 }
0x122b   :  { %v8405_v4 = vsub.f32 %v8362_v57, %v2369_v63  ;;  %v2384_v57 = vsel %vm2383_vm5, %v7301_v6, %v2380_v11 }
0x122c   :  { %v2389_v2 = vsel %vm2386_vm7, %v2388_v60, %v2384_v57 }
0x122d   :  { %v2371_v24 = vmul.f32 %v8405_v4, %v8405_v4 }
0x122f   :  { %v2372_v19 = vsel %vm2199_vm4, %v2371_v24, 0.0 }
0x1230   :  { %2373 = vadd.xlane.f32.xlu0 %v2372_v19 }
0x12a3   :  { %v8411_v58 = vpop.xlane.xlu0 %2373 }
0x12a4   :  { %v2390_v37 = vmul.f32 %v2389_v2, %v8411_v58 }
0x12a6   :  { %v2391_v14 = vmul.f32 %v2390_v37, %v8371_v29 }
0x12a8   :  { %v8416_v30 = vadd.f32 %v2391_v14, %v8405_v4 }
0x12aa   :  { %v2406_v35 = vperm.slane %v8416_v30, 1  ;;  %v2393_v36 = vperm.slane %v8416_v30, 0  ;;  %v2419_v23 = vperm.slane %v8416_v30, 2  ;;  %v2432_v38 = vperm.slane %v8416_v30, 3 }
0x12ac   :  { %2411 = vperm.xlu0 %6989, %v2406_v35   ;;  %2404 = vperm.xlu2 %6986, %v2393_v36  }
0x12ad   :  { %2398 = vperm.xlu1 %6987, %v2393_v36  }
0x12b4   :  { %2417 = vperm.xlu2 %6986, %v2406_v35  }
0x12b5   :  { %6991 = vset.pattern.permute.xlu1 %v7945_v28 }
0x12bc   :  { %6990 = vset.pattern.permute.xlu2 %v7933_v32 }
0x12bd   :  { %2430 = vperm.xlu1 %6991, %v2419_v23  }
0x12c4   :  { %2424 = vperm.xlu2 %6990, %v2419_v23  }
0x12c5   :  { %2443 = vperm.xlu1 %6991, %v2432_v38  }
0x12cc   :  { %2437 = vperm.xlu2 %6990, %v2432_v38  }
0x12cd   :  { %6995 = vset.pattern.permute.xlu1 %v7933_v32 }
0x12d4   :  { %6994 = vset.pattern.permute.xlu2 %v7945_v28 }
0x1306   :  { %v2405_v20 = vpop.permute.xlu2 %2404 }
0x1307   :  { %v2446_v47 = vmul.f32 %v2405_v20, %v8323_v22 }
0x1309   :  { %v2454_v51 = vsel %vm50_vm0, %v2446_v47, 0.0 }
0x130e   :  { %v2418_v25 = vpop.permute.xlu2 %2417 }
0x130f   :  { %v2448_v48 = vmul.f32 %v2418_v25, %v8319_v21 }
0x1311   :  { %v2463_v52 = vsel %vm50_vm0, %v2448_v48, 0.0 }
0x131e   :  { %v2412_v7 = vpop.permute.xlu0 %2411  ;;  %v2425_v34 = vpop.permute.xlu2 %2424 }
0x131f   :  { %v2399_v33 = vpop.permute.xlu1 %2398  ;;  %v2447_v42 = vmul.f32 %v2412_v7, %v8325_v39  ;;  %v2449_v54 = vmul.f32 %v2425_v34, %v8327_v1 }
0x1320   :  { %v2445_v10 = vmul.f32 %v2399_v33, %v8331_v12 }
0x1321   :  { %v2462_v44 = vsel %vm50_vm0, %v2447_v42, 0.0  ;;  %v2471_v63 = vsel %vm50_vm0, %v2449_v54, 0.0 }
0x1322   :  { %v2453_v50 = vsel %vm50_vm0, %v2445_v10, 0.0  ;;  %v2464_v53 = vadd.f32 %v2463_v52, %v2462_v44 }
0x1323   :  { %v2455_v15 = vadd.f32 %v2454_v51, %v2453_v50 }
0x1324   :  { %v2465_v27 = vrot.slane %v2464_v53, 4 }
0x1325   :  { %v2456_v26 = vrot.slane %v2455_v15, 4 }
0x1326   :  { %v2466_v19 = vadd.f32 %v2465_v27, %v2464_v53  ;;  %v2438_v6 = vpop.permute.xlu2 %2437 }
0x1327   :  { %v2457_v5 = vadd.f32 %v2456_v26, %v2455_v15  ;;  %v2451_v16 = vmul.f32 %v2438_v6, %v8347_v0 }
0x1328   :  { %v2467_v11 = vrot.slane %v2466_v19, 2 }
0x1329   :  { %v2458_v61 = vrot.slane %v2457_v5, 2  ;;  %v2480_v37 = vsel %vm50_vm0, %v2451_v16, 0.0  ;;  %v2367_v16 = vmul.f32 %v8401_v56, %v8371_v29  ;;  %v2525_v56 = vadd.f32 1e-30, %v8411_v58 }
0x132a   :  { %v2468_v35 = vadd.f32 %v2467_v11, %v2466_v19 }
0x132b   :  { %v2459_v36 = vadd.f32 %v2458_v61, %v2457_v5  ;;  %vm2531_vm15 = vweird.f32 %v2525_v56 }
0x132c   :  { %v2469_v25 = vrot.slane %v2468_v35, 1 }
0x132d   :  { %v2460_v7 = vrot.slane %v2459_v36, 1 }
0x132e   :  { %v2470_v47 = vadd.f32 %v2469_v25, %v2468_v35  ;;  %v2537_v25 = vand.u32 2147483648, %v2525_v56 }
0x132f   :  { %v2431_v46 = vpop.permute.xlu1 %2430  ;;  %v2461_v48 = vadd.f32 %v2460_v7, %v2459_v36 }
0x1330   :  { %v2450_v43 = vmul.f32 %v2431_v46, %v8321_v17 }
0x1331   :  { %v2493_v52 = vsel %vm2192_vm9, %v2470_v47, %v2461_v48 }
0x1332   :  { %v2472_v24 = vsel %vm50_vm0, %v2450_v43, 0.0 }
0x1333   :  { %v2473_v40 = vadd.f32 %v2472_v24, %v2471_v63 }
0x1335   :  { %v2474_v41 = vrot.slane %v2473_v40, 4 }
0x1337   :  { %v2475_v49 = vadd.f32 %v2474_v41, %v2473_v40  ;;  %v2444_v57 = vpop.permute.xlu1 %2443 }
0x1338   :  { %v2452_v60 = vmul.f32 %v2444_v57, %v8349_v8  ;;  %v2368_v57 = vadd.f32 %v2367_v16, %v8359_v55 }
0x1339   :  { %v2476_v2 = vrot.slane %v2475_v49, 2 }
0x133a   :  { %v2481_v14 = vsel %vm50_vm0, %v2452_v60, 0.0 }
0x133b   :  { %v2482_v23 = vadd.f32 %v2481_v14, %v2480_v37  ;;  %v2477_v38 = vadd.f32 %v2476_v2, %v2475_v49 }
0x133d   :  { %v2483_v20 = vrot.slane %v2482_v23, 4  ;;  %v2478_v42 = vrot.slane %v2477_v38, 1 }
0x133f   :  { %v2484_v33 = vadd.f32 %v2483_v20, %v2482_v23  ;;  %v2479_v50 = vadd.f32 %v2478_v42, %v2477_v38 }
0x1341   :  { %v2485_v10 = vrot.slane %v2484_v33, 2  ;;  %v2494_v53 = vsel %vm2194_vm13, %v2479_v50, %v2493_v52 }
0x1343   :  { %v2486_v44 = vadd.f32 %v2485_v10, %v2484_v33  ;;  %v2538_v33 = vor.u32 1.1754944e-38, %v2537_v25 }
0x1345   :  { %v2487_v34 = vrot.slane %v2486_v44, 1 }
0x1347   :  { %v2488_v51 = vadd.f32 %v2487_v34, %v2486_v44 }
0x1349   :  { %v2495_v15 = vsel %vm2196_vm3, %v2488_v51, %v2494_v53 }
0x134a   :  { %v2497_v54 = vmul.f32 %v2495_v15, %v8416_v30 }
0x134c   :  { %v2498_v27 = vsel %vm2199_vm4, %v2497_v54, 0.0 }
0x134d   :  { %2499 = vadd.xlane.f32.xlu2 %v2498_v27 }
0x13c0   :  { %v2500_v26 = vpop.xlane.xlu2 %2499 }
0x13c1   :  { %v2501_v46 = vadd.f32 1e-30, %v2500_v26 }
0x13c3   :  { %7302 = vrcp.f32 %v2501_v46  ;;  %v2513_v19 = vand.u32 2147483648, %v2501_v46  ;;  %v2511_v6 = vand.u32 2147483647, %v2501_v46  ;;  %vm2507_vm10 = vweird.f32 %v2501_v46 }
0x13c4   :  { %7304 = vrcp.f32 %v2525_v56 }
0x13c5   :  { %v2514_v41 = vor.u32 1.1754944e-38, %v2513_v19  ;;  %vm2512_vm12 = vcmp.eq.f32.partialorder %v2511_v6, 8.507059e+37 }
0x13c9   :  { %v7303_v43 = vpop.eup %7302 }
0x13ca   :  { %v2503_v63 = vmul.f32 %v7303_v43, %v2501_v46  ;;  %vm2508_vm8 = vweird.f32 %v7303_v43  ;;  %v7305_v36 = vpop.eup %7304 }
0x13cb   :  { %vm2509_vm11 = vmor %vm2507_vm10, %vm2508_vm8  ;;  %v2527_v23 = vmul.f32 %v7305_v36, %v2525_v56  ;;  %vm2532_vm14 = vweird.f32 %v7305_v36 }
0x13cc   :  { %v2504_v24 = vsub.f32 1.0, %v2503_v63  ;;  %vm2533_vm1 = vmor %vm2531_vm15, %vm2532_vm14 }
0x13cd   :  { %v2528_v55 = vsub.f32 1.0, %v2527_v23 }
0x13ce   :  { %v2505_v5 = vmul.f32 %v7303_v43, %v2504_v24 }
0x13cf   :  { %v2529_v38 = vmul.f32 %v7305_v36, %v2528_v55 }
0x13d0   :  { %v2506_v40 = vadd.f32 %v7303_v43, %v2505_v5 }
0x13d1   :  { %v2530_v20 = vadd.f32 %v7305_v36, %v2529_v38 }
0x13d2   :  { %v2510_v11 = vsel %vm2509_vm11, %v7303_v43, %v2506_v40 }
0x13d3   :  { %v2515_v61 = vsel %vm2512_vm12, %v2514_v41, %v2510_v11  ;;  %v2534_v7 = vsel %vm2533_vm1, %v7305_v36, %v2530_v20 }
0x13d4   :  { %v2516_v49 = vmul.f32 %v2515_v61, %v8411_v58 }
0x13d6   :  { %v2519_v60 = vmul.f32 %v2516_v49, %v2495_v15  ;;  %v2517_v2 = vmul.f32 %v2516_v49, %v8416_v30 }
0x13d8   :  { %v8453_v37 = vsub.f32 %v8405_v4, %v2519_v60  ;;  %v8455_v14 = vadd.f32 %v2517_v2, %v2368_v57  ;;  %v2535_v4 = vand.u32 2147483647, %v2525_v56 }
0x13da   :  { %v2521_v35 = vmul.f32 %v8453_v37, %v8453_v37  ;;  %vm2536_vm6 = vcmp.eq.f32.partialorder %v2535_v4, 8.507059e+37 }
0x13db   :  { %v2539_v10 = vsel %vm2536_vm6, %v2538_v33, %v2534_v7 }
0x13dc   :  { %v2522_v29 = vsel %vm2199_vm4, %v2521_v35, 0.0 }
0x13dd   :  { %2523 = vadd.xlane.f32.xlu1 %v2522_v29 }
0x1450   :  { %v8461_v42 = vpop.xlane.xlu1 %2523 }
0x1451   :  { %v2540_v47 = vmul.f32 %v2539_v10, %v8461_v42 }
0x1453   :  { %v2541_v58 = vmul.f32 %v2540_v47, %v8416_v30 }
0x1455   :  { %v8466_v48 = vadd.f32 %v2541_v58, %v8453_v37 }
0x1457   :  { %v2569_v44 = vperm.slane %v8466_v48, 2  ;;  %v2556_v50 = vperm.slane %v8466_v48, 1  ;;  %v2543_v34 = vperm.slane %v8466_v48, 0  ;;  %v2582_v51 = vperm.slane %v8466_v48, 3 }
0x1459   :  { %2574 = vperm.xlu1 %6995, %v2569_v44   ;;  %2567 = vperm.xlu2 %6994, %v2556_v50  }
0x145a   :  { %2548 = vperm.xlu0 %6989, %v2543_v34  }
0x1461   :  { %6997 = vset.pattern.permute.xlu2 %v7933_v32 }
0x1462   :  { %6992 = vset.pattern.permute.xlu0 %v7945_v28 }
0x1469   :  { %2587 = vperm.xlu2 %6997, %v2582_v51  }
0x146a   :  { %2554 = vperm.xlu0 %6992, %v2543_v34  }
0x1471   :  { %7001 = vset.pattern.permute.xlu2 %v7945_v28 }
0x1472   :  { %6993 = vset.pattern.permute.xlu0 %v7933_v32 }
0x147a   :  { %2561 = vperm.xlu0 %6993, %v2556_v50  }
0x1482   :  { %6996 = vset.pattern.permute.xlu0 %v7945_v28 }
0x148a   :  { %2580 = vperm.xlu0 %6996, %v2569_v44  }
0x1492   :  { %2593 = vperm.xlu0 %6996, %v2582_v51  }
0x149a   :  { %6998 = vset.pattern.permute.xlu0 %v7933_v32 }
0x14b3   :  { %v2568_v15 = vpop.permute.xlu2 %2567 }
0x14b4   :  { %v2598_v27 = vmul.f32 %v2568_v15, %v8319_v21 }
0x14b6   :  { %v2613_v63 = vsel %vm50_vm0, %v2598_v27, 0.0 }
0x14c3   :  { %v2588_v2 = vpop.permute.xlu2 %2587 }
0x14c4   :  { %v2601_v23 = vmul.f32 %v2588_v2, %v8347_v0 }
0x14c6   :  { %v2630_v33 = vsel %vm50_vm0, %v2601_v23, 0.0 }
0x14cb   :  { %v2575_v19 = vpop.permute.xlu1 %2574 }
0x14cc   :  { %v2549_v30 = vpop.permute.xlu0 %2548  ;;  %v2599_v41 = vmul.f32 %v2575_v19, %v8327_v1 }
0x14cd   :  { %v2595_v46 = vmul.f32 %v2549_v30, %v8331_v12 }
0x14ce   :  { %v2621_v57 = vsel %vm50_vm0, %v2599_v41, 0.0 }
0x14cf   :  { %v2603_v6 = vsel %vm50_vm0, %v2595_v46, 0.0 }
0x14dc   :  { %v2555_v52 = vpop.permute.xlu0 %2554 }
0x14dd   :  { %v2596_v26 = vmul.f32 %v2555_v52, %v8323_v22 }
0x14df   :  { %v2604_v24 = vsel %vm50_vm0, %v2596_v26, 0.0 }
0x14e0   :  { %v2605_v40 = vadd.f32 %v2604_v24, %v2603_v6 }
0x14e2   :  { %v2606_v49 = vrot.slane %v2605_v40, 4 }
0x14e4   :  { %v2607_v56 = vadd.f32 %v2606_v49, %v2605_v40 }
0x14e6   :  { %v2608_v4 = vrot.slane %v2607_v56, 2 }
0x14e8   :  { %v2609_v50 = vadd.f32 %v2608_v4, %v2607_v56 }
0x14ec   :  { %v2562_v53 = vpop.permute.xlu0 %2561 }
0x14ed   :  { %v2597_v54 = vmul.f32 %v2562_v53, %v8325_v39  ;;  %v2610_v53 = vrot.slane %v2609_v50, 1 }
0x14ef   :  { %v2612_v43 = vsel %vm50_vm0, %v2597_v54, 0.0  ;;  %v2611_v46 = vadd.f32 %v2610_v53, %v2609_v50 }
0x14f0   :  { %v2614_v5 = vadd.f32 %v2613_v63, %v2612_v43 }
0x14f2   :  { %v2615_v16 = vrot.slane %v2614_v5, 4 }
0x14f4   :  { %v2616_v35 = vadd.f32 %v2615_v16, %v2614_v5 }
0x14f6   :  { %v2617_v55 = vrot.slane %v2616_v35, 2 }
0x14f8   :  { %v2618_v47 = vadd.f32 %v2617_v55, %v2616_v35 }
0x14fa   :  { %v2619_v51 = vrot.slane %v2618_v47, 1 }
0x14fc   :  { %v2581_v11 = vpop.permute.xlu0 %2580  ;;  %v2620_v54 = vadd.f32 %v2619_v51, %v2618_v47 }
0x14fd   :  { %v2600_v61 = vmul.f32 %v2581_v11, %v8321_v17 }
0x14fe   :  { %v2643_v24 = vsel %vm2192_vm9, %v2620_v54, %v2611_v46 }
0x14ff   :  { %v2622_v60 = vsel %vm50_vm0, %v2600_v61, 0.0 }
0x1500   :  { %v2623_v29 = vadd.f32 %v2622_v60, %v2621_v57 }
0x1502   :  { %v2624_v36 = vrot.slane %v2623_v29, 4 }
0x1504   :  { %v2625_v38 = vadd.f32 %v2624_v36, %v2623_v29  ;;  %v2594_v20 = vpop.permute.xlu0 %2593 }
0x1505   :  { %v2602_v25 = vmul.f32 %v2594_v20, %v8349_v8 }
0x1506   :  { %v2626_v7 = vrot.slane %v2625_v38, 2 }
0x1507   :  { %v2631_v10 = vsel %vm50_vm0, %v2602_v25, 0.0 }
0x1508   :  { %v2632_v58 = vadd.f32 %v2631_v10, %v2630_v33  ;;  %v2627_v44 = vadd.f32 %v2626_v7, %v2625_v38  ;;  %v2675_v33 = vadd.f32 1e-30, %v8461_v42 }
0x150a   :  { %v2633_v34 = vrot.slane %v2632_v58, 4  ;;  %v2628_v52 = vrot.slane %v2627_v44, 1  ;;  %vm2681_vm11 = vweird.f32 %v2675_v33 }
0x150c   :  { %v2634_v30 = vadd.f32 %v2633_v34, %v2632_v58  ;;  %v2629_v26 = vadd.f32 %v2628_v52, %v2627_v44  ;;  %v2685_v34 = vand.u32 2147483647, %v2675_v33 }
0x150e   :  { %v2635_v15 = vrot.slane %v2634_v30, 2  ;;  %v2644_v19 = vsel %vm2194_vm13, %v2629_v26, %v2643_v24  ;;  %vm2686_vm14 = vcmp.eq.f32.partialorder %v2685_v34, 8.507059e+37 }
0x1510   :  { %v2636_v27 = vadd.f32 %v2635_v15, %v2634_v30 }
0x1512   :  { %v2637_v43 = vrot.slane %v2636_v27, 1 }
0x1514   :  { %v2638_v63 = vadd.f32 %v2637_v43, %v2636_v27 }
0x1516   :  { %v2645_v5 = vsel %vm2196_vm3, %v2638_v63, %v2644_v19 }
0x1517   :  { %v2647_v6 = vmul.f32 %v2645_v5, %v8466_v48 }
0x1519   :  { %v2648_v40 = vsel %vm2199_vm4, %v2647_v6, 0.0 }
0x151a   :  { %2649 = vadd.xlane.f32.xlu1 %v2648_v40 }
0x158d   :  { %v2650_v41 = vpop.xlane.xlu1 %2649 }
0x158e   :  { %v2651_v16 = vadd.f32 1e-30, %v2650_v41 }
0x1590   :  { %7306 = vrcp.f32 %v2651_v16  ;;  %v2663_v57 = vand.u32 2147483648, %v2651_v16  ;;  %v2661_v2 = vand.u32 2147483647, %v2651_v16  ;;  %vm2657_vm5 = vweird.f32 %v2651_v16 }
0x1591   :  { %7308 = vrcp.f32 %v2675_v33 }
0x1592   :  { %v2664_v29 = vor.u32 1.1754944e-38, %v2663_v57  ;;  %vm2662_vm8 = vcmp.eq.f32.partialorder %v2661_v2, 8.507059e+37 }
0x1596   :  { %v7307_v11 = vpop.eup %7306 }
0x1597   :  { %v2653_v61 = vmul.f32 %v7307_v11, %v2651_v16  ;;  %vm2658_vm2 = vweird.f32 %v7307_v11  ;;  %v7309_v10 = vpop.eup %7308 }
0x1598   :  { %vm2659_vm7 = vmor %vm2657_vm5, %vm2658_vm2  ;;  %v2677_v47 = vmul.f32 %v7309_v10, %v2675_v33  ;;  %vm2682_vm10 = vweird.f32 %v7309_v10 }
0x1599   :  { %v2654_v49 = vsub.f32 1.0, %v2653_v61  ;;  %vm2683_vm12 = vmor %vm2681_vm11, %vm2682_vm10 }
0x159a   :  { %v2678_v58 = vsub.f32 1.0, %v2677_v47 }
0x159b   :  { %v2655_v60 = vmul.f32 %v7307_v11, %v2654_v49 }
0x159c   :  { %v2679_v44 = vmul.f32 %v7309_v10, %v2678_v58 }
0x159d   :  { %v2656_v35 = vadd.f32 %v7307_v11, %v2655_v60 }
0x159e   :  { %v2680_v50 = vadd.f32 %v7309_v10, %v2679_v44 }
0x159f   :  { %v2660_v56 = vsel %vm2659_vm7, %v7307_v11, %v2656_v35 }
0x15a0   :  { %v2665_v36 = vsel %vm2662_vm8, %v2664_v29, %v2660_v56 }
0x15a1   :  { %v2666_v23 = vmul.f32 %v2665_v36, %v8461_v42 }
0x15a3   :  { %v2669_v55 = vmul.f32 %v2666_v23, %v2645_v5  ;;  %v2667_v38 = vmul.f32 %v2666_v23, %v8466_v48 }
0x15a5   :  { %v8502_v20 = vsub.f32 %v8453_v37, %v2669_v55  ;;  %v8505_v25 = vadd.f32 %v2667_v38, %v8455_v14  ;;  %v2687_v37 = vand.u32 2147483648, %v2675_v33  ;;  %v2684_v14 = vsel %vm2683_vm12, %v7309_v10, %v2680_v50 }
0x15a7   :  { %v2671_v4 = vmul.f32 %v8502_v20, %v8502_v20  ;;  %v2688_v51 = vor.u32 1.1754944e-38, %v2687_v37 }
0x15a9   :  { %v2672_v7 = vsel %vm2199_vm4, %v2671_v4, 0.0  ;;  %v2689_v30 = vsel %vm2686_vm14, %v2688_v51, %v2684_v14 }
0x15aa   :  { %2673 = vadd.xlane.f32.xlu2 %v2672_v7 }
0x161d   :  { %v8511_v52 = vpop.xlane.xlu2 %2673 }
0x161e   :  { %v2690_v53 = vmul.f32 %v2689_v30, %v8511_v52 }
0x1620   :  { %v2691_v42 = vmul.f32 %v2690_v53, %v8466_v48 }
0x1622   :  { %v8516_v15 = vadd.f32 %v2691_v42, %v8502_v20 }
0x1624   :  { %v2719_v54 = vperm.slane %v8516_v15, 2  ;;  %v2706_v27 = vperm.slane %v8516_v15, 1  ;;  %v2693_v26 = vperm.slane %v8516_v15, 0  ;;  %v2732_v48 = vperm.slane %v8516_v15, 3 }
0x1626   :  { %2724 = vperm.xlu1 %6995, %v2719_v54   ;;  %2717 = vperm.xlu2 %7001, %v2706_v27  }
0x1627   :  { %2698 = vperm.xlu0 %6998, %v2693_v26  }
0x162e   :  { %7003 = vset.pattern.permute.xlu2 %v7933_v32  ;;  %7007 = vset.pattern.permute.xlu1 %v7945_v28 }
0x162f   :  { %6999 = vset.pattern.permute.xlu0 %v7945_v28 }
0x1636   :  { %2737 = vperm.xlu2 %7003, %v2732_v48  }
0x1637   :  { %2704 = vperm.xlu0 %6999, %v2693_v26  }
0x163f   :  { %7000 = vset.pattern.permute.xlu0 %v7933_v32 }
0x1647   :  { %2711 = vperm.xlu0 %7000, %v2706_v27  }
0x164f   :  { %7002 = vset.pattern.permute.xlu0 %v7945_v28 }
0x1657   :  { %2730 = vperm.xlu0 %7002, %v2719_v54  }
0x165f   :  { %2743 = vperm.xlu0 %7002, %v2732_v48  }
0x1667   :  { %7004 = vset.pattern.permute.xlu0 %v7933_v32 }
0x1680   :  { %v2718_v24 = vpop.permute.xlu2 %2717 }
0x1681   :  { %v2748_v5 = vmul.f32 %v2718_v24, %v8319_v21 }
0x1683   :  { %v2763_v16 = vsel %vm50_vm0, %v2748_v5, 0.0 }
0x1690   :  { %v2738_v56 = vpop.permute.xlu2 %2737 }
0x1691   :  { %v2751_v4 = vmul.f32 %v2738_v56, %v8347_v0 }
0x1698   :  { %v2725_v61 = vpop.permute.xlu1 %2724 }
0x1699   :  { %v2699_v46 = vpop.permute.xlu0 %2698  ;;  %v2749_v2 = vmul.f32 %v2725_v61, %v8327_v1 }
0x169a   :  { %v2745_v40 = vmul.f32 %v2699_v46, %v8331_v12 }
0x169b   :  { %v2771_v12 = vsel %vm50_vm0, %v2749_v2, 0.0 }
0x169c   :  { %v2753_v57 = vsel %vm50_vm0, %v2745_v40, 0.0 }
0x16a9   :  { %v2705_v43 = vpop.permute.xlu0 %2704 }
0x16aa   :  { %v2746_v6 = vmul.f32 %v2705_v43, %v8323_v22 }
0x16ac   :  { %v2754_v11 = vsel %vm50_vm0, %v2746_v6, 0.0 }
0x16ad   :  { %v2755_v60 = vadd.f32 %v2754_v11, %v2753_v57 }
0x16af   :  { %v2756_v22 = vrot.slane %v2755_v60, 4 }
0x16b1   :  { %v2757_v55 = vadd.f32 %v2756_v22, %v2755_v60 }
0x16b3   :  { %v2758_v47 = vrot.slane %v2757_v55, 2 }
0x16b5   :  { %v2759_v14 = vadd.f32 %v2758_v47, %v2757_v55 }
0x16b7   :  { %v2760_v0 = vrot.slane %v2759_v14, 1 }
0x16b9   :  { %v2712_v63 = vpop.permute.xlu0 %2711 }
0x16ba   :  { %v2747_v19 = vmul.f32 %v2712_v63, %v8325_v39 }
0x16bc   :  { %v2762_v41 = vsel %vm50_vm0, %v2747_v19, 0.0 }
0x16bd   :  { %v2764_v49 = vadd.f32 %v2763_v16, %v2762_v41 }
0x16bf   :  { %v2765_v39 = vrot.slane %v2764_v49, 4 }
0x16c1   :  { %v2766_v36 = vadd.f32 %v2765_v39, %v2764_v49 }
0x16c3   :  { %v2767_v7 = vrot.slane %v2766_v36, 2 }
0x16c5   :  { %v2768_v50 = vadd.f32 %v2767_v7, %v2766_v36 }
0x16c7   :  { %v2769_v30 = vrot.slane %v2768_v50, 1 }
0x16c9   :  { %v2731_v35 = vpop.permute.xlu0 %2730  ;;  %v2770_v27 = vadd.f32 %v2769_v30, %v2768_v50 }
0x16ca   :  { %v2750_v21 = vmul.f32 %v2731_v35, %v8321_v17  ;;  %v2780_v17 = vsel %vm50_vm0, %v2751_v4, 0.0 }
0x16cc   :  { %v2772_v29 = vsel %vm50_vm0, %v2750_v21, 0.0 }
0x16cd   :  { %v2773_v23 = vadd.f32 %v2772_v29, %v2771_v12 }
0x16cf   :  { %v2774_v38 = vrot.slane %v2773_v23, 4 }
0x16d1   :  { %v2775_v33 = vadd.f32 %v2774_v38, %v2773_v23  ;;  %v2744_v10 = vpop.permute.xlu0 %2743  ;;  %v2825_v38 = vadd.f32 1e-30, %v8511_v52 }
0x16d2   :  { %v2752_v1 = vmul.f32 %v2744_v10, %v8349_v8  ;;  %v2761_v8 = vadd.f32 %v2760_v0, %v2759_v14 }
0x16d3   :  { %v2776_v58 = vrot.slane %v2775_v33, 2  ;;  %vm2831_vm7 = vweird.f32 %v2825_v38  ;;  %v2835_v47 = vand.u32 2147483647, %v2825_v38 }
0x16d4   :  { %v2781_v44 = vsel %vm50_vm0, %v2752_v1, 0.0  ;;  %v2793_v63 = vsel %vm2192_vm9, %v2770_v27, %v2761_v8  ;;  %v8584_v8 = vld [vmem:[#allocation5 + $0x8] sm:$0xff] }
0x16d5   :  { %v2782_v37 = vadd.f32 %v2781_v44, %v2780_v17  ;;  %v2777_v34 = vadd.f32 %v2776_v58, %v2775_v33  ;;  %vm2836_vm10 = vcmp.eq.f32.partialorder %v2835_v47, 8.507059e+37 }
0x16d7   :  { %v2783_v51 = vrot.slane %v2782_v37, 4  ;;  %v2778_v42 = vrot.slane %v2777_v34, 1 }
0x16d9   :  { %v2784_v53 = vadd.f32 %v2783_v51, %v2782_v37  ;;  %v2779_v48 = vadd.f32 %v2778_v42, %v2777_v34 }
0x16db   :  { %v2785_v54 = vrot.slane %v2784_v53, 2  ;;  %v2794_v24 = vsel %vm2194_vm13, %v2779_v48, %v2793_v63 }
0x16dd   :  { %v2786_v26 = vadd.f32 %v2785_v54, %v2784_v53  ;;  %v8578_v54 = vld [vmem:[#allocation5 + $0x10] sm:$0xff] }
0x16df   :  { %v2787_v46 = vrot.slane %v2786_v26, 1 }
0x16e1   :  { %v2788_v43 = vadd.f32 %v2787_v46, %v2786_v26  ;;  %v8581_v26 = vld [vmem:[#allocation5 + $0x18] sm:$0xff] }
0x16e3   :  { %v2795_v19 = vsel %vm2196_vm3, %v2788_v43, %v2794_v24  ;;  %v8587_v43 = vld [vmem:[#allocation5] sm:$0xff] }
0x16e4   :  { %v2797_v5 = vmul.f32 %v2795_v19, %v8516_v15 }
0x16e6   :  { %v2798_v6 = vsel %vm2199_vm4, %v2797_v5, 0.0 }
0x16e7   :  { %2799 = vadd.xlane.f32.xlu1 %v2798_v6 }
0x175a   :  { %v2800_v40 = vpop.xlane.xlu1 %2799 }
0x175b   :  { %v2801_v41 = vadd.f32 1e-30, %v2800_v40 }
0x175d   :  { %7310 = vrcp.f32 %v2801_v41  ;;  %v2813_v49 = vand.u32 2147483648, %v2801_v41  ;;  %v2811_v60 = vand.u32 2147483647, %v2801_v41  ;;  %vm2807_vm1 = vweird.f32 %v2801_v41 }
0x175e   :  { %7312 = vrcp.f32 %v2825_v38 }
0x175f   :  { %v2814_v39 = vor.u32 1.1754944e-38, %v2813_v49  ;;  %vm2812_vm2 = vcmp.eq.f32.partialorder %v2811_v60, 8.507059e+37  ;;  %v8597_v60 = vld [vmem:[#allocation5 + $0x28] sm:$0xff] }
0x1763   :  { %v7311_v16 = vpop.eup %7310 }
0x1764   :  { %v2803_v11 = vmul.f32 %v7311_v16, %v2801_v41  ;;  %vm2808_vm15 = vweird.f32 %v7311_v16  ;;  %v7313_v4 = vpop.eup %7312 }
0x1765   :  { %vm2809_vm6 = vmor %vm2807_vm1, %vm2808_vm15  ;;  %v2827_v7 = vmul.f32 %v7313_v4, %v2825_v38  ;;  %vm2832_vm5 = vweird.f32 %v7313_v4 }
0x1766   :  { %v2804_v61 = vsub.f32 1.0, %v2803_v11  ;;  %vm2833_vm8 = vmor %vm2831_vm7, %vm2832_vm5  ;;  %v8594_v11 = vld [vmem:[#allocation5 + $0x20] sm:$0xff] }
0x1767   :  { %v2828_v33 = vsub.f32 1.0, %v2827_v7 }
0x1768   :  { %v2805_v57 = vmul.f32 %v7311_v16, %v2804_v61 }
0x1769   :  { %v2829_v10 = vmul.f32 %v7313_v4, %v2828_v33 }
0x176a   :  { %v2806_v2 = vadd.f32 %v7311_v16, %v2805_v57 }
0x176b   :  { %v2830_v1 = vadd.f32 %v7313_v4, %v2829_v10 }
0x176c   :  { %v2810_v35 = vsel %vm2809_vm6, %v7311_v16, %v2806_v2 }
0x176d   :  { %v2815_v21 = vsel %vm2812_vm2, %v2814_v39, %v2810_v35 }
0x176e   :  { %v2816_v22 = vmul.f32 %v2815_v21, %v8511_v52 }
0x1770   :  { %v2819_v12 = vmul.f32 %v2816_v22, %v2795_v19  ;;  %v2817_v29 = vmul.f32 %v2816_v22, %v8516_v15 }
0x1772   :  { %v8552_v56 = vsub.f32 %v8502_v20, %v2819_v12  ;;  %v8555_v36 = vadd.f32 %v2817_v29, %v8505_v25  ;;  %v2837_v20 = vand.u32 2147483648, %v2825_v38  ;;  %v2834_v25 = vsel %vm2833_vm8, %v7313_v4, %v2830_v1  ;;  %v8602_v38 = vld [vmem:[#allocation5 + $0x30] sm:$0xff]  ;;  %v8605_v1 = vld [vmem:[#allocation5 + $0x38] sm:$0xff] }
0x1774   :  { %v2821_v23 = vmul.f32 %v8552_v56, %v8552_v56  ;;  %v2838_v58 = vor.u32 1.1754944e-38, %v2837_v20 }
0x1776   :  { %v2822_v55 = vsel %vm2199_vm4, %v2821_v23, 0.0  ;;  %v2839_v44 = vsel %vm2836_vm10, %v2838_v58, %v2834_v25 }
0x1777   :  { %2823 = vadd.xlane.f32.xlu2 %v2822_v55 }
0x17ea   :  { %v8561_v17 = vpop.xlane.xlu2 %2823 }
0x17eb   :  { %v2840_v50 = vmul.f32 %v2839_v44, %v8561_v17 }
0x17ed   :  { %v2841_v52 = vmul.f32 %v2840_v50, %v8516_v15 }
0x17ef   :  { %v8566_v37 = vadd.f32 %v2841_v52, %v8552_v56 }
0x17f1   :  { %v2869_v34 = vperm.slane %v8566_v37, 2  ;;  %v2856_v14 = vperm.slane %v8566_v37, 1  ;;  %v2843_v51 = vperm.slane %v8566_v37, 0  ;;  %v2882_v15 = vperm.slane %v8566_v37, 3 }
0x17f3   :  { %2874 = vperm.xlu2 %7003, %v2869_v34   ;;  %2867 = vperm.xlu1 %7007, %v2856_v14  }
0x17f4   :  { %2848 = vperm.xlu0 %7004, %v2843_v51  }
0x17fb   :  { %7009 = vset.pattern.permute.xlu1 %v7933_v32  ;;  %7013 = vset.pattern.permute.xlu2 %v7945_v28 }
0x17fc   :  { %7005 = vset.pattern.permute.xlu0 %v7945_v28 }
0x1803   :  { %2887 = vperm.xlu1 %7009, %v2882_v15  }
0x1804   :  { %2854 = vperm.xlu0 %7005, %v2843_v51  }
0x180c   :  { %7006 = vset.pattern.permute.xlu0 %v7933_v32 }
0x1814   :  { %2861 = vperm.xlu0 %7006, %v2856_v14  }
0x181c   :  { %7008 = vset.pattern.permute.xlu0 %v7945_v28 }
0x1824   :  { %2880 = vperm.xlu0 %7008, %v2869_v34  }
0x182c   :  { %2893 = vperm.xlu0 %7008, %v2882_v15  }
0x1834   :  { %7010 = vset.pattern.permute.xlu0 %v7933_v32 }
0x184d   :  { %v2875_v6 = vpop.permute.xlu2 %2874 }
0x184e   :  { %v2899_v61 = vmul.f32 %v8594_v11, %v2875_v6 }
0x1850   :  { %v2921_v35 = vsel %vm50_vm0, %v2899_v61, 0.0 }
0x1865   :  { %v2868_v0 = vpop.permute.xlu1 %2867 }
0x1866   :  { %v2849_v30 = vpop.permute.xlu0 %2848  ;;  %v2898_v48 = vmul.f32 %v8581_v26, %v2868_v0 }
0x1867   :  { %v2895_v63 = vmul.f32 %v8587_v43, %v2849_v30 }
0x1868   :  { %v2913_v19 = vsel %vm50_vm0, %v2898_v48, 0.0 }
0x1869   :  { %v2903_v41 = vsel %vm50_vm0, %v2895_v63, 0.0 }
0x1875   :  { %v2888_v22 = vpop.permute.xlu1 %2887 }
0x1876   :  { %v2855_v53 = vpop.permute.xlu0 %2854  ;;  %v2901_v4 = vmul.f32 %v8602_v38, %v2888_v22 }
0x1877   :  { %v2896_v46 = vmul.f32 %v8584_v8, %v2855_v53 }
0x1878   :  { %v2930_v58 = vsel %vm50_vm0, %v2901_v4, 0.0 }
0x1879   :  { %v2904_v5 = vsel %vm50_vm0, %v2896_v46, 0.0 }
0x187a   :  { %v2905_v16 = vadd.f32 %v2904_v5, %v2903_v41 }
0x187c   :  { %v2906_v39 = vrot.slane %v2905_v16, 4 }
0x187e   :  { %v2907_v23 = vadd.f32 %v2906_v39, %v2905_v16 }
0x1880   :  { %v2908_v47 = vrot.slane %v2907_v23, 2 }
0x1882   :  { %v2909_v14 = vadd.f32 %v2908_v47, %v2907_v23 }
0x1886   :  { %v2862_v42 = vpop.permute.xlu0 %2861 }
0x1887   :  { %v2897_v27 = vmul.f32 %v8578_v54, %v2862_v42  ;;  %v2910_v42 = vrot.slane %v2909_v14, 1 }
0x1889   :  { %v2912_v24 = vsel %vm50_vm0, %v2897_v27, 0.0  ;;  %v2911_v63 = vadd.f32 %v2910_v42, %v2909_v14 }
0x188a   :  { %v2914_v40 = vadd.f32 %v2913_v19, %v2912_v24 }
0x188c   :  { %v2915_v49 = vrot.slane %v2914_v40, 4 }
0x188e   :  { %v2916_v12 = vadd.f32 %v2915_v49, %v2914_v40 }
0x1890   :  { %v2917_v7 = vrot.slane %v2916_v12, 2 }
0x1892   :  { %v2918_v50 = vadd.f32 %v2917_v7, %v2916_v12 }
0x1894   :  { %v2919_v15 = vrot.slane %v2918_v50, 1 }
0x1896   :  { %v2881_v57 = vpop.permute.xlu0 %2880  ;;  %v2920_v27 = vadd.f32 %v2919_v15, %v2918_v50 }
0x1897   :  { %v2900_v2 = vmul.f32 %v8597_v60, %v2881_v57 }
0x1898   :  { %v2943_v5 = vsel %vm2192_vm9, %v2920_v27, %v2911_v63 }
0x1899   :  { %v2922_v21 = vsel %vm50_vm0, %v2900_v2, 0.0 }
0x189a   :  { %v2923_v29 = vadd.f32 %v2922_v21, %v2921_v35 }
0x189c   :  { %v2924_v55 = vrot.slane %v2923_v29, 4 }
0x189e   :  { %v2925_v33 = vadd.f32 %v2924_v55, %v2923_v29  ;;  %v2894_v10 = vpop.permute.xlu0 %2893 }
0x189f   :  { %v2902_v20 = vmul.f32 %v8605_v1, %v2894_v10 }
0x18a0   :  { %v2926_v25 = vrot.slane %v2925_v33, 2 }
0x18a1   :  { %v2931_v44 = vsel %vm50_vm0, %v2902_v20, 0.0 }
0x18a2   :  { %v2932_v52 = vadd.f32 %v2931_v44, %v2930_v58  ;;  %v2927_v34 = vadd.f32 %v2926_v25, %v2925_v33  ;;  %v2975_v58 = vadd.f32 1e-30, %v8561_v17 }
0x18a4   :  { %v2933_v51 = vrot.slane %v2932_v52, 4  ;;  %v2928_v53 = vrot.slane %v2927_v34, 1  ;;  %vm2981_vm6 = vweird.f32 %v2975_v58 }
0x18a6   :  { %v2934_v30 = vadd.f32 %v2933_v51, %v2932_v52  ;;  %v2929_v46 = vadd.f32 %v2928_v53, %v2927_v34  ;;  %v2985_v51 = vand.u32 2147483647, %v2975_v58 }
0x18a8   :  { %v2935_v0 = vrot.slane %v2934_v30, 2  ;;  %v2944_v6 = vsel %vm2194_vm13, %v2929_v46, %v2943_v5  ;;  %vm2986_vm5 = vcmp.eq.f32.partialorder %v2985_v51, 8.507059e+37 }
0x18aa   :  { %v2936_v48 = vadd.f32 %v2935_v0, %v2934_v30 }
0x18ac   :  { %v2937_v24 = vrot.slane %v2936_v48, 1 }
0x18ae   :  { %v2938_v19 = vadd.f32 %v2937_v24, %v2936_v48 }
0x18b0   :  { %v2945_v40 = vsel %vm2196_vm3, %v2938_v19, %v2944_v6 }
0x18b1   :  { %v2947_v41 = vmul.f32 %v2945_v40, %v8566_v37 }
0x18b3   :  { %v2948_v16 = vsel %vm2199_vm4, %v2947_v41, 0.0 }
0x18b4   :  { %2949 = vadd.xlane.f32.xlu2 %v2948_v16 }
0x1927   :  { %v2950_v61 = vpop.xlane.xlu2 %2949 }
0x1928   :  { %v2951_v49 = vadd.f32 1e-30, %v2950_v61 }
0x192a   :  { %7314 = vrcp.f32 %v2951_v49  ;;  %v2963_v35 = vand.u32 2147483648, %v2951_v49  ;;  %v2961_v22 = vand.u32 2147483647, %v2951_v49  ;;  %vm2957_vm12 = vweird.f32 %v2951_v49 }
0x192b   :  { %7316 = vrcp.f32 %v2975_v58 }
0x192c   :  { %v2964_v29 = vor.u32 1.1754944e-38, %v2963_v35  ;;  %vm2962_vm15 = vcmp.eq.f32.partialorder %v2961_v22, 8.507059e+37 }
0x1930   :  { %v7315_v57 = vpop.eup %7314 }
0x1931   :  { %v2953_v2 = vmul.f32 %v7315_v57, %v2951_v49  ;;  %vm2958_vm11 = vweird.f32 %v7315_v57  ;;  %v7317_v44 = vpop.eup %7316 }
0x1932   :  { %vm2959_vm14 = vmor %vm2957_vm12, %vm2958_vm11  ;;  %v2977_v50 = vmul.f32 %v7317_v44, %v2975_v58  ;;  %vm2982_vm1 = vweird.f32 %v7317_v44 }
0x1933   :  { %v2954_v39 = vsub.f32 1.0, %v2953_v2  ;;  %vm2983_vm2 = vmor %vm2981_vm6, %vm2982_vm1 }
0x1934   :  { %v2978_v52 = vsub.f32 1.0, %v2977_v50 }
0x1935   :  { %v2955_v21 = vmul.f32 %v7315_v57, %v2954_v39 }
0x1936   :  { %v2979_v34 = vmul.f32 %v7317_v44, %v2978_v52 }
0x1937   :  { %v2956_v12 = vadd.f32 %v7315_v57, %v2955_v21 }
0x1938   :  { %v2980_v14 = vadd.f32 %v7317_v44, %v2979_v34 }
0x1939   :  { %v2960_v23 = vsel %vm2959_vm14, %v7315_v57, %v2956_v12 }
0x193a   :  { %v2965_v55 = vsel %vm2962_vm15, %v2964_v29, %v2960_v23 }
0x193b   :  { %v2966_v4 = vmul.f32 %v2965_v55, %v8561_v17 }
0x193d   :  { %v2969_v7 = vmul.f32 %v2966_v4, %v2945_v40  ;;  %v2967_v33 = vmul.f32 %v2966_v4, %v8566_v37 }
0x193f   :  { %v8618_v10 = vsub.f32 %v8552_v56, %v2969_v7  ;;  %v8621_v20 = vadd.f32 %v2967_v33, %v8555_v36  ;;  %v2987_v56 = vand.u32 2147483648, %v2975_v58  ;;  %v2984_v36 = vsel %vm2983_vm2, %v7317_v44, %v2980_v14 }
0x1941   :  { %v2971_v47 = vmul.f32 %v8618_v10, %v8618_v10  ;;  %v2988_v15 = vor.u32 1.1754944e-38, %v2987_v56 }
0x1943   :  { %v2972_v25 = vsel %vm2199_vm4, %v2971_v47, 0.0  ;;  %v2989_v30 = vsel %vm2986_vm5, %v2988_v15, %v2984_v36 }
0x1944   :  { %2973 = vadd.xlane.f32.xlu1 %v2972_v25 }
0x19b7   :  { %v8627_v53 = vpop.xlane.xlu1 %2973 }
0x19b8   :  { %v2990_v42 = vmul.f32 %v2989_v30, %v8627_v53 }
0x19ba   :  { %v2991_v17 = vmul.f32 %v2990_v42, %v8566_v37 }
0x19bc   :  { %v8632_v0 = vadd.f32 %v2991_v17, %v8618_v10 }
0x19be   :  { %v3019_v27 = vperm.slane %v8632_v0, 2  ;;  %v3006_v48 = vperm.slane %v8632_v0, 1  ;;  %v2993_v46 = vperm.slane %v8632_v0, 0  ;;  %v3032_v37 = vperm.slane %v8632_v0, 3 }
0x19c0   :  { %3024 = vperm.xlu1 %7009, %v3019_v27   ;;  %3017 = vperm.xlu2 %7013, %v3006_v48  }
0x19c1   :  { %2998 = vperm.xlu0 %7010, %v2993_v46  }
0x19c8   :  { %7016 = vset.pattern.permute.xlu1 %v7945_v28  ;;  %7015 = vset.pattern.permute.xlu2 %v7933_v32 }
0x19c9   :  { %7011 = vset.pattern.permute.xlu0 %v7945_v28 }
0x19d0   :  { %3043 = vperm.xlu1 %7016, %v3032_v37   ;;  %3037 = vperm.xlu2 %7015, %v3032_v37  }
0x19d1   :  { %3004 = vperm.xlu0 %7011, %v2993_v46  }
0x19d8   :  { %7017 = vset.pattern.permute.xlu1 %v7933_v32 }
0x19d9   :  { %7012 = vset.pattern.permute.xlu0 %v7933_v32 }
0x19e1   :  { %3011 = vperm.xlu0 %7012, %v3006_v48  }
0x19e9   :  { %7014 = vset.pattern.permute.xlu0 %v7945_v28 }
0x19f1   :  { %3030 = vperm.xlu0 %7014, %v3019_v27  }
0x1a1a   :  { %v3018_v5 = vpop.permute.xlu2 %3017 }
0x1a1b   :  { %v3048_v40 = vmul.f32 %v8581_v26, %v3018_v5 }
0x1a1d   :  { %v3063_v35 = vsel %vm50_vm0, %v3048_v40, 0.0 }
0x1a2a   :  { %v3038_v61 = vpop.permute.xlu2 %3037 }
0x1a2b   :  { %v3051_v21 = vmul.f32 %v8602_v38, %v3038_v61 }
0x1a2d   :  { %v3080_v4 = vsel %vm50_vm0, %v3051_v21, 0.0 }
0x1a32   :  { %v3025_v24 = vpop.permute.xlu1 %3024 }
0x1a33   :  { %v2999_v63 = vpop.permute.xlu0 %2998  ;;  %v3049_v44 = vmul.f32 %v8594_v11, %v3025_v24 }
0x1a34   :  { %v3045_v57 = vmul.f32 %v8587_v43, %v2999_v63 }
0x1a35   :  { %v3071_v51 = vsel %vm50_vm0, %v3049_v44, 0.0 }
0x1a36   :  { %v3053_v29 = vsel %vm50_vm0, %v3045_v57, 0.0 }
0x1a42   :  { %v3044_v6 = vpop.permute.xlu1 %3043 }
0x1a43   :  { %v3005_v19 = vpop.permute.xlu0 %3004  ;;  %v3052_v2 = vmul.f32 %v8605_v1, %v3044_v6 }
0x1a44   :  { %v3046_v41 = vmul.f32 %v8584_v8, %v3005_v19 }
0x1a45   :  { %v3081_v23 = vsel %vm50_vm0, %v3052_v2, 0.0 }
0x1a46   :  { %v3054_v22 = vsel %vm50_vm0, %v3046_v41, 0.0  ;;  %v3082_v7 = vadd.f32 %v3081_v23, %v3080_v4 }
0x1a47   :  { %v3055_v55 = vadd.f32 %v3054_v22, %v3053_v29 }
0x1a48   :  { %v3083_v25 = vrot.slane %v3082_v7, 4 }
0x1a49   :  { %v3056_v47 = vrot.slane %v3055_v55, 4 }
0x1a4a   :  { %v3084_v34 = vadd.f32 %v3083_v25, %v3082_v7 }
0x1a4b   :  { %v3057_v50 = vadd.f32 %v3056_v47, %v3055_v55 }
0x1a4c   :  { %v3085_v42 = vrot.slane %v3084_v34, 2 }
0x1a4d   :  { %v3058_v36 = vrot.slane %v3057_v50, 2 }
0x1a4e   :  { %v3086_v37 = vadd.f32 %v3085_v42, %v3084_v34 }
0x1a4f   :  { %v3059_v48 = vadd.f32 %v3058_v36, %v3057_v50 }
0x1a50   :  { %v3087_v6 = vrot.slane %v3086_v37, 1 }
0x1a51   :  { %v3060_v19 = vrot.slane %v3059_v48, 1 }
0x1a53   :  { %v3012_v16 = vpop.permute.xlu0 %3011 }
0x1a54   :  { %v3047_v49 = vmul.f32 %v8578_v54, %v3012_v16  ;;  %v3061_v16 = vadd.f32 %v3060_v19, %v3059_v48 }
0x1a56   :  { %v3062_v39 = vsel %vm50_vm0, %v3047_v49, 0.0  ;;  %v3088_v49 = vadd.f32 %v3087_v6, %v3086_v37 }
0x1a57   :  { %v3064_v12 = vadd.f32 %v3063_v35, %v3062_v39 }
0x1a59   :  { %v3065_v33 = vrot.slane %v3064_v12, 4 }
0x1a5b   :  { %v3066_v58 = vadd.f32 %v3065_v33, %v3064_v12 }
0x1a5d   :  { %v3067_v14 = vrot.slane %v3066_v58, 2 }
0x1a5f   :  { %v3068_v17 = vadd.f32 %v3067_v14, %v3066_v58 }
0x1a61   :  { %v3069_v63 = vrot.slane %v3068_v17, 1 }
0x1a63   :  { %v3031_v52 = vpop.permute.xlu0 %3030  ;;  %v3070_v40 = vadd.f32 %v3069_v63, %v3068_v17 }
0x1a64   :  { %v3050_v56 = vmul.f32 %v8597_v60, %v3031_v52 }
0x1a65   :  { %v3093_v57 = vsel %vm2192_vm9, %v3070_v40, %v3061_v16 }
0x1a66   :  { %v3072_v15 = vsel %vm50_vm0, %v3050_v56, 0.0 }
0x1a67   :  { %v3073_v30 = vadd.f32 %v3072_v15, %v3071_v51  ;;  %v3125_v15 = vadd.f32 1e-30, %v8627_v53 }
0x1a69   :  { %v3074_v27 = vrot.slane %v3073_v30, 4  ;;  %vm3131_vm14 = vweird.f32 %v3125_v15 }
0x1a6b   :  { %v3075_v46 = vadd.f32 %v3074_v27, %v3073_v30 }
0x1a6d   :  { %v3076_v24 = vrot.slane %v3075_v46, 2 }
0x1a6f   :  { %v3077_v5 = vadd.f32 %v3076_v24, %v3075_v46  ;;  %v3135_v46 = vand.u32 2147483647, %v3125_v15 }
0x1a71   :  { %v3078_v41 = vrot.slane %v3077_v5, 1  ;;  %vm3136_vm1 = vcmp.eq.f32.partialorder %v3135_v46, 8.507059e+37 }
0x1a73   :  { %v3079_v61 = vadd.f32 %v3078_v41, %v3077_v5 }
0x1a75   :  { %v3094_v2 = vsel %vm2194_vm13, %v3079_v61, %v3093_v57 }
0x1a76   :  { %v3095_v39 = vsel %vm2196_vm3, %v3088_v49, %v3094_v2 }
0x1a77   :  { %v3097_v35 = vmul.f32 %v3095_v39, %v8632_v0 }
0x1a79   :  { %v3098_v21 = vsel %vm2199_vm4, %v3097_v35, 0.0 }
0x1a7a   :  { %3099 = vadd.xlane.f32.xlu0 %v3098_v21 }
0x1aed   :  { %v3100_v22 = vpop.xlane.xlu0 %3099 }
0x1aee   :  { %v3101_v12 = vadd.f32 1e-30, %v3100_v22 }
0x1af0   :  { %7318 = vrcp.f32 %v3101_v12  ;;  %v3113_v4 = vand.u32 2147483648, %v3101_v12  ;;  %v3111_v33 = vand.u32 2147483647, %v3101_v12  ;;  %vm3107_vm8 = vweird.f32 %v3101_v12 }
0x1af1   :  { %7320 = vrcp.f32 %v3125_v15 }
0x1af2   :  { %v3114_v25 = vor.u32 1.1754944e-38, %v3113_v4  ;;  %vm3112_vm11 = vcmp.eq.f32.partialorder %v3111_v33, 8.507059e+37 }
0x1af6   :  { %v7319_v29 = vpop.eup %7318 }
0x1af7   :  { %v3103_v23 = vmul.f32 %v7319_v29, %v3101_v12  ;;  %vm3108_vm7 = vweird.f32 %v7319_v29  ;;  %v7321_v30 = vpop.eup %7320 }
0x1af8   :  { %vm3109_vm10 = vmor %vm3107_vm8, %vm3108_vm7  ;;  %v3127_v42 = vmul.f32 %v7321_v30, %v3125_v15  ;;  %vm3132_vm12 = vweird.f32 %v7321_v30 }
0x1af9   :  { %v3104_v55 = vsub.f32 1.0, %v3103_v23  ;;  %vm3133_vm15 = vmor %vm3131_vm14, %vm3132_vm12 }
0x1afa   :  { %v3128_v17 = vsub.f32 1.0, %v3127_v42 }
0x1afb   :  { %v3105_v7 = vmul.f32 %v7319_v29, %v3104_v55 }
0x1afc   :  { %v3129_v27 = vmul.f32 %v7321_v30, %v3128_v17 }
0x1afd   :  { %v3106_v47 = vadd.f32 %v7319_v29, %v3105_v7 }
0x1afe   :  { %v3130_v48 = vadd.f32 %v7321_v30, %v3129_v27 }
0x1aff   :  { %v3110_v58 = vsel %vm3109_vm10, %v7319_v29, %v3106_v47 }
0x1b00   :  { %v3115_v44 = vsel %vm3112_vm11, %v3114_v25, %v3110_v58 }
0x1b01   :  { %v3116_v50 = vmul.f32 %v3115_v44, %v8627_v53 }
0x1b03   :  { %v3119_v52 = vmul.f32 %v3116_v50, %v3095_v39  ;;  %v3117_v34 = vmul.f32 %v3116_v50, %v8632_v0 }
0x1b05   :  { %v8668_v14 = vsub.f32 %v8618_v10, %v3119_v52  ;;  %v8671_v56 = vadd.f32 %v3117_v34, %v8621_v20  ;;  %v3137_v10 = vand.u32 2147483648, %v3125_v15  ;;  %v3134_v20 = vsel %vm3133_vm15, %v7321_v30, %v3130_v48 }
0x1b07   :  { %v3121_v51 = vmul.f32 %v8668_v14, %v8668_v14  ;;  %v3138_v37 = vor.u32 1.1754944e-38, %v3137_v10 }
0x1b09   :  { %v3122_v36 = vsel %vm2199_vm4, %v3121_v51, 0.0  ;;  %v3139_v24 = vsel %vm3136_vm1, %v3138_v37, %v3134_v20 }
0x1b0a   :  { %3123 = vadd.xlane.f32.xlu2 %v3122_v36 }
0x1b7d   :  { %v8677_v63 = vpop.xlane.xlu2 %3123 }
0x1b7e   :  { %v3140_v19 = vmul.f32 %v3139_v24, %v8677_v63 }
0x1b80   :  { %v3141_v53 = vmul.f32 %v3140_v19, %v8632_v0 }
0x1b82   :  { %v8682_v5 = vadd.f32 %v3141_v53, %v8668_v14 }
0x1b84   :  { %v3182_v6 = vperm.slane %v8682_v5, 3  ;;  %v3169_v40 = vperm.slane %v8682_v5, 2  ;;  %v3143_v41 = vperm.slane %v8682_v5, 0  ;;  %v3156_v0 = vperm.slane %v8682_v5, 1 }
0x1b86   :  { %3187 = vperm.xlu2 %7015, %v3182_v6   ;;  %3180 = vperm.xlu0 %7014, %v3169_v40  }
0x1b87   :  { %3148 = vperm.xlu1 %7017, %v3143_v41  }
0x1b8e   :  { %7027 = vset.pattern.permute.xlu0 %v7933_v32 }
0x1b8f   :  { %7018 = vset.pattern.permute.xlu1 %v7945_v28 }
0x1b97   :  { %3154 = vperm.xlu1 %7018, %v3143_v41  }
0x1b9f   :  { %7019 = vset.pattern.permute.xlu1 %v7933_v32 }
0x1ba7   :  { %3161 = vperm.xlu1 %7019, %v3156_v0  }
0x1baf   :  { %7020 = vset.pattern.permute.xlu1 %v7945_v28 }
0x1bb7   :  { %3167 = vperm.xlu1 %7020, %v3156_v0  }
0x1bbf   :  { %7021 = vset.pattern.permute.xlu1 %v7933_v32 }
0x1bc7   :  { %3174 = vperm.xlu1 %7021, %v3169_v40  }
0x1bcf   :  { %7022 = vset.pattern.permute.xlu1 %v7945_v28 }
0x1bd7   :  { %3193 = vperm.xlu1 %7022, %v3182_v6  }
0x1bdf   :  { %7026 = vset.pattern.permute.xlu1 %v7933_v32 }
0x1be0   :  { %v3188_v36 = vpop.permute.xlu2 %3187 }
0x1be1   :  { %v3201_v17 = vmul.f32 %v8602_v38, %v3188_v36 }
0x1be3   :  { %v3230_v37 = vsel %vm50_vm0, %v3201_v17, 0.0 }
0x1bf8   :  { %v3181_v2 = vpop.permute.xlu0 %3180 }
0x1bf9   :  { %v3149_v16 = vpop.permute.xlu1 %3148  ;;  %v3200_v22 = vmul.f32 %v8597_v60, %v3181_v2 }
0x1bfa   :  { %v3195_v29 = vmul.f32 %v8587_v43, %v3149_v16 }
0x1bfb   :  { %v3222_v47 = vsel %vm50_vm0, %v3200_v22, 0.0 }
0x1bfc   :  { %v3203_v58 = vsel %vm50_vm0, %v3195_v29, 0.0 }
0x1c09   :  { %v3155_v61 = vpop.permute.xlu1 %3154 }
0x1c0a   :  { %v3196_v35 = vmul.f32 %v8584_v8, %v3155_v61 }
0x1c0c   :  { %v3204_v4 = vsel %vm50_vm0, %v3196_v35, 0.0 }
0x1c0d   :  { %v3205_v50 = vadd.f32 %v3204_v4, %v3203_v58 }
0x1c0f   :  { %v3206_v51 = vrot.slane %v3205_v50, 4 }
0x1c11   :  { %v3207_v42 = vadd.f32 %v3206_v51, %v3205_v50 }
0x1c13   :  { %v3208_v20 = vrot.slane %v3207_v42, 2 }
0x1c15   :  { %v3209_v40 = vadd.f32 %v3208_v20, %v3207_v42 }
0x1c19   :  { %v3162_v49 = vpop.permute.xlu1 %3161 }
0x1c1a   :  { %v3197_v21 = vmul.f32 %v8578_v54, %v3162_v49  ;;  %v3210_v49 = vrot.slane %v3209_v40, 1 }
0x1c1c   :  { %v3212_v7 = vsel %vm50_vm0, %v3197_v21, 0.0  ;;  %v3211_v21 = vadd.f32 %v3210_v49, %v3209_v40 }
0x1c29   :  { %v3168_v57 = vpop.permute.xlu1 %3167 }
0x1c2a   :  { %v3198_v39 = vmul.f32 %v8581_v26, %v3168_v57 }
0x1c2c   :  { %v3213_v23 = vsel %vm50_vm0, %v3198_v39, 0.0 }
0x1c2d   :  { %v3214_v25 = vadd.f32 %v3213_v23, %v3212_v7 }
0x1c2f   :  { %v3215_v52 = vrot.slane %v3214_v25, 4 }
0x1c31   :  { %v3216_v15 = vadd.f32 %v3215_v52, %v3214_v25 }
0x1c33   :  { %v3217_v27 = vrot.slane %v3216_v15, 2 }
0x1c35   :  { %v3218_v19 = vadd.f32 %v3217_v27, %v3216_v15 }
0x1c37   :  { %v3219_v0 = vrot.slane %v3218_v19, 1 }
0x1c39   :  { %v3175_v12 = vpop.permute.xlu1 %3174  ;;  %v3220_v2 = vadd.f32 %v3219_v0, %v3218_v19 }
0x1c3a   :  { %v3199_v55 = vmul.f32 %v8594_v11, %v3175_v12 }
0x1c3b   :  { %v3243_v29 = vsel %vm2192_vm9, %v3220_v2, %v3211_v21 }
0x1c3c   :  { %v3221_v33 = vsel %vm50_vm0, %v3199_v55, 0.0 }
0x1c3d   :  { %v3223_v44 = vadd.f32 %v3222_v47, %v3221_v33 }
0x1c3f   :  { %v3224_v34 = vrot.slane %v3223_v44, 4 }
0x1c41   :  { %v3225_v30 = vadd.f32 %v3224_v34, %v3223_v44 }
0x1c43   :  { %v3226_v10 = vrot.slane %v3225_v30, 2 }
0x1c45   :  { %v3227_v6 = vadd.f32 %v3226_v10, %v3225_v30 }
0x1c47   :  { %v3228_v61 = vrot.slane %v3227_v6, 1 }
0x1c49   :  { %v3194_v48 = vpop.permute.xlu1 %3193  ;;  %v3229_v35 = vadd.f32 %v3228_v61, %v3227_v6 }
0x1c4a   :  { %v3202_v46 = vmul.f32 %v8605_v1, %v3194_v48 }
0x1c4b   :  { %v3244_v23 = vsel %vm2194_vm13, %v3229_v35, %v3243_v29 }
0x1c4c   :  { %v3231_v24 = vsel %vm50_vm0, %v3202_v46, 0.0 }
0x1c4d   :  { %v3232_v53 = vadd.f32 %v3231_v24, %v3230_v37  ;;  %v3275_v37 = vadd.f32 1e-30, %v8677_v63 }
0x1c4f   :  { %v3233_v41 = vrot.slane %v3232_v53, 4  ;;  %vm3281_vm10 = vweird.f32 %v3275_v37 }
0x1c51   :  { %v3234_v16 = vadd.f32 %v3233_v41, %v3232_v53  ;;  %v3285_v41 = vand.u32 2147483647, %v3275_v37 }
0x1c53   :  { %v3235_v57 = vrot.slane %v3234_v16, 2  ;;  %vm3286_vm12 = vcmp.eq.f32.partialorder %v3285_v41, 8.507059e+37 }
0x1c55   :  { %v3236_v39 = vadd.f32 %v3235_v57, %v3234_v16 }
0x1c57   :  { %v3237_v22 = vrot.slane %v3236_v39, 1 }
0x1c59   :  { %v3238_v12 = vadd.f32 %v3237_v22, %v3236_v39 }
0x1c5b   :  { %v3245_v55 = vsel %vm2196_vm3, %v3238_v12, %v3244_v23 }
0x1c5c   :  { %v3247_v4 = vmul.f32 %v3245_v55, %v8682_v5 }
0x1c5e   :  { %v3248_v7 = vsel %vm2199_vm4, %v3247_v4, 0.0 }
0x1c5f   :  { %3249 = vadd.xlane.f32.xlu1 %v3248_v7 }
0x1cd2   :  { %v3250_v33 = vpop.xlane.xlu1 %3249 }
0x1cd3   :  { %v3251_v47 = vadd.f32 1e-30, %v3250_v33 }
0x1cd5   :  { %7322 = vrcp.f32 %v3251_v47  ;;  %v3263_v50 = vand.u32 2147483648, %v3251_v47  ;;  %v3261_v34 = vand.u32 2147483647, %v3251_v47  ;;  %vm3257_vm2 = vweird.f32 %v3251_v47 }
0x1cd6   :  { %7324 = vrcp.f32 %v3275_v37 }
0x1cd7   :  { %v3264_v36 = vor.u32 1.1754944e-38, %v3263_v50  ;;  %vm3262_vm7 = vcmp.eq.f32.partialorder %v3261_v34, 8.507059e+37 }
0x1cdb   :  { %v7323_v25 = vpop.eup %7322 }
0x1cdc   :  { %v3253_v58 = vmul.f32 %v7323_v25, %v3251_v47  ;;  %vm3258_vm6 = vweird.f32 %v7323_v25  ;;  %v7325_v24 = vpop.eup %7324 }
0x1cdd   :  { %vm3259_vm5 = vmor %vm3257_vm2, %vm3258_vm6  ;;  %v3277_v19 = vmul.f32 %v7325_v24, %v3275_v37  ;;  %vm3282_vm8 = vweird.f32 %v7325_v24 }
0x1cde   :  { %v3254_v44 = vsub.f32 1.0, %v3253_v58  ;;  %vm3283_vm11 = vmor %vm3281_vm10, %vm3282_vm8 }
0x1cdf   :  { %v3278_v53 = vsub.f32 1.0, %v3277_v19 }
0x1ce0   :  { %v3255_v52 = vmul.f32 %v7323_v25, %v3254_v44 }
0x1ce1   :  { %v3279_v6 = vmul.f32 %v7325_v24, %v3278_v53 }
0x1ce2   :  { %v3256_v51 = vadd.f32 %v7323_v25, %v3255_v52 }
0x1ce3   :  { %v3280_v40 = vadd.f32 %v7325_v24, %v3279_v6 }
0x1ce4   :  { %v3260_v15 = vsel %vm3259_vm5, %v7323_v25, %v3256_v51 }
0x1ce5   :  { %v3265_v30 = vsel %vm3262_vm7, %v3264_v36, %v3260_v15 }
0x1ce6   :  { %v3266_v42 = vmul.f32 %v3265_v30, %v8677_v63 }
0x1ce8   :  { %v3269_v17 = vmul.f32 %v3266_v42, %v3245_v55  ;;  %v3267_v27 = vmul.f32 %v3266_v42, %v8682_v5 }
0x1cea   :  { %v8719_v48 = vsub.f32 %v8668_v14, %v3269_v17  ;;  %v8722_v10 = vadd.f32 %v3267_v27, %v8671_v56  ;;  %v3287_v14 = vand.u32 2147483648, %v3275_v37  ;;  %v3284_v56 = vsel %vm3283_vm11, %v7325_v24, %v3280_v40 }
0x1cec   :  { %v3271_v46 = vmul.f32 %v8719_v48, %v8719_v48  ;;  %v3288_v0 = vor.u32 1.1754944e-38, %v3287_v14 }
0x1cee   :  { %v3272_v20 = vsel %vm2199_vm4, %v3271_v46, 0.0  ;;  %v3289_v16 = vsel %vm3286_vm12, %v3288_v0, %v3284_v56 }
0x1cef   :  { %3273 = vadd.xlane.f32.xlu0 %v3272_v20 }
0x1d62   :  { %v8728_v61 = vpop.xlane.xlu0 %3273 }
0x1d63   :  { %v3290_v49 = vmul.f32 %v3289_v16, %v8728_v61 }
0x1d65   :  { %v3291_v63 = vmul.f32 %v3290_v49, %v8682_v5 }
0x1d67   :  { %v8733_v57 = vadd.f32 %v3291_v63, %v8719_v48 }
0x1d69   :  { %v3332_v2 = vperm.slane %v8733_v57, 3  ;;  %v3319_v39 = vperm.slane %v8733_v57, 2  ;;  %v3293_v35 = vperm.slane %v8733_v57, 0  ;;  %v3306_v5 = vperm.slane %v8733_v57, 1 }
0x1d6b   :  { %3337 = vperm.xlu0 %7027, %v3332_v2   ;;  %3324 = vperm.xlu1 %7026, %v3319_v39  }
0x1d6c   :  { %3298 = vperm.xlu2 %7015, %v3293_v35  }
0x1d73   :  { %7030 = vset.pattern.permute.xlu1 %v7945_v28 }
0x1d74   :  { %7023 = vset.pattern.permute.xlu2 %v7945_v28 }
0x1d7c   :  { %3304 = vperm.xlu2 %7023, %v3293_v35  }
0x1d84   :  { %7024 = vset.pattern.permute.xlu2 %v7933_v32 }
0x1d8c   :  { %3311 = vperm.xlu2 %7024, %v3306_v5  }
0x1d94   :  { %7025 = vset.pattern.permute.xlu2 %v7945_v28 }
0x1d9c   :  { %3317 = vperm.xlu2 %7025, %v3306_v5  }
0x1da4   :  { %3330 = vperm.xlu2 %7025, %v3319_v39  }
0x1dac   :  { %3343 = vperm.xlu2 %7025, %v3332_v2  }
0x1db4   :  { %7029 = vset.pattern.permute.xlu2 %v7933_v32 }
0x1dc6   :  { %v3299_v21 = vpop.permute.xlu2 %3298 }
0x1dc7   :  { %v3345_v4 = vmul.f32 %v8587_v43, %v3299_v21 }
0x1dc9   :  { %v3353_v50 = vsel %vm50_vm0, %v3345_v4, 0.0 }
0x1dd6   :  { %v3305_v22 = vpop.permute.xlu2 %3304 }
0x1dd7   :  { %v3346_v29 = vmul.f32 %v8584_v8, %v3305_v22 }
0x1dd9   :  { %v3354_v33 = vsel %vm50_vm0, %v3346_v29, 0.0 }
0x1dda   :  { %v3355_v52 = vadd.f32 %v3354_v33, %v3353_v50 }
0x1ddc   :  { %v3356_v30 = vrot.slane %v3355_v52, 4 }
0x1ddd   :  { %v3325_v58 = vpop.permute.xlu1 %3324  ;;  %v3338_v27 = vpop.permute.xlu0 %3337 }
0x1dde   :  { %v3349_v34 = vmul.f32 %v8594_v11, %v3325_v58  ;;  %v3357_v37 = vadd.f32 %v3356_v30, %v3355_v52  ;;  %v3351_v19 = vmul.f32 %v8602_v38, %v3338_v27 }
0x1de0   :  { %v3371_v42 = vsel %vm50_vm0, %v3349_v34, 0.0  ;;  %v3358_v41 = vrot.slane %v3357_v37, 2  ;;  %v3380_v0 = vsel %vm50_vm0, %v3351_v19, 0.0 }
0x1de2   :  { %v3359_v39 = vadd.f32 %v3358_v41, %v3357_v37 }
0x1de6   :  { %v3312_v12 = vpop.permute.xlu2 %3311 }
0x1de7   :  { %v3347_v23 = vmul.f32 %v8578_v54, %v3312_v12  ;;  %v3360_v12 = vrot.slane %v3359_v39, 1 }
0x1de9   :  { %v3362_v47 = vsel %vm50_vm0, %v3347_v23, 0.0 }
0x1df6   :  { %v3318_v55 = vpop.permute.xlu2 %3317 }
0x1df7   :  { %v3348_v7 = vmul.f32 %v8581_v26, %v3318_v55 }
0x1df9   :  { %v3363_v25 = vsel %vm50_vm0, %v3348_v7, 0.0  ;;  %v3361_v7 = vadd.f32 %v3360_v12, %v3359_v39 }
0x1dfa   :  { %v3364_v44 = vadd.f32 %v3363_v25, %v3362_v47 }
0x1dfc   :  { %v3365_v51 = vrot.slane %v3364_v44, 4 }
0x1dfe   :  { %v3331_v36 = vpop.permute.xlu2 %3330  ;;  %v3366_v46 = vadd.f32 %v3365_v51, %v3364_v44 }
0x1dff   :  { %v3350_v15 = vmul.f32 %v8597_v60, %v3331_v36 }
0x1e00   :  { %v3367_v53 = vrot.slane %v3366_v46, 2 }
0x1e01   :  { %v3372_v17 = vsel %vm50_vm0, %v3350_v15, 0.0 }
0x1e02   :  { %v3373_v20 = vadd.f32 %v3372_v17, %v3371_v42  ;;  %v3368_v49 = vadd.f32 %v3367_v53, %v3366_v46 }
0x1e04   :  { %v3374_v24 = vrot.slane %v3373_v20, 4  ;;  %v3369_v5 = vrot.slane %v3368_v49, 1 }
0x1e06   :  { %v3375_v6 = vadd.f32 %v3374_v24, %v3373_v20  ;;  %v3344_v40 = vpop.permute.xlu2 %3343  ;;  %v3370_v23 = vadd.f32 %v3369_v5, %v3368_v49 }
0x1e07   :  { %v3352_v14 = vmul.f32 %v8605_v1, %v3344_v40 }
0x1e08   :  { %v3376_v56 = vrot.slane %v3375_v6, 2  ;;  %v3393_v25 = vsel %vm2192_vm9, %v3370_v23, %v3361_v7 }
0x1e09   :  { %v3381_v16 = vsel %vm50_vm0, %v3352_v14, 0.0 }
0x1e0a   :  { %v3382_v63 = vadd.f32 %v3381_v16, %v3380_v0  ;;  %v3377_v2 = vadd.f32 %v3376_v56, %v3375_v6  ;;  %v3425_v0 = vadd.f32 1e-30, %v8728_v61 }
0x1e0c   :  { %v3383_v35 = vrot.slane %v3382_v63, 4  ;;  %v3378_v22 = vrot.slane %v3377_v2, 1  ;;  %vm3431_vm5 = vweird.f32 %v3425_v0 }
0x1e0e   :  { %v3384_v21 = vadd.f32 %v3383_v35, %v3382_v63  ;;  %v3379_v4 = vadd.f32 %v3378_v22, %v3377_v2  ;;  %v3435_v35 = vand.u32 2147483647, %v3425_v0 }
0x1e10   :  { %v3385_v29 = vrot.slane %v3384_v21, 2  ;;  %v3394_v58 = vsel %vm2194_vm13, %v3379_v4, %v3393_v25  ;;  %vm3436_vm8 = vcmp.eq.f32.partialorder %v3435_v35, 8.507059e+37 }
0x1e12   :  { %v3386_v55 = vadd.f32 %v3385_v29, %v3384_v21 }
0x1e14   :  { %v3387_v33 = vrot.slane %v3386_v55, 1 }
0x1e16   :  { %v3388_v47 = vadd.f32 %v3387_v33, %v3386_v55 }
0x1e18   :  { %v3395_v44 = vsel %vm2196_vm3, %v3388_v47, %v3394_v58 }
0x1e19   :  { %v3397_v50 = vmul.f32 %v3395_v44, %v8733_v57 }
0x1e1b   :  { %v3398_v52 = vsel %vm2199_vm4, %v3397_v50, 0.0 }
0x1e1c   :  { %3399 = vadd.xlane.f32.xlu2 %v3398_v52 }
0x1e8f   :  { %v3400_v34 = vpop.xlane.xlu2 %3399 }
0x1e90   :  { %v3401_v51 = vadd.f32 1e-30, %v3400_v34 }
0x1e92   :  { %7326 = vrcp.f32 %v3401_v51  ;;  %v3413_v42 = vand.u32 2147483648, %v3401_v51  ;;  %v3411_v27 = vand.u32 2147483647, %v3401_v51  ;;  %vm3407_vm15 = vweird.f32 %v3401_v51 }
0x1e93   :  { %7328 = vrcp.f32 %v3425_v0 }
0x1e94   :  { %v3414_v20 = vor.u32 1.1754944e-38, %v3413_v42  ;;  %vm3412_vm6 = vcmp.eq.f32.partialorder %v3411_v27, 8.507059e+37 }
0x1e98   :  { %v7327_v36 = vpop.eup %7326 }
0x1e99   :  { %v3403_v15 = vmul.f32 %v7327_v36, %v3401_v51  ;;  %vm3408_vm14 = vweird.f32 %v7327_v36  ;;  %v7329_v16 = vpop.eup %7328 }
0x1e9a   :  { %vm3409_vm1 = vmor %vm3407_vm15, %vm3408_vm14  ;;  %v3427_v49 = vmul.f32 %v7329_v16, %v3425_v0  ;;  %vm3432_vm2 = vweird.f32 %v7329_v16 }
0x1e9b   :  { %v3404_v30 = vsub.f32 1.0, %v3403_v15  ;;  %vm3433_vm7 = vmor %vm3431_vm5, %vm3432_vm2 }
0x1e9c   :  { %v3428_v63 = vsub.f32 1.0, %v3427_v49 }
0x1e9d   :  { %v3405_v17 = vmul.f32 %v7327_v36, %v3404_v30 }
0x1e9e   :  { %v3429_v2 = vmul.f32 %v7329_v16, %v3428_v63 }
0x1e9f   :  { %v3406_v46 = vadd.f32 %v7327_v36, %v3405_v17 }
0x1ea0   :  { %v3430_v39 = vadd.f32 %v7329_v16, %v3429_v2 }
0x1ea1   :  { %v3410_v37 = vsel %vm3409_vm1, %v7327_v36, %v3406_v46 }
0x1ea2   :  { %v3415_v24 = vsel %vm3412_vm6, %v3414_v20, %v3410_v37 }
0x1ea3   :  { %v3416_v19 = vmul.f32 %v3415_v24, %v8728_v61 }
0x1ea5   :  { %v3419_v53 = vmul.f32 %v3416_v19, %v3395_v44  ;;  %v3417_v6 = vmul.f32 %v3416_v19, %v8733_v57 }
0x1ea7   :  { %v8768_v40 = vsub.f32 %v8719_v48, %v3419_v53  ;;  %v8771_v14 = vadd.f32 %v3417_v6, %v8722_v10  ;;  %v3437_v48 = vand.u32 2147483648, %v3425_v0  ;;  %v3434_v10 = vsel %vm3433_vm7, %v7329_v16, %v3430_v39 }
0x1ea9   :  { %v3421_v41 = vmul.f32 %v8768_v40, %v8768_v40  ;;  %v3438_v5 = vor.u32 1.1754944e-38, %v3437_v48 }
0x1eab   :  { %v3422_v56 = vsel %vm2199_vm4, %v3421_v41, 0.0  ;;  %v3439_v22 = vsel %vm3436_vm8, %v3438_v5, %v3434_v10 }
0x1eac   :  { %3423 = vadd.xlane.f32.xlu1 %v3422_v56 }
0x1f1f   :  { %v8777_v21 = vpop.xlane.xlu1 %3423 }
0x1f20   :  { %v3440_v12 = vmul.f32 %v3439_v22, %v8777_v21 }
0x1f22   :  { %v3441_v61 = vmul.f32 %v3440_v12, %v8733_v57 }
0x1f24   :  { %v8782_v29 = vadd.f32 %v3441_v61, %v8768_v40 }
0x1f26   :  { %v3456_v23 = vperm.slane %v8782_v29, 1  ;;  %v3443_v55 = vperm.slane %v8782_v29, 0  ;;  %v3469_v4 = vperm.slane %v8782_v29, 2  ;;  %v3482_v57 = vperm.slane %v8782_v29, 3 }
0x1f28   :  { %3467 = vperm.xlu1 %7030, %v3456_v23   ;;  %3461 = vperm.xlu2 %7029, %v3456_v23  }
0x1f29   :  { %3448 = vperm.xlu0 %7027, %v3443_v55  }
0x1f30   :  { %7032 = vset.pattern.permute.xlu2 %v7945_v28 }
0x1f31   :  { %7028 = vset.pattern.permute.xlu0 %v7945_v28 }
0x1f38   :  { %3480 = vperm.xlu2 %7032, %v3469_v4  }
0x1f39   :  { %3454 = vperm.xlu0 %7028, %v3443_v55  }
0x1f40   :  { %3493 = vperm.xlu2 %7032, %v3482_v57  }
0x1f41   :  { %7031 = vset.pattern.permute.xlu0 %v7933_v32 }
0x1f48   :  { %7033 = vset.pattern.permute.xlu2 %v7933_v32 }
0x1f49   :  { %3474 = vperm.xlu0 %7031, %v3469_v4  }
0x1f51   :  { %3487 = vperm.xlu0 %7031, %v3482_v57  }
0x1f82   :  { %v3462_v33 = vpop.permute.xlu2 %3461 }
0x1f83   :  { %v3497_v52 = vmul.f32 %v8578_v54, %v3462_v33 }
0x1f85   :  { %v3512_v42 = vsel %vm50_vm0, %v3497_v52, 0.0 }
0x1f92   :  { %v3481_v51 = vpop.permute.xlu2 %3480 }
0x1f93   :  { %v3500_v27 = vmul.f32 %v8597_v60, %v3481_v51 }
0x1f95   :  { %v3522_v54 = vsel %vm50_vm0, %v3500_v27, 0.0 }
0x1f9a   :  { %v3468_v25 = vpop.permute.xlu1 %3467  ;;  %v3494_v37 = vpop.permute.xlu2 %3493 }
0x1f9b   :  { %v3449_v7 = vpop.permute.xlu0 %3448  ;;  %v3498_v44 = vmul.f32 %v8581_v26, %v3468_v25  ;;  %v3502_v41 = vmul.f32 %v8605_v1, %v3494_v37 }
0x1f9c   :  { %v3495_v50 = vmul.f32 %v8587_v43, %v3449_v7 }
0x1f9d   :  { %v3513_v36 = vsel %vm50_vm0, %v3498_v44, 0.0 }
0x1f9e   :  { %v3503_v15 = vsel %vm50_vm0, %v3495_v50, 0.0  ;;  %v3514_v17 = vadd.f32 %v3513_v36, %v3512_v42 }
0x1fa0   :  { %v3515_v43 = vrot.slane %v3514_v17, 4 }
0x1fa2   :  { %v3516_v53 = vadd.f32 %v3515_v43, %v3514_v17 }
0x1fa4   :  { %v3517_v49 = vrot.slane %v3516_v53, 2 }
0x1fa6   :  { %v3518_v10 = vadd.f32 %v3517_v49, %v3516_v53 }
0x1fa8   :  { %v3519_v1 = vrot.slane %v3518_v10, 1 }
0x1fab   :  { %v3455_v47 = vpop.permute.xlu0 %3454 }
0x1fac   :  { %v3496_v58 = vmul.f32 %v8584_v8, %v3455_v47 }
0x1fae   :  { %v3504_v34 = vsel %vm50_vm0, %v3496_v58, 0.0 }
0x1faf   :  { %v3505_v30 = vadd.f32 %v3504_v34, %v3503_v15 }
0x1fb1   :  { %v3506_v8 = vrot.slane %v3505_v30, 4 }
0x1fb3   :  { %v3507_v24 = vadd.f32 %v3506_v8, %v3505_v30 }
0x1fb5   :  { %v3508_v56 = vrot.slane %v3507_v24, 2 }
0x1fb7   :  { %v3509_v39 = vadd.f32 %v3508_v56, %v3507_v24 }
0x1fb9   :  { %v3510_v22 = vrot.slane %v3509_v39, 1 }
0x1fbb   :  { %v3475_v46 = vpop.permute.xlu0 %3474  ;;  %v3511_v55 = vadd.f32 %v3510_v22, %v3509_v39 }
0x1fbc   :  { %v3499_v26 = vmul.f32 %v8594_v11, %v3475_v46  ;;  %v3531_v11 = vsel %vm50_vm0, %v3502_v41, 0.0 }
0x1fbe   :  { %v3521_v20 = vsel %vm50_vm0, %v3499_v26, 0.0 }
0x1fbf   :  { %v3523_v19 = vadd.f32 %v3522_v54, %v3521_v20 }
0x1fc1   :  { %v3524_v6 = vrot.slane %v3523_v19, 4 }
0x1fc3   :  { %v3525_v0 = vadd.f32 %v3524_v6, %v3523_v19  ;;  %v3488_v16 = vpop.permute.xlu0 %3487  ;;  %v3575_v6 = vadd.f32 1e-30, %v8777_v21 }
0x1fc4   :  { %v3501_v60 = vmul.f32 %v8602_v38, %v3488_v16  ;;  %v3520_v38 = vadd.f32 %v3519_v1, %v3518_v10 }
0x1fc5   :  { %v3526_v63 = vrot.slane %v3525_v0, 2  ;;  %vm3581_vm1 = vweird.f32 %v3575_v6  ;;  %v3585_v49 = vand.u32 2147483647, %v3575_v6 }
0x1fc6   :  { %v3530_v2 = vsel %vm50_vm0, %v3501_v60, 0.0  ;;  %v3543_v47 = vsel %vm2192_vm9, %v3520_v38, %v3511_v55  ;;  %v8843_v55 = vld [vmem:[#allocation5 + $0x18] sm:$0xff] }
0x1fc7   :  { %v3532_v48 = vadd.f32 %v3531_v11, %v3530_v2  ;;  %v3527_v35 = vadd.f32 %v3526_v63, %v3525_v0  ;;  %vm3586_vm2 = vcmp.eq.f32.partialorder %v3585_v49, 8.507059e+37 }
0x1fc9   :  { %v3533_v5 = vrot.slane %v3532_v48, 4  ;;  %v3528_v61 = vrot.slane %v3527_v35, 1 }
0x1fcb   :  { %v3534_v12 = vadd.f32 %v3533_v5, %v3532_v48  ;;  %v3529_v57 = vadd.f32 %v3528_v61, %v3527_v35 }
0x1fcd   :  { %v3535_v23 = vrot.slane %v3534_v12, 2  ;;  %v3544_v25 = vsel %vm2194_vm13, %v3529_v57, %v3543_v47  ;;  %v8846_v57 = vld [vmem:[#allocation5 + $0x8] sm:$0xff] }
0x1fce   :  { %v8852_v47 = vld [vmem:[#allocation5 + $0x28] sm:$0xff] }
0x1fcf   :  { %v3536_v4 = vadd.f32 %v3535_v23, %v3534_v12 }
0x1fd1   :  { %v3537_v7 = vrot.slane %v3536_v4, 1 }
0x1fd3   :  { %v3538_v33 = vadd.f32 %v3537_v7, %v3536_v4  ;;  %v8849_v7 = vld [vmem:[#allocation5 + $0x10] sm:$0xff] }
0x1fd5   :  { %v3545_v58 = vsel %vm2196_vm3, %v3538_v33, %v3544_v25 }
0x1fd6   :  { %v3547_v44 = vmul.f32 %v3545_v58, %v8782_v29 }
0x1fd8   :  { %v3548_v50 = vsel %vm2199_vm4, %v3547_v44, 0.0  ;;  %v8855_v44 = vld [vmem:[#allocation5] sm:$0xff] }
0x1fd9   :  { %3549 = vadd.xlane.f32.xlu1 %v3548_v50 }
0x204c   :  { %v3550_v52 = vpop.xlane.xlu1 %3549 }
0x204d   :  { %v3551_v34 = vadd.f32 1e-30, %v3550_v52 }
0x204f   :  { %7330 = vrcp.f32 %v3551_v34  ;;  %v3563_v30 = vand.u32 2147483648, %v3551_v34  ;;  %v3561_v17 = vand.u32 2147483647, %v3551_v34  ;;  %vm3557_vm11 = vweird.f32 %v3551_v34 }
0x2050   :  { %7332 = vrcp.f32 %v3575_v6 }
0x2051   :  { %v3564_v8 = vor.u32 1.1754944e-38, %v3563_v30  ;;  %vm3562_vm14 = vcmp.eq.f32.partialorder %v3561_v17, 8.507059e+37 }
0x2055   :  { %v7331_v51 = vpop.eup %7330 }
0x2056   :  { %v3553_v36 = vmul.f32 %v7331_v51, %v3551_v34  ;;  %vm3558_vm10 = vweird.f32 %v7331_v51  ;;  %v7333_v41 = vpop.eup %7332  ;;  %v8859_v34 = vld [vmem:[#allocation5 + $0x20] sm:$0xff] }
0x2057   :  { %vm3559_vm12 = vmor %vm3557_vm11, %vm3558_vm10  ;;  %v3577_v56 = vmul.f32 %v7333_v41, %v3575_v6  ;;  %vm3582_vm15 = vweird.f32 %v7333_v41 }
0x2058   :  { %v3554_v15 = vsub.f32 1.0, %v3553_v36  ;;  %vm3583_vm6 = vmor %vm3581_vm1, %vm3582_vm15 }
0x2059   :  { %v3578_v0 = vsub.f32 1.0, %v3577_v56 }
0x205a   :  { %v3555_v42 = vmul.f32 %v7331_v51, %v3554_v15 }
0x205b   :  { %v3579_v16 = vmul.f32 %v7333_v41, %v3578_v0 }
0x205c   :  { %v3556_v27 = vadd.f32 %v7331_v51, %v3555_v42 }
0x205d   :  { %v3580_v60 = vadd.f32 %v7333_v41, %v3579_v16 }
0x205e   :  { %v3560_v46 = vsel %vm3559_vm12, %v7331_v51, %v3556_v27 }
0x205f   :  { %v3565_v26 = vsel %vm3562_vm14, %v3564_v8, %v3560_v46 }
0x2060   :  { %v3566_v43 = vmul.f32 %v3565_v26, %v8777_v21 }
0x2062   :  { %v3569_v54 = vmul.f32 %v3566_v43, %v3545_v58  ;;  %v3567_v20 = vmul.f32 %v3566_v43, %v8782_v29 }
0x2064   :  { %v8816_v37 = vsub.f32 %v8768_v40, %v3569_v54  ;;  %v8819_v24 = vadd.f32 %v3567_v20, %v8771_v14  ;;  %v3587_v40 = vand.u32 2147483648, %v3575_v6  ;;  %v3584_v14 = vsel %vm3583_vm6, %v7333_v41, %v3580_v60  ;;  %v8867_v41 = vld [vmem:[#allocation5 + $0x30] sm:$0xff] }
0x2066   :  { %v3571_v19 = vmul.f32 %v8816_v37, %v8816_v37  ;;  %v3588_v63 = vor.u32 1.1754944e-38, %v3587_v40  ;;  %v8870_v40 = vld [vmem:[#allocation5 + $0x38] sm:$0xff] }
0x2068   :  { %v3572_v53 = vsel %vm2199_vm4, %v3571_v19, 0.0  ;;  %v3589_v11 = vsel %vm3586_vm2, %v3588_v63, %v3584_v14 }
0x2069   :  { %3573 = vadd.xlane.f32.xlu0 %v3572_v53 }
0x20dc   :  { %v8825_v2 = vpop.xlane.xlu0 %3573 }
0x20dd   :  { %v3590_v39 = vmul.f32 %v3589_v11, %v8825_v2 }
0x20df   :  { %v3591_v21 = vmul.f32 %v3590_v39, %v8782_v29 }
0x20e1   :  { %v8830_v48 = vadd.f32 %v3591_v21, %v8816_v37 }
0x20e3   :  { %v3632_v35 = vperm.slane %v8830_v48, 3  ;;  %v3619_v10 = vperm.slane %v8830_v48, 2  ;;  %v3593_v5 = vperm.slane %v8830_v48, 0  ;;  %v3606_v29 = vperm.slane %v8830_v48, 1 }
0x20e5   :  { %3637 = vperm.xlu0 %7031, %v3632_v35   ;;  %3630 = vperm.xlu1 %7030, %v3619_v10  }
0x20e6   :  { %3598 = vperm.xlu2 %7033, %v3593_v5  }
0x20ed   :  { %7039 = vset.pattern.permute.xlu1 %v7933_v32 }
0x20ee   :  { %7034 = vset.pattern.permute.xlu2 %v7945_v28 }
0x20f6   :  { %3604 = vperm.xlu2 %7034, %v3593_v5  }
0x20fe   :  { %7035 = vset.pattern.permute.xlu2 %v7933_v32 }
0x2106   :  { %3611 = vperm.xlu2 %7035, %v3606_v29  }
0x210e   :  { %7036 = vset.pattern.permute.xlu2 %v7945_v28 }
0x2116   :  { %3617 = vperm.xlu2 %7036, %v3606_v29  }
0x211e   :  { %7037 = vset.pattern.permute.xlu2 %v7933_v32 }
0x2126   :  { %3624 = vperm.xlu2 %7037, %v3619_v10  }
0x212e   :  { %7038 = vset.pattern.permute.xlu2 %v7945_v28 }
0x2136   :  { %3643 = vperm.xlu2 %7038, %v3632_v35  }
0x213e   :  { %7043 = vset.pattern.permute.xlu2 %v7933_v32 }
0x2140   :  { %v3599_v22 = vpop.permute.xlu2 %3598 }
0x2141   :  { %v3645_v50 = vmul.f32 %v8855_v44, %v3599_v22 }
0x2143   :  { %v3653_v27 = vsel %vm50_vm0, %v3645_v50, 0.0 }
0x2150   :  { %v3605_v12 = vpop.permute.xlu2 %3604 }
0x2151   :  { %v3646_v38 = vmul.f32 %v8846_v57, %v3605_v12 }
0x2153   :  { %v3654_v36 = vsel %vm50_vm0, %v3646_v38, 0.0 }
0x2154   :  { %v3655_v46 = vadd.f32 %v3654_v36, %v3653_v27 }
0x2156   :  { %v3656_v54 = vrot.slane %v3655_v46, 4 }
0x2157   :  { %v3631_v23 = vpop.permute.xlu1 %3630  ;;  %v3638_v20 = vpop.permute.xlu0 %3637 }
0x2158   :  { %v3650_v25 = vmul.f32 %v8852_v47, %v3631_v23  ;;  %v3657_v6 = vadd.f32 %v3656_v54, %v3655_v46  ;;  %v3651_v56 = vmul.f32 %v8867_v41, %v3638_v20 }
0x215a   :  { %v3672_v42 = vsel %vm50_vm0, %v3650_v25, 0.0  ;;  %v3658_v14 = vrot.slane %v3657_v6, 2  ;;  %v3680_v63 = vsel %vm50_vm0, %v3651_v56, 0.0 }
0x215c   :  { %v3659_v10 = vadd.f32 %v3658_v14, %v3657_v6 }
0x2160   :  { %v3612_v61 = vpop.permute.xlu2 %3611 }
0x2161   :  { %v3647_v33 = vmul.f32 %v8849_v7, %v3612_v61  ;;  %v3660_v61 = vrot.slane %v3659_v10, 1 }
0x2163   :  { %v3662_v15 = vsel %vm50_vm0, %v3647_v33, 0.0  ;;  %v3661_v33 = vadd.f32 %v3660_v61, %v3659_v10 }
0x2170   :  { %v3618_v1 = vpop.permute.xlu2 %3617 }
0x2171   :  { %v3648_v4 = vmul.f32 %v8843_v55, %v3618_v1 }
0x2173   :  { %v3663_v52 = vsel %vm50_vm0, %v3648_v4, 0.0 }
0x2174   :  { %v3664_v17 = vadd.f32 %v3663_v52, %v3662_v15 }
0x2176   :  { %v3665_v26 = vrot.slane %v3664_v17, 4 }
0x2178   :  { %v3666_v19 = vadd.f32 %v3665_v26, %v3664_v17 }
0x217a   :  { %v3667_v0 = vrot.slane %v3666_v19, 2 }
0x217c   :  { %v3668_v39 = vadd.f32 %v3667_v0, %v3666_v19 }
0x217e   :  { %v3669_v29 = vrot.slane %v3668_v39, 1 }
0x2180   :  { %v3625_v58 = vpop.permute.xlu2 %3624  ;;  %v3670_v23 = vadd.f32 %v3669_v29, %v3668_v39 }
0x2181   :  { %v3649_v51 = vmul.f32 %v8859_v34, %v3625_v58 }
0x2182   :  { %v3693_v50 = vsel %vm2192_vm9, %v3670_v23, %v3661_v33 }
0x2183   :  { %v3671_v30 = vsel %vm50_vm0, %v3649_v51, 0.0 }
0x2184   :  { %v3673_v8 = vadd.f32 %v3672_v42, %v3671_v30 }
0x2186   :  { %v3674_v43 = vrot.slane %v3673_v8, 4 }
0x2188   :  { %v3675_v53 = vadd.f32 %v3674_v43, %v3673_v8 }
0x218a   :  { %v3676_v60 = vrot.slane %v3675_v53, 2 }
0x218c   :  { %v3677_v35 = vadd.f32 %v3676_v60, %v3675_v53 }
0x218e   :  { %v3678_v12 = vrot.slane %v3677_v35, 1 }
0x2190   :  { %v3644_v16 = vpop.permute.xlu2 %3643  ;;  %v3679_v38 = vadd.f32 %v3678_v12, %v3677_v35 }
0x2191   :  { %v3652_v49 = vmul.f32 %v8870_v40, %v3644_v16 }
0x2192   :  { %v3694_v52 = vsel %vm2194_vm13, %v3679_v38, %v3693_v50 }
0x2193   :  { %v3681_v11 = vsel %vm50_vm0, %v3652_v49, 0.0 }
0x2194   :  { %v3682_v21 = vadd.f32 %v3681_v11, %v3680_v63  ;;  %v3725_v63 = vadd.f32 1e-30, %v8825_v2 }
0x2196   :  { %v3683_v5 = vrot.slane %v3682_v21, 4  ;;  %vm3731_vm12 = vweird.f32 %v3725_v63 }
0x2198   :  { %v3684_v22 = vadd.f32 %v3683_v5, %v3682_v21  ;;  %v3735_v5 = vand.u32 2147483647, %v3725_v63 }
0x219a   :  { %v3685_v1 = vrot.slane %v3684_v22, 2  ;;  %vm3736_vm15 = vcmp.eq.f32.partialorder %v3735_v5, 8.507059e+37 }
0x219c   :  { %v3686_v4 = vadd.f32 %v3685_v1, %v3684_v22 }
0x219e   :  { %v3687_v25 = vrot.slane %v3686_v4, 1 }
0x21a0   :  { %v3688_v58 = vadd.f32 %v3687_v25, %v3686_v4 }
0x21a2   :  { %v3695_v51 = vsel %vm2196_vm3, %v3688_v58, %v3694_v52 }
0x21a3   :  { %v3697_v36 = vmul.f32 %v3695_v51, %v8830_v48 }
0x21a5   :  { %v3698_v15 = vsel %vm2199_vm4, %v3697_v36, 0.0 }
0x21a6   :  { %3699 = vadd.xlane.f32.xlu2 %v3698_v15 }
0x2219   :  { %v3700_v30 = vpop.xlane.xlu2 %3699 }
0x221a   :  { %v3701_v42 = vadd.f32 1e-30, %v3700_v30 }
0x221c   :  { %7334 = vrcp.f32 %v3701_v42  ;;  %v3713_v46 = vand.u32 2147483648, %v3701_v42  ;;  %v3711_v43 = vand.u32 2147483647, %v3701_v42  ;;  %vm3707_vm7 = vweird.f32 %v3701_v42 }
0x221d   :  { %7336 = vrcp.f32 %v3725_v63 }
0x221e   :  { %v3714_v20 = vor.u32 1.1754944e-38, %v3713_v46  ;;  %vm3712_vm10 = vcmp.eq.f32.partialorder %v3711_v43, 8.507059e+37 }
0x2222   :  { %v7335_v17 = vpop.eup %7334 }
0x2223   :  { %v3703_v27 = vmul.f32 %v7335_v17, %v3701_v42  ;;  %vm3708_vm5 = vweird.f32 %v7335_v17  ;;  %v7337_v11 = vpop.eup %7336 }
0x2224   :  { %vm3709_vm8 = vmor %vm3707_vm7, %vm3708_vm5  ;;  %v3727_v39 = vmul.f32 %v7337_v11, %v3725_v63  ;;  %vm3732_vm11 = vweird.f32 %v7337_v11 }
0x2225   :  { %v3704_v8 = vsub.f32 1.0, %v3703_v27  ;;  %vm3733_vm14 = vmor %vm3731_vm12, %vm3732_vm11 }
0x2226   :  { %v3728_v21 = vsub.f32 1.0, %v3727_v39 }
0x2227   :  { %v3705_v26 = vmul.f32 %v7335_v17, %v3704_v8 }
0x2228   :  { %v3729_v35 = vmul.f32 %v7337_v11, %v3728_v21 }
0x2229   :  { %v3706_v54 = vadd.f32 %v7335_v17, %v3705_v26 }
0x222a   :  { %v3730_v10 = vadd.f32 %v7337_v11, %v3729_v35 }
0x222b   :  { %v3710_v19 = vsel %vm3709_vm8, %v7335_v17, %v3706_v54 }
0x222c   :  { %v3715_v53 = vsel %vm3712_vm10, %v3714_v20, %v3710_v19 }
0x222d   :  { %v3716_v6 = vmul.f32 %v3715_v53, %v8825_v2 }
0x222f   :  { %v3719_v56 = vmul.f32 %v3716_v6, %v3695_v51  ;;  %v3717_v0 = vmul.f32 %v3716_v6, %v8830_v48 }
0x2231   :  { %v8883_v16 = vsub.f32 %v8816_v37, %v3719_v56  ;;  %v8886_v60 = vadd.f32 %v3717_v0, %v8819_v24  ;;  %v3737_v37 = vand.u32 2147483648, %v3725_v63  ;;  %v3734_v24 = vsel %vm3733_vm14, %v7337_v11, %v3730_v10 }
0x2233   :  { %v3721_v49 = vmul.f32 %v8883_v16, %v8883_v16  ;;  %v3738_v29 = vor.u32 1.1754944e-38, %v3737_v37 }
0x2235   :  { %v3722_v14 = vsel %vm2199_vm4, %v3721_v49, 0.0  ;;  %v3739_v12 = vsel %vm3736_vm15, %v3738_v29, %v3734_v24 }
0x2236   :  { %3723 = vadd.xlane.f32.xlu0 %v3722_v14 }
0x22a9   :  { %v8892_v22 = vpop.xlane.xlu0 %3723 }
0x22aa   :  { %v3740_v61 = vmul.f32 %v3739_v12, %v8892_v22 }
0x22ac   :  { %v3741_v2 = vmul.f32 %v3740_v61, %v8830_v48 }
0x22ae   :  { %v8897_v1 = vadd.f32 %v3741_v2, %v8883_v16 }
0x22b0   :  { %v3782_v23 = vperm.slane %v8897_v1, 3  ;;  %v3769_v4 = vperm.slane %v8897_v1, 2  ;;  %v3743_v38 = vperm.slane %v8897_v1, 0  ;;  %v3756_v33 = vperm.slane %v8897_v1, 1 }
0x22b2   :  { %3787 = vperm.xlu0 %7031, %v3782_v23   ;;  %3774 = vperm.xlu2 %7043, %v3769_v4  }
0x22b3   :  { %3748 = vperm.xlu1 %7039, %v3743_v38  }
0x22bb   :  { %7040 = vset.pattern.permute.xlu1 %v7945_v28 }
0x22c3   :  { %3754 = vperm.xlu1 %7040, %v3743_v38  }
0x22cb   :  { %7041 = vset.pattern.permute.xlu1 %v7933_v32 }
0x22d3   :  { %3761 = vperm.xlu1 %7041, %v3756_v33  }
0x22db   :  { %7042 = vset.pattern.permute.xlu1 %v7945_v28 }
0x22e3   :  { %3767 = vperm.xlu1 %7042, %v3756_v33  }
0x22eb   :  { %3780 = vperm.xlu1 %7042, %v3769_v4  }
0x22f3   :  { %3793 = vperm.xlu1 %7042, %v3782_v23  }
0x230c   :  { %v3775_v27 = vpop.permute.xlu2 %3774 }
0x230d   :  { %v3799_v43 = vmul.f32 %v8859_v34, %v3775_v27 }
0x230f   :  { %v3821_v6 = vsel %vm50_vm0, %v3799_v43, 0.0 }
0x2324   :  { %v3788_v0 = vpop.permute.xlu0 %3787 }
0x2325   :  { %v3749_v48 = vpop.permute.xlu1 %3748  ;;  %v3801_v39 = vmul.f32 %v8867_v41, %v3788_v0 }
0x2326   :  { %v3795_v36 = vmul.f32 %v8855_v44, %v3749_v48 }
0x2327   :  { %v3830_v29 = vsel %vm50_vm0, %v3801_v39, 0.0 }
0x2328   :  { %v3803_v46 = vsel %vm50_vm0, %v3795_v36, 0.0 }
0x2335   :  { %v3755_v25 = vpop.permute.xlu1 %3754 }
0x2336   :  { %v3796_v50 = vmul.f32 %v8846_v57, %v3755_v25 }
0x2338   :  { %v3804_v30 = vsel %vm50_vm0, %v3796_v50, 0.0 }
0x2339   :  { %v3805_v26 = vadd.f32 %v3804_v30, %v3803_v46 }
0x233b   :  { %v3806_v53 = vrot.slane %v3805_v26, 4 }
0x233d   :  { %v3807_v63 = vadd.f32 %v3806_v53, %v3805_v26 }
0x233f   :  { %v3808_v5 = vrot.slane %v3807_v63, 2 }
0x2341   :  { %v3809_v4 = vadd.f32 %v3808_v5, %v3807_v63 }
0x2345   :  { %v3762_v58 = vpop.permute.xlu1 %3761 }
0x2346   :  { %v3797_v52 = vmul.f32 %v8849_v7, %v3762_v58  ;;  %v3810_v58 = vrot.slane %v3809_v4, 1 }
0x2348   :  { %v3812_v42 = vsel %vm50_vm0, %v3797_v52, 0.0 }
0x2355   :  { %v3768_v51 = vpop.permute.xlu1 %3767 }
0x2356   :  { %v3798_v15 = vmul.f32 %v8843_v55, %v3768_v51 }
0x2358   :  { %v3813_v17 = vsel %vm50_vm0, %v3798_v15, 0.0  ;;  %v3811_v15 = vadd.f32 %v3810_v58, %v3809_v4 }
0x2359   :  { %v3814_v8 = vadd.f32 %v3813_v17, %v3812_v42 }
0x235b   :  { %v3815_v54 = vrot.slane %v3814_v8, 4 }
0x235d   :  { %v3781_v20 = vpop.permute.xlu1 %3780  ;;  %v3816_v49 = vadd.f32 %v3815_v54, %v3814_v8 }
0x235e   :  { %v3800_v19 = vmul.f32 %v8852_v47, %v3781_v20 }
0x235f   :  { %v3817_v21 = vrot.slane %v3816_v49, 2 }
0x2360   :  { %v3822_v56 = vsel %vm50_vm0, %v3800_v19, 0.0 }
0x2361   :  { %v3823_v14 = vadd.f32 %v3822_v56, %v3821_v6  ;;  %v3818_v61 = vadd.f32 %v3817_v21, %v3816_v49 }
0x2363   :  { %v3824_v11 = vrot.slane %v3823_v14, 4  ;;  %v3819_v33 = vrot.slane %v3818_v61, 1 }
0x2365   :  { %v3825_v35 = vadd.f32 %v3824_v11, %v3823_v14  ;;  %v3794_v10 = vpop.permute.xlu1 %3793  ;;  %v3820_v52 = vadd.f32 %v3819_v33, %v3818_v61 }
0x2366   :  { %v3802_v37 = vmul.f32 %v8870_v40, %v3794_v10 }
0x2367   :  { %v3826_v24 = vrot.slane %v3825_v35, 2  ;;  %v3843_v17 = vsel %vm2192_vm9, %v3820_v52, %v3811_v15 }
0x2368   :  { %v3831_v12 = vsel %vm50_vm0, %v3802_v37, 0.0 }
0x2369   :  { %v3832_v2 = vadd.f32 %v3831_v12, %v3830_v29  ;;  %v3827_v23 = vadd.f32 %v3826_v24, %v3825_v35  ;;  %v3875_v29 = vadd.f32 1e-30, %v8892_v22 }
0x236b   :  { %v3833_v38 = vrot.slane %v3832_v2, 4  ;;  %v3828_v25 = vrot.slane %v3827_v23, 1  ;;  %vm3881_vm8 = vweird.f32 %v3875_v29 }
0x236d   :  { %v3834_v48 = vadd.f32 %v3833_v38, %v3832_v2  ;;  %v3829_v36 = vadd.f32 %v3828_v25, %v3827_v23  ;;  %v3885_v38 = vand.u32 2147483647, %v3875_v29 }
0x236f   :  { %v3835_v50 = vrot.slane %v3834_v48, 2  ;;  %v3844_v27 = vsel %vm2194_vm13, %v3829_v36, %v3843_v17  ;;  %vm3886_vm11 = vcmp.eq.f32.partialorder %v3885_v38, 8.507059e+37 }
0x2371   :  { %v3836_v51 = vadd.f32 %v3835_v50, %v3834_v48 }
0x2373   :  { %v3837_v30 = vrot.slane %v3836_v51, 1 }
0x2375   :  { %v3838_v42 = vadd.f32 %v3837_v30, %v3836_v51 }
0x2377   :  { %v3845_v8 = vsel %vm2196_vm3, %v3838_v42, %v3844_v27 }
0x2378   :  { %v3847_v46 = vmul.f32 %v3845_v8, %v8897_v1 }
0x237a   :  { %v3848_v26 = vsel %vm2199_vm4, %v3847_v46, 0.0 }
0x237b   :  { %3849 = vadd.xlane.f32.xlu1 %v3848_v26 }
0x23ee   :  { %v3850_v43 = vpop.xlane.xlu1 %3849 }
0x23ef   :  { %v3851_v54 = vadd.f32 1e-30, %v3850_v43 }
0x23f1   :  { %7338 = vrcp.f32 %v3851_v54  ;;  %v3863_v6 = vand.u32 2147483648, %v3851_v54  ;;  %v3861_v0 = vand.u32 2147483647, %v3851_v54  ;;  %vm3857_vm6 = vweird.f32 %v3851_v54 }
0x23f2   :  { %7340 = vrcp.f32 %v3875_v29 }
0x23f3   :  { %v3864_v14 = vor.u32 1.1754944e-38, %v3863_v6  ;;  %vm3862_vm5 = vcmp.eq.f32.partialorder %v3861_v0, 8.507059e+37 }
0x23f7   :  { %v7339_v20 = vpop.eup %7338 }
0x23f8   :  { %v3853_v19 = vmul.f32 %v7339_v20, %v3851_v54  ;;  %vm3858_vm1 = vweird.f32 %v7339_v20  ;;  %v7341_v12 = vpop.eup %7340 }
0x23f9   :  { %vm3859_vm2 = vmor %vm3857_vm6, %vm3858_vm1  ;;  %v3877_v61 = vmul.f32 %v7341_v12, %v3875_v29  ;;  %vm3882_vm7 = vweird.f32 %v7341_v12 }
0x23fa   :  { %v3854_v53 = vsub.f32 1.0, %v3853_v19  ;;  %vm3883_vm10 = vmor %vm3881_vm8, %vm3882_vm7 }
0x23fb   :  { %v3878_v2 = vsub.f32 1.0, %v3877_v61 }
0x23fc   :  { %v3855_v56 = vmul.f32 %v7339_v20, %v3854_v53 }
0x23fd   :  { %v3879_v23 = vmul.f32 %v7341_v12, %v3878_v2 }
0x23fe   :  { %v3856_v49 = vadd.f32 %v7339_v20, %v3855_v56 }
0x23ff   :  { %v3880_v4 = vadd.f32 %v7341_v12, %v3879_v23 }
0x2400   :  { %v3860_v63 = vsel %vm3859_vm2, %v7339_v20, %v3856_v49 }
0x2401   :  { %v3865_v11 = vsel %vm3862_vm5, %v3864_v14, %v3860_v63 }
0x2402   :  { %v3866_v39 = vmul.f32 %v3865_v11, %v8892_v22 }
0x2404   :  { %v3869_v21 = vmul.f32 %v3866_v39, %v3845_v8  ;;  %v3867_v35 = vmul.f32 %v3866_v39, %v8897_v1 }
0x2406   :  { %v8930_v10 = vsub.f32 %v8883_v16, %v3869_v21  ;;  %v8933_v37 = vadd.f32 %v3867_v35, %v8886_v60  ;;  %v3887_v16 = vand.u32 2147483648, %v3875_v29  ;;  %v3884_v60 = vsel %vm3883_vm10, %v7341_v12, %v3880_v4 }
0x2408   :  { %v3871_v5 = vmul.f32 %v8930_v10, %v8930_v10  ;;  %v3888_v33 = vor.u32 1.1754944e-38, %v3887_v16 }
0x240a   :  { %v3872_v24 = vsel %vm2199_vm4, %v3871_v5, 0.0  ;;  %v3889_v48 = vsel %vm3886_vm11, %v3888_v33, %v3884_v60 }
0x240b   :  { %3873 = vadd.xlane.f32.xlu2 %v3872_v24 }
0x247e   :  { %v8939_v25 = vpop.xlane.xlu2 %3873 }
0x247f   :  { %v3890_v58 = vmul.f32 %v3889_v48, %v8939_v25 }
0x2481   :  { %v3891_v22 = vmul.f32 %v3890_v58, %v8897_v1 }
0x2483   :  { %v8944_v50 = vadd.f32 %v3891_v22, %v8930_v10 }
0x2485   :  { %v3919_v52 = vperm.slane %v8944_v50, 2  ;;  %v3906_v51 = vperm.slane %v8944_v50, 1  ;;  %v3893_v36 = vperm.slane %v8944_v50, 0  ;;  %v3932_v1 = vperm.slane %v8944_v50, 3 }
0x2487   :  { %3924 = vperm.xlu2 %7043, %v3919_v52   ;;  %3917 = vperm.xlu1 %7042, %v3906_v51  }
0x2488   :  { %3898 = vperm.xlu0 %7031, %v3893_v36  }
0x248f   :  { %7047 = vset.pattern.permute.xlu1 %v7933_v32  ;;  %7051 = vset.pattern.permute.xlu2 %v7945_v28 }
0x2490   :  { %7044 = vset.pattern.permute.xlu0 %v7945_v28 }
0x2497   :  { %3937 = vperm.xlu1 %7047, %v3932_v1  }
0x2498   :  { %3904 = vperm.xlu0 %7044, %v3893_v36  }
0x24a0   :  { %7045 = vset.pattern.permute.xlu0 %v7933_v32 }
0x24a8   :  { %3911 = vperm.xlu0 %7045, %v3906_v51  }
0x24b0   :  { %7046 = vset.pattern.permute.xlu0 %v7945_v28 }
0x24b8   :  { %3930 = vperm.xlu0 %7046, %v3919_v52  }
0x24c0   :  { %3943 = vperm.xlu0 %7046, %v3932_v1  }
0x24c8   :  { %7048 = vset.pattern.permute.xlu0 %v7933_v32 }
0x24e1   :  { %v3925_v19 = vpop.permute.xlu2 %3924 }
0x24e2   :  { %v3949_v0 = vmul.f32 %v8859_v34, %v3925_v19 }
0x24e4   :  { %v3971_v39 = vsel %vm50_vm0, %v3949_v0, 0.0 }
0x24f9   :  { %v3918_v17 = vpop.permute.xlu1 %3917 }
0x24fa   :  { %v3899_v15 = vpop.permute.xlu0 %3898  ;;  %v3948_v8 = vmul.f32 %v8843_v55, %v3918_v17 }
0x24fb   :  { %v3945_v26 = vmul.f32 %v8855_v44, %v3899_v15 }
0x24fc   :  { %v3963_v54 = vsel %vm50_vm0, %v3948_v8, 0.0 }
0x24fd   :  { %v3953_v6 = vsel %vm50_vm0, %v3945_v26, 0.0 }
0x2509   :  { %v3938_v35 = vpop.permute.xlu1 %3937 }
0x250a   :  { %v3905_v30 = vpop.permute.xlu0 %3904  ;;  %v3951_v61 = vmul.f32 %v8867_v41, %v3938_v35 }
0x250b   :  { %v3946_v46 = vmul.f32 %v8846_v57, %v3905_v30 }
0x250c   :  { %v3980_v33 = vsel %vm50_vm0, %v3951_v61, 0.0 }
0x250d   :  { %v3954_v20 = vsel %vm50_vm0, %v3946_v46, 0.0 }
0x250e   :  { %v3955_v56 = vadd.f32 %v3954_v20, %v3953_v6 }
0x2510   :  { %v3956_v11 = vrot.slane %v3955_v56, 4 }
0x2512   :  { %v3957_v29 = vadd.f32 %v3956_v11, %v3955_v56 }
0x2514   :  { %v3958_v38 = vrot.slane %v3957_v29, 2 }
0x2516   :  { %v3959_v51 = vadd.f32 %v3958_v38, %v3957_v29 }
0x251a   :  { %v3912_v42 = vpop.permute.xlu0 %3911 }
0x251b   :  { %v3947_v27 = vmul.f32 %v8849_v7, %v3912_v42  ;;  %v3960_v42 = vrot.slane %v3959_v51, 1 }
0x251d   :  { %v3962_v43 = vsel %vm50_vm0, %v3947_v27, 0.0  ;;  %v3961_v26 = vadd.f32 %v3960_v42, %v3959_v51 }
0x251e   :  { %v3964_v53 = vadd.f32 %v3963_v54, %v3962_v43 }
0x2520   :  { %v3965_v49 = vrot.slane %v3964_v53, 4 }
0x2522   :  { %v3966_v5 = vadd.f32 %v3965_v49, %v3964_v53 }
0x2524   :  { %v3967_v2 = vrot.slane %v3966_v5, 2 }
0x2526   :  { %v3968_v58 = vadd.f32 %v3967_v2, %v3966_v5 }
0x2528   :  { %v3969_v1 = vrot.slane %v3968_v58, 1 }
0x252a   :  { %v3931_v14 = vpop.permute.xlu0 %3930  ;;  %v3970_v27 = vadd.f32 %v3969_v1, %v3968_v58 }
0x252b   :  { %v3950_v63 = vmul.f32 %v8852_v47, %v3931_v14 }
0x252c   :  { %v3993_v20 = vsel %vm2192_vm9, %v3970_v27, %v3961_v26 }
0x252d   :  { %v3972_v21 = vsel %vm50_vm0, %v3950_v63, 0.0 }
0x252e   :  { %v3973_v24 = vadd.f32 %v3972_v21, %v3971_v39 }
0x2530   :  { %v3974_v12 = vrot.slane %v3973_v24, 4 }
0x2532   :  { %v3975_v23 = vadd.f32 %v3974_v12, %v3973_v24  ;;  %v3944_v4 = vpop.permute.xlu0 %3943 }
0x2533   :  { %v3952_v16 = vmul.f32 %v8870_v40, %v3944_v4 }
0x2534   :  { %v3976_v60 = vrot.slane %v3975_v23, 2 }
0x2535   :  { %v3981_v48 = vsel %vm50_vm0, %v3952_v16, 0.0 }
0x2536   :  { %v3982_v22 = vadd.f32 %v3981_v48, %v3980_v33  ;;  %v3977_v52 = vadd.f32 %v3976_v60, %v3975_v23  ;;  %v4025_v33 = vadd.f32 1e-30, %v8939_v25 }
0x2538   :  { %v3983_v36 = vrot.slane %v3982_v22, 4  ;;  %v3978_v30 = vrot.slane %v3977_v52, 1  ;;  %vm4031_vm2 = vweird.f32 %v4025_v33 }
0x253a   :  { %v3984_v15 = vadd.f32 %v3983_v36, %v3982_v22  ;;  %v3979_v46 = vadd.f32 %v3978_v30, %v3977_v52  ;;  %v4035_v36 = vand.u32 2147483647, %v4025_v33 }
0x253c   :  { %v3985_v17 = vrot.slane %v3984_v15, 2  ;;  %v3994_v19 = vsel %vm2194_vm13, %v3979_v46, %v3993_v20  ;;  %vm4036_vm7 = vcmp.eq.f32.partialorder %v4035_v36, 8.507059e+37 }
0x253e   :  { %v3986_v8 = vadd.f32 %v3985_v17, %v3984_v15 }
0x2540   :  { %v3987_v43 = vrot.slane %v3986_v8, 1 }
0x2542   :  { %v3988_v54 = vadd.f32 %v3987_v43, %v3986_v8 }
0x2544   :  { %v3995_v53 = vsel %vm2196_vm3, %v3988_v54, %v3994_v19 }
0x2545   :  { %v3997_v6 = vmul.f32 %v3995_v53, %v8944_v50 }
0x2547   :  { %v3998_v56 = vsel %vm2199_vm4, %v3997_v6, 0.0 }
0x2548   :  { %3999 = vadd.xlane.f32.xlu2 %v3998_v56 }
0x25bb   :  { %v4000_v0 = vpop.xlane.xlu2 %3999 }
0x25bc   :  { %v4001_v49 = vadd.f32 1e-30, %v4000_v0 }
0x25be   :  { %7342 = vrcp.f32 %v4001_v49  ;;  %v4013_v39 = vand.u32 2147483648, %v4001_v49  ;;  %v4011_v35 = vand.u32 2147483647, %v4001_v49  ;;  %vm4007_vm14 = vweird.f32 %v4001_v49 }
0x25bf   :  { %7344 = vrcp.f32 %v4025_v33 }
0x25c0   :  { %v4014_v24 = vor.u32 1.1754944e-38, %v4013_v39  ;;  %vm4012_vm1 = vcmp.eq.f32.partialorder %v4011_v35, 8.507059e+37 }
0x25c4   :  { %v7343_v14 = vpop.eup %7342 }
0x25c5   :  { %v4003_v63 = vmul.f32 %v7343_v14, %v4001_v49  ;;  %vm4008_vm12 = vweird.f32 %v7343_v14  ;;  %v7345_v48 = vpop.eup %7344 }
0x25c6   :  { %vm4009_vm15 = vmor %vm4007_vm14, %vm4008_vm12  ;;  %v4027_v58 = vmul.f32 %v7345_v48, %v4025_v33  ;;  %vm4032_vm6 = vweird.f32 %v7345_v48 }
0x25c7   :  { %v4004_v11 = vsub.f32 1.0, %v4003_v63  ;;  %vm4033_vm5 = vmor %vm4031_vm2, %vm4032_vm6 }
0x25c8   :  { %v4028_v22 = vsub.f32 1.0, %v4027_v58 }
0x25c9   :  { %v4005_v21 = vmul.f32 %v7343_v14, %v4004_v11 }
0x25ca   :  { %v4029_v52 = vmul.f32 %v7345_v48, %v4028_v22 }
0x25cb   :  { %v4006_v5 = vadd.f32 %v7343_v14, %v4005_v21 }
0x25cc   :  { %v4030_v51 = vadd.f32 %v7345_v48, %v4029_v52 }
0x25cd   :  { %v4010_v29 = vsel %vm4009_vm15, %v7343_v14, %v4006_v5 }
0x25ce   :  { %v4015_v12 = vsel %vm4012_vm1, %v4014_v24, %v4010_v29 }
0x25cf   :  { %v4016_v61 = vmul.f32 %v4015_v12, %v8939_v25 }
0x25d1   :  { %v4019_v2 = vmul.f32 %v4016_v61, %v3995_v53  ;;  %v4017_v23 = vmul.f32 %v4016_v61, %v8944_v50 }
0x25d3   :  { %v8980_v4 = vsub.f32 %v8930_v10, %v4019_v2  ;;  %v8983_v16 = vadd.f32 %v4017_v23, %v8933_v37  ;;  %v4037_v10 = vand.u32 2147483648, %v4025_v33  ;;  %v4034_v37 = vsel %vm4033_vm5, %v7345_v48, %v4030_v51 }
0x25d5   :  { %v4021_v38 = vmul.f32 %v8980_v4, %v8980_v4  ;;  %v4038_v1 = vor.u32 1.1754944e-38, %v4037_v10 }
0x25d7   :  { %v4022_v60 = vsel %vm2199_vm4, %v4021_v38, 0.0  ;;  %v4039_v30 = vsel %vm4036_vm7, %v4038_v1, %v4034_v37 }
0x25d8   :  { %4023 = vadd.xlane.f32.xlu1 %v4022_v60 }
0x264b   :  { %v8989_v15 = vpop.xlane.xlu1 %4023 }
0x264c   :  { %v4040_v42 = vmul.f32 %v4039_v30, %v8989_v15 }
0x264e   :  { %v4041_v25 = vmul.f32 %v4040_v42, %v8944_v50 }
0x2650   :  { %v8994_v17 = vadd.f32 %v4041_v25, %v8980_v4 }
0x2652   :  { %v4069_v27 = vperm.slane %v8994_v17, 2  ;;  %v4056_v8 = vperm.slane %v8994_v17, 1  ;;  %v4043_v46 = vperm.slane %v8994_v17, 0  ;;  %v4082_v26 = vperm.slane %v8994_v17, 3 }
0x2654   :  { %4074 = vperm.xlu1 %7047, %v4069_v27   ;;  %4067 = vperm.xlu2 %7051, %v4056_v8  }
0x2655   :  { %4048 = vperm.xlu0 %7048, %v4043_v46  }
0x265c   :  { %7053 = vset.pattern.permute.xlu2 %v7933_v32 }
0x265d   :  { %7049 = vset.pattern.permute.xlu0 %v7945_v28 }
0x2664   :  { %4087 = vperm.xlu2 %7053, %v4082_v26  }
0x2665   :  { %4054 = vperm.xlu0 %7049, %v4043_v46  }
0x266c   :  { %7057 = vset.pattern.permute.xlu2 %v7945_v28 }
0x266d   :  { %7050 = vset.pattern.permute.xlu0 %v7933_v32 }
0x2675   :  { %4061 = vperm.xlu0 %7050, %v4056_v8  }
0x267d   :  { %7052 = vset.pattern.permute.xlu0 %v7945_v28 }
0x2685   :  { %4080 = vperm.xlu0 %7052, %v4069_v27  }
0x268d   :  { %4093 = vperm.xlu0 %7052, %v4082_v26  }
0x2695   :  { %7054 = vset.pattern.permute.xlu0 %v7933_v32 }
0x26ae   :  { %v4068_v20 = vpop.permute.xlu2 %4067 }
0x26af   :  { %v4098_v53 = vmul.f32 %v8843_v55, %v4068_v20 }
0x26b1   :  { %v4113_v49 = vsel %vm50_vm0, %v4098_v53, 0.0 }
0x26be   :  { %v4088_v23 = vpop.permute.xlu2 %4087 }
0x26bf   :  { %v4101_v58 = vmul.f32 %v8867_v41, %v4088_v23 }
0x26c1   :  { %v4130_v1 = vsel %vm50_vm0, %v4101_v58, 0.0 }
0x26c6   :  { %v4075_v63 = vpop.permute.xlu1 %4074 }
0x26c7   :  { %v4049_v50 = vpop.permute.xlu0 %4048  ;;  %v4099_v35 = vmul.f32 %v8859_v34, %v4075_v63 }
0x26c8   :  { %v4095_v56 = vmul.f32 %v8855_v44, %v4049_v50 }
0x26c9   :  { %v4121_v61 = vsel %vm50_vm0, %v4099_v35, 0.0 }
0x26ca   :  { %v4103_v39 = vsel %vm50_vm0, %v4095_v56, 0.0 }
0x26d7   :  { %v4055_v43 = vpop.permute.xlu0 %4054 }
0x26d8   :  { %v4096_v6 = vmul.f32 %v8846_v57, %v4055_v43 }
0x26da   :  { %v4104_v14 = vsel %vm50_vm0, %v4096_v6, 0.0 }
0x26db   :  { %v4105_v21 = vadd.f32 %v4104_v14, %v4103_v39 }
0x26dd   :  { %v4106_v12 = vrot.slane %v4105_v21, 4 }
0x26df   :  { %v4107_v33 = vadd.f32 %v4106_v12, %v4105_v21 }
0x26e1   :  { %v4108_v36 = vrot.slane %v4107_v33, 2 }
0x26e3   :  { %v4109_v8 = vadd.f32 %v4108_v36, %v4107_v33 }
0x26e7   :  { %v4062_v54 = vpop.permute.xlu0 %4061 }
0x26e8   :  { %v4097_v19 = vmul.f32 %v8849_v7, %v4062_v54  ;;  %v4110_v54 = vrot.slane %v4109_v8, 1 }
0x26ea   :  { %v4112_v0 = vsel %vm50_vm0, %v4097_v19, 0.0  ;;  %v4111_v56 = vadd.f32 %v4110_v54, %v4109_v8 }
0x26eb   :  { %v4114_v11 = vadd.f32 %v4113_v49, %v4112_v0 }
0x26ed   :  { %v4115_v5 = vrot.slane %v4114_v11, 4 }
0x26ef   :  { %v4116_v38 = vadd.f32 %v4115_v5, %v4114_v11 }
0x26f1   :  { %v4117_v22 = vrot.slane %v4116_v38, 2 }
0x26f3   :  { %v4118_v42 = vadd.f32 %v4117_v22, %v4116_v38 }
0x26f5   :  { %v4119_v26 = vrot.slane %v4118_v42, 1 }
0x26f7   :  { %v4081_v24 = vpop.permute.xlu0 %4080  ;;  %v4120_v19 = vadd.f32 %v4119_v26, %v4118_v42 }
0x26f8   :  { %v4100_v29 = vmul.f32 %v8852_v47, %v4081_v24 }
0x26f9   :  { %v4143_v14 = vsel %vm2192_vm9, %v4120_v19, %v4111_v56 }
0x26fa   :  { %v4122_v2 = vsel %vm50_vm0, %v4100_v29, 0.0 }
0x26fb   :  { %v4123_v60 = vadd.f32 %v4122_v2, %v4121_v61 }
0x26fd   :  { %v4124_v48 = vrot.slane %v4123_v60, 4 }
0x26ff   :  { %v4125_v52 = vadd.f32 %v4124_v48, %v4123_v60  ;;  %v4094_v51 = vpop.permute.xlu0 %4093 }
0x2700   :  { %v4102_v10 = vmul.f32 %v8870_v40, %v4094_v51 }
0x2701   :  { %v4126_v37 = vrot.slane %v4125_v52, 2 }
0x2702   :  { %v4131_v30 = vsel %vm50_vm0, %v4102_v10, 0.0 }
0x2703   :  { %v4132_v25 = vadd.f32 %v4131_v30, %v4130_v1  ;;  %v4127_v27 = vadd.f32 %v4126_v37, %v4125_v52  ;;  %v4175_v1 = vadd.f32 1e-30, %v8989_v15 }
0x2705   :  { %v4133_v46 = vrot.slane %v4132_v25, 4  ;;  %v4128_v43 = vrot.slane %v4127_v27, 1  ;;  %vm4181_vm15 = vweird.f32 %v4175_v1 }
0x2707   :  { %v4134_v50 = vadd.f32 %v4133_v46, %v4132_v25  ;;  %v4129_v6 = vadd.f32 %v4128_v43, %v4127_v27  ;;  %v4185_v46 = vand.u32 2147483647, %v4175_v1 }
0x2709   :  { %v4135_v20 = vrot.slane %v4134_v50, 2  ;;  %v4144_v63 = vsel %vm2194_vm13, %v4129_v6, %v4143_v14  ;;  %vm4186_vm6 = vcmp.eq.f32.partialorder %v4185_v46, 8.507059e+37 }
0x270b   :  { %v4136_v53 = vadd.f32 %v4135_v20, %v4134_v50 }
0x270d   :  { %v4137_v0 = vrot.slane %v4136_v53, 1 }
0x270f   :  { %v4138_v49 = vadd.f32 %v4137_v0, %v4136_v53 }
0x2711   :  { %v4145_v11 = vsel %vm2196_vm3, %v4138_v49, %v4144_v63 }
0x2712   :  { %v4147_v39 = vmul.f32 %v4145_v11, %v8994_v17 }
0x2714   :  { %v4148_v21 = vsel %vm2199_vm4, %v4147_v39, 0.0 }
0x2715   :  { %4149 = vadd.xlane.f32.xlu1 %v4148_v21 }
0x2788   :  { %v4150_v35 = vpop.xlane.xlu1 %4149 }
0x2789   :  { %v4151_v5 = vadd.f32 1e-30, %v4150_v35 }
0x278b   :  { %7346 = vrcp.f32 %v4151_v5  ;;  %v4163_v61 = vand.u32 2147483648, %v4151_v5  ;;  %v4161_v23 = vand.u32 2147483647, %v4151_v5  ;;  %vm4157_vm10 = vweird.f32 %v4151_v5 }
0x278c   :  { %7348 = vrcp.f32 %v4175_v1 }
0x278d   :  { %v4164_v60 = vor.u32 1.1754944e-38, %v4163_v61  ;;  %vm4162_vm12 = vcmp.eq.f32.partialorder %v4161_v23, 8.507059e+37 }
0x2791   :  { %v7347_v24 = vpop.eup %7346 }
0x2792   :  { %v4153_v29 = vmul.f32 %v7347_v24, %v4151_v5  ;;  %vm4158_vm8 = vweird.f32 %v7347_v24  ;;  %v7349_v30 = vpop.eup %7348 }
0x2793   :  { %vm4159_vm11 = vmor %vm4157_vm10, %vm4158_vm8  ;;  %v4177_v42 = vmul.f32 %v7349_v30, %v4175_v1  ;;  %vm4182_vm14 = vweird.f32 %v7349_v30 }
0x2794   :  { %v4154_v12 = vsub.f32 1.0, %v4153_v29  ;;  %vm4183_vm1 = vmor %vm4181_vm15, %vm4182_vm14 }
0x2795   :  { %v4178_v25 = vsub.f32 1.0, %v4177_v42 }
0x2796   :  { %v4155_v2 = vmul.f32 %v7347_v24, %v4154_v12 }
0x2797   :  { %v4179_v27 = vmul.f32 %v7349_v30, %v4178_v25 }
0x2798   :  { %v4156_v38 = vadd.f32 %v7347_v24, %v4155_v2 }
0x2799   :  { %v4180_v8 = vadd.f32 %v7349_v30, %v4179_v27 }
0x279a   :  { %v4160_v33 = vsel %vm4159_vm11, %v7347_v24, %v4156_v38 }
0x279b   :  { %v4165_v48 = vsel %vm4162_vm12, %v4164_v60, %v4160_v33 }
0x279c   :  { %v4166_v58 = vmul.f32 %v4165_v48, %v8989_v15 }
0x279e   :  { %v4169_v22 = vmul.f32 %v4166_v58, %v4145_v11  ;;  %v4167_v52 = vmul.f32 %v4166_v58, %v8994_v17 }
0x27a0   :  { %v9030_v51 = vsub.f32 %v8980_v4, %v4169_v22  ;;  %v9033_v10 = vadd.f32 %v4167_v52, %v8983_v16  ;;  %v4187_v4 = vand.u32 2147483648, %v4175_v1  ;;  %v4184_v16 = vsel %vm4183_vm1, %v7349_v30, %v4180_v8 }
0x27a2   :  { %v4171_v36 = vmul.f32 %v9030_v51, %v9030_v51  ;;  %v4188_v26 = vor.u32 1.1754944e-38, %v4187_v4 }
0x27a4   :  { %v4172_v37 = vsel %vm2199_vm4, %v4171_v36, 0.0  ;;  %v4189_v50 = vsel %vm4186_vm6, %v4188_v26, %v4184_v16 }
0x27a5   :  { %4173 = vadd.xlane.f32.xlu2 %v4172_v37 }
0x2818   :  { %v9039_v43 = vpop.xlane.xlu2 %4173 }
0x2819   :  { %v4190_v54 = vmul.f32 %v4189_v50, %v9039_v43 }
0x281b   :  { %v4191_v15 = vmul.f32 %v4190_v54, %v8994_v17 }
0x281d   :  { %v9044_v20 = vadd.f32 %v4191_v15, %v9030_v51 }
0x281f   :  { %v4219_v19 = vperm.slane %v9044_v20, 2  ;;  %v4206_v53 = vperm.slane %v9044_v20, 1  ;;  %v4193_v6 = vperm.slane %v9044_v20, 0  ;;  %v4232_v17 = vperm.slane %v9044_v20, 3 }
0x2821   :  { %4224 = vperm.xlu1 %7047, %v4219_v19   ;;  %4217 = vperm.xlu2 %7057, %v4206_v53  }
0x2822   :  { %4198 = vperm.xlu0 %7054, %v4193_v6  }
0x2829   :  { %7060 = vset.pattern.permute.xlu1 %v7945_v28  ;;  %7059 = vset.pattern.permute.xlu2 %v7933_v32 }
0x282a   :  { %7055 = vset.pattern.permute.xlu0 %v7945_v28 }
0x2831   :  { %4243 = vperm.xlu1 %7060, %v4232_v17   ;;  %4237 = vperm.xlu2 %7059, %v4232_v17  }
0x2832   :  { %4204 = vperm.xlu0 %7055, %v4193_v6  }
0x2839   :  { %7061 = vset.pattern.permute.xlu1 %v7933_v32 }
0x283a   :  { %7056 = vset.pattern.permute.xlu0 %v7933_v32 }
0x2842   :  { %4211 = vperm.xlu0 %7056, %v4206_v53  }
0x284a   :  { %7058 = vset.pattern.permute.xlu0 %v7945_v28 }
0x2852   :  { %4230 = vperm.xlu0 %7058, %v4219_v19  }
0x287b   :  { %v4218_v14 = vpop.permute.xlu2 %4217 }
0x287c   :  { %v4248_v11 = vmul.f32 %v8843_v55, %v4218_v14 }
0x287e   :  { %v4263_v61 = vsel %vm50_vm0, %v4248_v11, 0.0 }
0x288b   :  { %v4238_v35 = vpop.permute.xlu2 %4237 }
0x288c   :  { %v4251_v2 = vmul.f32 %v8867_v41, %v4238_v35 }
0x2893   :  { %v4225_v0 = vpop.permute.xlu1 %4224 }
0x2894   :  { %v4199_v56 = vpop.permute.xlu0 %4198  ;;  %v4249_v22 = vmul.f32 %v8859_v34, %v4225_v0 }
0x2895   :  { %v4245_v24 = vmul.f32 %v8855_v44, %v4199_v56 }
0x2896   :  { %v4271_v30 = vsel %vm50_vm0, %v4249_v22, 0.0  ;;  %v4325_v22 = vadd.f32 1e-30, %v9039_v43 }
0x2897   :  { %v4253_v55 = vsel %vm50_vm0, %v4245_v24, 0.0 }
0x2898   :  { %vm4331_vm11 = vweird.f32 %v4325_v22 }
0x28a3   :  { %v4244_v63 = vpop.permute.xlu1 %4243 }
0x28a4   :  { %v4205_v49 = vpop.permute.xlu0 %4204  ;;  %v4252_v29 = vmul.f32 %v8870_v40, %v4244_v63 }
0x28a5   :  { %v4246_v39 = vmul.f32 %v8846_v57, %v4205_v49 }
0x28a6   :  { %v4281_v57 = vsel %vm50_vm0, %v4252_v29, 0.0 }
0x28a7   :  { %v4254_v23 = vsel %vm50_vm0, %v4246_v39, 0.0 }
0x28a8   :  { %v4255_v60 = vadd.f32 %v4254_v23, %v4253_v55 }
0x28aa   :  { %v4256_v48 = vrot.slane %v4255_v60, 4 }
0x28ac   :  { %v4257_v52 = vadd.f32 %v4256_v48, %v4255_v60 }
0x28ae   :  { %v4258_v42 = vrot.slane %v4257_v52, 2 }
0x28b0   :  { %v4259_v16 = vadd.f32 %v4258_v42, %v4257_v52 }
0x28b2   :  { %v4260_v15 = vrot.slane %v4259_v16, 1 }
0x28b4   :  { %v4212_v21 = vpop.permute.xlu0 %4211 }
0x28b5   :  { %v4247_v5 = vmul.f32 %v8849_v7, %v4212_v21  ;;  %v4280_v7 = vsel %vm50_vm0, %v4251_v2, 0.0 }
0x28b6   :  { %v4282_v33 = vadd.f32 %v4281_v57, %v4280_v7 }
0x28b7   :  { %v4262_v12 = vsel %vm50_vm0, %v4247_v5, 0.0 }
0x28b8   :  { %v4264_v38 = vadd.f32 %v4263_v61, %v4262_v12  ;;  %v4283_v40 = vrot.slane %v4282_v33, 4 }
0x28ba   :  { %v4265_v44 = vrot.slane %v4264_v38, 4  ;;  %v4284_v41 = vadd.f32 %v4283_v40, %v4282_v33 }
0x28bc   :  { %v4266_v58 = vadd.f32 %v4265_v44, %v4264_v38  ;;  %v4285_v8 = vrot.slane %v4284_v41, 2 }
0x28be   :  { %v4267_v37 = vrot.slane %v4266_v58, 2  ;;  %v4286_v50 = vadd.f32 %v4285_v8, %v4284_v41 }
0x28c0   :  { %v4268_v4 = vadd.f32 %v4267_v37, %v4266_v58  ;;  %v4287_v53 = vrot.slane %v4286_v50, 1 }
0x28c2   :  { %v4269_v54 = vrot.slane %v4268_v4, 1  ;;  %v4288_v0 = vadd.f32 %v4287_v53, %v4286_v50  ;;  %v9107_v53 = vld [vmem:[#allocation5 + $0x18] sm:$0xff] }
0x28c4   :  { %v4231_v36 = vpop.permute.xlu0 %4230  ;;  %v4270_v6 = vadd.f32 %v4269_v54, %v4268_v4 }
0x28c5   :  { %v4250_v1 = vmul.f32 %v8852_v47, %v4231_v36  ;;  %v4261_v47 = vadd.f32 %v4260_v15, %v4259_v16 }
0x28c7   :  { %v4272_v25 = vsel %vm50_vm0, %v4250_v1, 0.0  ;;  %v4293_v49 = vsel %vm2192_vm9, %v4270_v6, %v4261_v47 }
0x28c8   :  { %v4273_v27 = vadd.f32 %v4272_v25, %v4271_v30  ;;  %v4335_v30 = vand.u32 2147483647, %v4325_v22 }
0x28ca   :  { %v4274_v46 = vrot.slane %v4273_v27, 4  ;;  %vm4336_vm14 = vcmp.eq.f32.partialorder %v4335_v30, 8.507059e+37 }
0x28cc   :  { %v4275_v26 = vadd.f32 %v4274_v46, %v4273_v27 }
0x28ce   :  { %v4276_v34 = vrot.slane %v4275_v26, 2 }
0x28d0   :  { %v4277_v19 = vadd.f32 %v4276_v34, %v4275_v26 }
0x28d2   :  { %v4278_v17 = vrot.slane %v4277_v19, 1 }
0x28d4   :  { %v4279_v56 = vadd.f32 %v4278_v17, %v4277_v19  ;;  %v9110_v17 = vld [vmem:[#allocation5 + $0x8] sm:$0xff] }
0x28d6   :  { %v4294_v14 = vsel %vm2194_vm13, %v4279_v56, %v4293_v49  ;;  %v9113_v56 = vld [vmem:[#allocation5 + $0x10] sm:$0xff]  ;;  %v9116_v49 = vld [vmem:[#allocation5 + $0x28] sm:$0xff] }
0x28d7   :  { %v4295_v63 = vsel %vm2196_vm3, %v4288_v0, %v4294_v14 }
0x28d8   :  { %v4297_v11 = vmul.f32 %v4295_v63, %v9044_v20 }
0x28da   :  { %v4298_v39 = vsel %vm2199_vm4, %v4297_v11, 0.0  ;;  %v9119_v11 = vld [vmem:[#allocation5] sm:$0xff] }
0x28db   :  { %4299 = vadd.xlane.f32.xlu0 %v4298_v39 }
0x294e   :  { %v4300_v21 = vpop.xlane.xlu0 %4299 }
0x294f   :  { %v4301_v35 = vadd.f32 1e-30, %v4300_v21 }
0x2951   :  { %7350 = vrcp.f32 %v4301_v35  ;;  %v4313_v12 = vand.u32 2147483648, %v4301_v35  ;;  %v4311_v2 = vand.u32 2147483647, %v4301_v35  ;;  %vm4307_vm5 = vweird.f32 %v4301_v35 }
0x2952   :  { %7352 = vrcp.f32 %v4325_v22 }
0x2953   :  { %v4314_v38 = vor.u32 1.1754944e-38, %v4313_v12  ;;  %vm4312_vm8 = vcmp.eq.f32.partialorder %v4311_v2, 8.507059e+37 }
0x2957   :  { %v7351_v5 = vpop.eup %7350 }
0x2958   :  { %v4303_v24 = vmul.f32 %v7351_v5, %v4301_v35  ;;  %vm4308_vm2 = vweird.f32 %v7351_v5  ;;  %v7353_v52 = vpop.eup %7352  ;;  %v9123_v35 = vld [vmem:[#allocation5 + $0x20] sm:$0xff] }
0x2959   :  { %vm4309_vm7 = vmor %vm4307_vm5, %vm4308_vm2  ;;  %v4327_v36 = vmul.f32 %v7353_v52, %v4325_v22  ;;  %vm4332_vm10 = vweird.f32 %v7353_v52 }
0x295a   :  { %v4304_v29 = vsub.f32 1.0, %v4303_v24  ;;  %vm4333_vm12 = vmor %vm4331_vm11, %vm4332_vm10 }
0x295b   :  { %v4328_v41 = vsub.f32 1.0, %v4327_v36 }
0x295c   :  { %v4305_v61 = vmul.f32 %v7351_v5, %v4304_v29 }
0x295d   :  { %v4329_v37 = vmul.f32 %v7353_v52, %v4328_v41 }
0x295e   :  { %v4306_v23 = vadd.f32 %v7351_v5, %v4305_v61 }
0x295f   :  { %v4330_v1 = vadd.f32 %v7353_v52, %v4329_v37 }
0x2960   :  { %v4310_v55 = vsel %vm4309_vm7, %v7351_v5, %v4306_v23 }
0x2961   :  { %v4315_v57 = vsel %vm4312_vm8, %v4314_v38, %v4310_v55 }
0x2962   :  { %v4316_v60 = vmul.f32 %v4315_v57, %v9039_v43 }
0x2964   :  { %v4319_v7 = vmul.f32 %v4316_v60, %v4295_v63  ;;  %v4317_v33 = vmul.f32 %v4316_v60, %v9044_v20 }
0x2966   :  { %v9080_v44 = vsub.f32 %v9030_v51, %v4319_v7  ;;  %v9083_v48 = vadd.f32 %v4317_v33, %v9033_v10  ;;  %v4337_v51 = vand.u32 2147483648, %v4325_v22  ;;  %v4334_v10 = vsel %vm4333_vm12, %v7353_v52, %v4330_v1  ;;  %v9131_v52 = vld [vmem:[#allocation5 + $0x30] sm:$0xff] }
0x2968   :  { %v4321_v40 = vmul.f32 %v9080_v44, %v9080_v44  ;;  %v4338_v42 = vor.u32 1.1754944e-38, %v4337_v51  ;;  %v9134_v51 = vld [vmem:[#allocation5 + $0x38] sm:$0xff] }
0x296a   :  { %v4322_v58 = vsel %vm2199_vm4, %v4321_v40, 0.0  ;;  %v4339_v27 = vsel %vm4336_vm14, %v4338_v42, %v4334_v10 }
0x296b   :  { %4323 = vadd.xlane.f32.xlu2 %v4322_v58 }
0x29de   :  { %v9089_v25 = vpop.xlane.xlu2 %4323 }
0x29df   :  { %v4340_v8 = vmul.f32 %v4339_v27, %v9089_v25 }
0x29e1   :  { %v4341_v43 = vmul.f32 %v4340_v8, %v9044_v20 }
0x29e3   :  { %v9094_v4 = vadd.f32 %v4341_v43, %v9080_v44 }
0x29e5   :  { %v4382_v46 = vperm.slane %v9094_v4, 3  ;;  %v4369_v16 = vperm.slane %v9094_v4, 2  ;;  %v4343_v26 = vperm.slane %v9094_v4, 0  ;;  %v4356_v20 = vperm.slane %v9094_v4, 1 }
0x29e7   :  { %4387 = vperm.xlu2 %7059, %v4382_v46   ;;  %4380 = vperm.xlu0 %7058, %v4369_v16  }
0x29e8   :  { %4348 = vperm.xlu1 %7061, %v4343_v26  }
0x29ef   :  { %7071 = vset.pattern.permute.xlu0 %v7933_v32 }
0x29f0   :  { %7062 = vset.pattern.permute.xlu1 %v7945_v28 }
0x29f8   :  { %4354 = vperm.xlu1 %7062, %v4343_v26  }
0x2a00   :  { %7063 = vset.pattern.permute.xlu1 %v7933_v32 }
0x2a08   :  { %4361 = vperm.xlu1 %7063, %v4356_v20  }
0x2a10   :  { %7064 = vset.pattern.permute.xlu1 %v7945_v28 }
0x2a18   :  { %4367 = vperm.xlu1 %7064, %v4356_v20  }
0x2a20   :  { %7065 = vset.pattern.permute.xlu1 %v7933_v32 }
0x2a28   :  { %4374 = vperm.xlu1 %7065, %v4369_v16  }
0x2a30   :  { %7066 = vset.pattern.permute.xlu1 %v7945_v28 }
0x2a38   :  { %4393 = vperm.xlu1 %7066, %v4382_v46  }
0x2a40   :  { %7070 = vset.pattern.permute.xlu1 %v7933_v32 }
0x2a41   :  { %v4388_v33 = vpop.permute.xlu2 %4387 }
0x2a42   :  { %v4401_v36 = vmul.f32 %v9131_v52, %v4388_v33 }
0x2a44   :  { %v4430_v42 = vsel %vm50_vm0, %v4401_v36, 0.0 }
0x2a59   :  { %v4381_v19 = vpop.permute.xlu0 %4380 }
0x2a5a   :  { %v4349_v50 = vpop.permute.xlu1 %4348  ;;  %v4400_v14 = vmul.f32 %v9116_v49, %v4381_v19 }
0x2a5b   :  { %v4395_v39 = vmul.f32 %v9119_v11, %v4349_v50 }
0x2a5c   :  { %v4422_v61 = vsel %vm50_vm0, %v4400_v14, 0.0 }
0x2a5d   :  { %v4403_v23 = vsel %vm50_vm0, %v4395_v39, 0.0 }
0x2a6a   :  { %v4355_v54 = vpop.permute.xlu1 %4354 }
0x2a6b   :  { %v4396_v47 = vmul.f32 %v9110_v17, %v4355_v54 }
0x2a6d   :  { %v4404_v24 = vsel %vm50_vm0, %v4396_v47, 0.0 }
0x2a6e   :  { %v4405_v55 = vadd.f32 %v4404_v24, %v4403_v23 }
0x2a70   :  { %v4406_v7 = vrot.slane %v4405_v55, 4 }
0x2a72   :  { %v4407_v22 = vadd.f32 %v4406_v7, %v4405_v55 }
0x2a74   :  { %v4408_v10 = vrot.slane %v4407_v22, 2 }
0x2a76   :  { %v4409_v16 = vadd.f32 %v4408_v10, %v4407_v22 }
0x2a7a   :  { %v4362_v34 = vpop.permute.xlu1 %4361 }
0x2a7b   :  { %v4397_v0 = vmul.f32 %v9113_v56, %v4362_v34  ;;  %v4410_v34 = vrot.slane %v4409_v16, 1 }
0x2a7d   :  { %v4412_v29 = vsel %vm50_vm0, %v4397_v0, 0.0  ;;  %v4411_v0 = vadd.f32 %v4410_v34, %v4409_v16 }
0x2a8a   :  { %v4368_v15 = vpop.permute.xlu1 %4367 }
0x2a8b   :  { %v4398_v6 = vmul.f32 %v9107_v53, %v4368_v15 }
0x2a8d   :  { %v4413_v21 = vsel %vm50_vm0, %v4398_v6, 0.0 }
0x2a8e   :  { %v4414_v2 = vadd.f32 %v4413_v21, %v4412_v29 }
0x2a90   :  { %v4415_v57 = vrot.slane %v4414_v2, 4 }
0x2a92   :  { %v4416_v40 = vadd.f32 %v4415_v57, %v4414_v2 }
0x2a94   :  { %v4417_v41 = vrot.slane %v4416_v40, 2 }
0x2a96   :  { %v4418_v8 = vadd.f32 %v4417_v41, %v4416_v40 }
0x2a98   :  { %v4419_v20 = vrot.slane %v4418_v8, 1 }
0x2a9a   :  { %v4375_v63 = vpop.permute.xlu1 %4374  ;;  %v4420_v19 = vadd.f32 %v4419_v20, %v4418_v8 }
0x2a9b   :  { %v4399_v5 = vmul.f32 %v9123_v35, %v4375_v63 }
0x2a9c   :  { %v4443_v39 = vsel %vm2192_vm9, %v4420_v19, %v4411_v0 }
0x2a9d   :  { %v4421_v12 = vsel %vm50_vm0, %v4399_v5, 0.0 }
0x2a9e   :  { %v4423_v38 = vadd.f32 %v4422_v61, %v4421_v12 }
0x2aa0   :  { %v4424_v60 = vrot.slane %v4423_v38, 4 }
0x2aa2   :  { %v4425_v58 = vadd.f32 %v4424_v60, %v4423_v38 }
0x2aa4   :  { %v4426_v1 = vrot.slane %v4425_v58, 2 }
0x2aa6   :  { %v4427_v46 = vadd.f32 %v4426_v1, %v4425_v58 }
0x2aa8   :  { %v4428_v54 = vrot.slane %v4427_v46, 1 }
0x2aaa   :  { %v4394_v37 = vpop.permute.xlu1 %4393  ;;  %v4429_v47 = vadd.f32 %v4428_v54, %v4427_v46 }
0x2aab   :  { %v4402_v30 = vmul.f32 %v9134_v51, %v4394_v37 }
0x2aac   :  { %v4444_v21 = vsel %vm2194_vm13, %v4429_v47, %v4443_v39 }
0x2aad   :  { %v4431_v27 = vsel %vm50_vm0, %v4402_v30, 0.0 }
0x2aae   :  { %v4432_v43 = vadd.f32 %v4431_v27, %v4430_v42  ;;  %v4475_v42 = vadd.f32 1e-30, %v9089_v25 }
0x2ab0   :  { %v4433_v26 = vrot.slane %v4432_v43, 4  ;;  %vm4481_vm7 = vweird.f32 %v4475_v42 }
0x2ab2   :  { %v4434_v50 = vadd.f32 %v4433_v26, %v4432_v43  ;;  %v4485_v26 = vand.u32 2147483647, %v4475_v42 }
0x2ab4   :  { %v4435_v15 = vrot.slane %v4434_v50, 2  ;;  %vm4486_vm10 = vcmp.eq.f32.partialorder %v4485_v26, 8.507059e+37 }
0x2ab6   :  { %v4436_v6 = vadd.f32 %v4435_v15, %v4434_v50 }
0x2ab8   :  { %v4437_v14 = vrot.slane %v4436_v6, 1 }
0x2aba   :  { %v4438_v63 = vadd.f32 %v4437_v14, %v4436_v6 }
0x2abc   :  { %v4445_v5 = vsel %vm2196_vm3, %v4438_v63, %v4444_v21 }
0x2abd   :  { %v4447_v24 = vmul.f32 %v4445_v5, %v9094_v4 }
0x2abf   :  { %v4448_v29 = vsel %vm2199_vm4, %v4447_v24, 0.0 }
0x2ac0   :  { %4449 = vadd.xlane.f32.xlu1 %v4448_v29 }
0x2b33   :  { %v4450_v12 = vpop.xlane.xlu1 %4449 }
0x2b34   :  { %v4451_v61 = vadd.f32 1e-30, %v4450_v12 }
0x2b36   :  { %7354 = vrcp.f32 %v4451_v61  ;;  %v4463_v55 = vand.u32 2147483648, %v4451_v61  ;;  %v4461_v60 = vand.u32 2147483647, %v4451_v61  ;;  %vm4457_vm1 = vweird.f32 %v4451_v61 }
0x2b37   :  { %7356 = vrcp.f32 %v4475_v42 }
0x2b38   :  { %v4464_v33 = vor.u32 1.1754944e-38, %v4463_v55  ;;  %vm4462_vm2 = vcmp.eq.f32.partialorder %v4461_v60, 8.507059e+37 }
0x2b3c   :  { %v7355_v2 = vpop.eup %7354 }
0x2b3d   :  { %v4453_v23 = vmul.f32 %v7355_v2, %v4451_v61  ;;  %vm4458_vm15 = vweird.f32 %v7355_v2  ;;  %v7357_v27 = vpop.eup %7356 }
0x2b3e   :  { %vm4459_vm6 = vmor %vm4457_vm1, %vm4458_vm15  ;;  %v4477_v8 = vmul.f32 %v7357_v27, %v4475_v42  ;;  %vm4482_vm5 = vweird.f32 %v7357_v27 }
0x2b3f   :  { %v4454_v38 = vsub.f32 1.0, %v4453_v23  ;;  %vm4483_vm8 = vmor %vm4481_vm7, %vm4482_vm5 }
0x2b40   :  { %v4478_v43 = vsub.f32 1.0, %v4477_v8 }
0x2b41   :  { %v4455_v57 = vmul.f32 %v7355_v2, %v4454_v38 }
0x2b42   :  { %v4479_v46 = vmul.f32 %v7357_v27, %v4478_v43 }
0x2b43   :  { %v4456_v7 = vadd.f32 %v7355_v2, %v4455_v57 }
0x2b44   :  { %v4480_v16 = vadd.f32 %v7357_v27, %v4479_v46 }
0x2b45   :  { %v4460_v40 = vsel %vm4459_vm6, %v7355_v2, %v4456_v7 }
0x2b46   :  { %v4465_v58 = vsel %vm4462_vm2, %v4464_v33, %v4460_v40 }
0x2b47   :  { %v4466_v22 = vmul.f32 %v4465_v58, %v9089_v25 }
0x2b49   :  { %v4469_v36 = vmul.f32 %v4466_v22, %v4445_v5  ;;  %v4467_v41 = vmul.f32 %v4466_v22, %v9094_v4 }
0x2b4b   :  { %v9147_v37 = vsub.f32 %v9080_v44, %v4469_v36  ;;  %v9150_v1 = vadd.f32 %v4467_v41, %v9083_v48  ;;  %v4487_v44 = vand.u32 2147483648, %v4475_v42  ;;  %v4484_v48 = vsel %vm4483_vm8, %v7357_v27, %v4480_v16 }
0x2b4d   :  { %v4471_v30 = vmul.f32 %v9147_v37, %v9147_v37  ;;  %v4488_v20 = vor.u32 1.1754944e-38, %v4487_v44 }
0x2b4f   :  { %v4472_v10 = vsel %vm2199_vm4, %v4471_v30, 0.0  ;;  %v4489_v50 = vsel %vm4486_vm10, %v4488_v20, %v4484_v48 }
0x2b50   :  { %4473 = vadd.xlane.f32.xlu0 %v4472_v10 }
0x2bc3   :  { %v9156_v54 = vpop.xlane.xlu0 %4473 }
0x2bc4   :  { %v4490_v34 = vmul.f32 %v4489_v50, %v9156_v54 }
0x2bc6   :  { %v4491_v25 = vmul.f32 %v4490_v34, %v9094_v4 }
0x2bc8   :  { %v9161_v15 = vadd.f32 %v4491_v25, %v9147_v37 }
0x2bca   :  { %v4532_v19 = vperm.slane %v9161_v15, 3  ;;  %v4519_v6 = vperm.slane %v9161_v15, 2  ;;  %v4493_v47 = vperm.slane %v9161_v15, 0  ;;  %v4506_v4 = vperm.slane %v9161_v15, 1 }
0x2bcc   :  { %4537 = vperm.xlu0 %7071, %v4532_v19   ;;  %4524 = vperm.xlu1 %7070, %v4519_v6  }
0x2bcd   :  { %4498 = vperm.xlu2 %7059, %v4493_v47  }
0x2bd4   :  { %7074 = vset.pattern.permute.xlu1 %v7945_v28 }
0x2bd5   :  { %7067 = vset.pattern.permute.xlu2 %v7945_v28 }
0x2bdd   :  { %4504 = vperm.xlu2 %7067, %v4493_v47  }
0x2be5   :  { %7068 = vset.pattern.permute.xlu2 %v7933_v32 }
0x2bed   :  { %4511 = vperm.xlu2 %7068, %v4506_v4  }
0x2bf5   :  { %7069 = vset.pattern.permute.xlu2 %v7945_v28 }
0x2bfd   :  { %4517 = vperm.xlu2 %7069, %v4506_v4  }
0x2c05   :  { %4530 = vperm.xlu2 %7069, %v4519_v6  }
0x2c0d   :  { %4543 = vperm.xlu2 %7069, %v4532_v19  }
0x2c15   :  { %7073 = vset.pattern.permute.xlu2 %v7933_v32 }
0x2c27   :  { %v4499_v0 = vpop.permute.xlu2 %4498 }
0x2c28   :  { %v4545_v24 = vmul.f32 %v9119_v11, %v4499_v0 }
0x2c2a   :  { %v4553_v55 = vsel %vm50_vm0, %v4545_v24, 0.0 }
0x2c37   :  { %v4505_v14 = vpop.permute.xlu2 %4504 }
0x2c38   :  { %v4546_v39 = vmul.f32 %v9110_v17, %v4505_v14 }
0x2c3a   :  { %v4554_v12 = vsel %vm50_vm0, %v4546_v39, 0.0 }
0x2c3b   :  { %v4555_v57 = vadd.f32 %v4554_v12, %v4553_v55 }
0x2c3d   :  { %v4556_v58 = vrot.slane %v4555_v57, 4 }
0x2c3e   :  { %v4525_v23 = vpop.permute.xlu1 %4524  ;;  %v4538_v41 = vpop.permute.xlu0 %4537 }
0x2c3f   :  { %v4549_v60 = vmul.f32 %v9123_v35, %v4525_v23  ;;  %v4557_v42 = vadd.f32 %v4556_v58, %v4555_v57  ;;  %v4551_v8 = vmul.f32 %v9131_v52, %v4538_v41 }
0x2c41   :  { %v4571_v22 = vsel %vm50_vm0, %v4549_v60, 0.0  ;;  %v4558_v26 = vrot.slane %v4557_v42, 2  ;;  %v4580_v20 = vsel %vm50_vm0, %v4551_v8, 0.0 }
0x2c43   :  { %v4559_v6 = vadd.f32 %v4558_v26, %v4557_v42 }
0x2c47   :  { %v4512_v63 = vpop.permute.xlu2 %4511 }
0x2c48   :  { %v4547_v21 = vmul.f32 %v9113_v56, %v4512_v63  ;;  %v4560_v63 = vrot.slane %v4559_v6, 1 }
0x2c4a   :  { %v4562_v61 = vsel %vm50_vm0, %v4547_v21, 0.0 }
0x2c57   :  { %v4518_v5 = vpop.permute.xlu2 %4517 }
0x2c58   :  { %v4548_v29 = vmul.f32 %v9107_v53, %v4518_v5 }
0x2c5a   :  { %v4563_v2 = vsel %vm50_vm0, %v4548_v29, 0.0  ;;  %v4561_v29 = vadd.f32 %v4560_v63, %v4559_v6 }
0x2c5b   :  { %v4564_v38 = vadd.f32 %v4563_v2, %v4562_v61 }
0x2c5d   :  { %v4565_v7 = vrot.slane %v4564_v38, 4 }
0x2c5f   :  { %v4531_v33 = vpop.permute.xlu2 %4530  ;;  %v4566_v30 = vadd.f32 %v4565_v7, %v4564_v38 }
0x2c60   :  { %v4550_v40 = vmul.f32 %v9116_v49, %v4531_v33 }
0x2c61   :  { %v4567_v43 = vrot.slane %v4566_v30, 2 }
0x2c62   :  { %v4572_v36 = vsel %vm50_vm0, %v4550_v40, 0.0 }
0x2c63   :  { %v4573_v10 = vadd.f32 %v4572_v36, %v4571_v22  ;;  %v4568_v34 = vadd.f32 %v4567_v43, %v4566_v30 }
0x2c65   :  { %v4574_v27 = vrot.slane %v4573_v10, 4  ;;  %v4569_v4 = vrot.slane %v4568_v34, 1 }
0x2c67   :  { %v4575_v46 = vadd.f32 %v4574_v27, %v4573_v10  ;;  %v4544_v16 = vpop.permute.xlu2 %4543  ;;  %v4570_v21 = vadd.f32 %v4569_v4, %v4568_v34 }
0x2c68   :  { %v4552_v44 = vmul.f32 %v9134_v51, %v4544_v16 }
0x2c69   :  { %v4576_v48 = vrot.slane %v4575_v46, 2  ;;  %v4593_v2 = vsel %vm2192_vm9, %v4570_v21, %v4561_v29 }
0x2c6a   :  { %v4581_v50 = vsel %vm50_vm0, %v4552_v44, 0.0 }
0x2c6b   :  { %v4582_v25 = vadd.f32 %v4581_v50, %v4580_v20  ;;  %v4577_v19 = vadd.f32 %v4576_v48, %v4575_v46  ;;  %v4625_v20 = vadd.f32 1e-30, %v9156_v54 }
0x2c6d   :  { %v4583_v47 = vrot.slane %v4582_v25, 4  ;;  %v4578_v14 = vrot.slane %v4577_v19, 1  ;;  %vm4631_vm6 = vweird.f32 %v4625_v20 }
0x2c6f   :  { %v4584_v0 = vadd.f32 %v4583_v47, %v4582_v25  ;;  %v4579_v24 = vadd.f32 %v4578_v14, %v4577_v19  ;;  %v4635_v47 = vand.u32 2147483647, %v4625_v20 }
0x2c71   :  { %v4585_v39 = vrot.slane %v4584_v0, 2  ;;  %v4594_v23 = vsel %vm2194_vm13, %v4579_v24, %v4593_v2  ;;  %vm4636_vm5 = vcmp.eq.f32.partialorder %v4635_v47, 8.507059e+37 }
0x2c73   :  { %v4586_v5 = vadd.f32 %v4585_v39, %v4584_v0 }
0x2c75   :  { %v4587_v12 = vrot.slane %v4586_v5, 1 }
0x2c77   :  { %v4588_v61 = vadd.f32 %v4587_v12, %v4586_v5 }
0x2c79   :  { %v4595_v38 = vsel %vm2196_vm3, %v4588_v61, %v4594_v23 }
0x2c7a   :  { %v4597_v55 = vmul.f32 %v4595_v38, %v9161_v15 }
0x2c7c   :  { %v4598_v57 = vsel %vm2199_vm4, %v4597_v55, 0.0 }
0x2c7d   :  { %4599 = vadd.xlane.f32.xlu2 %v4598_v57 }
0x2cf0   :  { %v4600_v60 = vpop.xlane.xlu2 %4599 }
0x2cf1   :  { %v4601_v7 = vadd.f32 1e-30, %v4600_v60 }
0x2cf3   :  { %7358 = vrcp.f32 %v4601_v7  ;;  %v4613_v22 = vand.u32 2147483648, %v4601_v7  ;;  %v4611_v41 = vand.u32 2147483647, %v4601_v7  ;;  %vm4607_vm12 = vweird.f32 %v4601_v7 }
0x2cf4   :  { %7360 = vrcp.f32 %v4625_v20 }
0x2cf5   :  { %v4614_v10 = vor.u32 1.1754944e-38, %v4613_v22  ;;  %vm4612_vm15 = vcmp.eq.f32.partialorder %v4611_v41, 8.507059e+37 }
0x2cf9   :  { %v7359_v33 = vpop.eup %7358 }
0x2cfa   :  { %v4603_v40 = vmul.f32 %v7359_v33, %v4601_v7  ;;  %vm4608_vm11 = vweird.f32 %v7359_v33  ;;  %v7361_v50 = vpop.eup %7360 }
0x2cfb   :  { %vm4609_vm14 = vmor %vm4607_vm12, %vm4608_vm11  ;;  %v4627_v34 = vmul.f32 %v7361_v50, %v4625_v20  ;;  %vm4632_vm1 = vweird.f32 %v7361_v50 }
0x2cfc   :  { %v4604_v58 = vsub.f32 1.0, %v4603_v40  ;;  %vm4633_vm2 = vmor %vm4631_vm6, %vm4632_vm1 }
0x2cfd   :  { %v4628_v25 = vsub.f32 1.0, %v4627_v34 }
0x2cfe   :  { %v4605_v36 = vmul.f32 %v7359_v33, %v4604_v58 }
0x2cff   :  { %v4629_v19 = vmul.f32 %v7361_v50, %v4628_v25 }
0x2d00   :  { %v4606_v30 = vadd.f32 %v7359_v33, %v4605_v36 }
0x2d01   :  { %v4630_v6 = vadd.f32 %v7361_v50, %v4629_v19 }
0x2d02   :  { %v4610_v42 = vsel %vm4609_vm14, %v7359_v33, %v4606_v30 }
0x2d03   :  { %v4615_v27 = vsel %vm4612_vm15, %v4614_v10, %v4610_v42 }
0x2d04   :  { %v4616_v8 = vmul.f32 %v4615_v27, %v9156_v54 }
0x2d06   :  { %v4619_v43 = vmul.f32 %v4616_v8, %v4595_v38  ;;  %v4617_v46 = vmul.f32 %v4616_v8, %v9161_v15 }
0x2d08   :  { %v9196_v16 = vsub.f32 %v9147_v37, %v4619_v43  ;;  %v9199_v44 = vadd.f32 %v4617_v46, %v9150_v1  ;;  %v4637_v37 = vand.u32 2147483648, %v4625_v20  ;;  %v4634_v1 = vsel %vm4633_vm2, %v7361_v50, %v4630_v6 }
0x2d0a   :  { %v4621_v26 = vmul.f32 %v9196_v16, %v9196_v16  ;;  %v4638_v4 = vor.u32 1.1754944e-38, %v4637_v37 }
0x2d0c   :  { %v4622_v48 = vsel %vm2199_vm4, %v4621_v26, 0.0  ;;  %v4639_v14 = vsel %vm4636_vm5, %v4638_v4, %v4634_v1 }
0x2d0d   :  { %4623 = vadd.xlane.f32.xlu1 %v4622_v48 }
0x2d80   :  { %v9205_v0 = vpop.xlane.xlu1 %4623 }
0x2d81   :  { %v4640_v63 = vmul.f32 %v4639_v14, %v9205_v0 }
0x2d83   :  { %v4641_v54 = vmul.f32 %v4640_v63, %v9161_v15 }
0x2d85   :  { %v9210_v39 = vadd.f32 %v4641_v54, %v9196_v16 }
0x2d87   :  { %v4656_v21 = vperm.slane %v9210_v39, 1  ;;  %v4643_v5 = vperm.slane %v9210_v39, 0  ;;  %v4682_v24 = vperm.slane %v9210_v39, 3  ;;  %v4669_v29 = vperm.slane %v9210_v39, 2 }
0x2d89   :  { %4667 = vperm.xlu1 %7074, %v4656_v21   ;;  %4661 = vperm.xlu2 %7073, %v4656_v21  }
0x2d8a   :  { %4648 = vperm.xlu0 %7071, %v4643_v5  }
0x2d91   :  { %4693 = vperm.xlu1 %7074, %v4682_v24   ;;  %7076 = vset.pattern.permute.xlu2 %v7945_v28 }
0x2d92   :  { %7072 = vset.pattern.permute.xlu0 %v7945_v28 }
0x2d99   :  { %4680 = vperm.xlu2 %7076, %v4669_v29   ;;  %7077 = vset.pattern.permute.xlu1 %v7933_v32 }
0x2d9a   :  { %4654 = vperm.xlu0 %7072, %v4643_v5  }
0x2da2   :  { %7075 = vset.pattern.permute.xlu0 %v7933_v32 }
0x2daa   :  { %4674 = vperm.xlu0 %7075, %v4669_v29  }
0x2db2   :  { %4687 = vperm.xlu0 %7075, %v4682_v24  }
0x2de3   :  { %v4662_v61 = vpop.permute.xlu2 %4661 }
0x2de4   :  { %v4697_v57 = vmul.f32 %v9113_v56, %v4662_v61 }
0x2de6   :  { %v4712_v22 = vsel %vm50_vm0, %v4697_v57, 0.0 }
0x2df3   :  { %v4681_v40 = vpop.permute.xlu2 %4680 }
0x2df4   :  { %v4700_v41 = vmul.f32 %v9116_v49, %v4681_v40 }
0x2df6   :  { %v4722_v8 = vsel %vm50_vm0, %v4700_v41, 0.0 }
0x2dfb   :  { %v4668_v2 = vpop.permute.xlu1 %4667 }
0x2dfc   :  { %v4649_v15 = vpop.permute.xlu0 %4648  ;;  %v4698_v38 = vmul.f32 %v9107_v53, %v4668_v2 }
0x2dfd   :  { %v4695_v55 = vmul.f32 %v9119_v11, %v4649_v15 }
0x2dfe   :  { %v4713_v7 = vsel %vm50_vm0, %v4698_v38, 0.0 }
0x2dff   :  { %v4703_v33 = vsel %vm50_vm0, %v4695_v55, 0.0  ;;  %v4714_v36 = vadd.f32 %v4713_v7, %v4712_v22 }
0x2e01   :  { %v4715_v27 = vrot.slane %v4714_v36, 4 }
0x2e03   :  { %v4694_v46 = vpop.permute.xlu1 %4693  ;;  %v4716_v20 = vadd.f32 %v4715_v27, %v4714_v36 }
0x2e04   :  { %v4702_v34 = vmul.f32 %v9134_v51, %v4694_v46 }
0x2e05   :  { %v4717_v47 = vrot.slane %v4716_v20, 2 }
0x2e06   :  { %v4731_v4 = vsel %vm50_vm0, %v4702_v34, 0.0 }
0x2e07   :  { %v4718_v5 = vadd.f32 %v4717_v47, %v4716_v20 }
0x2e09   :  { %v4719_v61 = vrot.slane %v4718_v5, 1 }
0x2e0b   :  { %v4720_v57 = vadd.f32 %v4719_v61, %v4718_v5 }
0x2e0c   :  { %v4655_v12 = vpop.permute.xlu0 %4654 }
0x2e0d   :  { %v4696_v23 = vmul.f32 %v9110_v17, %v4655_v12 }
0x2e0f   :  { %v4704_v60 = vsel %vm50_vm0, %v4696_v23, 0.0 }
0x2e10   :  { %v4705_v58 = vadd.f32 %v4704_v60, %v4703_v33 }
0x2e12   :  { %v4706_v30 = vrot.slane %v4705_v58, 4 }
0x2e14   :  { %v4707_v26 = vadd.f32 %v4706_v30, %v4705_v58 }
0x2e16   :  { %v4708_v25 = vrot.slane %v4707_v26, 2 }
0x2e18   :  { %v4709_v63 = vadd.f32 %v4708_v25, %v4707_v26 }
0x2e1a   :  { %v4710_v29 = vrot.slane %v4709_v63, 1 }
0x2e1c   :  { %v4675_v10 = vpop.permute.xlu0 %4674  ;;  %v4711_v23 = vadd.f32 %v4710_v29, %v4709_v63 }
0x2e1d   :  { %v4699_v42 = vmul.f32 %v9123_v35, %v4675_v10 }
0x2e1e   :  { %v4743_v33 = vsel %vm2192_vm9, %v4720_v57, %v4711_v23 }
0x2e1f   :  { %v4721_v43 = vsel %vm50_vm0, %v4699_v42, 0.0 }
0x2e20   :  { %v4723_v48 = vadd.f32 %v4722_v8, %v4721_v43 }
0x2e22   :  { %v4724_v50 = vrot.slane %v4723_v48, 4 }
0x2e24   :  { %v4725_v19 = vadd.f32 %v4724_v50, %v4723_v48  ;;  %v4688_v6 = vpop.permute.xlu0 %4687 }
0x2e25   :  { %v4701_v37 = vmul.f32 %v9131_v52, %v4688_v6 }
0x2e26   :  { %v4726_v1 = vrot.slane %v4725_v19, 2 }
0x2e27   :  { %v4730_v14 = vsel %vm50_vm0, %v4701_v37, 0.0 }
0x2e28   :  { %v4732_v54 = vadd.f32 %v4731_v4, %v4730_v14  ;;  %v4727_v21 = vadd.f32 %v4726_v1, %v4725_v19  ;;  %v4775_v4 = vadd.f32 1e-30, %v9205_v0 }
0x2e2a   :  { %v4733_v24 = vrot.slane %v4732_v54, 4  ;;  %v4728_v12 = vrot.slane %v4727_v21, 1  ;;  %vm4781_vm14 = vweird.f32 %v4775_v4 }
0x2e2c   :  { %v4734_v15 = vadd.f32 %v4733_v24, %v4732_v54  ;;  %v4729_v55 = vadd.f32 %v4728_v12, %v4727_v21  ;;  %v4785_v24 = vand.u32 2147483647, %v4775_v4 }
0x2e2e   :  { %v4735_v2 = vrot.slane %v4734_v15, 2  ;;  %v4744_v40 = vsel %vm2194_vm13, %v4729_v55, %v4743_v33  ;;  %vm4786_vm1 = vcmp.eq.f32.partialorder %v4785_v24, 8.507059e+37 }
0x2e30   :  { %v4736_v38 = vadd.f32 %v4735_v2, %v4734_v15 }
0x2e32   :  { %v4737_v60 = vrot.slane %v4736_v38, 1 }
0x2e34   :  { %v4738_v7 = vadd.f32 %v4737_v60, %v4736_v38 }
0x2e36   :  { %v4745_v58 = vsel %vm2196_vm3, %v4738_v7, %v4744_v40 }
0x2e37   :  { %v4747_v22 = vmul.f32 %v4745_v58, %v9210_v39 }
0x2e39   :  { %v4748_v36 = vsel %vm2199_vm4, %v4747_v22, 0.0 }
0x2e3a   :  { %4749 = vadd.xlane.f32.xlu2 %v4748_v36 }
0x2ead   :  { %v4750_v41 = vpop.xlane.xlu2 %4749 }
0x2eae   :  { %v4751_v30 = vadd.f32 1e-30, %v4750_v41 }
0x2eb0   :  { %7362 = vrcp.f32 %v4751_v30  ;;  %v4763_v8 = vand.u32 2147483648, %v4751_v30  ;;  %v4761_v46 = vand.u32 2147483647, %v4751_v30  ;;  %vm4757_vm8 = vweird.f32 %v4751_v30 }
0x2eb1   :  { %7364 = vrcp.f32 %v4775_v4 }
0x2eb2   :  { %v4764_v48 = vor.u32 1.1754944e-38, %v4763_v8  ;;  %vm4762_vm11 = vcmp.eq.f32.partialorder %v4761_v46, 8.507059e+37 }
0x2eb6   :  { %v7363_v10 = vpop.eup %7362 }
0x2eb7   :  { %v4753_v42 = vmul.f32 %v7363_v10, %v4751_v30  ;;  %vm4758_vm7 = vweird.f32 %v7363_v10  ;;  %v7365_v14 = vpop.eup %7364 }
0x2eb8   :  { %vm4759_vm10 = vmor %vm4757_vm8, %vm4758_vm7  ;;  %v4777_v63 = vmul.f32 %v7365_v14, %v4775_v4  ;;  %vm4782_vm12 = vweird.f32 %v7365_v14 }
0x2eb9   :  { %v4754_v27 = vsub.f32 1.0, %v4753_v42  ;;  %vm4783_vm15 = vmor %vm4781_vm14, %vm4782_vm12 }
0x2eba   :  { %v4778_v54 = vsub.f32 1.0, %v4777_v63 }
0x2ebb   :  { %v4755_v43 = vmul.f32 %v7363_v10, %v4754_v27 }
0x2ebc   :  { %v4779_v21 = vmul.f32 %v7365_v14, %v4778_v54 }
0x2ebd   :  { %v4756_v26 = vadd.f32 %v7363_v10, %v4755_v43 }
0x2ebe   :  { %v4780_v5 = vadd.f32 %v7365_v14, %v4779_v21 }
0x2ebf   :  { %v4760_v20 = vsel %vm4759_vm10, %v7363_v10, %v4756_v26 }
0x2ec0   :  { %v4765_v50 = vsel %vm4762_vm11, %v4764_v48, %v4760_v20 }
0x2ec1   :  { %v4766_v34 = vmul.f32 %v4765_v50, %v9205_v0 }
0x2ec3   :  { %v4769_v25 = vmul.f32 %v4766_v34, %v4745_v58  ;;  %v4767_v19 = vmul.f32 %v4766_v34, %v9210_v39 }
0x2ec5   :  { %v9244_v6 = vsub.f32 %v9196_v16, %v4769_v25  ;;  %v9247_v37 = vadd.f32 %v4767_v19, %v9199_v44  ;;  %v4787_v16 = vand.u32 2147483648, %v4775_v4  ;;  %v4784_v44 = vsel %vm4783_vm15, %v7365_v14, %v4780_v5 }
0x2ec7   :  { %v4771_v47 = vmul.f32 %v9244_v6, %v9244_v6  ;;  %v4788_v29 = vor.u32 1.1754944e-38, %v4787_v16 }
0x2ec9   :  { %v4772_v1 = vsel %vm2199_vm4, %v4771_v47, 0.0  ;;  %v4789_v15 = vsel %vm4786_vm1, %v4788_v29, %v4784_v44 }
0x2eca   :  { %4773 = vadd.xlane.f32.xlu0 %v4772_v1 }
0x2f3d   :  { %v9253_v12 = vpop.xlane.xlu0 %4773 }
0x2f3e   :  { %v4790_v61 = vmul.f32 %v4789_v15, %v9253_v12 }
0x2f40   :  { %v4791_v0 = vmul.f32 %v4790_v61, %v9210_v39 }
0x2f42   :  { %v9258_v2 = vadd.f32 %v4791_v0, %v9244_v6 }
0x2f44   :  { %v4832_v23 = vperm.slane %v9258_v2, 3  ;;  %v4819_v38 = vperm.slane %v9258_v2, 2  ;;  %v4793_v55 = vperm.slane %v9258_v2, 0  ;;  %v4806_v39 = vperm.slane %v9258_v2, 1 }
0x2f46   :  { %4837 = vperm.xlu0 %7075, %v4832_v23   ;;  %4830 = vperm.xlu2 %7076, %v4819_v38  }
0x2f47   :  { %4798 = vperm.xlu1 %7077, %v4793_v55  }
0x2f4e   :  { %7089 = vset.pattern.permute.xlu0 %v7945_v28  ;;  %7083 = vset.pattern.permute.xlu2 %v7933_v32 }
0x2f4f   :  { %7078 = vset.pattern.permute.xlu1 %v7945_v28 }
0x2f57   :  { %4804 = vperm.xlu1 %7078, %v4793_v55  }
0x2f5f   :  { %7079 = vset.pattern.permute.xlu1 %v7933_v32 }
0x2f67   :  { %4811 = vperm.xlu1 %7079, %v4806_v39  }
0x2f6f   :  { %7080 = vset.pattern.permute.xlu1 %v7945_v28 }
0x2f77   :  { %4817 = vperm.xlu1 %7080, %v4806_v39  }
0x2f7f   :  { %7081 = vset.pattern.permute.xlu1 %v7933_v32 }
0x2f87   :  { %4824 = vperm.xlu1 %7081, %v4819_v38  }
0x2f8f   :  { %7082 = vset.pattern.permute.xlu1 %v7945_v28 }
0x2f97   :  { %4843 = vperm.xlu1 %7082, %v4832_v23  }
0x2f9f   :  { %7087 = vset.pattern.permute.xlu1 %v7933_v32 }
0x2fa0   :  { %v4831_v40 = vpop.permute.xlu2 %4830 }
0x2fa1   :  { %v4850_v41 = vmul.f32 %v9116_v49, %v4831_v40 }
0x2fa3   :  { %v4872_v26 = vsel %vm50_vm0, %v4850_v41, 0.0 }
0x2fb8   :  { %v4838_v1 = vpop.permute.xlu0 %4837 }
0x2fb9   :  { %v4799_v57 = vpop.permute.xlu1 %4798  ;;  %v4851_v54 = vmul.f32 %v9131_v52, %v4838_v1 }
0x2fba   :  { %v4845_v10 = vmul.f32 %v9119_v11, %v4799_v57 }
0x2fbb   :  { %v4880_v29 = vsel %vm50_vm0, %v4851_v54, 0.0 }
0x2fbc   :  { %v4853_v20 = vsel %vm50_vm0, %v4845_v10, 0.0 }
0x2fc9   :  { %v4805_v60 = vpop.permute.xlu1 %4804 }
0x2fca   :  { %v4846_v22 = vmul.f32 %v9110_v17, %v4805_v60 }
0x2fcc   :  { %v4854_v8 = vsel %vm50_vm0, %v4846_v22, 0.0 }
0x2fcd   :  { %v4855_v34 = vadd.f32 %v4854_v8, %v4853_v20 }
0x2fcf   :  { %v4856_v47 = vrot.slane %v4855_v34, 4 }
0x2fd1   :  { %v4857_v63 = vadd.f32 %v4856_v47, %v4855_v34 }
0x2fd3   :  { %v4858_v44 = vrot.slane %v4857_v63, 2 }
0x2fd5   :  { %v4859_v38 = vadd.f32 %v4858_v44, %v4857_v63 }
0x2fd9   :  { %v4812_v7 = vpop.permute.xlu1 %4811 }
0x2fda   :  { %v4847_v36 = vmul.f32 %v9113_v56, %v4812_v7  ;;  %v4860_v7 = vrot.slane %v4859_v38, 1 }
0x2fdc   :  { %v4862_v43 = vsel %vm50_vm0, %v4847_v36, 0.0  ;;  %v4861_v36 = vadd.f32 %v4860_v7, %v4859_v38 }
0x2fe9   :  { %v4818_v33 = vpop.permute.xlu1 %4817 }
0x2fea   :  { %v4848_v58 = vmul.f32 %v9107_v53, %v4818_v33 }
0x2fec   :  { %v4863_v42 = vsel %vm50_vm0, %v4848_v58, 0.0 }
0x2fed   :  { %v4864_v48 = vadd.f32 %v4863_v42, %v4862_v43 }
0x2fef   :  { %v4865_v25 = vrot.slane %v4864_v48, 4 }
0x2ff1   :  { %v4866_v4 = vadd.f32 %v4865_v25, %v4864_v48 }
0x2ff3   :  { %v4867_v21 = vrot.slane %v4866_v4, 2 }
0x2ff5   :  { %v4868_v61 = vadd.f32 %v4867_v21, %v4866_v4 }
0x2ff7   :  { %v4869_v39 = vrot.slane %v4868_v61, 1 }
0x2ff9   :  { %v4825_v30 = vpop.permute.xlu1 %4824  ;;  %v4870_v40 = vadd.f32 %v4869_v39, %v4868_v61 }
0x2ffa   :  { %v4849_v27 = vmul.f32 %v9123_v35, %v4825_v30 }
0x2ffb   :  { %v4893_v10 = vsel %vm2192_vm9, %v4870_v40, %v4861_v36 }
0x2ffc   :  { %v4871_v46 = vsel %vm50_vm0, %v4849_v27, 0.0 }
0x2ffd   :  { %v4873_v50 = vadd.f32 %v4872_v26, %v4871_v46 }
0x2fff   :  { %v4874_v19 = vrot.slane %v4873_v50, 4 }
0x3001   :  { %v4875_v14 = vadd.f32 %v4874_v19, %v4873_v50 }
0x3003   :  { %v4876_v16 = vrot.slane %v4875_v14, 2 }
0x3005   :  { %v4877_v23 = vadd.f32 %v4876_v16, %v4875_v14 }
0x3007   :  { %v4878_v60 = vrot.slane %v4877_v23, 1 }
0x3009   :  { %v4844_v5 = vpop.permute.xlu1 %4843  ;;  %v4879_v22 = vadd.f32 %v4878_v60, %v4877_v23 }
0x300a   :  { %v4852_v24 = vmul.f32 %v9134_v51, %v4844_v5 }
0x300b   :  { %v4894_v42 = vsel %vm2194_vm13, %v4879_v22, %v4893_v10 }
0x300c   :  { %v4881_v15 = vsel %vm50_vm0, %v4852_v24, 0.0 }
0x300d   :  { %v4882_v0 = vadd.f32 %v4881_v15, %v4880_v29  ;;  %v4925_v29 = vadd.f32 1e-30, %v9253_v12 }
0x300f   :  { %v4883_v55 = vrot.slane %v4882_v0, 4  ;;  %vm4931_vm10 = vweird.f32 %v4925_v29 }
0x3011   :  { %v4884_v57 = vadd.f32 %v4883_v55, %v4882_v0  ;;  %v4935_v55 = vand.u32 2147483647, %v4925_v29 }
0x3013   :  { %v4885_v33 = vrot.slane %v4884_v57, 2  ;;  %vm4936_vm12 = vcmp.eq.f32.partialorder %v4935_v55, 8.507059e+37 }
0x3015   :  { %v4886_v58 = vadd.f32 %v4885_v33, %v4884_v57 }
0x3017   :  { %v4887_v41 = vrot.slane %v4886_v58, 1 }
0x3019   :  { %v4888_v30 = vadd.f32 %v4887_v41, %v4886_v58 }
0x301b   :  { %v4895_v27 = vsel %vm2196_vm3, %v4888_v30, %v4894_v42 }
0x301c   :  { %v4897_v8 = vmul.f32 %v4895_v27, %v9258_v2 }
0x301e   :  { %v4898_v43 = vsel %vm2199_vm4, %v4897_v8, 0.0 }
0x301f   :  { %4899 = vadd.xlane.f32.xlu1 %v4898_v43 }
0x3092   :  { %v4900_v46 = vpop.xlane.xlu1 %4899 }
0x3093   :  { %v4901_v26 = vadd.f32 1e-30, %v4900_v46 }
0x3095   :  { %7366 = vrcp.f32 %v4901_v26  ;;  %v4913_v34 = vand.u32 2147483648, %v4901_v26  ;;  %v4911_v19 = vand.u32 2147483647, %v4901_v26  ;;  %vm4907_vm2 = vweird.f32 %v4901_v26 }
0x3096   :  { %7368 = vrcp.f32 %v4925_v29 }
0x3097   :  { %v4914_v1 = vor.u32 1.1754944e-38, %v4913_v34  ;;  %vm4912_vm7 = vcmp.eq.f32.partialorder %v4911_v19, 8.507059e+37 }
0x309b   :  { %v7367_v48 = vpop.eup %7366 }
0x309c   :  { %v4903_v20 = vmul.f32 %v7367_v48, %v4901_v26  ;;  %vm4908_vm6 = vweird.f32 %v7367_v48  ;;  %v7369_v15 = vpop.eup %7368 }
0x309d   :  { %vm4909_vm5 = vmor %vm4907_vm2, %vm4908_vm6  ;;  %v4927_v61 = vmul.f32 %v7369_v15, %v4925_v29  ;;  %vm4932_vm8 = vweird.f32 %v7369_v15 }
0x309e   :  { %v4904_v50 = vsub.f32 1.0, %v4903_v20  ;;  %vm4933_vm11 = vmor %vm4931_vm10, %vm4932_vm8 }
0x309f   :  { %v4928_v0 = vsub.f32 1.0, %v4927_v61 }
0x30a0   :  { %v4905_v25 = vmul.f32 %v7367_v48, %v4904_v50 }
0x30a1   :  { %v4929_v23 = vmul.f32 %v7369_v15, %v4928_v0 }
0x30a2   :  { %v4906_v47 = vadd.f32 %v7367_v48, %v4905_v25 }
0x30a3   :  { %v4930_v38 = vadd.f32 %v7369_v15, %v4929_v23 }
0x30a4   :  { %v4910_v4 = vsel %vm4909_vm5, %v7367_v48, %v4906_v47 }
0x30a5   :  { %v4915_v14 = vsel %vm4912_vm7, %v4914_v1, %v4910_v4 }
0x30a6   :  { %v4916_v63 = vmul.f32 %v4915_v14, %v9253_v12 }
0x30a8   :  { %v4919_v54 = vmul.f32 %v4916_v63, %v4895_v27  ;;  %v4917_v21 = vmul.f32 %v4916_v63, %v9258_v2 }
0x30aa   :  { %v9296_v5 = vsub.f32 %v9244_v6, %v4919_v54  ;;  %v9299_v16 = vadd.f32 %v4917_v21, %v9247_v37  ;;  %v4937_v6 = vand.u32 2147483648, %v4925_v29  ;;  %v4934_v37 = vsel %vm4933_vm11, %v7369_v15, %v4930_v38 }
0x30ac   :  { %v4921_v24 = vmul.f32 %v9296_v5, %v9296_v5  ;;  %v4938_v39 = vor.u32 1.1754944e-38, %v4937_v6 }
0x30ae   :  { %v4922_v44 = vsel %vm2199_vm4, %v4921_v24, 0.0  ;;  %v4939_v60 = vsel %vm4936_vm12, %v4938_v39, %v4934_v37 }
0x30af   :  { %4923 = vadd.xlane.f32.xlu0 %v4922_v44 }
0x3122   :  { %v9305_v57 = vpop.xlane.xlu0 %4923 }
0x3123   :  { %v4940_v7 = vmul.f32 %v4939_v60, %v9305_v57 }
0x3125   :  { %v4941_v12 = vmul.f32 %v4940_v7, %v9258_v2 }
0x3127   :  { %v9310_v33 = vadd.f32 %v4941_v12, %v9296_v5 }
0x3129   :  { %v4982_v40 = vperm.slane %v9310_v33, 3  ;;  %v4969_v58 = vperm.slane %v9310_v33, 2  ;;  %v4943_v22 = vperm.slane %v9310_v33, 0  ;;  %v4956_v2 = vperm.slane %v9310_v33, 1 }
0x312b   :  { %4993 = vperm.xlu0 %7089, %v4982_v40   ;;  %4974 = vperm.xlu1 %7087, %v4969_v58  }
0x312c   :  { %4948 = vperm.xlu2 %7083, %v4943_v22  }
0x3133   :  { %7090 = vset.pattern.permute.xlu0 %v7933_v32  ;;  %7092 = vset.pattern.permute.xlu1 %v7945_v28 }
0x3134   :  { %7084 = vset.pattern.permute.xlu2 %v7945_v28 }
0x313c   :  { %4954 = vperm.xlu2 %7084, %v4943_v22  }
0x3144   :  { %7085 = vset.pattern.permute.xlu2 %v7933_v32 }
0x314c   :  { %4961 = vperm.xlu2 %7085, %v4956_v2  }
0x3154   :  { %7086 = vset.pattern.permute.xlu2 %v7945_v28 }
0x315c   :  { %4967 = vperm.xlu2 %7086, %v4956_v2  }
0x3164   :  { %4980 = vperm.xlu2 %7086, %v4969_v58  }
0x316c   :  { %7088 = vset.pattern.permute.xlu2 %v7933_v32 }
0x3174   :  { %4987 = vperm.xlu2 %7088, %v4982_v40  }
0x317c   :  { %7091 = vset.pattern.permute.xlu2 %v7945_v28 }
0x3186   :  { %v4949_v36 = vpop.permute.xlu2 %4948 }
0x3187   :  { %v4995_v48 = vmul.f32 %v9119_v11, %v4949_v36 }
0x3196   :  { %v4955_v41 = vpop.permute.xlu2 %4954 }
0x3197   :  { %v4996_v8 = vmul.f32 %v9110_v17, %v4955_v41 }
0x3199   :  { %v5004_v34 = vsel %vm50_vm0, %v4996_v8, 0.0 }
0x319d   :  { %v4975_v42 = vpop.permute.xlu1 %4974  ;;  %v4994_v14 = vpop.permute.xlu0 %4993 }
0x319e   :  { %v4999_v46 = vmul.f32 %v9123_v35, %v4975_v42  ;;  %v5002_v21 = vmul.f32 %v9134_v51, %v4994_v14 }
0x31a0   :  { %v5031_v0 = vsel %vm50_vm0, %v5002_v21, 0.0 }
0x31a6   :  { %v4962_v30 = vpop.permute.xlu2 %4961 }
0x31a7   :  { %v4997_v43 = vmul.f32 %v9113_v56, %v4962_v30  ;;  %v5003_v56 = vsel %vm50_vm0, %v4995_v48, 0.0 }
0x31a8   :  { %v5005_v35 = vadd.f32 %v5004_v34, %v5003_v56 }
0x31a9   :  { %v5012_v25 = vsel %vm50_vm0, %v4997_v43, 0.0 }
0x31aa   :  { %v5006_v11 = vrot.slane %v5005_v35, 4 }
0x31b6   :  { %v4968_v10 = vpop.permute.xlu2 %4967 }
0x31b7   :  { %v4998_v27 = vmul.f32 %v9107_v53, %v4968_v10  ;;  %v5021_v53 = vsel %vm50_vm0, %v4999_v46, 0.0 }
0x31b9   :  { %v5013_v20 = vsel %vm50_vm0, %v4998_v27, 0.0 }
0x31ba   :  { %v5014_v17 = vadd.f32 %v5013_v20, %v5012_v25 }
0x31bc   :  { %v5015_v1 = vrot.slane %v5014_v17, 4 }
0x31be   :  { %v4981_v26 = vpop.permute.xlu2 %4980  ;;  %v5016_v63 = vadd.f32 %v5015_v1, %v5014_v17 }
0x31bf   :  { %v5000_v50 = vmul.f32 %v9116_v49, %v4981_v26  ;;  %v5007_v49 = vadd.f32 %v5006_v11, %v5005_v35 }
0x31c0   :  { %v5017_v24 = vrot.slane %v5016_v63, 2 }
0x31c1   :  { %v5022_v19 = vsel %vm50_vm0, %v5000_v50, 0.0  ;;  %v5008_v61 = vrot.slane %v5007_v49, 2 }
0x31c2   :  { %v5023_v47 = vadd.f32 %v5022_v19, %v5021_v53  ;;  %v5018_v38 = vadd.f32 %v5017_v24, %v5016_v63 }
0x31c3   :  { %v5009_v37 = vadd.f32 %v5008_v61, %v5007_v49 }
0x31c4   :  { %v5024_v4 = vrot.slane %v5023_v47, 4  ;;  %v5019_v60 = vrot.slane %v5018_v38, 1 }
0x31c5   :  { %v5010_v40 = vrot.slane %v5009_v37, 1 }
0x31c6   :  { %v5025_v54 = vadd.f32 %v5024_v4, %v5023_v47  ;;  %v5020_v58 = vadd.f32 %v5019_v60, %v5018_v38 }
0x31c7   :  { %v5011_v36 = vadd.f32 %v5010_v40, %v5009_v37  ;;  %v9370_v40 = vld [vmem:[#allocation5 + $0x18] sm:$0xff] }
0x31c8   :  { %v5026_v29 = vrot.slane %v5025_v54, 2 }
0x31c9   :  { %v5043_v30 = vsel %vm2192_vm9, %v5020_v58, %v5011_v36  ;;  %v9373_v58 = vld [vmem:[#allocation5] sm:$0xff]  ;;  %v9376_v36 = vld [vmem:[#allocation5 + $0x8] sm:$0xff] }
0x31ca   :  { %v5027_v55 = vadd.f32 %v5026_v29, %v5025_v54  ;;  %v5075_v54 = vadd.f32 1e-30, %v9305_v57 }
0x31cc   :  { %v5028_v12 = vrot.slane %v5027_v55, 1  ;;  %vm5081_vm5 = vweird.f32 %v5075_v54 }
0x31ce   :  { %v4988_v44 = vpop.permute.xlu2 %4987  ;;  %v5029_v2 = vadd.f32 %v5028_v12, %v5027_v55 }
0x31cf   :  { %v5001_v15 = vmul.f32 %v9131_v52, %v4988_v44 }
0x31d0   :  { %v5044_v10 = vsel %vm2194_vm13, %v5029_v2, %v5043_v30 }
0x31d1   :  { %v5030_v23 = vsel %vm50_vm0, %v5001_v15, 0.0  ;;  %v5085_v15 = vand.u32 2147483647, %v5075_v54 }
0x31d2   :  { %v5032_v6 = vadd.f32 %v5031_v0, %v5030_v23 }
0x31d3   :  { %vm5086_vm8 = vcmp.eq.f32.partialorder %v5085_v15, 8.507059e+37 }
0x31d4   :  { %v5033_v39 = vrot.slane %v5032_v6, 4 }
0x31d6   :  { %v5034_v7 = vadd.f32 %v5033_v39, %v5032_v6 }
0x31d8   :  { %v5035_v51 = vrot.slane %v5034_v7, 2 }
0x31da   :  { %v5036_v22 = vadd.f32 %v5035_v51, %v5034_v7 }
0x31dc   :  { %v5037_v52 = vrot.slane %v5036_v22, 1 }
0x31de   :  { %v5038_v41 = vadd.f32 %v5037_v52, %v5036_v22 }
0x31e0   :  { %v5045_v42 = vsel %vm2196_vm3, %v5038_v41, %v5044_v10  ;;  %v9379_v41 = vld [vmem:[#allocation5 + $0x10] sm:$0xff] }
0x31e1   :  { %v5047_v27 = vmul.f32 %v5045_v42, %v9310_v33 }
0x31e3   :  { %v5048_v8 = vsel %vm2199_vm4, %v5047_v27, 0.0 }
0x31e4   :  { %5049 = vadd.xlane.f32.xlu2 %v5048_v8 }
0x3257   :  { %v5050_v43 = vpop.xlane.xlu2 %5049 }
0x3258   :  { %v5051_v46 = vadd.f32 1e-30, %v5050_v43 }
0x325a   :  { %7370 = vrcp.f32 %v5051_v46  ;;  %v5063_v50 = vand.u32 2147483648, %v5051_v46  ;;  %v5061_v25 = vand.u32 2147483647, %v5051_v46  ;;  %vm5057_vm15 = vweird.f32 %v5051_v46 }
0x325b   :  { %7372 = vrcp.f32 %v5075_v54 }
0x325c   :  { %v5064_v53 = vor.u32 1.1754944e-38, %v5063_v50  ;;  %vm5062_vm6 = vcmp.eq.f32.partialorder %v5061_v25, 8.507059e+37  ;;  %v9389_v25 = vld [vmem:[#allocation5 + $0x20] sm:$0xff] }
0x3260   :  { %v7371_v26 = vpop.eup %7370 }
0x3261   :  { %v5053_v48 = vmul.f32 %v7371_v26, %v5051_v46  ;;  %vm5058_vm14 = vweird.f32 %v7371_v26  ;;  %v7373_v49 = vpop.eup %7372 }
0x3262   :  { %vm5059_vm1 = vmor %vm5057_vm15, %vm5058_vm14  ;;  %v5077_v21 = vmul.f32 %v7373_v49, %v5075_v54  ;;  %vm5082_vm2 = vweird.f32 %v7373_v49 }
0x3263   :  { %v5054_v20 = vsub.f32 1.0, %v5053_v48  ;;  %vm5083_vm7 = vmor %vm5081_vm5, %vm5082_vm2  ;;  %v9386_v48 = vld [vmem:[#allocation5 + $0x28] sm:$0xff] }
0x3264   :  { %v5078_v24 = vsub.f32 1.0, %v5077_v21 }
0x3265   :  { %v5055_v34 = vmul.f32 %v7371_v26, %v5054_v20 }
0x3266   :  { %v5079_v44 = vmul.f32 %v7373_v49, %v5078_v24 }
0x3267   :  { %v5056_v19 = vadd.f32 %v7371_v26, %v5055_v34 }
0x3268   :  { %v5080_v29 = vadd.f32 %v7373_v49, %v5079_v44 }
0x3269   :  { %v5060_v17 = vsel %vm5059_vm1, %v7371_v26, %v5056_v19 }
0x326a   :  { %v5065_v56 = vsel %vm5062_vm6, %v5064_v53, %v5060_v17 }
0x326b   :  { %v5066_v47 = vmul.f32 %v5065_v56, %v9305_v57 }
0x326d   :  { %v5069_v35 = vmul.f32 %v5066_v47, %v5045_v42  ;;  %v5067_v1 = vmul.f32 %v5066_v47, %v9310_v33 }
0x326f   :  { %v9347_v4 = vsub.f32 %v9296_v5, %v5069_v35  ;;  %v9350_v11 = vadd.f32 %v5067_v1, %v9299_v16  ;;  %v5087_v5 = vand.u32 2147483648, %v5075_v54  ;;  %v5084_v16 = vsel %vm5083_vm7, %v7373_v49, %v5080_v29  ;;  %v9394_v54 = vld [vmem:[#allocation5 + $0x38] sm:$0xff]  ;;  %v9397_v29 = vld [vmem:[#allocation5 + $0x30] sm:$0xff] }
0x3271   :  { %v5071_v14 = vmul.f32 %v9347_v4, %v9347_v4  ;;  %v5088_v61 = vor.u32 1.1754944e-38, %v5087_v5 }
0x3273   :  { %v5072_v63 = vsel %vm2199_vm4, %v5071_v14, 0.0  ;;  %v5089_v0 = vsel %vm5086_vm8, %v5088_v61, %v5084_v16 }
0x3274   :  { %5073 = vadd.xlane.f32.xlu1 %v5072_v63 }
0x32e7   :  { %v9356_v23 = vpop.xlane.xlu1 %5073 }
0x32e8   :  { %v5090_v38 = vmul.f32 %v5089_v0, %v9356_v23 }
0x32ea   :  { %v5091_v57 = vmul.f32 %v5090_v38, %v9310_v33 }
0x32ec   :  { %v9361_v6 = vadd.f32 %v5091_v57, %v9347_v4 }
0x32ee   :  { %v5106_v55 = vperm.slane %v9361_v6, 1  ;;  %v5093_v37 = vperm.slane %v9361_v6, 0  ;;  %v5119_v39 = vperm.slane %v9361_v6, 2  ;;  %v5132_v60 = vperm.slane %v9361_v6, 3 }
0x32f0   :  { %5117 = vperm.xlu1 %7092, %v5106_v55   ;;  %5104 = vperm.xlu2 %7091, %v5093_v37  }
0x32f1   :  { %5098 = vperm.xlu0 %7090, %v5093_v37  }
0x32f8   :  { %5130 = vperm.xlu2 %7091, %v5119_v39   ;;  %7099 = vset.pattern.permute.xlu1 %v7933_v32 }
0x32f9   :  { %5111 = vperm.xlu0 %7090, %v5106_v55  }
0x3300   :  { %5143 = vperm.xlu2 %7091, %v5132_v60  }
0x3301   :  { %5124 = vperm.xlu0 %7090, %v5119_v39  }
0x3308   :  { %7093 = vset.pattern.permute.xlu2 %v7933_v32 }
0x3309   :  { %5137 = vperm.xlu0 %7090, %v5132_v60  }
0x3311   :  { %7098 = vset.pattern.permute.xlu0 %v7945_v28 }
0x334a   :  { %v5105_v33 = vpop.permute.xlu2 %5104 }
0x334b   :  { %v5146_v52 = vmul.f32 %v9376_v36, %v5105_v33 }
0x334d   :  { %v5154_v46 = vsel %vm50_vm0, %v5146_v52, 0.0 }
0x3352   :  { %v5131_v10 = vpop.permute.xlu2 %5130 }
0x3353   :  { %v5150_v20 = vmul.f32 %v9386_v48, %v5131_v10 }
0x3355   :  { %v5172_v17 = vsel %vm50_vm0, %v5150_v20, 0.0 }
0x335a   :  { %v5144_v47 = vpop.permute.xlu2 %5143 }
0x335b   :  { %v5152_v49 = vmul.f32 %v9394_v54, %v5144_v47 }
0x335d   :  { %v5181_v61 = vsel %vm50_vm0, %v5152_v49, 0.0 }
0x3362   :  { %v5118_v12 = vpop.permute.xlu1 %5117 }
0x3363   :  { %v5099_v7 = vpop.permute.xlu0 %5098  ;;  %v5148_v51 = vmul.f32 %v9370_v40, %v5118_v12 }
0x3364   :  { %v5145_v22 = vmul.f32 %v9373_v58, %v5099_v7 }
0x3365   :  { %v5163_v42 = vsel %vm50_vm0, %v5148_v51, 0.0 }
0x3366   :  { %v5153_v27 = vsel %vm50_vm0, %v5145_v22, 0.0 }
0x3367   :  { %v5155_v26 = vadd.f32 %v5154_v46, %v5153_v27 }
0x3369   :  { %v5156_v53 = vrot.slane %v5155_v26, 4 }
0x336b   :  { %v5112_v2 = vpop.permute.xlu0 %5111  ;;  %v5157_v14 = vadd.f32 %v5156_v53, %v5155_v26 }
0x336c   :  { %v5147_v30 = vmul.f32 %v9379_v41, %v5112_v2 }
0x336d   :  { %v5158_v15 = vrot.slane %v5157_v14, 2 }
0x336e   :  { %v5162_v8 = vsel %vm50_vm0, %v5147_v30, 0.0 }
0x336f   :  { %v5164_v43 = vadd.f32 %v5163_v42, %v5162_v8  ;;  %v5159_v37 = vadd.f32 %v5158_v15, %v5157_v14 }
0x3371   :  { %v5165_v50 = vrot.slane %v5164_v43, 4  ;;  %v5160_v12 = vrot.slane %v5159_v37, 1 }
0x3373   :  { %v5125_v34 = vpop.permute.xlu0 %5124  ;;  %v5166_v35 = vadd.f32 %v5165_v50, %v5164_v43  ;;  %v5161_v30 = vadd.f32 %v5160_v12, %v5159_v37 }
0x3374   :  { %v5149_v19 = vmul.f32 %v9389_v25, %v5125_v34 }
0x3375   :  { %v5167_v21 = vrot.slane %v5166_v35, 2 }
0x3376   :  { %v5171_v56 = vsel %vm50_vm0, %v5149_v19, 0.0 }
0x3377   :  { %v5173_v1 = vadd.f32 %v5172_v17, %v5171_v56  ;;  %v5168_v38 = vadd.f32 %v5167_v21, %v5166_v35 }
0x3379   :  { %v5174_v63 = vrot.slane %v5173_v1, 4  ;;  %v5169_v60 = vrot.slane %v5168_v38, 1 }
0x337b   :  { %v5175_v24 = vadd.f32 %v5174_v63, %v5173_v1  ;;  %v5138_v44 = vpop.permute.xlu0 %5137  ;;  %v5170_v22 = vadd.f32 %v5169_v60, %v5168_v38 }
0x337c   :  { %v5151_v5 = vmul.f32 %v9397_v29, %v5138_v44 }
0x337d   :  { %v5176_v16 = vrot.slane %v5175_v24, 2  ;;  %v5193_v27 = vsel %vm2192_vm9, %v5170_v22, %v5161_v30 }
0x337e   :  { %v5180_v0 = vsel %vm50_vm0, %v5151_v5, 0.0 }
0x337f   :  { %v5182_v57 = vadd.f32 %v5181_v61, %v5180_v0  ;;  %v5177_v55 = vadd.f32 %v5176_v16, %v5175_v24  ;;  %v5225_v61 = vadd.f32 1e-30, %v9356_v23 }
0x3381   :  { %v5183_v39 = vrot.slane %v5182_v57, 4  ;;  %v5178_v7 = vrot.slane %v5177_v55, 1  ;;  %vm5231_vm1 = vweird.f32 %v5225_v61 }
0x3383   :  { %v5184_v33 = vadd.f32 %v5183_v39, %v5182_v57  ;;  %v5179_v52 = vadd.f32 %v5178_v7, %v5177_v55  ;;  %v5235_v39 = vand.u32 2147483647, %v5225_v61 }
0x3385   :  { %v5185_v51 = vrot.slane %v5184_v33, 2  ;;  %v5194_v8 = vsel %vm2194_vm13, %v5179_v52, %v5193_v27  ;;  %vm5236_vm2 = vcmp.eq.f32.partialorder %v5235_v39, 8.507059e+37 }
0x3387   :  { %v5186_v2 = vadd.f32 %v5185_v51, %v5184_v33 }
0x3389   :  { %v5187_v10 = vrot.slane %v5186_v2, 1 }
0x338b   :  { %v5188_v42 = vadd.f32 %v5187_v10, %v5186_v2 }
0x338d   :  { %v5195_v43 = vsel %vm2196_vm3, %v5188_v42, %v5194_v8 }
0x338e   :  { %v5197_v46 = vmul.f32 %v5195_v43, %v9361_v6 }
0x3390   :  { %v5198_v26 = vsel %vm2199_vm4, %v5197_v46, 0.0 }
0x3391   :  { %5199 = vadd.xlane.f32.xlu0 %v5198_v26 }
0x3404   :  { %v5200_v20 = vpop.xlane.xlu0 %5199 }
0x3405   :  { %v5201_v50 = vadd.f32 1e-30, %v5200_v20 }
0x3407   :  { %7374 = vrcp.f32 %v5201_v50  ;;  %v5213_v17 = vand.u32 2147483648, %v5201_v50  ;;  %v5211_v47 = vand.u32 2147483647, %v5201_v50  ;;  %vm5207_vm11 = vweird.f32 %v5201_v50 }
0x3408   :  { %7376 = vrcp.f32 %v5225_v61 }
0x3409   :  { %v5214_v1 = vor.u32 1.1754944e-38, %v5213_v17  ;;  %vm5212_vm14 = vcmp.eq.f32.partialorder %v5211_v47, 8.507059e+37 }
0x340d   :  { %v7375_v34 = vpop.eup %7374 }
0x340e   :  { %v5203_v19 = vmul.f32 %v7375_v34, %v5201_v50  ;;  %vm5208_vm10 = vweird.f32 %v7375_v34  ;;  %v7377_v0 = vpop.eup %7376 }
0x340f   :  { %vm5209_vm12 = vmor %vm5207_vm11, %vm5208_vm10  ;;  %v5227_v38 = vmul.f32 %v7377_v0, %v5225_v61  ;;  %vm5232_vm15 = vweird.f32 %v7377_v0 }
0x3410   :  { %v5204_v53 = vsub.f32 1.0, %v5203_v19  ;;  %vm5233_vm6 = vmor %vm5231_vm1, %vm5232_vm15 }
0x3411   :  { %v5228_v57 = vsub.f32 1.0, %v5227_v38 }
0x3412   :  { %v5205_v56 = vmul.f32 %v7375_v34, %v5204_v53 }
0x3413   :  { %v5229_v55 = vmul.f32 %v7377_v0, %v5228_v57 }
0x3414   :  { %v5206_v35 = vadd.f32 %v7375_v34, %v5205_v56 }
0x3415   :  { %v5230_v37 = vadd.f32 %v7377_v0, %v5229_v55 }
0x3416   :  { %v5210_v14 = vsel %vm5209_vm12, %v7375_v34, %v5206_v35 }
0x3417   :  { %v5215_v63 = vsel %vm5212_vm14, %v5214_v1, %v5210_v14 }
0x3418   :  { %v5216_v49 = vmul.f32 %v5215_v63, %v9356_v23 }
0x341a   :  { %v5219_v21 = vmul.f32 %v5216_v49, %v5195_v43  ;;  %v5217_v24 = vmul.f32 %v5216_v49, %v9361_v6 }
0x341c   :  { %v9410_v44 = vsub.f32 %v9347_v4, %v5219_v21  ;;  %v9413_v5 = vadd.f32 %v5217_v24, %v9350_v11  ;;  %v5237_v4 = vand.u32 2147483648, %v5225_v61  ;;  %v5234_v11 = vsel %vm5233_vm6, %v7377_v0, %v5230_v37 }
0x341e   :  { %v5221_v15 = vmul.f32 %v9410_v44, %v9410_v44  ;;  %v5238_v60 = vor.u32 1.1754944e-38, %v5237_v4 }
0x3420   :  { %v5222_v16 = vsel %vm2199_vm4, %v5221_v15, 0.0  ;;  %v5239_v7 = vsel %vm5236_vm2, %v5238_v60, %v5234_v11 }
0x3421   :  { %5223 = vadd.xlane.f32.xlu1 %v5222_v16 }
0x3494   :  { %v9419_v33 = vpop.xlane.xlu1 %5223 }
0x3495   :  { %v5240_v12 = vmul.f32 %v5239_v7, %v9419_v33 }
0x3497   :  { %v5241_v23 = vmul.f32 %v5240_v12, %v9361_v6 }
0x3499   :  { %v9424_v51 = vadd.f32 %v5241_v23, %v9410_v44 }
0x349b   :  { %v5282_v22 = vperm.slane %v9424_v51, 3  ;;  %v5269_v2 = vperm.slane %v9424_v51, 2  ;;  %v5243_v52 = vperm.slane %v9424_v51, 0  ;;  %v5256_v6 = vperm.slane %v9424_v51, 1 }
0x349d   :  { %5287 = vperm.xlu1 %7099, %v5282_v22   ;;  %5280 = vperm.xlu0 %7098, %v5269_v2  }
0x349e   :  { %5248 = vperm.xlu2 %7093, %v5243_v52  }
0x34a5   :  { %7101 = vset.pattern.permute.xlu0 %v7933_v32 }
0x34a6   :  { %7094 = vset.pattern.permute.xlu2 %v7945_v28 }
0x34ae   :  { %5254 = vperm.xlu2 %7094, %v5243_v52  }
0x34b6   :  { %7095 = vset.pattern.permute.xlu2 %v7933_v32 }
0x34be   :  { %5261 = vperm.xlu2 %7095, %v5256_v6  }
0x34c6   :  { %7096 = vset.pattern.permute.xlu2 %v7945_v28 }
0x34ce   :  { %5267 = vperm.xlu2 %7096, %v5256_v6  }
0x34d6   :  { %7097 = vset.pattern.permute.xlu2 %v7933_v32 }
0x34de   :  { %5274 = vperm.xlu2 %7097, %v5269_v2  }
0x34e6   :  { %7100 = vset.pattern.permute.xlu2 %v7945_v28 }
0x34ee   :  { %5293 = vperm.xlu2 %7100, %v5282_v22  }
0x34f8   :  { %v5249_v30 = vpop.permute.xlu2 %5248 }
0x34f9   :  { %v5295_v34 = vmul.f32 %v9373_v58, %v5249_v30 }
0x34fb   :  { %v5303_v14 = vsel %vm50_vm0, %v5295_v34, 0.0 }
0x3508   :  { %v5255_v10 = vpop.permute.xlu2 %5254 }
0x3509   :  { %v5296_v46 = vmul.f32 %v9376_v36, %v5255_v10 }
0x350b   :  { %v5304_v17 = vsel %vm50_vm0, %v5296_v46, 0.0 }
0x350c   :  { %v5305_v49 = vadd.f32 %v5304_v17, %v5303_v14 }
0x350e   :  { %v5306_v15 = vrot.slane %v5305_v49, 4 }
0x350f   :  { %v5281_v8 = vpop.permute.xlu0 %5280  ;;  %v5288_v16 = vpop.permute.xlu1 %5287 }
0x3510   :  { %v5300_v20 = vmul.f32 %v9386_v48, %v5281_v8  ;;  %v5307_v38 = vadd.f32 %v5306_v15, %v5305_v49  ;;  %v5301_v57 = vmul.f32 %v9397_v29, %v5288_v16 }
0x3512   :  { %v5322_v35 = vsel %vm50_vm0, %v5300_v20, 0.0  ;;  %v5308_v11 = vrot.slane %v5307_v38, 2  ;;  %v5330_v60 = vsel %vm50_vm0, %v5301_v57, 0.0 }
0x3514   :  { %v5309_v2 = vadd.f32 %v5308_v11, %v5307_v38 }
0x3518   :  { %v5262_v42 = vpop.permute.xlu2 %5261 }
0x3519   :  { %v5297_v26 = vmul.f32 %v9379_v41, %v5262_v42  ;;  %v5310_v42 = vrot.slane %v5309_v2, 1 }
0x351b   :  { %v5312_v56 = vsel %vm50_vm0, %v5297_v26, 0.0  ;;  %v5311_v26 = vadd.f32 %v5310_v42, %v5309_v2 }
0x3528   :  { %v5268_v27 = vpop.permute.xlu2 %5267 }
0x3529   :  { %v5298_v43 = vmul.f32 %v9370_v40, %v5268_v27 }
0x352b   :  { %v5313_v19 = vsel %vm50_vm0, %v5298_v43, 0.0 }
0x352c   :  { %v5314_v1 = vadd.f32 %v5313_v19, %v5312_v56 }
0x352e   :  { %v5315_v21 = vrot.slane %v5314_v1, 4 }
0x3530   :  { %v5316_v61 = vadd.f32 %v5315_v21, %v5314_v1 }
0x3532   :  { %v5317_v55 = vrot.slane %v5316_v61, 2 }
0x3534   :  { %v5318_v12 = vadd.f32 %v5317_v55, %v5316_v61 }
0x3536   :  { %v5319_v6 = vrot.slane %v5318_v12, 1 }
0x3538   :  { %v5275_v50 = vpop.permute.xlu2 %5274  ;;  %v5320_v8 = vadd.f32 %v5319_v6, %v5318_v12 }
0x3539   :  { %v5299_v53 = vmul.f32 %v9389_v25, %v5275_v50 }
0x353a   :  { %v5343_v34 = vsel %vm2192_vm9, %v5320_v8, %v5311_v26 }
0x353b   :  { %v5321_v47 = vsel %vm50_vm0, %v5299_v53, 0.0 }
0x353c   :  { %v5323_v63 = vadd.f32 %v5322_v35, %v5321_v47 }
0x353e   :  { %v5324_v24 = vrot.slane %v5323_v63, 4 }
0x3540   :  { %v5325_v0 = vadd.f32 %v5324_v24, %v5323_v63 }
0x3542   :  { %v5326_v4 = vrot.slane %v5325_v0, 2 }
0x3544   :  { %v5327_v22 = vadd.f32 %v5326_v4, %v5325_v0 }
0x3546   :  { %v5328_v10 = vrot.slane %v5327_v22, 1 }
0x3548   :  { %v5294_v37 = vpop.permute.xlu2 %5293  ;;  %v5329_v46 = vadd.f32 %v5328_v10, %v5327_v22 }
0x3549   :  { %v5302_v39 = vmul.f32 %v9394_v54, %v5294_v37 }
0x354a   :  { %v5344_v19 = vsel %vm2194_vm13, %v5329_v46, %v5343_v34 }
0x354b   :  { %v5331_v7 = vsel %vm50_vm0, %v5302_v39, 0.0 }
0x354c   :  { %v5332_v23 = vadd.f32 %v5331_v7, %v5330_v60  ;;  %v5375_v60 = vadd.f32 1e-30, %v9419_v33 }
0x354e   :  { %v5333_v52 = vrot.slane %v5332_v23, 4  ;;  %vm5381_vm12 = vweird.f32 %v5375_v60 }
0x3550   :  { %v5334_v30 = vadd.f32 %v5333_v52, %v5332_v23  ;;  %v5385_v52 = vand.u32 2147483647, %v5375_v60 }
0x3552   :  { %v5335_v27 = vrot.slane %v5334_v30, 2  ;;  %vm5386_vm15 = vcmp.eq.f32.partialorder %v5385_v52, 8.507059e+37 }
0x3554   :  { %v5336_v43 = vadd.f32 %v5335_v27, %v5334_v30 }
0x3556   :  { %v5337_v20 = vrot.slane %v5336_v43, 1 }
0x3558   :  { %v5338_v50 = vadd.f32 %v5337_v20, %v5336_v43 }
0x355a   :  { %v5345_v53 = vsel %vm2196_vm3, %v5338_v50, %v5344_v19 }
0x355b   :  { %v5347_v17 = vmul.f32 %v5345_v53, %v9424_v51 }
0x355d   :  { %v5348_v56 = vsel %vm2199_vm4, %v5347_v17, 0.0 }
0x355e   :  { %5349 = vadd.xlane.f32.xlu2 %v5348_v56 }
0x35d1   :  { %v5350_v47 = vpop.xlane.xlu2 %5349 }
0x35d2   :  { %v5351_v35 = vadd.f32 1e-30, %v5350_v47 }
0x35d4   :  { %7378 = vrcp.f32 %v5351_v35  ;;  %v5363_v49 = vand.u32 2147483648, %v5351_v35  ;;  %v5361_v24 = vand.u32 2147483647, %v5351_v35  ;;  %vm5357_vm7 = vweird.f32 %v5351_v35 }
0x35d5   :  { %7380 = vrcp.f32 %v5375_v60 }
0x35d6   :  { %v5364_v16 = vor.u32 1.1754944e-38, %v5363_v49  ;;  %vm5362_vm10 = vcmp.eq.f32.partialorder %v5361_v24, 8.507059e+37 }
0x35da   :  { %v7379_v1 = vpop.eup %7378 }
0x35db   :  { %v5353_v14 = vmul.f32 %v7379_v1, %v5351_v35  ;;  %vm5358_vm5 = vweird.f32 %v7379_v1  ;;  %v7381_v7 = vpop.eup %7380 }
0x35dc   :  { %vm5359_vm8 = vmor %vm5357_vm7, %vm5358_vm5  ;;  %v5377_v12 = vmul.f32 %v7381_v7, %v5375_v60  ;;  %vm5382_vm11 = vweird.f32 %v7381_v7 }
0x35dd   :  { %v5354_v63 = vsub.f32 1.0, %v5353_v14  ;;  %vm5383_vm14 = vmor %vm5381_vm12, %vm5382_vm11 }
0x35de   :  { %v5378_v23 = vsub.f32 1.0, %v5377_v12 }
0x35df   :  { %v5355_v21 = vmul.f32 %v7379_v1, %v5354_v63 }
0x35e0   :  { %v5379_v22 = vmul.f32 %v7381_v7, %v5378_v23 }
0x35e1   :  { %v5356_v15 = vadd.f32 %v7379_v1, %v5355_v21 }
0x35e2   :  { %v5380_v2 = vadd.f32 %v7381_v7, %v5379_v22 }
0x35e3   :  { %v5360_v61 = vsel %vm5359_vm8, %v7379_v1, %v5356_v15 }
0x35e4   :  { %v5365_v0 = vsel %vm5362_vm10, %v5364_v16, %v5360_v61 }
0x35e5   :  { %v5366_v38 = vmul.f32 %v5365_v0, %v9419_v33 }
0x35e7   :  { %v5369_v57 = vmul.f32 %v5366_v38, %v5345_v53  ;;  %v5367_v55 = vmul.f32 %v5366_v38, %v9424_v51 }
0x35e9   :  { %v9460_v37 = vsub.f32 %v9410_v44, %v5369_v57  ;;  %v9463_v4 = vadd.f32 %v5367_v55, %v9413_v5  ;;  %v5387_v44 = vand.u32 2147483648, %v5375_v60  ;;  %v5384_v5 = vsel %vm5383_vm14, %v7381_v7, %v5380_v2 }
0x35eb   :  { %v5371_v39 = vmul.f32 %v9460_v37, %v9460_v37  ;;  %v5388_v6 = vor.u32 1.1754944e-38, %v5387_v44 }
0x35ed   :  { %v5372_v11 = vsel %vm2199_vm4, %v5371_v39, 0.0  ;;  %v5389_v30 = vsel %vm5386_vm15, %v5388_v6, %v5384_v5 }
0x35ee   :  { %5373 = vadd.xlane.f32.xlu1 %v5372_v11 }
0x3661   :  { %v9469_v10 = vpop.xlane.xlu1 %5373 }
0x3662   :  { %v5390_v42 = vmul.f32 %v5389_v30, %v9469_v10 }
0x3664   :  { %v5391_v33 = vmul.f32 %v5390_v42, %v9424_v51 }
0x3666   :  { %v9474_v27 = vadd.f32 %v5391_v33, %v9460_v37 }
0x3668   :  { %v5419_v8 = vperm.slane %v9474_v27, 2  ;;  %v5393_v43 = vperm.slane %v9474_v27, 0  ;;  %v5406_v46 = vperm.slane %v9474_v27, 1  ;;  %v5432_v26 = vperm.slane %v9474_v27, 3 }
0x366a   :  { %5424 = vperm.xlu1 %7099, %v5419_v8   ;;  %5404 = vperm.xlu2 %7100, %v5393_v43  }
0x366b   :  { %5398 = vperm.xlu0 %7101, %v5393_v43  }
0x3672   :  { %5430 = vperm.xlu2 %7100, %v5419_v8   ;;  %7106 = vset.pattern.permute.xlu1 %v7945_v28 }
0x3673   :  { %5411 = vperm.xlu0 %7101, %v5406_v46  }
0x367a   :  { %5443 = vperm.xlu2 %7100, %v5432_v26  }
0x367b   :  { %7102 = vset.pattern.permute.xlu0 %v7945_v28 }
0x3682   :  { %7107 = vset.pattern.permute.xlu2 %v7933_v32 }
0x3683   :  { %5417 = vperm.xlu0 %7102, %v5406_v46  }
0x368b   :  { %7103 = vset.pattern.permute.xlu0 %v7933_v32 }
0x3693   :  { %5437 = vperm.xlu0 %7103, %v5432_v26  }
0x36c4   :  { %v5405_v20 = vpop.permute.xlu2 %5404 }
0x36c5   :  { %v5446_v53 = vmul.f32 %v9376_v36, %v5405_v20 }
0x36c7   :  { %v5454_v49 = vsel %vm50_vm0, %v5446_v53, 0.0 }
0x36cc   :  { %v5431_v17 = vpop.permute.xlu2 %5430 }
0x36cd   :  { %v5450_v63 = vmul.f32 %v9386_v48, %v5431_v17 }
0x36cf   :  { %v5472_v0 = vsel %vm50_vm0, %v5450_v63, 0.0 }
0x36d4   :  { %v5444_v60 = vpop.permute.xlu2 %5443 }
0x36d5   :  { %v5452_v23 = vmul.f32 %v9394_v54, %v5444_v60 }
0x36d7   :  { %v5481_v6 = vsel %vm50_vm0, %v5452_v23, 0.0 }
0x36dc   :  { %v5425_v34 = vpop.permute.xlu1 %5424 }
0x36dd   :  { %v5399_v51 = vpop.permute.xlu0 %5398  ;;  %v5449_v47 = vmul.f32 %v9389_v25, %v5425_v34 }
0x36de   :  { %v5445_v19 = vmul.f32 %v9373_v58, %v5399_v51 }
0x36df   :  { %v5471_v15 = vsel %vm50_vm0, %v5449_v47, 0.0 }
0x36e0   :  { %v5453_v1 = vsel %vm50_vm0, %v5445_v19, 0.0  ;;  %v5473_v57 = vadd.f32 %v5472_v0, %v5471_v15 }
0x36e1   :  { %v5455_v16 = vadd.f32 %v5454_v49, %v5453_v1 }
0x36e2   :  { %v5474_v11 = vrot.slane %v5473_v57, 4 }
0x36e3   :  { %v5456_v55 = vrot.slane %v5455_v16, 4 }
0x36e4   :  { %v5475_v22 = vadd.f32 %v5474_v11, %v5473_v57 }
0x36e5   :  { %v5412_v50 = vpop.permute.xlu0 %5411  ;;  %v5457_v7 = vadd.f32 %v5456_v55, %v5455_v16 }
0x36e6   :  { %v5447_v56 = vmul.f32 %v9379_v41, %v5412_v50  ;;  %v5476_v30 = vrot.slane %v5475_v22, 2 }
0x36e7   :  { %v5458_v2 = vrot.slane %v5457_v7, 2 }
0x36e8   :  { %v5462_v21 = vsel %vm50_vm0, %v5447_v56, 0.0  ;;  %v5477_v26 = vadd.f32 %v5476_v30, %v5475_v22 }
0x36e9   :  { %v5459_v33 = vadd.f32 %v5458_v2, %v5457_v7 }
0x36ea   :  { %v5478_v19 = vrot.slane %v5477_v26, 1 }
0x36eb   :  { %v5460_v51 = vrot.slane %v5459_v33, 1 }
0x36ed   :  { %v5461_v53 = vadd.f32 %v5460_v51, %v5459_v33 }
0x36f5   :  { %v5418_v35 = vpop.permute.xlu0 %5417 }
0x36f6   :  { %v5448_v14 = vmul.f32 %v9370_v40, %v5418_v35  ;;  %v5479_v35 = vadd.f32 %v5478_v19, %v5477_v26 }
0x36f8   :  { %v5463_v24 = vsel %vm50_vm0, %v5448_v14, 0.0 }
0x36f9   :  { %v5464_v61 = vadd.f32 %v5463_v24, %v5462_v21 }
0x36fb   :  { %v5465_v38 = vrot.slane %v5464_v61, 4 }
0x36fd   :  { %v5466_v39 = vadd.f32 %v5465_v38, %v5464_v61 }
0x36ff   :  { %v5467_v12 = vrot.slane %v5466_v39, 2 }
0x3701   :  { %v5468_v5 = vadd.f32 %v5467_v12, %v5466_v39 }
0x3703   :  { %v5469_v43 = vrot.slane %v5468_v5, 1 }
0x3705   :  { %v5438_v44 = vpop.permute.xlu0 %5437  ;;  %v5470_v50 = vadd.f32 %v5469_v43, %v5468_v5 }
0x3706   :  { %v5451_v52 = vmul.f32 %v9397_v29, %v5438_v44 }
0x3707   :  { %v5493_v47 = vsel %vm2192_vm9, %v5470_v50, %v5461_v53 }
0x3708   :  { %v5480_v42 = vsel %vm50_vm0, %v5451_v52, 0.0  ;;  %v5494_v14 = vsel %vm2194_vm13, %v5479_v35, %v5493_v47 }
0x3709   :  { %v5482_v8 = vadd.f32 %v5481_v6, %v5480_v42  ;;  %v5525_v6 = vadd.f32 1e-30, %v9469_v10 }
0x370b   :  { %v5483_v46 = vrot.slane %v5482_v8, 4  ;;  %vm5531_vm8 = vweird.f32 %v5525_v6 }
0x370d   :  { %v5484_v20 = vadd.f32 %v5483_v46, %v5482_v8  ;;  %v5535_v46 = vand.u32 2147483647, %v5525_v6 }
0x370f   :  { %v5485_v34 = vrot.slane %v5484_v20, 2  ;;  %vm5536_vm11 = vcmp.eq.f32.partialorder %v5535_v46, 8.507059e+37 }
0x3711   :  { %v5486_v17 = vadd.f32 %v5485_v34, %v5484_v20 }
0x3713   :  { %v5487_v56 = vrot.slane %v5486_v17, 1 }
0x3715   :  { %v5488_v1 = vadd.f32 %v5487_v56, %v5486_v17 }
0x3717   :  { %v5495_v63 = vsel %vm2196_vm3, %v5488_v1, %v5494_v14 }
0x3718   :  { %v5497_v49 = vmul.f32 %v5495_v63, %v9474_v27 }
0x371a   :  { %v5498_v21 = vsel %vm2199_vm4, %v5497_v49, 0.0 }
0x371b   :  { %5499 = vadd.xlane.f32.xlu1 %v5498_v21 }
0x378e   :  { %v5500_v24 = vpop.xlane.xlu1 %5499 }
0x378f   :  { %v5501_v15 = vadd.f32 1e-30, %v5500_v24 }
0x3791   :  { %7382 = vrcp.f32 %v5501_v15  ;;  %v5513_v38 = vand.u32 2147483648, %v5501_v15  ;;  %v5511_v55 = vand.u32 2147483647, %v5501_v15  ;;  %vm5507_vm6 = vweird.f32 %v5501_v15 }
0x3792   :  { %7384 = vrcp.f32 %v5525_v6 }
0x3793   :  { %v5514_v11 = vor.u32 1.1754944e-38, %v5513_v38  ;;  %vm5512_vm5 = vcmp.eq.f32.partialorder %v5511_v55, 8.507059e+37 }
0x3797   :  { %v7383_v16 = vpop.eup %7382 }
0x3798   :  { %v5503_v61 = vmul.f32 %v7383_v16, %v5501_v15  ;;  %vm5508_vm1 = vweird.f32 %v7383_v16  ;;  %v7385_v30 = vpop.eup %7384 }
0x3799   :  { %vm5509_vm2 = vmor %vm5507_vm6, %vm5508_vm1  ;;  %v5527_v42 = vmul.f32 %v7385_v30, %v5525_v6  ;;  %vm5532_vm7 = vweird.f32 %v7385_v30 }
0x379a   :  { %v5504_v0 = vsub.f32 1.0, %v5503_v61  ;;  %vm5533_vm10 = vmor %vm5531_vm8, %vm5532_vm7 }
0x379b   :  { %v5528_v33 = vsub.f32 1.0, %v5527_v42 }
0x379c   :  { %v5505_v57 = vmul.f32 %v7383_v16, %v5504_v0 }
0x379d   :  { %v5529_v8 = vmul.f32 %v7385_v30, %v5528_v33 }
0x379e   :  { %v5506_v39 = vadd.f32 %v7383_v16, %v5505_v57 }
0x379f   :  { %v5530_v43 = vadd.f32 %v7385_v30, %v5529_v8 }
0x37a0   :  { %v5510_v60 = vsel %vm5509_vm2, %v7383_v16, %v5506_v39 }
0x37a1   :  { %v5515_v7 = vsel %vm5512_vm5, %v5514_v11, %v5510_v60 }
0x37a2   :  { %v5516_v12 = vmul.f32 %v5515_v7, %v9469_v10 }
0x37a4   :  { %v5519_v23 = vmul.f32 %v5516_v12, %v5495_v63  ;;  %v5517_v22 = vmul.f32 %v5516_v12, %v9474_v27 }
0x37a6   :  { %v9508_v2 = vsub.f32 %v9460_v37, %v5519_v23  ;;  %v9511_v44 = vadd.f32 %v5517_v22, %v9463_v4  ;;  %v5537_v37 = vand.u32 2147483648, %v5525_v6  ;;  %v5534_v4 = vsel %vm5533_vm10, %v7385_v30, %v5530_v43 }
0x37a8   :  { %v5521_v52 = vmul.f32 %v9508_v2, %v9508_v2  ;;  %v5538_v26 = vor.u32 1.1754944e-38, %v5537_v37 }
0x37aa   :  { %v5522_v5 = vsel %vm2199_vm4, %v5521_v52, 0.0  ;;  %v5539_v20 = vsel %vm5536_vm11, %v5538_v26, %v5534_v4 }
0x37ab   :  { %5523 = vadd.xlane.f32.xlu2 %v5522_v5 }
0x381e   :  { %v9517_v51 = vpop.xlane.xlu2 %5523 }
0x381f   :  { %v5540_v50 = vmul.f32 %v5539_v20, %v9517_v51 }
0x3821   :  { %v5541_v10 = vmul.f32 %v5540_v50, %v9474_v27 }
0x3823   :  { %v9522_v34 = vadd.f32 %v5541_v10, %v9508_v2 }
0x3825   :  { %v5569_v19 = vperm.slane %v9522_v34, 2  ;;  %v5556_v53 = vperm.slane %v9522_v34, 1  ;;  %v5543_v17 = vperm.slane %v9522_v34, 0  ;;  %v5582_v56 = vperm.slane %v9522_v34, 3 }
0x3827   :  { %5574 = vperm.xlu2 %7107, %v5569_v19   ;;  %5567 = vperm.xlu1 %7106, %v5556_v53  }
0x3828   :  { %5548 = vperm.xlu0 %7103, %v5543_v17  }
0x382f   :  { %7110 = vset.pattern.permute.xlu2 %v7945_v28 }
0x3830   :  { %7104 = vset.pattern.permute.xlu0 %v7945_v28 }
0x3837   :  { %5593 = vperm.xlu2 %7110, %v5582_v56  }
0x3838   :  { %5554 = vperm.xlu0 %7104, %v5543_v17  }
0x3840   :  { %7105 = vset.pattern.permute.xlu0 %v7933_v32 }
0x3848   :  { %5561 = vperm.xlu0 %7105, %v5556_v53  }
0x3850   :  { %7108 = vset.pattern.permute.xlu0 %v7945_v28 }
0x3858   :  { %5580 = vperm.xlu0 %7108, %v5569_v19  }
0x3860   :  { %7109 = vset.pattern.permute.xlu0 %v7933_v32 }
0x3868   :  { %5587 = vperm.xlu0 %7109, %v5582_v56  }
0x3881   :  { %v5575_v14 = vpop.permute.xlu2 %5574 }
0x3882   :  { %v5599_v24 = vmul.f32 %v9389_v25, %v5575_v14 }
0x3884   :  { %v5621_v39 = vsel %vm50_vm0, %v5599_v24, 0.0 }
0x3891   :  { %v5594_v5 = vpop.permute.xlu2 %5593 }
0x3892   :  { %v5602_v33 = vmul.f32 %v9394_v54, %v5594_v5 }
0x3894   :  { %v5631_v26 = vsel %vm50_vm0, %v5602_v33, 0.0 }
0x3899   :  { %v5568_v1 = vpop.permute.xlu1 %5567 }
0x389a   :  { %v5549_v27 = vpop.permute.xlu0 %5548  ;;  %v5598_v49 = vmul.f32 %v9370_v40, %v5568_v1 }
0x389b   :  { %v5595_v16 = vmul.f32 %v9373_v58, %v5549_v27 }
0x389c   :  { %v5613_v38 = vsel %vm50_vm0, %v5598_v49, 0.0 }
0x389d   :  { %v5603_v60 = vsel %vm50_vm0, %v5595_v16, 0.0 }
0x38aa   :  { %v5555_v47 = vpop.permute.xlu0 %5554 }
0x38ab   :  { %v5596_v21 = vmul.f32 %v9376_v36, %v5555_v47 }
0x38ad   :  { %v5604_v57 = vsel %vm50_vm0, %v5596_v21, 0.0 }
0x38ae   :  { %v5605_v12 = vadd.f32 %v5604_v57, %v5603_v60 }
0x38b0   :  { %v5606_v52 = vrot.slane %v5605_v12, 4 }
0x38b2   :  { %v5607_v42 = vadd.f32 %v5606_v52, %v5605_v12 }
0x38b4   :  { %v5608_v4 = vrot.slane %v5607_v42, 2 }
0x38b6   :  { %v5609_v53 = vadd.f32 %v5608_v4, %v5607_v42 }
0x38ba   :  { %v5562_v35 = vpop.permute.xlu0 %5561 }
0x38bb   :  { %v5597_v63 = vmul.f32 %v9379_v41, %v5562_v35  ;;  %v5610_v35 = vrot.slane %v5609_v53, 1 }
0x38bd   :  { %v5612_v61 = vsel %vm50_vm0, %v5597_v63, 0.0  ;;  %v5611_v21 = vadd.f32 %v5610_v35, %v5609_v53 }
0x38be   :  { %v5614_v11 = vadd.f32 %v5613_v38, %v5612_v61 }
0x38c0   :  { %v5615_v23 = vrot.slane %v5614_v11, 4 }
0x38c2   :  { %v5616_v6 = vadd.f32 %v5615_v23, %v5614_v11 }
0x38c4   :  { %v5617_v8 = vrot.slane %v5616_v6, 2 }
0x38c6   :  { %v5618_v50 = vadd.f32 %v5617_v8, %v5616_v6 }
0x38c8   :  { %v5619_v56 = vrot.slane %v5618_v50, 1 }
0x38ca   :  { %v5581_v15 = vpop.permute.xlu0 %5580  ;;  %v5620_v14 = vadd.f32 %v5619_v56, %v5618_v50 }
0x38cb   :  { %v5600_v0 = vmul.f32 %v9386_v48, %v5581_v15 }
0x38cc   :  { %v5643_v16 = vsel %vm2192_vm9, %v5620_v14, %v5611_v21 }
0x38cd   :  { %v5622_v55 = vsel %vm50_vm0, %v5600_v0, 0.0 }
0x38ce   :  { %v5623_v7 = vadd.f32 %v5622_v55, %v5621_v39 }
0x38d0   :  { %v5624_v22 = vrot.slane %v5623_v7, 4 }
0x38d2   :  { %v5625_v30 = vadd.f32 %v5624_v22, %v5623_v7 }
0x38d4   :  { %v5626_v37 = vrot.slane %v5625_v30, 2 }
0x38d6   :  { %v5627_v19 = vadd.f32 %v5626_v37, %v5625_v30 }
0x38d8   :  { %v5628_v47 = vrot.slane %v5627_v19, 1 }
0x38da   :  { %v5588_v43 = vpop.permute.xlu0 %5587  ;;  %v5629_v49 = vadd.f32 %v5628_v47, %v5627_v19 }
0x38db   :  { %v5601_v46 = vmul.f32 %v9397_v29, %v5588_v43 }
0x38dc   :  { %v5644_v61 = vsel %vm2194_vm13, %v5629_v49, %v5643_v16 }
0x38dd   :  { %v5630_v20 = vsel %vm50_vm0, %v5601_v46, 0.0 }
0x38de   :  { %v5632_v10 = vadd.f32 %v5631_v26, %v5630_v20  ;;  %v5675_v26 = vadd.f32 1e-30, %v9517_v51 }
0x38e0   :  { %v5633_v17 = vrot.slane %v5632_v10, 4  ;;  %vm5681_vm2 = vweird.f32 %v5675_v26 }
0x38e2   :  { %v5634_v27 = vadd.f32 %v5633_v17, %v5632_v10  ;;  %v5685_v17 = vand.u32 2147483647, %v5675_v26 }
0x38e4   :  { %v5635_v1 = vrot.slane %v5634_v27, 2  ;;  %vm5686_vm7 = vcmp.eq.f32.partialorder %v5685_v17, 8.507059e+37 }
0x38e6   :  { %v5636_v63 = vadd.f32 %v5635_v1, %v5634_v27 }
0x38e8   :  { %v5637_v24 = vrot.slane %v5636_v63, 1 }
0x38ea   :  { %v5638_v15 = vadd.f32 %v5637_v24, %v5636_v63 }
0x38ec   :  { %v5645_v0 = vsel %vm2196_vm3, %v5638_v15, %v5644_v61 }
0x38ed   :  { %v5647_v38 = vmul.f32 %v5645_v0, %v9522_v34 }
0x38ef   :  { %v5648_v57 = vsel %vm2199_vm4, %v5647_v38, 0.0 }
0x38f0   :  { %5649 = vadd.xlane.f32.xlu1 %v5648_v57 }
0x3963   :  { %v5650_v55 = vpop.xlane.xlu1 %5649 }
0x3964   :  { %v5651_v39 = vadd.f32 1e-30, %v5650_v55 }
0x3966   :  { %7386 = vrcp.f32 %v5651_v39  ;;  %v5663_v12 = vand.u32 2147483648, %v5651_v39  ;;  %v5661_v22 = vand.u32 2147483647, %v5651_v39  ;;  %vm5657_vm14 = vweird.f32 %v5651_v39 }
0x3967   :  { %7388 = vrcp.f32 %v5675_v26 }
0x3968   :  { %v5664_v5 = vor.u32 1.1754944e-38, %v5663_v12  ;;  %vm5662_vm1 = vcmp.eq.f32.partialorder %v5661_v22, 8.507059e+37 }
0x396c   :  { %v7387_v11 = vpop.eup %7386 }
0x396d   :  { %v5653_v60 = vmul.f32 %v7387_v11, %v5651_v39  ;;  %vm5658_vm12 = vweird.f32 %v7387_v11  ;;  %v7389_v20 = vpop.eup %7388 }
0x396e   :  { %vm5659_vm15 = vmor %vm5657_vm14, %vm5658_vm12  ;;  %v5677_v50 = vmul.f32 %v7389_v20, %v5675_v26  ;;  %vm5682_vm6 = vweird.f32 %v7389_v20 }
0x396f   :  { %v5654_v7 = vsub.f32 1.0, %v5653_v60  ;;  %vm5683_vm5 = vmor %vm5681_vm2, %vm5682_vm6 }
0x3970   :  { %v5678_v10 = vsub.f32 1.0, %v5677_v50 }
0x3971   :  { %v5655_v23 = vmul.f32 %v7387_v11, %v5654_v7 }
0x3972   :  { %v5679_v19 = vmul.f32 %v7389_v20, %v5678_v10 }
0x3973   :  { %v5656_v52 = vadd.f32 %v7387_v11, %v5655_v23 }
0x3974   :  { %v5680_v53 = vadd.f32 %v7389_v20, %v5679_v19 }
0x3975   :  { %v5660_v6 = vsel %vm5659_vm15, %v7387_v11, %v5656_v52 }
0x3976   :  { %v5665_v30 = vsel %vm5662_vm1, %v5664_v5, %v5660_v6 }
0x3977   :  { %v5666_v42 = vmul.f32 %v5665_v30, %v9517_v51 }
0x3979   :  { %v5669_v33 = vmul.f32 %v5666_v42, %v5645_v0  ;;  %v5667_v8 = vmul.f32 %v5666_v42, %v9522_v34 }
0x397b   :  { %v9557_v43 = vsub.f32 %v9508_v2, %v5669_v33  ;;  %v9560_v37 = vadd.f32 %v5667_v8, %v9511_v44  ;;  %v5687_v2 = vand.u32 2147483648, %v5675_v26  ;;  %v5684_v44 = vsel %vm5683_vm5, %v7389_v20, %v5680_v53 }
0x397d   :  { %v5671_v46 = vmul.f32 %v9557_v43, %v9557_v43  ;;  %v5688_v56 = vor.u32 1.1754944e-38, %v5687_v2 }
0x397f   :  { %v5672_v4 = vsel %vm2199_vm4, %v5671_v46, 0.0  ;;  %v5689_v27 = vsel %vm5686_vm7, %v5688_v56, %v5684_v44 }
0x3980   :  { %5673 = vadd.xlane.f32.xlu2 %v5672_v4 }
0x39f3   :  { %v9566_v47 = vpop.xlane.xlu2 %5673 }
0x39f4   :  { %v5690_v35 = vmul.f32 %v5689_v27, %v9566_v47 }
0x39f6   :  { %v5691_v51 = vmul.f32 %v5690_v35, %v9522_v34 }
0x39f8   :  { %v9571_v1 = vadd.f32 %v5691_v51, %v9557_v43 }
0x39fa   :  { %v5719_v14 = vperm.slane %v9571_v1, 2  ;;  %v5706_v63 = vperm.slane %v9571_v1, 1  ;;  %v5693_v49 = vperm.slane %v9571_v1, 0  ;;  %v5732_v34 = vperm.slane %v9571_v1, 3 }
0x39fc   :  { %5730 = vperm.xlu2 %7110, %v5719_v14   ;;  %5717 = vperm.xlu1 %7106, %v5706_v63  }
0x39fd   :  { %5698 = vperm.xlu0 %7109, %v5693_v49  }
0x3a04   :  { %7117 = vset.pattern.permute.xlu2 %v7933_v32  ;;  %7116 = vset.pattern.permute.xlu1 %v7933_v32 }
0x3a05   :  { %7111 = vset.pattern.permute.xlu0 %v7945_v28 }
0x3a0d   :  { %5704 = vperm.xlu0 %7111, %v5693_v49  }
0x3a15   :  { %7112 = vset.pattern.permute.xlu0 %v7933_v32 }
0x3a1d   :  { %5711 = vperm.xlu0 %7112, %v5706_v63  }
0x3a25   :  { %5724 = vperm.xlu0 %7112, %v5719_v14  }
0x3a2d   :  { %5737 = vperm.xlu0 %7112, %v5732_v34  }
0x3a35   :  { %7113 = vset.pattern.permute.xlu0 %v7945_v28 }
0x3a3d   :  { %5743 = vperm.xlu0 %7113, %v5732_v34  }
0x3a45   :  { %7114 = vset.pattern.permute.xlu0 %v7933_v32 }
0x3a56   :  { %v5731_v0 = vpop.permute.xlu2 %5730 }
0x3a57   :  { %v5750_v11 = vmul.f32 %v9386_v48, %v5731_v0 }
0x3a6e   :  { %v5718_v61 = vpop.permute.xlu1 %5717 }
0x3a6f   :  { %v5699_v21 = vpop.permute.xlu0 %5698  ;;  %v5748_v55 = vmul.f32 %v9370_v40, %v5718_v61 }
0x3a70   :  { %v5745_v60 = vmul.f32 %v9373_v58, %v5699_v21 }
0x3a71   :  { %v5763_v23 = vsel %vm50_vm0, %v5748_v55, 0.0 }
0x3a7f   :  { %v5705_v24 = vpop.permute.xlu0 %5704 }
0x3a80   :  { %v5746_v39 = vmul.f32 %v9376_v36, %v5705_v24 }
0x3a82   :  { %v5754_v22 = vsel %vm50_vm0, %v5746_v39, 0.0 }
0x3a8f   :  { %v5712_v15 = vpop.permute.xlu0 %5711 }
0x3a90   :  { %v5747_v38 = vmul.f32 %v9379_v41, %v5712_v15  ;;  %v5772_v41 = vsel %vm50_vm0, %v5750_v11, 0.0 }
0x3a92   :  { %v5762_v7 = vsel %vm50_vm0, %v5747_v38, 0.0 }
0x3a93   :  { %v5764_v52 = vadd.f32 %v5763_v23, %v5762_v7 }
0x3a95   :  { %v5765_v36 = vrot.slane %v5764_v52, 4 }
0x3a97   :  { %v5725_v16 = vpop.permute.xlu0 %5724  ;;  %v5766_v58 = vadd.f32 %v5765_v36, %v5764_v52 }
0x3a98   :  { %v5749_v57 = vmul.f32 %v9389_v25, %v5725_v16  ;;  %v5753_v25 = vsel %vm50_vm0, %v5745_v60, 0.0 }
0x3a99   :  { %v5755_v5 = vadd.f32 %v5754_v22, %v5753_v25  ;;  %v5767_v46 = vrot.slane %v5766_v58, 2 }
0x3a9a   :  { %v5771_v12 = vsel %vm50_vm0, %v5749_v57, 0.0 }
0x3a9b   :  { %v5773_v40 = vadd.f32 %v5772_v41, %v5771_v12  ;;  %v5756_v30 = vrot.slane %v5755_v5, 4  ;;  %v5768_v53 = vadd.f32 %v5767_v46, %v5766_v58 }
0x3a9d   :  { %v5774_v48 = vrot.slane %v5773_v40, 4  ;;  %v5757_v33 = vadd.f32 %v5756_v30, %v5755_v5  ;;  %v5769_v27 = vrot.slane %v5768_v53, 1 }
0x3a9f   :  { %v5738_v6 = vpop.permute.xlu0 %5737  ;;  %v5775_v42 = vadd.f32 %v5774_v48, %v5773_v40  ;;  %v5758_v50 = vrot.slane %v5757_v33, 2  ;;  %v5770_v63 = vadd.f32 %v5769_v27, %v5768_v53 }
0x3aa0   :  { %v5751_v8 = vmul.f32 %v9397_v29, %v5738_v6 }
0x3aa1   :  { %v5776_v26 = vrot.slane %v5775_v42, 2  ;;  %v5759_v44 = vadd.f32 %v5758_v50, %v5757_v33 }
0x3aa2   :  { %v5780_v10 = vsel %vm50_vm0, %v5751_v8, 0.0 }
0x3aa3   :  { %v5777_v17 = vadd.f32 %v5776_v26, %v5775_v42  ;;  %v5760_v14 = vrot.slane %v5759_v44, 1  ;;  %v5825_v42 = vadd.f32 1e-30, %v9566_v47 }
0x3aa5   :  { %v5778_v51 = vrot.slane %v5777_v17, 1  ;;  %v5761_v21 = vadd.f32 %v5760_v14, %v5759_v44  ;;  %vm5831_vm15 = vweird.f32 %v5825_v42 }
0x3aa7   :  { %v5779_v34 = vadd.f32 %v5778_v51, %v5777_v17  ;;  %v5793_v15 = vsel %vm2192_vm9, %v5770_v63, %v5761_v21  ;;  %v9631_v63 = vld [vmem:[#allocation5 + $0x18] sm:$0xff] }
0x3aa9   :  { %v5794_v16 = vsel %vm2194_vm13, %v5779_v34, %v5793_v15  ;;  %v9634_v34 = vld [vmem:[#allocation5 + $0x10] sm:$0xff]  ;;  %v9640_v15 = vld [vmem:[#allocation5 + $0x20] sm:$0xff] }
0x3aaf   :  { %v5744_v4 = vpop.permute.xlu0 %5743 }
0x3ab0   :  { %v5752_v20 = vmul.f32 %v9394_v54, %v5744_v4 }
0x3ab2   :  { %v5781_v19 = vsel %vm50_vm0, %v5752_v20, 0.0  ;;  %v5835_v20 = vand.u32 2147483647, %v5825_v42 }
0x3ab3   :  { %v5782_v2 = vadd.f32 %v5781_v19, %v5780_v10 }
0x3ab4   :  { %vm5836_vm6 = vcmp.eq.f32.partialorder %v5835_v20, 8.507059e+37 }
0x3ab5   :  { %v5783_v56 = vrot.slane %v5782_v2, 4 }
0x3ab7   :  { %v5784_v35 = vadd.f32 %v5783_v56, %v5782_v2 }
0x3ab9   :  { %v5785_v29 = vrot.slane %v5784_v35, 2 }
0x3abb   :  { %v5786_v49 = vadd.f32 %v5785_v29, %v5784_v35 }
0x3abd   :  { %v5787_v54 = vrot.slane %v5786_v49, 1 }
0x3abf   :  { %v5788_v24 = vadd.f32 %v5787_v54, %v5786_v49  ;;  %v9637_v54 = vld [vmem:[#allocation5 + $0x8] sm:$0xff] }
0x3ac1   :  { %v5795_v61 = vsel %vm2196_vm3, %v5788_v24, %v5794_v16 }
0x3ac2   :  { %v5797_v0 = vmul.f32 %v5795_v61, %v9571_v1 }
0x3ac4   :  { %v5798_v38 = vsel %vm2199_vm4, %v5797_v0, 0.0  ;;  %v9643_v0 = vld [vmem:[#allocation5] sm:$0xff] }
0x3ac5   :  { %5799 = vadd.xlane.f32.xlu1 %v5798_v38 }
0x3b38   :  { %v5800_v57 = vpop.xlane.xlu1 %5799 }
0x3b39   :  { %v5801_v55 = vadd.f32 1e-30, %v5800_v57 }
0x3b3b   :  { %7390 = vrcp.f32 %v5801_v55  ;;  %v5813_v7 = vand.u32 2147483648, %v5801_v55  ;;  %v5811_v23 = vand.u32 2147483647, %v5801_v55  ;;  %vm5807_vm10 = vweird.f32 %v5801_v55 }
0x3b3c   :  { %7392 = vrcp.f32 %v5825_v42 }
0x3b3d   :  { %v5814_v41 = vor.u32 1.1754944e-38, %v5813_v7  ;;  %vm5812_vm12 = vcmp.eq.f32.partialorder %v5811_v23, 8.507059e+37 }
0x3b41   :  { %v7391_v39 = vpop.eup %7390 }
0x3b42   :  { %v5803_v11 = vmul.f32 %v7391_v39, %v5801_v55  ;;  %vm5808_vm8 = vweird.f32 %v7391_v39  ;;  %v7393_v33 = vpop.eup %7392  ;;  %v9647_v55 = vld [vmem:[#allocation5 + $0x28] sm:$0xff] }
0x3b43   :  { %vm5809_vm11 = vmor %vm5807_vm10, %vm5808_vm8  ;;  %v5827_v8 = vmul.f32 %v7393_v33, %v5825_v42  ;;  %vm5832_vm14 = vweird.f32 %v7393_v33 }
0x3b44   :  { %v5804_v60 = vsub.f32 1.0, %v5803_v11  ;;  %vm5833_vm1 = vmor %vm5831_vm15, %vm5832_vm14 }
0x3b45   :  { %v5828_v46 = vsub.f32 1.0, %v5827_v8 }
0x3b46   :  { %v5805_v12 = vmul.f32 %v7391_v39, %v5804_v60 }
0x3b47   :  { %v5829_v4 = vmul.f32 %v7393_v33, %v5828_v46 }
0x3b48   :  { %v5806_v22 = vadd.f32 %v7391_v39, %v5805_v12 }
0x3b49   :  { %v5830_v26 = vadd.f32 %v7393_v33, %v5829_v4 }
0x3b4a   :  { %v5810_v52 = vsel %vm5809_vm11, %v7391_v39, %v5806_v22 }
0x3b4b   :  { %v5815_v25 = vsel %vm5812_vm12, %v5814_v41, %v5810_v52 }
0x3b4c   :  { %v5816_v40 = vmul.f32 %v5815_v25, %v9566_v47 }
0x3b4e   :  { %v5819_v5 = vmul.f32 %v5816_v40, %v5795_v61  ;;  %v5817_v36 = vmul.f32 %v5816_v40, %v9571_v1 }
0x3b50   :  { %v9607_v6 = vsub.f32 %v9557_v43, %v5819_v5  ;;  %v9610_v48 = vadd.f32 %v5817_v36, %v9560_v37  ;;  %v5837_v43 = vand.u32 2147483648, %v5825_v42  ;;  %v5834_v37 = vsel %vm5833_vm1, %v7393_v33, %v5830_v26  ;;  %v9655_v33 = vld [vmem:[#allocation5 + $0x38] sm:$0xff] }
0x3b52   :  { %v5821_v30 = vmul.f32 %v9607_v6, %v9607_v6  ;;  %v5838_v50 = vor.u32 1.1754944e-38, %v5837_v43  ;;  %v9658_v43 = vld [vmem:[#allocation5 + $0x30] sm:$0xff] }
0x3b54   :  { %v5822_v58 = vsel %vm2199_vm4, %v5821_v30, 0.0  ;;  %v5839_v19 = vsel %vm5836_vm6, %v5838_v50, %v5834_v37 }
0x3b55   :  { %5823 = vadd.xlane.f32.xlu2 %v5822_v58 }
0x3bc8   :  { %v9616_v10 = vpop.xlane.xlu2 %5823 }
0x3bc9   :  { %v5840_v53 = vmul.f32 %v5839_v19, %v9616_v10 }
0x3bcb   :  { %v5841_v47 = vmul.f32 %v5840_v53, %v9571_v1 }
0x3bcd   :  { %v9621_v2 = vadd.f32 %v5841_v47, %v9607_v6 }
0x3bcf   :  { %v5869_v17 = vperm.slane %v9621_v2, 2  ;;  %v5856_v44 = vperm.slane %v9621_v2, 1  ;;  %v5843_v56 = vperm.slane %v9621_v2, 0  ;;  %v5882_v1 = vperm.slane %v9621_v2, 3 }
0x3bd1   :  { %5874 = vperm.xlu2 %7117, %v5869_v17   ;;  %5861 = vperm.xlu1 %7116, %v5856_v44  }
0x3bd2   :  { %5848 = vperm.xlu0 %7114, %v5843_v56  }
0x3bd9   :  { %7119 = vset.pattern.permute.xlu1 %v7945_v28  ;;  %7122 = vset.pattern.permute.xlu2 %v7945_v28 }
0x3bda   :  { %7115 = vset.pattern.permute.xlu0 %v7945_v28 }
0x3be1   :  { %5893 = vperm.xlu1 %7119, %v5882_v1  }
0x3be2   :  { %5854 = vperm.xlu0 %7115, %v5843_v56  }
0x3bea   :  { %5867 = vperm.xlu0 %7115, %v5856_v44  }
0x3bf2   :  { %5880 = vperm.xlu0 %7115, %v5869_v17  }
0x3bfa   :  { %7118 = vset.pattern.permute.xlu0 %v7933_v32 }
0x3c02   :  { %5887 = vperm.xlu0 %7118, %v5882_v1  }
0x3c2b   :  { %v5875_v29 = vpop.permute.xlu2 %5874 }
0x3c2c   :  { %v5899_v16 = vmul.f32 %v9640_v15, %v5875_v29 }
0x3c2e   :  { %v5921_v12 = vsel %vm50_vm0, %v5899_v16, 0.0 }
0x3c43   :  { %v5862_v14 = vpop.permute.xlu1 %5861 }
0x3c44   :  { %v5849_v27 = vpop.permute.xlu0 %5848  ;;  %v5897_v21 = vmul.f32 %v9634_v34, %v5862_v14 }
0x3c45   :  { %v5895_v38 = vmul.f32 %v9643_v0, %v5849_v27 }
0x3c46   :  { %v5912_v11 = vsel %vm50_vm0, %v5897_v21, 0.0 }
0x3c47   :  { %v5903_v22 = vsel %vm50_vm0, %v5895_v38, 0.0 }
0x3c53   :  { %v5894_v36 = vpop.permute.xlu1 %5893 }
0x3c54   :  { %v5855_v35 = vpop.permute.xlu0 %5854  ;;  %v5902_v8 = vmul.f32 %v9655_v33, %v5894_v36 }
0x3c55   :  { %v5896_v24 = vmul.f32 %v9637_v54, %v5855_v35 }
0x3c56   :  { %v5931_v50 = vsel %vm50_vm0, %v5902_v8, 0.0 }
0x3c57   :  { %v5904_v60 = vsel %vm50_vm0, %v5896_v24, 0.0 }
0x3c58   :  { %v5905_v52 = vadd.f32 %v5904_v60, %v5903_v22 }
0x3c5a   :  { %v5906_v5 = vrot.slane %v5905_v52, 4 }
0x3c5c   :  { %v5868_v51 = vpop.permute.xlu0 %5867  ;;  %v5907_v42 = vadd.f32 %v5906_v5, %v5905_v52 }
0x3c5d   :  { %v5898_v49 = vmul.f32 %v9631_v63, %v5868_v51 }
0x3c5e   :  { %v5908_v37 = vrot.slane %v5907_v42, 2 }
0x3c5f   :  { %v5913_v57 = vsel %vm50_vm0, %v5898_v49, 0.0 }
0x3c60   :  { %v5914_v23 = vadd.f32 %v5913_v57, %v5912_v11  ;;  %v5909_v44 = vadd.f32 %v5908_v37, %v5907_v42 }
0x3c62   :  { %v5915_v25 = vrot.slane %v5914_v23, 4  ;;  %v5910_v51 = vrot.slane %v5909_v44, 1 }
0x3c64   :  { %v5881_v61 = vpop.permute.xlu0 %5880  ;;  %v5916_v30 = vadd.f32 %v5915_v25, %v5914_v23  ;;  %v5911_v24 = vadd.f32 %v5910_v51, %v5909_v44 }
0x3c65   :  { %v5900_v39 = vmul.f32 %v9647_v55, %v5881_v61 }
0x3c66   :  { %v5917_v46 = vrot.slane %v5916_v30, 2 }
0x3c67   :  { %v5922_v7 = vsel %vm50_vm0, %v5900_v39, 0.0 }
0x3c68   :  { %v5923_v41 = vadd.f32 %v5922_v7, %v5921_v12  ;;  %v5918_v53 = vadd.f32 %v5917_v46, %v5916_v30 }
0x3c6a   :  { %v5924_v40 = vrot.slane %v5923_v41, 4  ;;  %v5919_v1 = vrot.slane %v5918_v53, 1 }
0x3c6c   :  { %v5925_v58 = vadd.f32 %v5924_v40, %v5923_v41  ;;  %v5920_v29 = vadd.f32 %v5919_v1, %v5918_v53 }
0x3c6e   :  { %v5926_v26 = vrot.slane %v5925_v58, 2  ;;  %v5943_v38 = vsel %vm2192_vm9, %v5920_v29, %v5911_v24 }
0x3c70   :  { %v5927_v17 = vadd.f32 %v5926_v26, %v5925_v58 }
0x3c72   :  { %v5928_v35 = vrot.slane %v5927_v17, 1 }
0x3c74   :  { %v5888_v4 = vpop.permute.xlu0 %5887  ;;  %v5929_v21 = vadd.f32 %v5928_v35, %v5927_v17 }
0x3c75   :  { %v5901_v20 = vmul.f32 %v9658_v43, %v5888_v4 }
0x3c76   :  { %v5944_v57 = vsel %vm2194_vm13, %v5929_v21, %v5943_v38 }
0x3c77   :  { %v5930_v19 = vsel %vm50_vm0, %v5901_v20, 0.0 }
0x3c78   :  { %v5932_v47 = vadd.f32 %v5931_v50, %v5930_v19  ;;  %v5975_v50 = vadd.f32 1e-30, %v9616_v10 }
0x3c7a   :  { %v5933_v56 = vrot.slane %v5932_v47, 4  ;;  %vm5981_vm11 = vweird.f32 %v5975_v50 }
0x3c7c   :  { %v5934_v27 = vadd.f32 %v5933_v56, %v5932_v47  ;;  %v5985_v56 = vand.u32 2147483647, %v5975_v50 }
0x3c7e   :  { %v5935_v14 = vrot.slane %v5934_v27, 2  ;;  %vm5986_vm14 = vcmp.eq.f32.partialorder %v5985_v56, 8.507059e+37 }
0x3c80   :  { %v5936_v49 = vadd.f32 %v5935_v14, %v5934_v27 }
0x3c82   :  { %v5937_v16 = vrot.slane %v5936_v49, 1 }
0x3c84   :  { %v5938_v61 = vadd.f32 %v5937_v16, %v5936_v49 }
0x3c86   :  { %v5945_v39 = vsel %vm2196_vm3, %v5938_v61, %v5944_v57 }
0x3c87   :  { %v5947_v11 = vmul.f32 %v5945_v39, %v9621_v2 }
0x3c89   :  { %v5948_v60 = vsel %vm2199_vm4, %v5947_v11, 0.0 }
0x3c8a   :  { %5949 = vadd.xlane.f32.xlu2 %v5948_v60 }
0x3cfd   :  { %v5950_v7 = vpop.xlane.xlu2 %5949 }
0x3cfe   :  { %v5951_v12 = vadd.f32 1e-30, %v5950_v7 }
0x3d00   :  { %7394 = vrcp.f32 %v5951_v12  ;;  %v5963_v52 = vand.u32 2147483648, %v5951_v12  ;;  %v5961_v40 = vand.u32 2147483647, %v5951_v12  ;;  %vm5957_vm5 = vweird.f32 %v5951_v12 }
0x3d01   :  { %7396 = vrcp.f32 %v5975_v50 }
0x3d02   :  { %v5964_v36 = vor.u32 1.1754944e-38, %v5963_v52  ;;  %vm5962_vm8 = vcmp.eq.f32.partialorder %v5961_v40, 8.507059e+37 }
0x3d06   :  { %v7395_v23 = vpop.eup %7394 }
0x3d07   :  { %v5953_v22 = vmul.f32 %v7395_v23, %v5951_v12  ;;  %vm5958_vm2 = vweird.f32 %v7395_v23  ;;  %v7397_v19 = vpop.eup %7396 }
0x3d08   :  { %vm5959_vm7 = vmor %vm5957_vm5, %vm5958_vm2  ;;  %v5977_v53 = vmul.f32 %v7397_v19, %v5975_v50  ;;  %vm5982_vm10 = vweird.f32 %v7397_v19 }
0x3d09   :  { %v5954_v41 = vsub.f32 1.0, %v5953_v22  ;;  %vm5983_vm12 = vmor %vm5981_vm11, %vm5982_vm10 }
0x3d0a   :  { %v5978_v47 = vsub.f32 1.0, %v5977_v53 }
0x3d0b   :  { %v5955_v25 = vmul.f32 %v7395_v23, %v5954_v41 }
0x3d0c   :  { %v5979_v17 = vmul.f32 %v7397_v19, %v5978_v47 }
0x3d0d   :  { %v5956_v5 = vadd.f32 %v7395_v23, %v5955_v25 }
0x3d0e   :  { %v5980_v44 = vadd.f32 %v7397_v19, %v5979_v17 }
0x3d0f   :  { %v5960_v30 = vsel %vm5959_vm7, %v7395_v23, %v5956_v5 }
0x3d10   :  { %v5965_v58 = vsel %vm5962_vm8, %v5964_v36, %v5960_v30 }
0x3d11   :  { %v5966_v42 = vmul.f32 %v5965_v58, %v9616_v10 }
0x3d13   :  { %v5969_v8 = vmul.f32 %v5966_v42, %v5945_v39  ;;  %v5967_v46 = vmul.f32 %v5966_v42, %v9621_v2 }
0x3d15   :  { %v9671_v4 = vsub.f32 %v9607_v6, %v5969_v8  ;;  %v9674_v26 = vadd.f32 %v5967_v46, %v9610_v48  ;;  %v5987_v6 = vand.u32 2147483648, %v5975_v50  ;;  %v5984_v48 = vsel %vm5983_vm12, %v7397_v19, %v5980_v44 }
0x3d17   :  { %v5971_v20 = vmul.f32 %v9671_v4, %v9671_v4  ;;  %v5988_v1 = vor.u32 1.1754944e-38, %v5987_v6 }
0x3d19   :  { %v5972_v37 = vsel %vm2199_vm4, %v5971_v20, 0.0  ;;  %v5989_v27 = vsel %vm5986_vm14, %v5988_v1, %v5984_v48 }
0x3d1a   :  { %5973 = vadd.xlane.f32.xlu1 %v5972_v37 }
0x3d8d   :  { %v9680_v35 = vpop.xlane.xlu1 %5973 }
0x3d8e   :  { %v5990_v51 = vmul.f32 %v5989_v27, %v9680_v35 }
0x3d90   :  { %v5991_v10 = vmul.f32 %v5990_v51, %v9621_v2 }
0x3d92   :  { %v9685_v14 = vadd.f32 %v5991_v10, %v9671_v4 }
0x3d94   :  { %v6019_v29 = vperm.slane %v9685_v14, 2  ;;  %v6006_v49 = vperm.slane %v9685_v14, 1  ;;  %v5993_v21 = vperm.slane %v9685_v14, 0  ;;  %v6032_v2 = vperm.slane %v9685_v14, 3 }
0x3d96   :  { %6030 = vperm.xlu1 %7119, %v6019_v29   ;;  %6017 = vperm.xlu2 %7122, %v6006_v49  }
0x3d97   :  { %5998 = vperm.xlu0 %7118, %v5993_v21  }
0x3d9e   :  { %7127 = vset.pattern.permute.xlu1 %v7933_v32  ;;  %7126 = vset.pattern.permute.xlu2 %v7933_v32 }
0x3d9f   :  { %7120 = vset.pattern.permute.xlu0 %v7945_v28 }
0x3da7   :  { %6004 = vperm.xlu0 %7120, %v5993_v21  }
0x3daf   :  { %7121 = vset.pattern.permute.xlu0 %v7933_v32 }
0x3db7   :  { %6011 = vperm.xlu0 %7121, %v6006_v49  }
0x3dbf   :  { %6024 = vperm.xlu0 %7121, %v6019_v29  }
0x3dc7   :  { %6037 = vperm.xlu0 %7121, %v6032_v2  }
0x3dcf   :  { %7123 = vset.pattern.permute.xlu0 %v7945_v28 }
0x3dd7   :  { %6043 = vperm.xlu0 %7123, %v6032_v2  }
0x3ddf   :  { %7124 = vset.pattern.permute.xlu0 %v7933_v32 }
0x3df0   :  { %v6018_v57 = vpop.permute.xlu2 %6017 }
0x3df1   :  { %v6048_v7 = vmul.f32 %v9631_v63, %v6018_v57 }
0x3df3   :  { %v6063_v25 = vsel %vm50_vm0, %v6048_v7, 0.0 }
0x3e08   :  { %v6031_v39 = vpop.permute.xlu1 %6030 }
0x3e09   :  { %v5999_v24 = vpop.permute.xlu0 %5998  ;;  %v6050_v23 = vmul.f32 %v9647_v55, %v6031_v39 }
0x3e0a   :  { %v6045_v22 = vmul.f32 %v9643_v0, %v5999_v24 }
0x3e0b   :  { %v6072_v5 = vsel %vm50_vm0, %v6050_v23, 0.0 }
0x3e0c   :  { %v6053_v30 = vsel %vm50_vm0, %v6045_v22, 0.0 }
0x3e19   :  { %v6005_v16 = vpop.permute.xlu0 %6004 }
0x3e1a   :  { %v6046_v12 = vmul.f32 %v9637_v54, %v6005_v16 }
0x3e1c   :  { %v6054_v40 = vsel %vm50_vm0, %v6046_v12, 0.0 }
0x3e1d   :  { %v6055_v42 = vadd.f32 %v6054_v40, %v6053_v30 }
0x3e1f   :  { %v6056_v37 = vrot.slane %v6055_v42, 4 }
0x3e21   :  { %v6057_v53 = vadd.f32 %v6056_v37, %v6055_v42 }
0x3e23   :  { %v6058_v48 = vrot.slane %v6057_v53, 2 }
0x3e25   :  { %v6059_v49 = vadd.f32 %v6058_v48, %v6057_v53 }
0x3e29   :  { %v6012_v61 = vpop.permute.xlu0 %6011 }
0x3e2a   :  { %v6047_v11 = vmul.f32 %v9634_v34, %v6012_v61  ;;  %v6060_v61 = vrot.slane %v6059_v49, 1 }
0x3e2c   :  { %v6062_v41 = vsel %vm50_vm0, %v6047_v11, 0.0 }
0x3e2d   :  { %v6064_v36 = vadd.f32 %v6063_v25, %v6062_v41 }
0x3e2f   :  { %v6065_v8 = vrot.slane %v6064_v36, 4 }
0x3e31   :  { %v6025_v38 = vpop.permute.xlu0 %6024  ;;  %v6066_v50 = vadd.f32 %v6065_v8, %v6064_v36 }
0x3e32   :  { %v6049_v60 = vmul.f32 %v9640_v15, %v6025_v38 }
0x3e33   :  { %v6067_v17 = vrot.slane %v6066_v50, 2 }
0x3e34   :  { %v6071_v52 = vsel %vm50_vm0, %v6049_v60, 0.0  ;;  %v6061_v60 = vadd.f32 %v6060_v61, %v6059_v49 }
0x3e35   :  { %v6073_v58 = vadd.f32 %v6072_v5, %v6071_v52  ;;  %v6068_v51 = vadd.f32 %v6067_v17, %v6066_v50 }
0x3e37   :  { %v6074_v20 = vrot.slane %v6073_v58, 4  ;;  %v6069_v2 = vrot.slane %v6068_v51, 1 }
0x3e39   :  { %v6038_v46 = vpop.permute.xlu0 %6037  ;;  %v6075_v19 = vadd.f32 %v6074_v20, %v6073_v58  ;;  %v6070_v57 = vadd.f32 %v6069_v2, %v6068_v51 }
0x3e3a   :  { %v6051_v47 = vmul.f32 %v9658_v43, %v6038_v46 }
0x3e3b   :  { %v6076_v6 = vrot.slane %v6075_v19, 2  ;;  %v6093_v23 = vsel %vm2192_vm9, %v6070_v57, %v6061_v60 }
0x3e3c   :  { %v6080_v1 = vsel %vm50_vm0, %v6051_v47, 0.0 }
0x3e3d   :  { %v6077_v29 = vadd.f32 %v6076_v6, %v6075_v19 }
0x3e3f   :  { %v6078_v16 = vrot.slane %v6077_v29, 1 }
0x3e41   :  { %v6079_v11 = vadd.f32 %v6078_v16, %v6077_v29 }
0x3e43   :  { %v6094_v22 = vsel %vm2194_vm13, %v6079_v11, %v6093_v23 }
0x3e49   :  { %v6044_v44 = vpop.permute.xlu0 %6043 }
0x3e4a   :  { %v6052_v56 = vmul.f32 %v9655_v33, %v6044_v44 }
0x3e4c   :  { %v6081_v27 = vsel %vm50_vm0, %v6052_v56, 0.0 }
0x3e4d   :  { %v6082_v10 = vadd.f32 %v6081_v27, %v6080_v1  ;;  %v6125_v1 = vadd.f32 1e-30, %v9680_v35 }
0x3e4f   :  { %v6083_v21 = vrot.slane %v6082_v10, 4  ;;  %vm6131_vm7 = vweird.f32 %v6125_v1 }
0x3e51   :  { %v6084_v24 = vadd.f32 %v6083_v21, %v6082_v10  ;;  %v6135_v21 = vand.u32 2147483647, %v6125_v1 }
0x3e53   :  { %v6085_v38 = vrot.slane %v6084_v24, 2  ;;  %vm6136_vm10 = vcmp.eq.f32.partialorder %v6135_v21, 8.507059e+37 }
0x3e55   :  { %v6086_v39 = vadd.f32 %v6085_v38, %v6084_v24 }
0x3e57   :  { %v6087_v7 = vrot.slane %v6086_v39, 1 }
0x3e59   :  { %v6088_v12 = vadd.f32 %v6087_v7, %v6086_v39 }
0x3e5b   :  { %v6095_v41 = vsel %vm2196_vm3, %v6088_v12, %v6094_v22 }
0x3e5c   :  { %v6097_v52 = vmul.f32 %v6095_v41, %v9685_v14 }
0x3e5e   :  { %v6098_v25 = vsel %vm2199_vm4, %v6097_v52, 0.0 }
0x3e5f   :  { %6099 = vadd.xlane.f32.xlu2 %v6098_v25 }
0x3ed2   :  { %v6100_v40 = vpop.xlane.xlu2 %6099 }
0x3ed3   :  { %v6101_v5 = vadd.f32 1e-30, %v6100_v40 }
0x3ed5   :  { %7398 = vrcp.f32 %v6101_v5  ;;  %v6113_v42 = vand.u32 2147483648, %v6101_v5  ;;  %v6111_v46 = vand.u32 2147483647, %v6101_v5  ;;  %vm6107_vm1 = vweird.f32 %v6101_v5 }
0x3ed6   :  { %7400 = vrcp.f32 %v6125_v1 }
0x3ed7   :  { %v6114_v37 = vor.u32 1.1754944e-38, %v6113_v42  ;;  %vm6112_vm2 = vcmp.eq.f32.partialorder %v6111_v46, 8.507059e+37 }
0x3edb   :  { %v7399_v36 = vpop.eup %7398 }
0x3edc   :  { %v6103_v30 = vmul.f32 %v7399_v36, %v6101_v5  ;;  %vm6108_vm15 = vweird.f32 %v7399_v36  ;;  %v7401_v27 = vpop.eup %7400 }
0x3edd   :  { %vm6109_vm6 = vmor %vm6107_vm1, %vm6108_vm15  ;;  %v6127_v51 = vmul.f32 %v7401_v27, %v6125_v1  ;;  %vm6132_vm5 = vweird.f32 %v7401_v27 }
0x3ede   :  { %v6104_v58 = vsub.f32 1.0, %v6103_v30  ;;  %vm6133_vm8 = vmor %vm6131_vm7, %vm6132_vm5 }
0x3edf   :  { %v6128_v10 = vsub.f32 1.0, %v6127_v51 }
0x3ee0   :  { %v6105_v8 = vmul.f32 %v7399_v36, %v6104_v58 }
0x3ee1   :  { %v6129_v29 = vmul.f32 %v7401_v27, %v6128_v10 }
0x3ee2   :  { %v6106_v20 = vadd.f32 %v7399_v36, %v6105_v8 }
0x3ee3   :  { %v6130_v49 = vadd.f32 %v7401_v27, %v6129_v29 }
0x3ee4   :  { %v6110_v50 = vsel %vm6109_vm6, %v7399_v36, %v6106_v20 }
0x3ee5   :  { %v6115_v19 = vsel %vm6112_vm2, %v6114_v37, %v6110_v50 }
0x3ee6   :  { %v6116_v53 = vmul.f32 %v6115_v19, %v9680_v35 }
0x3ee8   :  { %v6119_v47 = vmul.f32 %v6116_v53, %v6095_v41  ;;  %v6117_v17 = vmul.f32 %v6116_v53, %v9685_v14 }
0x3eea   :  { %v9721_v44 = vsub.f32 %v9671_v4, %v6119_v47  ;;  %v9724_v6 = vadd.f32 %v6117_v17, %v9674_v26  ;;  %v6137_v4 = vand.u32 2147483648, %v6125_v1  ;;  %v6134_v26 = vsel %vm6133_vm8, %v7401_v27, %v6130_v49 }
0x3eec   :  { %v6121_v56 = vmul.f32 %v9721_v44, %v9721_v44  ;;  %v6138_v2 = vor.u32 1.1754944e-38, %v6137_v4 }
0x3eee   :  { %v6122_v48 = vsel %vm2199_vm4, %v6121_v56, 0.0  ;;  %v6139_v16 = vsel %vm6136_vm10, %v6138_v2, %v6134_v26 }
0x3eef   :  { %6123 = vadd.xlane.f32.xlu1 %v6122_v48 }
0x3f62   :  { %v9730_v24 = vpop.xlane.xlu1 %6123 }
0x3f63   :  { %v6140_v61 = vmul.f32 %v6139_v16, %v9730_v24 }
0x3f65   :  { %v6141_v35 = vmul.f32 %v6140_v61, %v9685_v14 }
0x3f67   :  { %v9735_v38 = vadd.f32 %v6141_v35, %v9721_v44 }
0x3f69   :  { %v6169_v57 = vperm.slane %v9735_v38, 2  ;;  %v6156_v39 = vperm.slane %v9735_v38, 1  ;;  %v6143_v11 = vperm.slane %v9735_v38, 0  ;;  %v6182_v60 = vperm.slane %v9735_v38, 3 }
0x3f6b   :  { %6174 = vperm.xlu1 %7127, %v6169_v57   ;;  %6161 = vperm.xlu2 %7126, %v6156_v39  }
0x3f6c   :  { %6148 = vperm.xlu0 %7124, %v6143_v11  }
0x3f73   :  { %7129 = vset.pattern.permute.xlu2 %v7945_v28 }
0x3f74   :  { %7125 = vset.pattern.permute.xlu0 %v7945_v28 }
0x3f7b   :  { %6193 = vperm.xlu2 %7129, %v6182_v60  }
0x3f7c   :  { %6154 = vperm.xlu0 %7125, %v6143_v11  }
0x3f84   :  { %6167 = vperm.xlu0 %7125, %v6156_v39  }
0x3f8c   :  { %6180 = vperm.xlu0 %7125, %v6169_v57  }
0x3f94   :  { %7128 = vset.pattern.permute.xlu0 %v7933_v32 }
0x3f9c   :  { %6187 = vperm.xlu0 %7128, %v6182_v60  }
0x3fc5   :  { %v6162_v23 = vpop.permute.xlu2 %6161 }
0x3fc6   :  { %v6197_v52 = vmul.f32 %v9634_v34, %v6162_v23 }
0x3fc8   :  { %v6212_v42 = vsel %vm50_vm0, %v6197_v52, 0.0 }
0x3fd5   :  { %v6194_v48 = vpop.permute.xlu2 %6193 }
0x3fd6   :  { %v6202_v10 = vmul.f32 %v9655_v33, %v6194_v48 }
0x3fd8   :  { %v6231_v2 = vsel %vm50_vm0, %v6202_v10, 0.0 }
0x3fdd   :  { %v6175_v22 = vpop.permute.xlu1 %6174 }
0x3fde   :  { %v6149_v14 = vpop.permute.xlu0 %6148  ;;  %v6199_v40 = vmul.f32 %v9640_v15, %v6175_v22 }
0x3fdf   :  { %v6195_v36 = vmul.f32 %v9643_v0, %v6149_v14 }
0x3fe0   :  { %v6221_v20 = vsel %vm50_vm0, %v6199_v40, 0.0 }
0x3fe1   :  { %v6203_v50 = vsel %vm50_vm0, %v6195_v36, 0.0 }
0x3fee   :  { %v6155_v7 = vpop.permute.xlu0 %6154 }
0x3fef   :  { %v6196_v25 = vmul.f32 %v9637_v54, %v6155_v7 }
0x3ff1   :  { %v6204_v8 = vsel %vm50_vm0, %v6196_v25, 0.0 }
0x3ff2   :  { %v6205_v53 = vadd.f32 %v6204_v8, %v6203_v50 }
0x3ff4   :  { %v6206_v56 = vrot.slane %v6205_v53, 4 }
0x3ff6   :  { %v6168_v12 = vpop.permute.xlu0 %6167  ;;  %v6207_v51 = vadd.f32 %v6206_v56, %v6205_v53 }
0x3ff7   :  { %v6198_v41 = vmul.f32 %v9631_v63, %v6168_v12 }
0x3ff8   :  { %v6208_v26 = vrot.slane %v6207_v51, 2 }
0x3ff9   :  { %v6213_v30 = vsel %vm50_vm0, %v6198_v41, 0.0 }
0x3ffa   :  { %v6214_v37 = vadd.f32 %v6213_v30, %v6212_v42  ;;  %v6209_v39 = vadd.f32 %v6208_v26, %v6207_v51 }
0x3ffc   :  { %v6215_v47 = vrot.slane %v6214_v37, 4  ;;  %v6210_v12 = vrot.slane %v6209_v39, 1 }
0x3ffe   :  { %v6181_v5 = vpop.permute.xlu0 %6180  ;;  %v6216_v1 = vadd.f32 %v6215_v47, %v6214_v37  ;;  %v6211_v25 = vadd.f32 %v6210_v12, %v6209_v39 }
0x3fff   :  { %v6200_v58 = vmul.f32 %v9647_v55, %v6181_v5 }
0x4000   :  { %v6217_v29 = vrot.slane %v6216_v1, 2 }
0x4001   :  { %v6222_v46 = vsel %vm50_vm0, %v6200_v58, 0.0 }
0x4002   :  { %v6223_v19 = vadd.f32 %v6222_v46, %v6221_v20  ;;  %v6218_v61 = vadd.f32 %v6217_v29, %v6216_v1 }
0x4004   :  { %v6224_v17 = vrot.slane %v6223_v19, 4  ;;  %v6219_v60 = vrot.slane %v6218_v61, 1 }
0x4006   :  { %v6225_v27 = vadd.f32 %v6224_v17, %v6223_v19  ;;  %v6220_v22 = vadd.f32 %v6219_v60, %v6218_v61 }
0x4008   :  { %v6226_v4 = vrot.slane %v6225_v27, 2  ;;  %v6243_v36 = vsel %vm2192_vm9, %v6220_v22, %v6211_v25 }
0x400a   :  { %v6227_v57 = vadd.f32 %v6226_v4, %v6225_v27 }
0x400c   :  { %v6228_v7 = vrot.slane %v6227_v57, 1 }
0x400e   :  { %v6188_v49 = vpop.permute.xlu0 %6187  ;;  %v6229_v52 = vadd.f32 %v6228_v7, %v6227_v57 }
0x400f   :  { %v6201_v21 = vmul.f32 %v9658_v43, %v6188_v49 }
0x4010   :  { %v6244_v30 = vsel %vm2194_vm13, %v6229_v52, %v6243_v36 }
0x4011   :  { %v6230_v16 = vsel %vm50_vm0, %v6201_v21, 0.0 }
0x4012   :  { %v6232_v35 = vadd.f32 %v6231_v2, %v6230_v16  ;;  %v6275_v2 = vadd.f32 1e-30, %v9730_v24 }
0x4014   :  { %v6233_v11 = vrot.slane %v6232_v35, 4  ;;  %vm6281_vm6 = vweird.f32 %v6275_v2 }
0x4016   :  { %v6234_v14 = vadd.f32 %v6233_v11, %v6232_v35  ;;  %v6285_v11 = vand.u32 2147483647, %v6275_v2 }
0x4018   :  { %v6235_v23 = vrot.slane %v6234_v14, 2  ;;  %vm6286_vm5 = vcmp.eq.f32.partialorder %v6285_v11, 8.507059e+37 }
0x401a   :  { %v6236_v41 = vadd.f32 %v6235_v23, %v6234_v14 }
0x401c   :  { %v6237_v40 = vrot.slane %v6236_v41, 1 }
0x401e   :  { %v6238_v5 = vadd.f32 %v6237_v40, %v6236_v41 }
0x4020   :  { %v6245_v58 = vsel %vm2196_vm3, %v6238_v5, %v6244_v30 }
0x4021   :  { %v6247_v42 = vmul.f32 %v6245_v58, %v9735_v38 }
0x4023   :  { %v6248_v8 = vsel %vm2199_vm4, %v6247_v42, 0.0 }
0x4024   :  { %6249 = vadd.xlane.f32.xlu2 %v6248_v8 }
0x4097   :  { %v6250_v46 = vpop.xlane.xlu2 %6249 }
0x4098   :  { %v6251_v20 = vadd.f32 1e-30, %v6250_v46 }
0x409a   :  { %7402 = vrcp.f32 %v6251_v20  ;;  %v6263_v53 = vand.u32 2147483648, %v6251_v20  ;;  %v6261_v17 = vand.u32 2147483647, %v6251_v20  ;;  %vm6257_vm12 = vweird.f32 %v6251_v20 }
0x409b   :  { %7404 = vrcp.f32 %v6275_v2 }
0x409c   :  { %v6264_v48 = vor.u32 1.1754944e-38, %v6263_v53  ;;  %vm6262_vm15 = vcmp.eq.f32.partialorder %v6261_v17, 8.507059e+37 }
0x40a0   :  { %v7403_v37 = vpop.eup %7402 }
0x40a1   :  { %v6253_v50 = vmul.f32 %v7403_v37, %v6251_v20  ;;  %vm6258_vm11 = vweird.f32 %v7403_v37  ;;  %v7405_v16 = vpop.eup %7404 }
0x40a2   :  { %vm6259_vm14 = vmor %vm6257_vm12, %vm6258_vm11  ;;  %v6277_v61 = vmul.f32 %v7405_v16, %v6275_v2  ;;  %vm6282_vm1 = vweird.f32 %v7405_v16 }
0x40a3   :  { %v6254_v19 = vsub.f32 1.0, %v6253_v50  ;;  %vm6283_vm2 = vmor %vm6281_vm6, %vm6282_vm1 }
0x40a4   :  { %v6278_v35 = vsub.f32 1.0, %v6277_v61 }
0x40a5   :  { %v6255_v47 = vmul.f32 %v7403_v37, %v6254_v19 }
0x40a6   :  { %v6279_v57 = vmul.f32 %v7405_v16, %v6278_v35 }
0x40a7   :  { %v6256_v56 = vadd.f32 %v7403_v37, %v6255_v47 }
0x40a8   :  { %v6280_v39 = vadd.f32 %v7405_v16, %v6279_v57 }
0x40a9   :  { %v6260_v1 = vsel %vm6259_vm14, %v7403_v37, %v6256_v56 }
0x40aa   :  { %v6265_v27 = vsel %vm6262_vm15, %v6264_v48, %v6260_v1 }
0x40ab   :  { %v6266_v51 = vmul.f32 %v6265_v27, %v9730_v24 }
0x40ad   :  { %v6269_v10 = vmul.f32 %v6266_v51, %v6245_v58  ;;  %v6267_v29 = vmul.f32 %v6266_v51, %v9735_v38 }
0x40af   :  { %v9768_v49 = vsub.f32 %v9721_v44, %v6269_v10  ;;  %v9771_v4 = vadd.f32 %v6267_v29, %v9724_v6  ;;  %v6287_v44 = vand.u32 2147483648, %v6275_v2  ;;  %v6284_v6 = vsel %vm6283_vm2, %v7405_v16, %v6280_v39 }
0x40b1   :  { %v6271_v21 = vmul.f32 %v9768_v49, %v9768_v49  ;;  %v6288_v60 = vor.u32 1.1754944e-38, %v6287_v44 }
0x40b3   :  { %v6272_v26 = vsel %vm2199_vm4, %v6271_v21, 0.0  ;;  %v6289_v14 = vsel %vm6286_vm5, %v6288_v60, %v6284_v6 }
0x40b4   :  { %6273 = vadd.xlane.f32.xlu1 %v6272_v26 }
0x4127   :  { %v9777_v7 = vpop.xlane.xlu1 %6273 }
0x4128   :  { %v6290_v12 = vmul.f32 %v6289_v14, %v9777_v7 }
0x412a   :  { %v6291_v24 = vmul.f32 %v6290_v12, %v9735_v38 }
0x412c   :  { %v9782_v23 = vadd.f32 %v6291_v24, %v9768_v49 }
0x412e   :  { %v6319_v22 = vperm.slane %v9782_v23, 2  ;;  %v6306_v41 = vperm.slane %v9782_v23, 1  ;;  %v6293_v52 = vperm.slane %v9782_v23, 0  ;;  %v6332_v25 = vperm.slane %v9782_v23, 3 }
0x4130   :  { %6324 = vperm.xlu1 %7127, %v6319_v22   ;;  %6317 = vperm.xlu2 %7129, %v6306_v41  }
0x4131   :  { %6298 = vperm.xlu0 %7128, %v6293_v52  }
0x4138   :  { %6343 = vperm.xlu2 %7129, %v6332_v25   ;;  %7136 = vset.pattern.permute.xlu1 %v7945_v28 }
0x4139   :  { %7130 = vset.pattern.permute.xlu0 %v7945_v28 }
0x4140   :  { %7137 = vset.pattern.permute.xlu2 %v7933_v32 }
0x4141   :  { %6304 = vperm.xlu0 %7130, %v6293_v52  }
0x4149   :  { %7131 = vset.pattern.permute.xlu0 %v7933_v32 }
0x4151   :  { %6311 = vperm.xlu0 %7131, %v6306_v41  }
0x4159   :  { %7132 = vset.pattern.permute.xlu0 %v7945_v28 }
0x4161   :  { %6330 = vperm.xlu0 %7132, %v6319_v22  }
0x4169   :  { %7133 = vset.pattern.permute.xlu0 %v7933_v32 }
0x4171   :  { %6337 = vperm.xlu0 %7133, %v6332_v25  }
0x418a   :  { %v6318_v36 = vpop.permute.xlu2 %6317 }
0x418b   :  { %v6348_v42 = vmul.f32 %v9631_v63, %v6318_v36 }
0x418d   :  { %v6363_v53 = vsel %vm50_vm0, %v6348_v42, 0.0 }
0x4192   :  { %v6344_v26 = vpop.permute.xlu2 %6343 }
0x4193   :  { %v6352_v35 = vmul.f32 %v9655_v33, %v6344_v26 }
0x4195   :  { %v6381_v60 = vsel %vm50_vm0, %v6352_v35, 0.0 }
0x41a2   :  { %v6325_v30 = vpop.permute.xlu1 %6324 }
0x41a3   :  { %v6299_v38 = vpop.permute.xlu0 %6298  ;;  %v6349_v46 = vmul.f32 %v9640_v15, %v6325_v30 }
0x41a4   :  { %v6345_v37 = vmul.f32 %v9643_v0, %v6299_v38 }
0x41a5   :  { %v6371_v56 = vsel %vm50_vm0, %v6349_v46, 0.0 }
0x41a6   :  { %v6353_v1 = vsel %vm50_vm0, %v6345_v37, 0.0 }
0x41b3   :  { %v6305_v40 = vpop.permute.xlu0 %6304 }
0x41b4   :  { %v6346_v8 = vmul.f32 %v9637_v54, %v6305_v40 }
0x41b6   :  { %v6354_v47 = vsel %vm50_vm0, %v6346_v8, 0.0 }
0x41b7   :  { %v6355_v51 = vadd.f32 %v6354_v47, %v6353_v1 }
0x41b9   :  { %v6356_v21 = vrot.slane %v6355_v51, 4 }
0x41bb   :  { %v6357_v61 = vadd.f32 %v6356_v21, %v6355_v51 }
0x41bd   :  { %v6358_v6 = vrot.slane %v6357_v61, 2 }
0x41bf   :  { %v6359_v41 = vadd.f32 %v6358_v6, %v6357_v61 }
0x41c3   :  { %v6312_v5 = vpop.permute.xlu0 %6311 }
0x41c4   :  { %v6347_v58 = vmul.f32 %v9634_v34, %v6312_v5  ;;  %v6360_v5 = vrot.slane %v6359_v41, 1 }
0x41c6   :  { %v6362_v50 = vsel %vm50_vm0, %v6347_v58, 0.0  ;;  %v6361_v8 = vadd.f32 %v6360_v5, %v6359_v41 }
0x41c7   :  { %v6364_v48 = vadd.f32 %v6363_v53, %v6362_v50 }
0x41c9   :  { %v6365_v10 = vrot.slane %v6364_v48, 4 }
0x41cb   :  { %v6366_v2 = vadd.f32 %v6365_v10, %v6364_v48 }
0x41cd   :  { %v6367_v57 = vrot.slane %v6366_v2, 2 }
0x41cf   :  { %v6368_v12 = vadd.f32 %v6367_v57, %v6366_v2 }
0x41d1   :  { %v6369_v25 = vrot.slane %v6368_v12, 1 }
0x41d3   :  { %v6331_v20 = vpop.permute.xlu0 %6330  ;;  %v6370_v30 = vadd.f32 %v6369_v25, %v6368_v12 }
0x41d4   :  { %v6350_v19 = vmul.f32 %v9647_v55, %v6331_v20 }
0x41d5   :  { %v6393_v37 = vsel %vm2192_vm9, %v6370_v30, %v6361_v8 }
0x41d6   :  { %v6372_v17 = vsel %vm50_vm0, %v6350_v19, 0.0 }
0x41d7   :  { %v6373_v27 = vadd.f32 %v6372_v17, %v6371_v56 }
0x41d9   :  { %v6374_v29 = vrot.slane %v6373_v27, 4 }
0x41db   :  { %v6375_v16 = vadd.f32 %v6374_v29, %v6373_v27 }
0x41dd   :  { %v6376_v44 = vrot.slane %v6375_v16, 2 }
0x41df   :  { %v6377_v22 = vadd.f32 %v6376_v44, %v6375_v16 }
0x41e1   :  { %v6378_v40 = vrot.slane %v6377_v22, 1 }
0x41e3   :  { %v6338_v39 = vpop.permute.xlu0 %6337  ;;  %v6379_v42 = vadd.f32 %v6378_v40, %v6377_v22 }
0x41e4   :  { %v6351_v11 = vmul.f32 %v9658_v43, %v6338_v39 }
0x41e5   :  { %v6394_v50 = vsel %vm2194_vm13, %v6379_v42, %v6393_v37 }
0x41e6   :  { %v6380_v14 = vsel %vm50_vm0, %v6351_v11, 0.0 }
0x41e7   :  { %v6382_v24 = vadd.f32 %v6381_v60, %v6380_v14  ;;  %v6425_v60 = vadd.f32 1e-30, %v9777_v7 }
0x41e9   :  { %v6383_v52 = vrot.slane %v6382_v24, 4  ;;  %vm6431_vm14 = vweird.f32 %v6425_v60 }
0x41eb   :  { %v6384_v38 = vadd.f32 %v6383_v52, %v6382_v24  ;;  %v6435_v52 = vand.u32 2147483647, %v6425_v60 }
0x41ed   :  { %v6385_v36 = vrot.slane %v6384_v38, 2  ;;  %vm6436_vm1 = vcmp.eq.f32.partialorder %v6435_v52, 8.507059e+37 }
0x41ef   :  { %v6386_v58 = vadd.f32 %v6385_v36, %v6384_v38 }
0x41f1   :  { %v6387_v46 = vrot.slane %v6386_v58, 1 }
0x41f3   :  { %v6388_v20 = vadd.f32 %v6387_v46, %v6386_v58 }
0x41f5   :  { %v6395_v19 = vsel %vm2196_vm3, %v6388_v20, %v6394_v50 }
0x41f6   :  { %v6397_v53 = vmul.f32 %v6395_v19, %v9782_v23 }
0x41f8   :  { %v6398_v47 = vsel %vm2199_vm4, %v6397_v53, 0.0 }
0x41f9   :  { %6399 = vadd.xlane.f32.xlu1 %v6398_v47 }
0x426c   :  { %v6400_v17 = vpop.xlane.xlu1 %6399 }
0x426d   :  { %v6401_v56 = vadd.f32 1e-30, %v6400_v17 }
0x426f   :  { %7406 = vrcp.f32 %v6401_v56  ;;  %v6413_v51 = vand.u32 2147483648, %v6401_v56  ;;  %v6411_v29 = vand.u32 2147483647, %v6401_v56  ;;  %vm6407_vm8 = vweird.f32 %v6401_v56 }
0x4270   :  { %7408 = vrcp.f32 %v6425_v60 }
0x4271   :  { %v6414_v26 = vor.u32 1.1754944e-38, %v6413_v51  ;;  %vm6412_vm11 = vcmp.eq.f32.partialorder %v6411_v29, 8.507059e+37 }
0x4275   :  { %v7407_v48 = vpop.eup %7406 }
0x4276   :  { %v6403_v1 = vmul.f32 %v7407_v48, %v6401_v56  ;;  %vm6408_vm7 = vweird.f32 %v7407_v48  ;;  %v7409_v14 = vpop.eup %7408 }
0x4277   :  { %vm6409_vm10 = vmor %vm6407_vm8, %vm6408_vm7  ;;  %v6427_v12 = vmul.f32 %v7409_v14, %v6425_v60  ;;  %vm6432_vm12 = vweird.f32 %v7409_v14 }
0x4278   :  { %v6404_v27 = vsub.f32 1.0, %v6403_v1  ;;  %vm6433_vm15 = vmor %vm6431_vm14, %vm6432_vm12 }
0x4279   :  { %v6428_v24 = vsub.f32 1.0, %v6427_v12 }
0x427a   :  { %v6405_v10 = vmul.f32 %v7407_v48, %v6404_v27 }
0x427b   :  { %v6429_v22 = vmul.f32 %v7409_v14, %v6428_v24 }
0x427c   :  { %v6406_v21 = vadd.f32 %v7407_v48, %v6405_v10 }
0x427d   :  { %v6430_v41 = vadd.f32 %v7409_v14, %v6429_v22 }
0x427e   :  { %v6410_v2 = vsel %vm6409_vm10, %v7407_v48, %v6406_v21 }
0x427f   :  { %v6415_v16 = vsel %vm6412_vm11, %v6414_v26, %v6410_v2 }
0x4280   :  { %v6416_v61 = vmul.f32 %v6415_v16, %v9777_v7 }
0x4282   :  { %v6419_v35 = vmul.f32 %v6416_v61, %v6395_v19  ;;  %v6417_v57 = vmul.f32 %v6416_v61, %v9782_v23 }
0x4284   :  { %v9818_v39 = vsub.f32 %v9768_v49, %v6419_v35  ;;  %v9821_v44 = vadd.f32 %v6417_v57, %v9771_v4  ;;  %v6437_v49 = vand.u32 2147483648, %v6425_v60  ;;  %v6434_v4 = vsel %vm6433_vm15, %v7409_v14, %v6430_v41 }
0x4286   :  { %v6421_v11 = vmul.f32 %v9818_v39, %v9818_v39  ;;  %v6438_v25 = vor.u32 1.1754944e-38, %v6437_v49 }
0x4288   :  { %v6422_v6 = vsel %vm2199_vm4, %v6421_v11, 0.0  ;;  %v6439_v40 = vsel %vm6436_vm1, %v6438_v25, %v6434_v4 }
0x4289   :  { %6423 = vadd.xlane.f32.xlu2 %v6422_v6 }
0x42fc   :  { %v9827_v38 = vpop.xlane.xlu2 %6423 }
0x42fd   :  { %v6440_v5 = vmul.f32 %v6439_v40, %v9827_v38 }
0x42ff   :  { %v6441_v7 = vmul.f32 %v6440_v5, %v9782_v23 }
0x4301   :  { %v9832_v36 = vadd.f32 %v6441_v7, %v9818_v39 }
0x4303   :  { %v6469_v30 = vperm.slane %v9832_v36, 2  ;;  %v6456_v58 = vperm.slane %v9832_v36, 1  ;;  %v6443_v42 = vperm.slane %v9832_v36, 0  ;;  %v6482_v8 = vperm.slane %v9832_v36, 3 }
0x4305   :  { %6474 = vperm.xlu2 %7137, %v6469_v30   ;;  %6467 = vperm.xlu1 %7136, %v6456_v58  }
0x4306   :  { %6448 = vperm.xlu0 %7133, %v6443_v42  }
0x430d   :  { %6493 = vperm.xlu1 %7136, %v6482_v8   ;;  %7142 = vset.pattern.permute.xlu2 %v7945_v28 }
0x430e   :  { %7134 = vset.pattern.permute.xlu0 %v7945_v28 }
0x4315   :  { %7143 = vset.pattern.permute.xlu1 %v7933_v32 }
0x4316   :  { %6454 = vperm.xlu0 %7134, %v6443_v42  }
0x431e   :  { %7135 = vset.pattern.permute.xlu0 %v7933_v32 }
0x4326   :  { %6461 = vperm.xlu0 %7135, %v6456_v58  }
0x432e   :  { %7138 = vset.pattern.permute.xlu0 %v7945_v28 }
0x4336   :  { %6480 = vperm.xlu0 %7138, %v6469_v30  }
0x433e   :  { %7139 = vset.pattern.permute.xlu0 %v7933_v32 }
0x4346   :  { %6487 = vperm.xlu0 %7139, %v6482_v8  }
0x435f   :  { %v6475_v50 = vpop.permute.xlu2 %6474 }
0x4360   :  { %v6499_v17 = vmul.f32 %v9640_v15, %v6475_v50 }
0x4377   :  { %v6468_v37 = vpop.permute.xlu1 %6467 }
0x4378   :  { %v6449_v23 = vpop.permute.xlu0 %6448  ;;  %v6498_v53 = vmul.f32 %v9631_v63, %v6468_v37 }
0x4379   :  { %v6495_v48 = vmul.f32 %v9643_v0, %v6449_v23 }
0x437a   :  { %v6513_v51 = vsel %vm50_vm0, %v6498_v53, 0.0 }
0x437f   :  { %v6494_v16 = vpop.permute.xlu1 %6493 }
0x4380   :  { %v6502_v57 = vmul.f32 %v9655_v33, %v6494_v16 }
0x4382   :  { %v6531_v24 = vsel %vm50_vm0, %v6502_v57, 0.0 }
0x4388   :  { %v6455_v46 = vpop.permute.xlu0 %6454 }
0x4389   :  { %v6496_v47 = vmul.f32 %v9637_v54, %v6455_v46  ;;  %v6503_v54 = vsel %vm50_vm0, %v6495_v48, 0.0 }
0x438b   :  { %v6504_v10 = vsel %vm50_vm0, %v6496_v47, 0.0 }
0x438c   :  { %v6505_v15 = vadd.f32 %v6504_v10, %v6503_v54 }
0x438e   :  { %v6506_v0 = vrot.slane %v6505_v15, 4 }
0x4398   :  { %v6462_v20 = vpop.permute.xlu0 %6461 }
0x4399   :  { %v6497_v19 = vmul.f32 %v9634_v34, %v6462_v20  ;;  %v6521_v34 = vsel %vm50_vm0, %v6499_v17, 0.0 }
0x439b   :  { %v6512_v1 = vsel %vm50_vm0, %v6497_v19, 0.0 }
0x439c   :  { %v6514_v63 = vadd.f32 %v6513_v51, %v6512_v1 }
0x439e   :  { %v6515_v26 = vrot.slane %v6514_v63, 4 }
0x43a0   :  { %v6516_v61 = vadd.f32 %v6515_v26, %v6514_v63 }
0x43a2   :  { %v6517_v11 = vrot.slane %v6516_v61, 2 }
0x43a4   :  { %v6518_v41 = vadd.f32 %v6517_v11, %v6516_v61 }
0x43a6   :  { %v6519_v40 = vrot.slane %v6518_v41, 1 }
0x43a8   :  { %v6481_v56 = vpop.permute.xlu0 %6480  ;;  %v6520_v58 = vadd.f32 %v6519_v40, %v6518_v41 }
0x43a9   :  { %v6500_v27 = vmul.f32 %v9647_v55, %v6481_v56  ;;  %v6507_v55 = vadd.f32 %v6506_v0, %v6505_v15 }
0x43ab   :  { %v6522_v29 = vsel %vm50_vm0, %v6500_v27, 0.0  ;;  %v6508_v12 = vrot.slane %v6507_v55, 2 }
0x43ac   :  { %v6523_v21 = vadd.f32 %v6522_v29, %v6521_v34 }
0x43ad   :  { %v6509_v4 = vadd.f32 %v6508_v12, %v6507_v55 }
0x43ae   :  { %v6524_v2 = vrot.slane %v6523_v21, 4 }
0x43af   :  { %v6510_v30 = vrot.slane %v6509_v4, 1 }
0x43b0   :  { %v6525_v35 = vadd.f32 %v6524_v2, %v6523_v21 }
0x43b1   :  { %v6511_v23 = vadd.f32 %v6510_v30, %v6509_v4 }
0x43b2   :  { %v6526_v60 = vrot.slane %v6525_v35, 2 }
0x43b3   :  { %v6543_v20 = vsel %vm2192_vm9, %v6520_v58, %v6511_v23  ;;  %v9900_v23 = vld [vmem:[#allocation5 + $0x8] sm:$0xff] }
0x43b4   :  { %v6527_v52 = vadd.f32 %v6526_v60, %v6525_v35  ;;  %v6575_v35 = vadd.f32 1e-30, %v9827_v38 }
0x43b6   :  { %v6528_v7 = vrot.slane %v6527_v52, 1  ;;  %vm6581_vm10 = vweird.f32 %v6575_v35 }
0x43b8   :  { %v6488_v6 = vpop.permute.xlu0 %6487  ;;  %v6529_v8 = vadd.f32 %v6528_v7, %v6527_v52 }
0x43b9   :  { %v6501_v14 = vmul.f32 %v9658_v43, %v6488_v6 }
0x43ba   :  { %v6544_v37 = vsel %vm2194_vm13, %v6529_v8, %v6543_v20 }
0x43bb   :  { %v6530_v22 = vsel %vm50_vm0, %v6501_v14, 0.0  ;;  %v6585_v14 = vand.u32 2147483647, %v6575_v35 }
0x43bc   :  { %v6532_v49 = vadd.f32 %v6531_v24, %v6530_v22 }
0x43bd   :  { %vm6586_vm12 = vcmp.eq.f32.partialorder %v6585_v14, 8.507059e+37 }
0x43be   :  { %v6533_v25 = vrot.slane %v6532_v49, 4 }
0x43c0   :  { %v6534_v5 = vadd.f32 %v6533_v25, %v6532_v49 }
0x43c2   :  { %v6535_v33 = vrot.slane %v6534_v5, 2 }
0x43c4   :  { %v6536_v42 = vadd.f32 %v6535_v33, %v6534_v5  ;;  %v9894_v33 = vld [vmem:[#allocation5 + $0x10] sm:$0xff] }
0x43c6   :  { %v6537_v43 = vrot.slane %v6536_v42, 1 }
0x43c8   :  { %v6538_v46 = vadd.f32 %v6537_v43, %v6536_v42  ;;  %v9897_v42 = vld [vmem:[#allocation5 + $0x18] sm:$0xff] }
0x43ca   :  { %v6545_v50 = vsel %vm2196_vm3, %v6538_v46, %v6544_v37  ;;  %v9903_v46 = vld [vmem:[#allocation5] sm:$0xff] }
0x43cb   :  { %v6547_v19 = vmul.f32 %v6545_v50, %v9832_v36 }
0x43cd   :  { %v6548_v53 = vsel %vm2199_vm4, %v6547_v19, 0.0 }
0x43ce   :  { %6549 = vadd.xlane.f32.xlu2 %v6548_v53 }
0x4441   :  { %v6550_v47 = vpop.xlane.xlu2 %6549 }
0x4442   :  { %v6551_v17 = vadd.f32 1e-30, %v6550_v47 }
0x4444   :  { %7410 = vrcp.f32 %v6551_v17  ;;  %v6563_v27 = vand.u32 2147483648, %v6551_v17  ;;  %v6561_v10 = vand.u32 2147483647, %v6551_v17  ;;  %vm6557_vm2 = vweird.f32 %v6551_v17 }
0x4445   :  { %7412 = vrcp.f32 %v6575_v35 }
0x4446   :  { %v6564_v34 = vor.u32 1.1754944e-38, %v6563_v27  ;;  %vm6562_vm7 = vcmp.eq.f32.partialorder %v6561_v10, 8.507059e+37  ;;  %v9913_v10 = vld [vmem:[#allocation5 + $0x28] sm:$0xff] }
0x444a   :  { %v7411_v56 = vpop.eup %7410 }
0x444b   :  { %v6553_v48 = vmul.f32 %v7411_v56, %v6551_v17  ;;  %vm6558_vm6 = vweird.f32 %v7411_v56  ;;  %v7413_v55 = vpop.eup %7412 }
0x444c   :  { %vm6559_vm5 = vmor %vm6557_vm2, %vm6558_vm6  ;;  %v6577_v57 = vmul.f32 %v7413_v55, %v6575_v35  ;;  %vm6582_vm8 = vweird.f32 %v7413_v55 }
0x444d   :  { %v6554_v1 = vsub.f32 1.0, %v6553_v48  ;;  %vm6583_vm11 = vmor %vm6581_vm10, %vm6582_vm8  ;;  %v9910_v48 = vld [vmem:[#allocation5 + $0x20] sm:$0xff] }
0x444e   :  { %v6578_v11 = vsub.f32 1.0, %v6577_v57 }
0x444f   :  { %v6555_v51 = vmul.f32 %v7411_v56, %v6554_v1 }
0x4450   :  { %v6579_v6 = vmul.f32 %v7413_v55, %v6578_v11 }
0x4451   :  { %v6556_v29 = vadd.f32 %v7411_v56, %v6555_v51 }
0x4452   :  { %v6580_v60 = vadd.f32 %v7413_v55, %v6579_v6 }
0x4453   :  { %v6560_v63 = vsel %vm6559_vm5, %v7411_v56, %v6556_v29 }
0x4454   :  { %v6565_v54 = vsel %vm6562_vm7, %v6564_v34, %v6560_v63 }
0x4455   :  { %v6566_v21 = vmul.f32 %v6565_v54, %v9827_v38 }
0x4457   :  { %v6569_v15 = vmul.f32 %v6566_v21, %v6545_v50  ;;  %v6567_v26 = vmul.f32 %v6566_v21, %v9832_v36 }
0x4459   :  { %v9868_v2 = vsub.f32 %v9818_v39, %v6569_v15  ;;  %v9871_v0 = vadd.f32 %v6567_v26, %v9821_v44  ;;  %v6587_v39 = vand.u32 2147483648, %v6575_v35  ;;  %v6584_v44 = vsel %vm6583_vm11, %v7413_v55, %v6580_v60  ;;  %v9918_v35 = vld [vmem:[#allocation5 + $0x30] sm:$0xff]  ;;  %v9921_v60 = vld [vmem:[#allocation5 + $0x38] sm:$0xff] }
0x445b   :  { %v6571_v16 = vmul.f32 %v9868_v2, %v9868_v2  ;;  %v6588_v12 = vor.u32 1.1754944e-38, %v6587_v39 }
0x445d   :  { %v6572_v61 = vsel %vm2199_vm4, %v6571_v16, 0.0  ;;  %v6589_v24 = vsel %vm6586_vm12, %v6588_v12, %v6584_v44 }
0x445e   :  { %6573 = vadd.xlane.f32.xlu1 %v6572_v61 }
0x44d1   :  { %v9877_v22 = vpop.xlane.xlu1 %6573 }
0x44d2   :  { %v6590_v41 = vmul.f32 %v6589_v24, %v9877_v22 }
0x44d4   :  { %v6591_v38 = vmul.f32 %v6590_v41, %v9832_v36 }
0x44d6   :  { %v9882_v49 = vadd.f32 %v6591_v38, %v9868_v2 }
0x44d8   :  { %v6619_v52 = vperm.slane %v9882_v49, 2  ;;  %v6606_v4 = vperm.slane %v9882_v49, 1  ;;  %v6593_v25 = vperm.slane %v9882_v49, 0  ;;  %v6632_v36 = vperm.slane %v9882_v49, 3 }
0x44da   :  { %6624 = vperm.xlu1 %7143, %v6619_v52   ;;  %6617 = vperm.xlu2 %7142, %v6606_v4  }
0x44db   :  { %6598 = vperm.xlu0 %7139, %v6593_v25  }
0x44e2   :  { %7145 = vset.pattern.permute.xlu2 %v7933_v32  ;;  %7149 = vset.pattern.permute.xlu1 %v7945_v28 }
0x44e3   :  { %7140 = vset.pattern.permute.xlu0 %v7945_v28 }
0x44ea   :  { %6637 = vperm.xlu2 %7145, %v6632_v36  }
0x44eb   :  { %6604 = vperm.xlu0 %7140, %v6593_v25  }
0x44f3   :  { %7141 = vset.pattern.permute.xlu0 %v7933_v32 }
0x44fb   :  { %6611 = vperm.xlu0 %7141, %v6606_v4  }
0x4503   :  { %7144 = vset.pattern.permute.xlu0 %v7945_v28 }
0x450b   :  { %6630 = vperm.xlu0 %7144, %v6619_v52  }
0x4513   :  { %6643 = vperm.xlu0 %7144, %v6632_v36  }
0x451b   :  { %7146 = vset.pattern.permute.xlu0 %v7933_v32 }
0x4534   :  { %v6618_v30 = vpop.permute.xlu2 %6617 }
0x4535   :  { %v6648_v8 = vmul.f32 %v9897_v42, %v6618_v30 }
0x4537   :  { %v6663_v50 = vsel %vm50_vm0, %v6648_v8, 0.0 }
0x4544   :  { %v6638_v21 = vpop.permute.xlu2 %6637 }
0x4545   :  { %v6651_v55 = vmul.f32 %v9918_v35, %v6638_v21 }
0x4547   :  { %v6680_v12 = vsel %vm50_vm0, %v6651_v55, 0.0 }
0x454c   :  { %v6625_v53 = vpop.permute.xlu1 %6624 }
0x454d   :  { %v6599_v40 = vpop.permute.xlu0 %6598  ;;  %v6649_v1 = vmul.f32 %v9910_v48, %v6625_v53 }
0x454e   :  { %v6645_v20 = vmul.f32 %v9903_v46, %v6599_v40 }
0x454f   :  { %v6671_v63 = vsel %vm50_vm0, %v6649_v1, 0.0 }
0x4550   :  { %v6653_v17 = vsel %vm50_vm0, %v6645_v20, 0.0 }
0x455d   :  { %v6605_v5 = vpop.permute.xlu0 %6604 }
0x455e   :  { %v6646_v43 = vmul.f32 %v9900_v23, %v6605_v5 }
0x4560   :  { %v6654_v19 = vsel %vm50_vm0, %v6646_v43, 0.0 }
0x4561   :  { %v6655_v56 = vadd.f32 %v6654_v19, %v6653_v17 }
0x4563   :  { %v6656_v34 = vrot.slane %v6655_v56, 4 }
0x4565   :  { %v6657_v16 = vadd.f32 %v6656_v34, %v6655_v56 }
0x4567   :  { %v6658_v14 = vrot.slane %v6657_v16, 2 }
0x4569   :  { %v6659_v4 = vadd.f32 %v6658_v14, %v6657_v16 }
0x456d   :  { %v6612_v7 = vpop.permute.xlu0 %6611 }
0x456e   :  { %v6647_v58 = vmul.f32 %v9894_v33, %v6612_v7  ;;  %v6660_v7 = vrot.slane %v6659_v4, 1 }
0x4570   :  { %v6662_v37 = vsel %vm50_vm0, %v6647_v58, 0.0  ;;  %v6661_v20 = vadd.f32 %v6660_v7, %v6659_v4 }
0x4571   :  { %v6664_v47 = vadd.f32 %v6663_v50, %v6662_v37 }
0x4573   :  { %v6665_v27 = vrot.slane %v6664_v47, 4 }
0x4575   :  { %v6666_v15 = vadd.f32 %v6665_v27, %v6664_v47 }
0x4577   :  { %v6667_v57 = vrot.slane %v6666_v15, 2 }
0x4579   :  { %v6668_v41 = vadd.f32 %v6667_v57, %v6666_v15 }
0x457b   :  { %v6669_v36 = vrot.slane %v6668_v41, 1 }
0x457d   :  { %v6631_v51 = vpop.permute.xlu0 %6630  ;;  %v6670_v58 = vadd.f32 %v6669_v36, %v6668_v41 }
0x457e   :  { %v6650_v29 = vmul.f32 %v9913_v10, %v6631_v51 }
0x457f   :  { %v6693_v19 = vsel %vm2192_vm9, %v6670_v58, %v6661_v20 }
0x4580   :  { %v6672_v54 = vsel %vm50_vm0, %v6650_v29, 0.0 }
0x4581   :  { %v6673_v26 = vadd.f32 %v6672_v54, %v6671_v63 }
0x4583   :  { %v6674_v61 = vrot.slane %v6673_v26, 4 }
0x4585   :  { %v6675_v11 = vadd.f32 %v6674_v61, %v6673_v26  ;;  %v6644_v6 = vpop.permute.xlu0 %6643 }
0x4586   :  { %v6652_v39 = vmul.f32 %v9921_v60, %v6644_v6 }
0x4587   :  { %v6676_v44 = vrot.slane %v6675_v11, 2 }
0x4588   :  { %v6681_v24 = vsel %vm50_vm0, %v6652_v39, 0.0 }
0x4589   :  { %v6682_v38 = vadd.f32 %v6681_v24, %v6680_v12  ;;  %v6677_v52 = vadd.f32 %v6676_v44, %v6675_v11  ;;  %v6725_v12 = vadd.f32 1e-30, %v9877_v22 }
0x458b   :  { %v6683_v25 = vrot.slane %v6682_v38, 4  ;;  %v6678_v5 = vrot.slane %v6677_v52, 1  ;;  %vm6731_vm5 = vweird.f32 %v6725_v12  ;;  %v6735_v36 = vand.u32 2147483647, %v6725_v12 }
0x458d   :  { %v6684_v40 = vadd.f32 %v6683_v25, %v6682_v38  ;;  %v6679_v43 = vadd.f32 %v6678_v5, %v6677_v52  ;;  %v6737_v25 = vand.u32 2147483648, %v6725_v12  ;;  %vm6736_vm8 = vcmp.eq.f32.partialorder %v6735_v36, 8.507059e+37 }
0x458f   :  { %v6685_v30 = vrot.slane %v6684_v40, 2  ;;  %v6694_v53 = vsel %vm2194_vm13, %v6679_v43, %v6693_v19 }
0x4591   :  { %v6686_v8 = vadd.f32 %v6685_v30, %v6684_v40 }
0x4593   :  { %v6687_v37 = vrot.slane %v6686_v8, 1 }
0x4595   :  { %v6688_v50 = vadd.f32 %v6687_v37, %v6686_v8 }
0x4597   :  { %v6695_v47 = vsel %vm2196_vm3, %v6688_v50, %v6694_v53 }
0x4598   :  { %v6697_v17 = vmul.f32 %v6695_v47, %v9882_v49 }
0x459a   :  { %v6698_v56 = vsel %vm2199_vm4, %v6697_v17, 0.0 }
0x459b   :  { %6699 = vadd.xlane.f32.xlu1 %v6698_v56 }
0x460e   :  { %v6700_v1 = vpop.xlane.xlu1 %6699 }
0x460f   :  { %v6701_v27 = vadd.f32 1e-30, %v6700_v1 }
0x4611   :  { %7414 = vrcp.f32 %v6701_v27  ;;  %v6713_v63 = vand.u32 2147483648, %v6701_v27  ;;  %v6711_v21 = vand.u32 2147483647, %v6701_v27  ;;  %vm6707_vm15 = vweird.f32 %v6701_v27 }
0x4612   :  { %7416 = vrcp.f32 %v6725_v12 }
0x4613   :  { %v6714_v26 = vor.u32 1.1754944e-38, %v6713_v63  ;;  %vm6712_vm6 = vcmp.eq.f32.partialorder %v6711_v21, 8.507059e+37 }
0x4617   :  { %v7415_v51 = vpop.eup %7414 }
0x4618   :  { %v6703_v29 = vmul.f32 %v7415_v51, %v6701_v27  ;;  %vm6708_vm14 = vweird.f32 %v7415_v51  ;;  %v7417_v24 = vpop.eup %7416 }
0x4619   :  { %vm6709_vm1 = vmor %vm6707_vm15, %vm6708_vm14  ;;  %v6727_v41 = vmul.f32 %v7417_v24, %v6725_v12  ;;  %vm6732_vm2 = vweird.f32 %v7417_v24 }
0x461a   :  { %v6704_v34 = vsub.f32 1.0, %v6703_v29  ;;  %vm6733_vm7 = vmor %vm6731_vm5, %vm6732_vm2 }
0x461b   :  { %v6728_v38 = vsub.f32 1.0, %v6727_v41 }
0x461c   :  { %v6705_v54 = vmul.f32 %v7415_v51, %v6704_v34 }
0x461d   :  { %v6729_v52 = vmul.f32 %v7417_v24, %v6728_v38 }
0x461e   :  { %v6706_v15 = vadd.f32 %v7415_v51, %v6705_v54 }
0x461f   :  { %v6730_v4 = vadd.f32 %v7417_v24, %v6729_v52 }
0x4620   :  { %v6710_v16 = vsel %vm6709_vm1, %v7415_v51, %v6706_v15 }
0x4621   :  { %v6715_v61 = vsel %vm6712_vm6, %v6714_v26, %v6710_v16 }
0x4622   :  { %v6716_v55 = vmul.f32 %v6715_v61, %v9877_v22 }
0x4624   :  { %v6719_v57 = vmul.f32 %v6716_v55, %v6695_v47  ;;  %v6717_v11 = vmul.f32 %v6716_v55, %v9882_v49 }
0x4626   :  { %v6720_v6 = vsub.f32 %v9868_v2, %v6719_v57  ;;  %v9935_v39 = vadd.f32 %v6717_v11, %v9871_v0  ;;  %v6734_v2 = vsel %vm6733_vm7, %v7417_v24, %v6730_v4  ;;  %v6738_v0 = vor.u32 1.1754944e-38, %v6737_v25 }
0x4628   :  { %v6721_v14 = vmul.f32 %v6720_v6, %v6720_v6  ;;  %v6739_v5 = vsel %vm6736_vm8, %v6738_v0, %v6734_v2 }
0x462a   :  { %v6722_v44 = vsel %vm2199_vm4, %v6721_v14, 0.0 }
0x462b   :  { %6723 = vadd.xlane.f32.xlu2 %v6722_v44 }
0x469e   :  { %v9939_v40 = vpop.xlane.xlu2 %6723 }
0x469f   :  { %v6740_v7 = vmul.f32 %v6739_v5, %v9939_v40 }
0x46a1   :  { %v6741_v22 = vmul.f32 %v6740_v7, %v9882_v49 }
0x46a3   :  { %v9943_v30 = vadd.f32 %v6741_v22, %v6720_v6 }
0x46a5   :  { %v6769_v58 = vperm.slane %v9943_v30, 2  ;;  %v6756_v8 = vperm.slane %v9943_v30, 1  ;;  %v6743_v43 = vperm.slane %v9943_v30, 0  ;;  %v6782_v20 = vperm.slane %v9943_v30, 3 }
0x46a7   :  { %6774 = vperm.xlu2 %7145, %v6769_v58   ;;  %6767 = vperm.xlu1 %7149, %v6756_v8  }
0x46a8   :  { %6748 = vperm.xlu0 %7146, %v6743_v43  }
0x46af   :  { %6787 = vperm.xlu2 %7145, %v6782_v20  }
0x46b0   :  { %7147 = vset.pattern.permute.xlu0 %v7945_v28 }
0x46b8   :  { %6754 = vperm.xlu0 %7147, %v6743_v43  }
0x46c0   :  { %7148 = vset.pattern.permute.xlu0 %v7933_v32 }
0x46c8   :  { %6761 = vperm.xlu0 %7148, %v6756_v8  }
0x46d0   :  { %7150 = vset.pattern.permute.xlu0 %v7945_v28 }
0x46d8   :  { %6780 = vperm.xlu0 %7150, %v6769_v58  }
0x46e0   :  { %6793 = vperm.xlu0 %7150, %v6782_v20  }
0x46e8   :  { %1972 = vrot.lane.b32.xlu0 %v8267_v13, %s7522_s8 }
0x46f0   :  { %1974 = vrot.lane.b32.xlu0 %v8262_v45, %s7522_s8 }
0x46f8   :  { %1976 = vrot.lane.b32.xlu0 %v8270_v31, %s7522_s8 }
0x4700   :  { %1978 = vrot.lane.b32.xlu0 %v8272_v18, %s7522_s8 }
0x4701   :  { %v6775_v19 = vpop.permute.xlu2 %6774 }
0x4702   :  { %v6799_v56 = vmul.f32 %v9910_v48, %v6775_v19 }
0x4708   :  { %1992 = vrot.lane.b32.xlu0 %v8280_v59, %s7521_s1 }
0x4709   :  { %v6788_v51 = vpop.permute.xlu2 %6787 }
0x470a   :  { %v6801_v21 = vmul.f32 %v9918_v35, %v6788_v51 }
0x4710   :  { %1996 = vrot.lane.b32.xlu0 %v8285_v9, %s7521_s1 }
0x4719   :  { %v6768_v37 = vpop.permute.xlu1 %6767 }
0x471a   :  { %v6749_v32 = vpop.permute.xlu0 %6748  ;;  %v6798_v45 = vmul.f32 %v9897_v42, %v6768_v37 }
0x471b   :  { %v6795_v31 = vmul.f32 %v9903_v46, %v6749_v32  ;;  %v6821_v46 = vsel %vm50_vm0, %v6799_v56, 0.0 }
0x471c   :  { %v6813_v59 = vsel %vm50_vm0, %v6798_v45, 0.0 }
0x471d   :  { %v6803_v47 = vsel %vm50_vm0, %v6795_v31, 0.0 }
0x472a   :  { %v6755_v28 = vpop.permute.xlu0 %6754 }
0x472b   :  { %v6796_v50 = vmul.f32 %v9900_v23, %v6755_v28 }
0x472d   :  { %v6804_v53 = vsel %vm50_vm0, %v6796_v50, 0.0 }
0x472e   :  { %v6805_v17 = vadd.f32 %v6804_v53, %v6803_v47 }
0x4730   :  { %v6806_v23 = vrot.slane %v6805_v17, 4 }
0x4732   :  { %v6807_v63 = vadd.f32 %v6806_v23, %v6805_v17 }
0x4734   :  { %v6808_v61 = vrot.slane %v6807_v63, 2 }
0x4736   :  { %v6809_v44 = vadd.f32 %v6808_v61, %v6807_v63 }
0x4738   :  { %v6810_v52 = vrot.slane %v6809_v44, 1 }
0x473a   :  { %v6762_v49 = vpop.permute.xlu0 %6761  ;;  %v6811_v2 = vadd.f32 %v6810_v52, %v6809_v44 }
0x473b   :  { %v6797_v13 = vmul.f32 %v9894_v33, %v6762_v49 }
0x473d   :  { %v6812_v18 = vsel %vm50_vm0, %v6797_v13, 0.0 }
0x473e   :  { %v6814_v9 = vadd.f32 %v6813_v59, %v6812_v18 }
0x4740   :  { %v6815_v33 = vrot.slane %v6814_v9, 4 }
0x4742   :  { %v6816_v29 = vadd.f32 %v6815_v33, %v6814_v9 }
0x4744   :  { %v6817_v15 = vrot.slane %v6816_v29, 2 }
0x4746   :  { %v6818_v11 = vadd.f32 %v6817_v15, %v6816_v29 }
0x4748   :  { %v6819_v24 = vrot.slane %v6818_v11, 1 }
0x474a   :  { %v6781_v1 = vpop.permute.xlu0 %6780 }
0x474b   :  { %v6800_v42 = vmul.f32 %v9913_v10, %v6781_v1  ;;  %v6830_v10 = vsel %vm50_vm0, %v6801_v21, 0.0 }
0x474d   :  { %v6822_v27 = vsel %vm50_vm0, %v6800_v42, 0.0 }
0x474e   :  { %v6823_v34 = vadd.f32 %v6822_v27, %v6821_v46 }
0x4750   :  { %v6824_v54 = vrot.slane %v6823_v34, 4 }
0x4752   :  { %v6825_v26 = vadd.f32 %v6824_v54, %v6823_v34  ;;  %v6794_v16 = vpop.permute.xlu0 %6793 }
0x4753   :  { %v6802_v48 = vmul.f32 %v9921_v60, %v6794_v16  ;;  %v6820_v60 = vadd.f32 %v6819_v24, %v6818_v11 }
0x4754   :  { %v6826_v55 = vrot.slane %v6825_v26, 2 }
0x4755   :  { %v6831_v57 = vsel %vm50_vm0, %v6802_v48, 0.0  ;;  %v6843_v22 = vsel %vm2192_vm9, %v6820_v60, %v6811_v2 }
0x4756   :  { %v6832_v6 = vadd.f32 %v6831_v57, %v6830_v10  ;;  %v6827_v14 = vadd.f32 %v6826_v55, %v6825_v26 }
0x4758   :  { %v6833_v12 = vrot.slane %v6832_v6, 4  ;;  %v6828_v35 = vrot.slane %v6827_v14, 1 }
0x475a   :  { %v6834_v41 = vadd.f32 %v6833_v12, %v6832_v6  ;;  %v1973_v38 = vpop.permute.xlu0 %1972  ;;  %v6829_v36 = vadd.f32 %v6828_v35, %v6827_v14 }
0x475b   :  { %1984 = vst.msk [vmem:[#allocation4] sm:$0xff] %vm50_vm0, %v1973_v38 }
0x475c   :  { %v6835_v4 = vrot.slane %v6834_v41, 2  ;;  %v6844_v58 = vsel %vm2194_vm13, %v6829_v36, %v6843_v22 }
0x475e   :  { %v6836_v25 = vadd.f32 %v6835_v4, %v6834_v41 }
0x4760   :  { %v6837_v0 = vrot.slane %v6836_v25, 1 }
0x4762   :  { %v1975_v5 = vpop.permute.xlu0 %1974  ;;  %v6838_v7 = vadd.f32 %v6837_v0, %v6836_v25 }
0x4763   :  { %1985 = vst.msk [vmem:[#allocation4 + $0x8] sm:$0xff] %vm50_vm0, %v1975_v5 }
0x4764   :  { %v6845_v8 = vsel %vm2196_vm3, %v6838_v7, %v6844_v58 }
0x4765   :  { %v6847_v43 = vmul.f32 %v6845_v8, %v9943_v30 }
0x4767   :  { %v6848_v20 = vsel %vm2199_vm4, %v6847_v43, 0.0 }
0x4768   :  { %6849 = vadd.xlane.f32.xlu1 %v6848_v20 }
0x476a   :  { %v1977_v32 = vpop.permute.xlu0 %1976 }
0x476b   :  { %1986 = vst.msk [vmem:[#allocation4 + $0x10] sm:$0xff] %vm50_vm0, %v1977_v32 }
0x4772   :  { %v1979_v28 = vpop.permute.xlu0 %1978 }
0x4773   :  { %1987 = vst.msk [vmem:[#allocation4 + $0x18] sm:$0xff] %vm50_vm0, %v1979_v28 }
0x477a   :  { %v1993_v49 = vpop.permute.xlu0 %1992 }
0x477b   :  { %2004 = vst.msk [vmem:[#allocation3] sm:$0xff] %vm50_vm0, %v1993_v49 }
0x4781   :  { %1994 = vrot.lane.b32.xlu1 %v8283_v62, %s7521_s1 }
0x4782   :  { %v1997_v37 = vpop.permute.xlu0 %1996 }
0x4783   :  { %2006 = vst.msk [vmem:[#allocation3 + $0x10] sm:$0xff] %vm50_vm0, %v1997_v37 }
0x47db   :  { %v6850_v13 = vpop.xlane.xlu1 %6849 }
0x47dc   :  { %v6851_v45 = vadd.f32 1e-30, %v6850_v13 }
0x47de   :  { %7418 = vrcp.f32 %v6851_v45  ;;  %v6863_v19 = vand.u32 2147483648, %v6851_v45  ;;  %v6861_v53 = vand.u32 2147483647, %v6851_v45  ;;  %vm6857_vm13 = vweird.f32 %v6851_v45 }
0x47e0   :  { %v6864_v47 = vor.u32 1.1754944e-38, %v6863_v19  ;;  %vm6862_vm10 = vcmp.eq.f32.partialorder %v6861_v53, 8.507059e+37 }
0x47e4   :  { %v7419_v50 = vpop.eup %7418 }
0x47e5   :  { %v6853_v31 = vmul.f32 %v7419_v50, %v6851_v45  ;;  %vm6858_vm9 = vweird.f32 %v7419_v50 }
0x47e6   :  { %vm6859_vm3 = vmor %vm6857_vm13, %vm6858_vm9 }
0x47e7   :  { %v6854_v18 = vsub.f32 1.0, %v6853_v31 }
0x47e9   :  { %v6855_v59 = vmul.f32 %v7419_v50, %v6854_v18 }
0x47eb   :  { %v6856_v9 = vadd.f32 %v7419_v50, %v6855_v59 }
0x47ed   :  { %v6860_v17 = vsel %vm6859_vm3, %v7419_v50, %v6856_v9 }
0x47ee   :  { %v6865_v62 = vsel %vm6862_vm10, %v6864_v47, %v6860_v17 }
0x47ef   :  { %v6866_v56 = vmul.f32 %v6865_v62, %v9939_v40 }
0x47f1   :  { %v6867_v33 = vmul.f32 %v6866_v56, %v9943_v30 }
0x47f3   :  { %v1995_v1 = vpop.permute.xlu1 %1994  ;;  %v6868_v42 = vadd.f32 %v6867_v33, %v9935_v39 }
0x47f4   :  { %2005 = vst.msk [vmem:[#allocation3 + $0x8] sm:$0xff] %vm50_vm0, %v1995_v1 }
0x47f5   :  { %v6869_v23 = vsel %vm2199_vm4, %v6868_v42, 0.0 }
0x47f6   :  { %6870 = vadd.xlane.f32.xlu2 %v6869_v23 }
0x480e   :  { %1998 = vrot.lane.b32.xlu2 %v8293_v3, %s7521_s1  ;;  %s6895_s1 = sshll.u32 %s10010_s5, 4  ;;  %s6896_s1 = int_to_ptr.hbm [resolvable:$true] %s6895_s1 }
0x4869   :  { %v6871_v46 = vpop.xlane.xlu2 %6870 }
0x486a   :  { %7420 = vrcp.f32 %v6871_v46  ;;  %v6883_v30 = vand.u32 2147483648, %v6871_v46  ;;  %v6881_v39 = vand.u32 2147483647, %v6871_v46  ;;  %vm6877_vm12 = vweird.f32 %v6871_v46 }
0x486c   :  { %v6884_v54 = vor.u32 1.1754944e-38, %v6883_v30  ;;  %vm6882_vm15 = vcmp.eq.f32.partialorder %v6881_v39, 8.507059e+37 }
0x4870   :  { %v7421_v27 = vpop.eup %7420 }
0x4871   :  { %v6873_v51 = vmul.f32 %v7421_v27, %v6871_v46  ;;  %v1999_v29 = vpop.permute.xlu2 %1998  ;;  %vm6878_vm11 = vweird.f32 %v7421_v27 }
0x4872   :  { %2007 = vst.msk [vmem:[#allocation3 + $0x18] sm:$0xff] %vm50_vm0, %v1999_v29  ;;  %vm6879_vm14 = vmor %vm6877_vm12, %vm6878_vm11 }
0x4873   :  { %v6874_v40 = vsub.f32 1.0, %v6873_v51 }
0x4875   :  { %v6875_v34 = vmul.f32 %v7421_v27, %v6874_v40 }
0x4877   :  { %v6876_v63 = vadd.f32 %v7421_v27, %v6875_v34 }
0x4879   :  { %v6880_v3 = vsel %vm6879_vm14, %v7421_v27, %v6876_v63 }
0x487a   :  { %v6885_v21 = vsel %vm6882_vm15, %v6884_v54, %v6880_v3 }
0x487b   :  { %v6886_v15 = vmul.f32 %v6885_v21, %v6868_v42 }
0x487d   :  { %6887 = vst.msk [vmem:[#allocation9] sm:$0xf] %vm2199_vm4, %v6886_v15 }
0x487e   :  { %6898 = dma.vmem_to_hbm [thread:$0]  %s6894_s13, 64, %s6896_s1, [#allocation7]  }
0x487f   :  { %7512 = dma.done.wait [#allocation7], 64  }
0x4880   :  { %7513 = vsyncadd [#allocation7], 4294967232 }
0x4881   :  { %6903 = vsyncpa [#allocation7], 1 }
0x4882   :  { %6904 = vsyncpa [#allocation8], 1 }

</bundles_post_ra>
